<compile_context>
chip_gen: v6e
topology: v6e:2x2x1
jax: 0.10.0
libtpu: 0.0.40
codegen_flags: <defaults>
</compile_context>

<pallas_src>
import functools

import jax
import jax.numpy as jnp
import numpy as np
from jax.experimental import pallas as pl
from jax.experimental.pallas import tpu as pltpu

_GP = 4  # pooled positions packed per MXU lane group (4 * 32 channels = 128 lanes)


# ------------------------------ Pallas kernel ------------------------------- #

def _fused_audio_cnn_kernel(lhs_ref, wc_ref, bc_ref, w1_ref, b1_ref, w2_ref, b2_ref,
                            out_ref, *, bb, n_grp):
    """One grid step = one block of `bb` batch rows, end to end.

    lhs_ref : (1, n_grp*4*bb, GP*9)   im2col patches; rows ordered (g, sub, b_local),
                                      cols ordered (pos_in_group, tap).
    wc_ref  : (GP*9, GP*C)            block-diagonal conv weight kron(I_GP, W[9,C]).
    bc_ref  : (1, GP*C)               conv bias tiled over the GP position groups.
    w1_ref  : (n_grp, GP*C, hidden)   fc1 weight, rows pre-permuted to the kernel's
                                      (g, p', c) feature order (optionally bf16).
    b1_ref  : (1, hidden)   w2_ref: (hidden, 128)   b2_ref: (1, 128)   (padded classes)
    out_ref : (1, bb, 128)
    """
    hidden = b1_ref.shape[1]
    wc = wc_ref[...]
    bc = bc_ref[...]

    # Grouped conv + pool + fc1 accumulation: every matmul has MXU-friendly K (36 / 128),
    # and the live conv temporary is only (4*bb, GP*C) per group.
    acc = jnp.zeros((bb, hidden), jnp.float32)
    for g in range(n_grp):
        blk = lhs_ref[0, g * 4 * bb:(g + 1) * 4 * bb, :]                 # (4*bb, GP*9)
        conv = jnp.dot(blk, wc, preferred_element_type=jnp.float32)      # (4*bb, GP*C)
        # 2x2 max-pool = max over the 4 sub-position row blocks.
        m = jnp.maximum(jnp.maximum(conv[0:bb], conv[bb:2 * bb]),
                        jnp.maximum(conv[2 * bb:3 * bb], conv[3 * bb:4 * bb]))
        # Bias + ReLU hoisted after the max: relu(max(x) + b) == max(relu(x + b)).
        pooled = jnp.maximum(m + bc, 0.0)                                # (bb, GP*C)
        acc = acc + jnp.dot(pooled.astype(w1_ref.dtype), w1_ref[g],
                            preferred_element_type=jnp.float32)          # (bb, hidden)

    h = jnp.maximum(acc + b1_ref[...], 0.0)                              # (bb, hidden)
    out_ref[0] = jnp.dot(h, w2_ref[...],
                         preferred_element_type=jnp.float32) + b2_ref[...]


# -------------------------------- Wrapper ------------------------------------ #

@functools.partial(jax.jit, static_argnames=("batch_block", "fc1_bf16"))
def audio_cnn_forward(x, conv_w, conv_b, w1, b1, w2, b2, *, batch_block=256, fc1_bf16=True):
    """x: (B, H, W) f32.  conv_w: (C,3,3), conv_b: (C,), w1: (C*Hp*Wp, hidden) in PyTorch
    NCHW-flatten row order, b1: (hidden,), w2: (hidden, num_classes), b2: (num_classes,).
    Returns (B, num_classes)."""
    B, H, W = x.shape
    C = conv_w.shape[0]
    Hp, Wp = H // 2, W // 2
    n_pos = Hp * Wp
    hidden = w1.shape[1]
    num_classes = w2.shape[1]
    bb = batch_block

    # TODO(synk): odd H/W would need PyTorch MaxPool2d floor-mode remainder handling.
    assert H % 2 == 0 and W % 2 == 0, "even spatial dims required (floor-mode pool)"
    assert n_pos % _GP == 0 and w1.shape[0] == n_pos * C
    assert bb % 8 == 0, "batch_block must be a multiple of 8 (sublane alignment)"

    # Pad the batch to a multiple of bb (never shrink bb); slice the output back below.
    Bp = ((B + bb - 1) // bb) * bb
    if Bp != B:
        x = jnp.pad(x, ((0, Bp - B), (0, 0), (0, 0)))
    nb = Bp // bb
    n_grp = n_pos // _GP

    lhs_dtype = jnp.bfloat16 if fc1_bf16 else jnp.float32

    # ---- glue: pad + im2col, packed into ONE tensor (single DMA stream) ----
    x_pad = jnp.pad(x, ((0, 0), (1, 1), (1, 1)))
    taps = jnp.stack([x_pad[:, dy:dy + H, dx:dx + W]
                      for dy in range(3) for dx in range(3)], axis=-1)        # (Bp,H,W,9)
    subs = jnp.stack([taps[:, p::2, q::2, :] for p in (0, 1) for q in (0, 1)],
                     axis=1)                                                  # (Bp,4,Hp,Wp,9)
    subs = subs.reshape(nb, bb, 4, n_grp, _GP, 9)
    # row order (g, sub, b_local); column order (p', tap)
    lhs = subs.transpose(0, 3, 2, 1, 4, 5).reshape(nb, n_grp * 4 * bb, _GP * 9)
    lhs = lhs.astype(lhs_dtype)

    # ---- trace-time weight transforms ----
    w_tap = conv_w.reshape(C, 9).T                                  # (9, C), taps (dy,dx)
    wc = jnp.kron(jnp.eye(_GP, dtype=w_tap.dtype), w_tap).astype(lhs_dtype)   # (GP*9, GP*C)
    bc = jnp.tile(conv_b, _GP).reshape(1, _GP * C)

    # Fold the NCHW flatten permutation into fc1's weight (kernel feature order is
    # f = g*GP*C + p'*C + c  <->  torch order c*n_pos + (g*GP + p')), grouped to K=128.
    f = np.arange(n_pos * C)
    c_idx = f % C
    p_idx = (f // C) % _GP
    g_idx = f // (_GP * C)
    perm = c_idx * n_pos + g_idx * _GP + p_idx
    w1p = jnp.take(w1, perm, axis=0).reshape(n_grp, _GP * C, hidden)
    if fc1_bf16:
        w1p = w1p.astype(jnp.bfloat16)

    # Lane-dense output: zero-pad the class dim to 128 (sliced off after the call).
    ncp = max(128, ((num_classes + 127) // 128) * 128)
    w2p = jnp.zeros((hidden, ncp), w2.dtype).at[:, :num_classes].set(w2)
    b2p = jnp.zeros((1, ncp), b2.dtype).at[0, :num_classes].set(b2)

    kernel = functools.partial(_fused_audio_cnn_kernel, bb=bb, n_grp=n_grp)

    out3 = pl.pallas_call(
        kernel,
        out_shape=jax.ShapeDtypeStruct((nb, bb, ncp), jnp.float32),
        grid=(nb,),
        in_specs=[
            pl.BlockSpec((1, n_grp * 4 * bb, _GP * 9), lambda i: (i, 0, 0)),  # patches
            pl.BlockSpec((_GP * 9, _GP * C), lambda i: (0, 0)),               # conv weight
            pl.BlockSpec((1, _GP * C), lambda i: (0, 0)),                     # conv bias
            pl.BlockSpec((n_grp, _GP * C, hidden), lambda i: (0, 0, 0)),      # fc1 weight
            pl.BlockSpec((1, hidden), lambda i: (0, 0)),                      # fc1 bias
            pl.BlockSpec((hidden, ncp), lambda i: (0, 0)),                    # fc2 weight (padded)
            pl.BlockSpec((1, ncp), lambda i: (0, 0)),                         # fc2 bias (padded)
        ],
        out_specs=pl.BlockSpec((1, bb, ncp), lambda i: (i, 0, 0)),
        compiler_params=pltpu.CompilerParams(
            dimension_semantics=("parallel",),
            vmem_limit_bytes=48 * 1024 * 1024,
        ),
    )(lhs, wc, bc, w1p, b1.reshape(1, hidden), w2p, b2p)

    return out3.reshape(Bp, ncp)[:B, :num_classes]


# ------------------------------- Reference ----------------------------------- #

def reference_forward(x, conv_w, conv_b, w1, b1, w2, b2):
    B, H, W = x.shape
    Hp, Wp = H // 2, W // 2
    C = conv_w.shape[0]
    x_pad = jnp.pad(x, ((0, 0), (1, 1), (1, 1)))
    conv = conv_b[None, :, None, None]
    for dy in range(3):
        for dx in range(3):
            conv = conv + (x_pad[:, None, dy:dy + H, dx:dx + W]
                           * conv_w[None, :, dy, dx, None, None])
    conv = jnp.maximum(conv, 0.0)                                        # (B, C, H, W)
    pooled = conv.reshape(B, C, Hp, 2, Wp, 2).max(axis=(3, 5))           # (B, C, Hp, Wp)
    flat = pooled.reshape(B, -1)                                         # NCHW flatten
    h = jnp.maximum(
        jnp.dot(flat, w1, precision=jax.lax.Precision.HIGHEST) + b1, 0.0)
    return jnp.dot(h, w2, precision=jax.lax.Precision.HIGHEST) + b2


# ---------------------------------- Main -------------------------------------- #

if __name__ == "__main__":
    input_shape = (16, 16)     # spectrogram (H, W)
    num_classes = 10
    B = 2
    H, W = input_shape
    Hp, Wp = H // 2, W // 2
    feat = 32 * Hp * Wp        # 32 * 8 * 8 = 2048

    key = jax.random.PRNGKey(0)
    k = jax.random.split(key, 7)
    conv_w = 0.10 * jax.random.normal(k[0], (32, 3, 3), jnp.float32)       # conv1.weight (32,1,3,3) squeezed
    conv_b = 0.10 * jax.random.normal(k[1], (32,), jnp.float32)            # conv1.bias
    w1 = 0.02 * jax.random.normal(k[2], (feat, 128), jnp.float32)          # fc1.weight.T (torch flatten order)
    b1 = 0.02 * jax.random.normal(k[3], (128,), jnp.float32)               # fc1.bias
    w2 = 0.05 * jax.random.normal(k[4], (128, num_classes), jnp.float32)   # fc2.weight.T
    b2 = 0.05 * jax.random.normal(k[5], (num_classes,), jnp.float32)       # fc2.bias

    x = jax.random.normal(k[6], (B, H, W), jnp.float32)

    ref = jax.block_until_ready(reference_forward(x, conv_w, conv_b, w1, b1, w2, b2))

    # f32 path: tight numerics check (smaller bb just to exercise a second tiling).
    out_f32 = audio_cnn_forward(x, conv_w, conv_b, w1, b1, w2, b2,
                                batch_block=128, fc1_bf16=False)
    out_f32 = jax.block_until_ready(out_f32)
    np.testing.assert_allclose(np.asarray(out_f32), np.asarray(ref), rtol=2e-3, atol=2e-3)

    # Default (optimized) path: bf16 streaming operands, f32 accumulate, bb=256,
    # 128-lane padded output -> looser tolerance.
    out_bf16 = audio_cnn_forward(x, conv_w, conv_b, w1, b1, w2, b2)
    out_bf16 = jax.block_until_ready(out_bf16)
    np.testing.assert_allclose(np.asarray(out_bf16), np.asarray(ref), rtol=3e-2, atol=3e-2)

    assert out_bf16.shape == (B, num_classes)
    print("KERNEL_OK")
</pallas_src>

<mosaic_0001>
module attributes {stable_mosaic.version = 11 : i64} {
  func.func @_fused_audio_cnn_kernel(%arg0: i32, %arg1: memref<1x8192x36xf32, #tpu.memory_space<vmem>>, %arg2: memref<36x128xf32, #tpu.memory_space<vmem>>, %arg3: memref<1x128xf32, #tpu.memory_space<vmem>>, %arg4: memref<16x128x128xf32, #tpu.memory_space<vmem>>, %arg5: memref<1x128xf32, #tpu.memory_space<vmem>>, %arg6: memref<128x128xf32, #tpu.memory_space<vmem>>, %arg7: memref<1x128xf32, #tpu.memory_space<vmem>>, %arg8: memref<1x128x128xf32, #tpu.memory_space<vmem>>) attributes {dimension_semantics = [#tpu.dimension_semantics<parallel>], iteration_bounds = array<i64: 1>, scalar_prefetch = 0 : i64, scratch_operands = 0 : i64, tpu.core_type = #tpu.core_type<tc>, window_params = [{transform_indices = @transform_0, window_bounds = array<i64: 1, 8192, 36>}, {pipeline_mode = #tpu.pipeline_mode<synchronous>, transform_indices = @transform_1, window_bounds = array<i64: 36, 128>}, {pipeline_mode = #tpu.pipeline_mode<synchronous>, transform_indices = @transform_2, window_bounds = array<i64: 1, 128>}, {pipeline_mode = #tpu.pipeline_mode<synchronous>, transform_indices = @transform_3, window_bounds = array<i64: 16, 128, 128>}, {pipeline_mode = #tpu.pipeline_mode<synchronous>, transform_indices = @transform_4, window_bounds = array<i64: 1, 128>}, {pipeline_mode = #tpu.pipeline_mode<synchronous>, transform_indices = @transform_5, window_bounds = array<i64: 128, 128>}, {pipeline_mode = #tpu.pipeline_mode<synchronous>, transform_indices = @transform_6, window_bounds = array<i64: 1, 128>}, {transform_indices = @transform_7, window_bounds = array<i64: 1, 128, 128>}]} {
    %c0 = arith.constant 0 : index
    %c0_0 = arith.constant 0 : index
    %0 = vector.load %arg2[%c0, %c0_0] : memref<36x128xf32, #tpu.memory_space<vmem>>, vector<36x128xf32>
    %c0_1 = arith.constant 0 : index
    %c0_2 = arith.constant 0 : index
    %1 = vector.load %arg3[%c0_1, %c0_2] : memref<1x128xf32, #tpu.memory_space<vmem>>, vector<1x128xf32>
    %cst = arith.constant 0.000000e+00 : f32
    %2 = vector.broadcast %cst : f32 to vector<128x128xf32>
    %c0_3 = arith.constant 0 : index
    %c0_4 = arith.constant 0 : index
    %c0_5 = arith.constant 0 : index
    %3 = vector.load %arg1[%c0_3, %c0_4, %c0_5] : memref<1x8192x36xf32, #tpu.memory_space<vmem>>, vector<1x512x36xf32>
    %4 = vector.shape_cast %3 : vector<1x512x36xf32> to vector<512x36xf32>
    %cst_6 = arith.constant dense<0.000000e+00> : vector<512x128xf32>
    %5 = tpu.matmul %4, %0, %cst_6 {dimension_numbers = #tpu.dot_dimension_numbers<[1], [0], [0], [1], [0, 0, 1, 1], [], []>} : vector<512x36xf32>, vector<36x128xf32>, vector<512x128xf32> -> vector<512x128xf32>
    %6 = vector.extract_strided_slice %5 {offsets = [0, 0], sizes = [128, 128], strides = [1, 1]} : vector<512x128xf32> to vector<128x128xf32>
    %7 = vector.extract_strided_slice %5 {offsets = [128, 0], sizes = [128, 128], strides = [1, 1]} : vector<512x128xf32> to vector<128x128xf32>
    %8 = arith.maximumf %6, %7 : vector<128x128xf32>
    %9 = vector.extract_strided_slice %5 {offsets = [256, 0], sizes = [128, 128], strides = [1, 1]} : vector<512x128xf32> to vector<128x128xf32>
    %10 = vector.extract_strided_slice %5 {offsets = [384, 0], sizes = [128, 128], strides = [1, 1]} : vector<512x128xf32> to vector<128x128xf32>
    %11 = arith.maximumf %9, %10 : vector<128x128xf32>
    %12 = arith.maximumf %8, %11 : vector<128x128xf32>
    %13 = vector.broadcast %1 : vector<1x128xf32> to vector<128x128xf32>
    %14 = arith.addf %12, %13 : vector<128x128xf32>
    %cst_7 = arith.constant 0.000000e+00 : f32
    %15 = vector.broadcast %cst_7 : f32 to vector<128x128xf32>
    %16 = arith.maximumf %14, %15 : vector<128x128xf32>
    %c0_8 = arith.constant 0 : index
    %c0_9 = arith.constant 0 : index
    %c0_10 = arith.constant 0 : index
    %17 = vector.load %arg4[%c0_8, %c0_9, %c0_10] : memref<16x128x128xf32, #tpu.memory_space<vmem>>, vector<1x128x128xf32>
    %18 = vector.shape_cast %17 : vector<1x128x128xf32> to vector<128x128xf32>
    %cst_11 = arith.constant dense<0.000000e+00> : vector<128x128xf32>
    %19 = tpu.matmul %16, %18, %cst_11 {dimension_numbers = #tpu.dot_dimension_numbers<[1], [0], [0], [1], [0, 0, 1, 1], [], []>} : vector<128x128xf32>, vector<128x128xf32>, vector<128x128xf32> -> vector<128x128xf32>
    %20 = arith.addf %2, %19 : vector<128x128xf32>
    %c0_12 = arith.constant 0 : index
    %c512 = arith.constant 512 : index
    %c0_13 = arith.constant 0 : index
    %21 = vector.load %arg1[%c0_12, %c512, %c0_13] : memref<1x8192x36xf32, #tpu.memory_space<vmem>>, vector<1x512x36xf32>
    %22 = vector.shape_cast %21 : vector<1x512x36xf32> to vector<512x36xf32>
    %cst_14 = arith.constant dense<0.000000e+00> : vector<512x128xf32>
    %23 = tpu.matmul %22, %0, %cst_14 {dimension_numbers = #tpu.dot_dimension_numbers<[1], [0], [0], [1], [0, 0, 1, 1], [], []>} : vector<512x36xf32>, vector<36x128xf32>, vector<512x128xf32> -> vector<512x128xf32>
    %24 = vector.extract_strided_slice %23 {offsets = [0, 0], sizes = [128, 128], strides = [1, 1]} : vector<512x128xf32> to vector<128x128xf32>
    %25 = vector.extract_strided_slice %23 {offsets = [128, 0], sizes = [128, 128], strides = [1, 1]} : vector<512x128xf32> to vector<128x128xf32>
    %26 = arith.maximumf %24, %25 : vector<128x128xf32>
    %27 = vector.extract_strided_slice %23 {offsets = [256, 0], sizes = [128, 128], strides = [1, 1]} : vector<512x128xf32> to vector<128x128xf32>
    %28 = vector.extract_strided_slice %23 {offsets = [384, 0], sizes = [128, 128], strides = [1, 1]} : vector<512x128xf32> to vector<128x128xf32>
    %29 = arith.maximumf %27, %28 : vector<128x128xf32>
    %30 = arith.maximumf %26, %29 : vector<128x128xf32>
    %31 = vector.broadcast %1 : vector<1x128xf32> to vector<128x128xf32>
    %32 = arith.addf %30, %31 : vector<128x128xf32>
    %cst_15 = arith.constant 0.000000e+00 : f32
    %33 = vector.broadcast %cst_15 : f32 to vector<128x128xf32>
    %34 = arith.maximumf %32, %33 : vector<128x128xf32>
    %c1 = arith.constant 1 : index
    %c0_16 = arith.constant 0 : index
    %c0_17 = arith.constant 0 : index
    %35 = vector.load %arg4[%c1, %c0_16, %c0_17] : memref<16x128x128xf32, #tpu.memory_space<vmem>>, vector<1x128x128xf32>
    %36 = vector.shape_cast %35 : vector<1x128x128xf32> to vector<128x128xf32>
    %cst_18 = arith.constant dense<0.000000e+00> : vector<128x128xf32>
    %37 = tpu.matmul %34, %36, %cst_18 {dimension_numbers = #tpu.dot_dimension_numbers<[1], [0], [0], [1], [0, 0, 1, 1], [], []>} : vector<128x128xf32>, vector<128x128xf32>, vector<128x128xf32> -> vector<128x128xf32>
    %38 = arith.addf %20, %37 : vector<128x128xf32>
    %c0_19 = arith.constant 0 : index
    %c1024 = arith.constant 1024 : index
    %c0_20 = arith.constant 0 : index
    %39 = vector.load %arg1[%c0_19, %c1024, %c0_20] : memref<1x8192x36xf32, #tpu.memory_space<vmem>>, vector<1x512x36xf32>
    %40 = vector.shape_cast %39 : vector<1x512x36xf32> to vector<512x36xf32>
    %cst_21 = arith.constant dense<0.000000e+00> : vector<512x128xf32>
    %41 = tpu.matmul %40, %0, %cst_21 {dimension_numbers = #tpu.dot_dimension_numbers<[1], [0], [0], [1], [0, 0, 1, 1], [], []>} : vector<512x36xf32>, vector<36x128xf32>, vector<512x128xf32> -> vector<512x128xf32>
    %42 = vector.extract_strided_slice %41 {offsets = [0, 0], sizes = [128, 128], strides = [1, 1]} : vector<512x128xf32> to vector<128x128xf32>
    %43 = vector.extract_strided_slice %41 {offsets = [128, 0], sizes = [128, 128], strides = [1, 1]} : vector<512x128xf32> to vector<128x128xf32>
    %44 = arith.maximumf %42, %43 : vector<128x128xf32>
    %45 = vector.extract_strided_slice %41 {offsets = [256, 0], sizes = [128, 128], strides = [1, 1]} : vector<512x128xf32> to vector<128x128xf32>
    %46 = vector.extract_strided_slice %41 {offsets = [384, 0], sizes = [128, 128], strides = [1, 1]} : vector<512x128xf32> to vector<128x128xf32>
    %47 = arith.maximumf %45, %46 : vector<128x128xf32>
    %48 = arith.maximumf %44, %47 : vector<128x128xf32>
    %49 = vector.broadcast %1 : vector<1x128xf32> to vector<128x128xf32>
    %50 = arith.addf %48, %49 : vector<128x128xf32>
    %cst_22 = arith.constant 0.000000e+00 : f32
    %51 = vector.broadcast %cst_22 : f32 to vector<128x128xf32>
    %52 = arith.maximumf %50, %51 : vector<128x128xf32>
    %c2 = arith.constant 2 : index
    %c0_23 = arith.constant 0 : index
    %c0_24 = arith.constant 0 : index
    %53 = vector.load %arg4[%c2, %c0_23, %c0_24] : memref<16x128x128xf32, #tpu.memory_space<vmem>>, vector<1x128x128xf32>
    %54 = vector.shape_cast %53 : vector<1x128x128xf32> to vector<128x128xf32>
    %cst_25 = arith.constant dense<0.000000e+00> : vector<128x128xf32>
    %55 = tpu.matmul %52, %54, %cst_25 {dimension_numbers = #tpu.dot_dimension_numbers<[1], [0], [0], [1], [0, 0, 1, 1], [], []>} : vector<128x128xf32>, vector<128x128xf32>, vector<128x128xf32> -> vector<128x128xf32>
    %56 = arith.addf %38, %55 : vector<128x128xf32>
    %c0_26 = arith.constant 0 : index
    %c1536 = arith.constant 1536 : index
    %c0_27 = arith.constant 0 : index
    %57 = vector.load %arg1[%c0_26, %c1536, %c0_27] : memref<1x8192x36xf32, #tpu.memory_space<vmem>>, vector<1x512x36xf32>
    %58 = vector.shape_cast %57 : vector<1x512x36xf32> to vector<512x36xf32>
    %cst_28 = arith.constant dense<0.000000e+00> : vector<512x128xf32>
    %59 = tpu.matmul %58, %0, %cst_28 {dimension_numbers = #tpu.dot_dimension_numbers<[1], [0], [0], [1], [0, 0, 1, 1], [], []>} : vector<512x36xf32>, vector<36x128xf32>, vector<512x128xf32> -> vector<512x128xf32>
    %60 = vector.extract_strided_slice %59 {offsets = [0, 0], sizes = [128, 128], strides = [1, 1]} : vector<512x128xf32> to vector<128x128xf32>
    %61 = vector.extract_strided_slice %59 {offsets = [128, 0], sizes = [128, 128], strides = [1, 1]} : vector<512x128xf32> to vector<128x128xf32>
    %62 = arith.maximumf %60, %61 : vector<128x128xf32>
    %63 = vector.extract_strided_slice %59 {offsets = [256, 0], sizes = [128, 128], strides = [1, 1]} : vector<512x128xf32> to vector<128x128xf32>
    %64 = vector.extract_strided_slice %59 {offsets = [384, 0], sizes = [128, 128], strides = [1, 1]} : vector<512x128xf32> to vector<128x128xf32>
    %65 = arith.maximumf %63, %64 : vector<128x128xf32>
    %66 = arith.maximumf %62, %65 : vector<128x128xf32>
    %67 = vector.broadcast %1 : vector<1x128xf32> to vector<128x128xf32>
    %68 = arith.addf %66, %67 : vector<128x128xf32>
    %cst_29 = arith.constant 0.000000e+00 : f32
    %69 = vector.broadcast %cst_29 : f32 to vector<128x128xf32>
    %70 = arith.maximumf %68, %69 : vector<128x128xf32>
    %c3 = arith.constant 3 : index
    %c0_30 = arith.constant 0 : index
    %c0_31 = arith.constant 0 : index
    %71 = vector.load %arg4[%c3, %c0_30, %c0_31] : memref<16x128x128xf32, #tpu.memory_space<vmem>>, vector<1x128x128xf32>
    %72 = vector.shape_cast %71 : vector<1x128x128xf32> to vector<128x128xf32>
    %cst_32 = arith.constant dense<0.000000e+00> : vector<128x128xf32>
    %73 = tpu.matmul %70, %72, %cst_32 {dimension_numbers = #tpu.dot_dimension_numbers<[1], [0], [0], [1], [0, 0, 1, 1], [], []>} : vector<128x128xf32>, vector<128x128xf32>, vector<128x128xf32> -> vector<128x128xf32>
    %74 = arith.addf %56, %73 : vector<128x128xf32>
    %c0_33 = arith.constant 0 : index
    %c2048 = arith.constant 2048 : index
    %c0_34 = arith.constant 0 : index
    %75 = vector.load %arg1[%c0_33, %c2048, %c0_34] : memref<1x8192x36xf32, #tpu.memory_space<vmem>>, vector<1x512x36xf32>
    %76 = vector.shape_cast %75 : vector<1x512x36xf32> to vector<512x36xf32>
    %cst_35 = arith.constant dense<0.000000e+00> : vector<512x128xf32>
    %77 = tpu.matmul %76, %0, %cst_35 {dimension_numbers = #tpu.dot_dimension_numbers<[1], [0], [0], [1], [0, 0, 1, 1], [], []>} : vector<512x36xf32>, vector<36x128xf32>, vector<512x128xf32> -> vector<512x128xf32>
    %78 = vector.extract_strided_slice %77 {offsets = [0, 0], sizes = [128, 128], strides = [1, 1]} : vector<512x128xf32> to vector<128x128xf32>
    %79 = vector.extract_strided_slice %77 {offsets = [128, 0], sizes = [128, 128], strides = [1, 1]} : vector<512x128xf32> to vector<128x128xf32>
    %80 = arith.maximumf %78, %79 : vector<128x128xf32>
    %81 = vector.extract_strided_slice %77 {offsets = [256, 0], sizes = [128, 128], strides = [1, 1]} : vector<512x128xf32> to vector<128x128xf32>
    %82 = vector.extract_strided_slice %77 {offsets = [384, 0], sizes = [128, 128], strides = [1, 1]} : vector<512x128xf32> to vector<128x128xf32>
    %83 = arith.maximumf %81, %82 : vector<128x128xf32>
    %84 = arith.maximumf %80, %83 : vector<128x128xf32>
    %85 = vector.broadcast %1 : vector<1x128xf32> to vector<128x128xf32>
    %86 = arith.addf %84, %85 : vector<128x128xf32>
    %cst_36 = arith.constant 0.000000e+00 : f32
    %87 = vector.broadcast %cst_36 : f32 to vector<128x128xf32>
    %88 = arith.maximumf %86, %87 : vector<128x128xf32>
    %c4 = arith.constant 4 : index
    %c0_37 = arith.constant 0 : index
    %c0_38 = arith.constant 0 : index
    %89 = vector.load %arg4[%c4, %c0_37, %c0_38] : memref<16x128x128xf32, #tpu.memory_space<vmem>>, vector<1x128x128xf32>
    %90 = vector.shape_cast %89 : vector<1x128x128xf32> to vector<128x128xf32>
    %cst_39 = arith.constant dense<0.000000e+00> : vector<128x128xf32>
    %91 = tpu.matmul %88, %90, %cst_39 {dimension_numbers = #tpu.dot_dimension_numbers<[1], [0], [0], [1], [0, 0, 1, 1], [], []>} : vector<128x128xf32>, vector<128x128xf32>, vector<128x128xf32> -> vector<128x128xf32>
    %92 = arith.addf %74, %91 : vector<128x128xf32>
    %c0_40 = arith.constant 0 : index
    %c2560 = arith.constant 2560 : index
    %c0_41 = arith.constant 0 : index
    %93 = vector.load %arg1[%c0_40, %c2560, %c0_41] : memref<1x8192x36xf32, #tpu.memory_space<vmem>>, vector<1x512x36xf32>
    %94 = vector.shape_cast %93 : vector<1x512x36xf32> to vector<512x36xf32>
    %cst_42 = arith.constant dense<0.000000e+00> : vector<512x128xf32>
    %95 = tpu.matmul %94, %0, %cst_42 {dimension_numbers = #tpu.dot_dimension_numbers<[1], [0], [0], [1], [0, 0, 1, 1], [], []>} : vector<512x36xf32>, vector<36x128xf32>, vector<512x128xf32> -> vector<512x128xf32>
    %96 = vector.extract_strided_slice %95 {offsets = [0, 0], sizes = [128, 128], strides = [1, 1]} : vector<512x128xf32> to vector<128x128xf32>
    %97 = vector.extract_strided_slice %95 {offsets = [128, 0], sizes = [128, 128], strides = [1, 1]} : vector<512x128xf32> to vector<128x128xf32>
    %98 = arith.maximumf %96, %97 : vector<128x128xf32>
    %99 = vector.extract_strided_slice %95 {offsets = [256, 0], sizes = [128, 128], strides = [1, 1]} : vector<512x128xf32> to vector<128x128xf32>
    %100 = vector.extract_strided_slice %95 {offsets = [384, 0], sizes = [128, 128], strides = [1, 1]} : vector<512x128xf32> to vector<128x128xf32>
    %101 = arith.maximumf %99, %100 : vector<128x128xf32>
    %102 = arith.maximumf %98, %101 : vector<128x128xf32>
    %103 = vector.broadcast %1 : vector<1x128xf32> to vector<128x128xf32>
    %104 = arith.addf %102, %103 : vector<128x128xf32>
    %cst_43 = arith.constant 0.000000e+00 : f32
    %105 = vector.broadcast %cst_43 : f32 to vector<128x128xf32>
    %106 = arith.maximumf %104, %105 : vector<128x128xf32>
    %c5 = arith.constant 5 : index
    %c0_44 = arith.constant 0 : index
    %c0_45 = arith.constant 0 : index
    %107 = vector.load %arg4[%c5, %c0_44, %c0_45] : memref<16x128x128xf32, #tpu.memory_space<vmem>>, vector<1x128x128xf32>
    %108 = vector.shape_cast %107 : vector<1x128x128xf32> to vector<128x128xf32>
    %cst_46 = arith.constant dense<0.000000e+00> : vector<128x128xf32>
    %109 = tpu.matmul %106, %108, %cst_46 {dimension_numbers = #tpu.dot_dimension_numbers<[1], [0], [0], [1], [0, 0, 1, 1], [], []>} : vector<128x128xf32>, vector<128x128xf32>, vector<128x128xf32> -> vector<128x128xf32>
    %110 = arith.addf %92, %109 : vector<128x128xf32>
    %c0_47 = arith.constant 0 : index
    %c3072 = arith.constant 3072 : index
    %c0_48 = arith.constant 0 : index
    %111 = vector.load %arg1[%c0_47, %c3072, %c0_48] : memref<1x8192x36xf32, #tpu.memory_space<vmem>>, vector<1x512x36xf32>
    %112 = vector.shape_cast %111 : vector<1x512x36xf32> to vector<512x36xf32>
    %cst_49 = arith.constant dense<0.000000e+00> : vector<512x128xf32>
    %113 = tpu.matmul %112, %0, %cst_49 {dimension_numbers = #tpu.dot_dimension_numbers<[1], [0], [0], [1], [0, 0, 1, 1], [], []>} : vector<512x36xf32>, vector<36x128xf32>, vector<512x128xf32> -> vector<512x128xf32>
    %114 = vector.extract_strided_slice %113 {offsets = [0, 0], sizes = [128, 128], strides = [1, 1]} : vector<512x128xf32> to vector<128x128xf32>
    %115 = vector.extract_strided_slice %113 {offsets = [128, 0], sizes = [128, 128], strides = [1, 1]} : vector<512x128xf32> to vector<128x128xf32>
    %116 = arith.maximumf %114, %115 : vector<128x128xf32>
    %117 = vector.extract_strided_slice %113 {offsets = [256, 0], sizes = [128, 128], strides = [1, 1]} : vector<512x128xf32> to vector<128x128xf32>
    %118 = vector.extract_strided_slice %113 {offsets = [384, 0], sizes = [128, 128], strides = [1, 1]} : vector<512x128xf32> to vector<128x128xf32>
    %119 = arith.maximumf %117, %118 : vector<128x128xf32>
    %120 = arith.maximumf %116, %119 : vector<128x128xf32>
    %121 = vector.broadcast %1 : vector<1x128xf32> to vector<128x128xf32>
    %122 = arith.addf %120, %121 : vector<128x128xf32>
    %cst_50 = arith.constant 0.000000e+00 : f32
    %123 = vector.broadcast %cst_50 : f32 to vector<128x128xf32>
    %124 = arith.maximumf %122, %123 : vector<128x128xf32>
    %c6 = arith.constant 6 : index
    %c0_51 = arith.constant 0 : index
    %c0_52 = arith.constant 0 : index
    %125 = vector.load %arg4[%c6, %c0_51, %c0_52] : memref<16x128x128xf32, #tpu.memory_space<vmem>>, vector<1x128x128xf32>
    %126 = vector.shape_cast %125 : vector<1x128x128xf32> to vector<128x128xf32>
    %cst_53 = arith.constant dense<0.000000e+00> : vector<128x128xf32>
    %127 = tpu.matmul %124, %126, %cst_53 {dimension_numbers = #tpu.dot_dimension_numbers<[1], [0], [0], [1], [0, 0, 1, 1], [], []>} : vector<128x128xf32>, vector<128x128xf32>, vector<128x128xf32> -> vector<128x128xf32>
    %128 = arith.addf %110, %127 : vector<128x128xf32>
    %c0_54 = arith.constant 0 : index
    %c3584 = arith.constant 3584 : index
    %c0_55 = arith.constant 0 : index
    %129 = vector.load %arg1[%c0_54, %c3584, %c0_55] : memref<1x8192x36xf32, #tpu.memory_space<vmem>>, vector<1x512x36xf32>
    %130 = vector.shape_cast %129 : vector<1x512x36xf32> to vector<512x36xf32>
    %cst_56 = arith.constant dense<0.000000e+00> : vector<512x128xf32>
    %131 = tpu.matmul %130, %0, %cst_56 {dimension_numbers = #tpu.dot_dimension_numbers<[1], [0], [0], [1], [0, 0, 1, 1], [], []>} : vector<512x36xf32>, vector<36x128xf32>, vector<512x128xf32> -> vector<512x128xf32>
    %132 = vector.extract_strided_slice %131 {offsets = [0, 0], sizes = [128, 128], strides = [1, 1]} : vector<512x128xf32> to vector<128x128xf32>
    %133 = vector.extract_strided_slice %131 {offsets = [128, 0], sizes = [128, 128], strides = [1, 1]} : vector<512x128xf32> to vector<128x128xf32>
    %134 = arith.maximumf %132, %133 : vector<128x128xf32>
    %135 = vector.extract_strided_slice %131 {offsets = [256, 0], sizes = [128, 128], strides = [1, 1]} : vector<512x128xf32> to vector<128x128xf32>
    %136 = vector.extract_strided_slice %131 {offsets = [384, 0], sizes = [128, 128], strides = [1, 1]} : vector<512x128xf32> to vector<128x128xf32>
    %137 = arith.maximumf %135, %136 : vector<128x128xf32>
    %138 = arith.maximumf %134, %137 : vector<128x128xf32>
    %139 = vector.broadcast %1 : vector<1x128xf32> to vector<128x128xf32>
    %140 = arith.addf %138, %139 : vector<128x128xf32>
    %cst_57 = arith.constant 0.000000e+00 : f32
    %141 = vector.broadcast %cst_57 : f32 to vector<128x128xf32>
    %142 = arith.maximumf %140, %141 : vector<128x128xf32>
    %c7 = arith.constant 7 : index
    %c0_58 = arith.constant 0 : index
    %c0_59 = arith.constant 0 : index
    %143 = vector.load %arg4[%c7, %c0_58, %c0_59] : memref<16x128x128xf32, #tpu.memory_space<vmem>>, vector<1x128x128xf32>
    %144 = vector.shape_cast %143 : vector<1x128x128xf32> to vector<128x128xf32>
    %cst_60 = arith.constant dense<0.000000e+00> : vector<128x128xf32>
    %145 = tpu.matmul %142, %144, %cst_60 {dimension_numbers = #tpu.dot_dimension_numbers<[1], [0], [0], [1], [0, 0, 1, 1], [], []>} : vector<128x128xf32>, vector<128x128xf32>, vector<128x128xf32> -> vector<128x128xf32>
    %146 = arith.addf %128, %145 : vector<128x128xf32>
    %c0_61 = arith.constant 0 : index
    %c4096 = arith.constant 4096 : index
    %c0_62 = arith.constant 0 : index
    %147 = vector.load %arg1[%c0_61, %c4096, %c0_62] : memref<1x8192x36xf32, #tpu.memory_space<vmem>>, vector<1x512x36xf32>
    %148 = vector.shape_cast %147 : vector<1x512x36xf32> to vector<512x36xf32>
    %cst_63 = arith.constant dense<0.000000e+00> : vector<512x128xf32>
    %149 = tpu.matmul %148, %0, %cst_63 {dimension_numbers = #tpu.dot_dimension_numbers<[1], [0], [0], [1], [0, 0, 1, 1], [], []>} : vector<512x36xf32>, vector<36x128xf32>, vector<512x128xf32> -> vector<512x128xf32>
    %150 = vector.extract_strided_slice %149 {offsets = [0, 0], sizes = [128, 128], strides = [1, 1]} : vector<512x128xf32> to vector<128x128xf32>
    %151 = vector.extract_strided_slice %149 {offsets = [128, 0], sizes = [128, 128], strides = [1, 1]} : vector<512x128xf32> to vector<128x128xf32>
    %152 = arith.maximumf %150, %151 : vector<128x128xf32>
    %153 = vector.extract_strided_slice %149 {offsets = [256, 0], sizes = [128, 128], strides = [1, 1]} : vector<512x128xf32> to vector<128x128xf32>
    %154 = vector.extract_strided_slice %149 {offsets = [384, 0], sizes = [128, 128], strides = [1, 1]} : vector<512x128xf32> to vector<128x128xf32>
    %155 = arith.maximumf %153, %154 : vector<128x128xf32>
    %156 = arith.maximumf %152, %155 : vector<128x128xf32>
    %157 = vector.broadcast %1 : vector<1x128xf32> to vector<128x128xf32>
    %158 = arith.addf %156, %157 : vector<128x128xf32>
    %cst_64 = arith.constant 0.000000e+00 : f32
    %159 = vector.broadcast %cst_64 : f32 to vector<128x128xf32>
    %160 = arith.maximumf %158, %159 : vector<128x128xf32>
    %c8 = arith.constant 8 : index
    %c0_65 = arith.constant 0 : index
    %c0_66 = arith.constant 0 : index
    %161 = vector.load %arg4[%c8, %c0_65, %c0_66] : memref<16x128x128xf32, #tpu.memory_space<vmem>>, vector<1x128x128xf32>
    %162 = vector.shape_cast %161 : vector<1x128x128xf32> to vector<128x128xf32>
    %cst_67 = arith.constant dense<0.000000e+00> : vector<128x128xf32>
    %163 = tpu.matmul %160, %162, %cst_67 {dimension_numbers = #tpu.dot_dimension_numbers<[1], [0], [0], [1], [0, 0, 1, 1], [], []>} : vector<128x128xf32>, vector<128x128xf32>, vector<128x128xf32> -> vector<128x128xf32>
    %164 = arith.addf %146, %163 : vector<128x128xf32>
    %c0_68 = arith.constant 0 : index
    %c4608 = arith.constant 4608 : index
    %c0_69 = arith.constant 0 : index
    %165 = vector.load %arg1[%c0_68, %c4608, %c0_69] : memref<1x8192x36xf32, #tpu.memory_space<vmem>>, vector<1x512x36xf32>
    %166 = vector.shape_cast %165 : vector<1x512x36xf32> to vector<512x36xf32>
    %cst_70 = arith.constant dense<0.000000e+00> : vector<512x128xf32>
    %167 = tpu.matmul %166, %0, %cst_70 {dimension_numbers = #tpu.dot_dimension_numbers<[1], [0], [0], [1], [0, 0, 1, 1], [], []>} : vector<512x36xf32>, vector<36x128xf32>, vector<512x128xf32> -> vector<512x128xf32>
    %168 = vector.extract_strided_slice %167 {offsets = [0, 0], sizes = [128, 128], strides = [1, 1]} : vector<512x128xf32> to vector<128x128xf32>
    %169 = vector.extract_strided_slice %167 {offsets = [128, 0], sizes = [128, 128], strides = [1, 1]} : vector<512x128xf32> to vector<128x128xf32>
    %170 = arith.maximumf %168, %169 : vector<128x128xf32>
    %171 = vector.extract_strided_slice %167 {offsets = [256, 0], sizes = [128, 128], strides = [1, 1]} : vector<512x128xf32> to vector<128x128xf32>
    %172 = vector.extract_strided_slice %167 {offsets = [384, 0], sizes = [128, 128], strides = [1, 1]} : vector<512x128xf32> to vector<128x128xf32>
    %173 = arith.maximumf %171, %172 : vector<128x128xf32>
    %174 = arith.maximumf %170, %173 : vector<128x128xf32>
    %175 = vector.broadcast %1 : vector<1x128xf32> to vector<128x128xf32>
    %176 = arith.addf %174, %175 : vector<128x128xf32>
    %cst_71 = arith.constant 0.000000e+00 : f32
    %177 = vector.broadcast %cst_71 : f32 to vector<128x128xf32>
    %178 = arith.maximumf %176, %177 : vector<128x128xf32>
    %c9 = arith.constant 9 : index
    %c0_72 = arith.constant 0 : index
    %c0_73 = arith.constant 0 : index
    %179 = vector.load %arg4[%c9, %c0_72, %c0_73] : memref<16x128x128xf32, #tpu.memory_space<vmem>>, vector<1x128x128xf32>
    %180 = vector.shape_cast %179 : vector<1x128x128xf32> to vector<128x128xf32>
    %cst_74 = arith.constant dense<0.000000e+00> : vector<128x128xf32>
    %181 = tpu.matmul %178, %180, %cst_74 {dimension_numbers = #tpu.dot_dimension_numbers<[1], [0], [0], [1], [0, 0, 1, 1], [], []>} : vector<128x128xf32>, vector<128x128xf32>, vector<128x128xf32> -> vector<128x128xf32>
    %182 = arith.addf %164, %181 : vector<128x128xf32>
    %c0_75 = arith.constant 0 : index
    %c5120 = arith.constant 5120 : index
    %c0_76 = arith.constant 0 : index
    %183 = vector.load %arg1[%c0_75, %c5120, %c0_76] : memref<1x8192x36xf32, #tpu.memory_space<vmem>>, vector<1x512x36xf32>
    %184 = vector.shape_cast %183 : vector<1x512x36xf32> to vector<512x36xf32>
    %cst_77 = arith.constant dense<0.000000e+00> : vector<512x128xf32>
    %185 = tpu.matmul %184, %0, %cst_77 {dimension_numbers = #tpu.dot_dimension_numbers<[1], [0], [0], [1], [0, 0, 1, 1], [], []>} : vector<512x36xf32>, vector<36x128xf32>, vector<512x128xf32> -> vector<512x128xf32>
    %186 = vector.extract_strided_slice %185 {offsets = [0, 0], sizes = [128, 128], strides = [1, 1]} : vector<512x128xf32> to vector<128x128xf32>
    %187 = vector.extract_strided_slice %185 {offsets = [128, 0], sizes = [128, 128], strides = [1, 1]} : vector<512x128xf32> to vector<128x128xf32>
    %188 = arith.maximumf %186, %187 : vector<128x128xf32>
    %189 = vector.extract_strided_slice %185 {offsets = [256, 0], sizes = [128, 128], strides = [1, 1]} : vector<512x128xf32> to vector<128x128xf32>
    %190 = vector.extract_strided_slice %185 {offsets = [384, 0], sizes = [128, 128], strides = [1, 1]} : vector<512x128xf32> to vector<128x128xf32>
    %191 = arith.maximumf %189, %190 : vector<128x128xf32>
    %192 = arith.maximumf %188, %191 : vector<128x128xf32>
    %193 = vector.broadcast %1 : vector<1x128xf32> to vector<128x128xf32>
    %194 = arith.addf %192, %193 : vector<128x128xf32>
    %cst_78 = arith.constant 0.000000e+00 : f32
    %195 = vector.broadcast %cst_78 : f32 to vector<128x128xf32>
    %196 = arith.maximumf %194, %195 : vector<128x128xf32>
    %c10 = arith.constant 10 : index
    %c0_79 = arith.constant 0 : index
    %c0_80 = arith.constant 0 : index
    %197 = vector.load %arg4[%c10, %c0_79, %c0_80] : memref<16x128x128xf32, #tpu.memory_space<vmem>>, vector<1x128x128xf32>
    %198 = vector.shape_cast %197 : vector<1x128x128xf32> to vector<128x128xf32>
    %cst_81 = arith.constant dense<0.000000e+00> : vector<128x128xf32>
    %199 = tpu.matmul %196, %198, %cst_81 {dimension_numbers = #tpu.dot_dimension_numbers<[1], [0], [0], [1], [0, 0, 1, 1], [], []>} : vector<128x128xf32>, vector<128x128xf32>, vector<128x128xf32> -> vector<128x128xf32>
    %200 = arith.addf %182, %199 : vector<128x128xf32>
    %c0_82 = arith.constant 0 : index
    %c5632 = arith.constant 5632 : index
    %c0_83 = arith.constant 0 : index
    %201 = vector.load %arg1[%c0_82, %c5632, %c0_83] : memref<1x8192x36xf32, #tpu.memory_space<vmem>>, vector<1x512x36xf32>
    %202 = vector.shape_cast %201 : vector<1x512x36xf32> to vector<512x36xf32>
    %cst_84 = arith.constant dense<0.000000e+00> : vector<512x128xf32>
    %203 = tpu.matmul %202, %0, %cst_84 {dimension_numbers = #tpu.dot_dimension_numbers<[1], [0], [0], [1], [0, 0, 1, 1], [], []>} : vector<512x36xf32>, vector<36x128xf32>, vector<512x128xf32> -> vector<512x128xf32>
    %204 = vector.extract_strided_slice %203 {offsets = [0, 0], sizes = [128, 128], strides = [1, 1]} : vector<512x128xf32> to vector<128x128xf32>
    %205 = vector.extract_strided_slice %203 {offsets = [128, 0], sizes = [128, 128], strides = [1, 1]} : vector<512x128xf32> to vector<128x128xf32>
    %206 = arith.maximumf %204, %205 : vector<128x128xf32>
    %207 = vector.extract_strided_slice %203 {offsets = [256, 0], sizes = [128, 128], strides = [1, 1]} : vector<512x128xf32> to vector<128x128xf32>
    %208 = vector.extract_strided_slice %203 {offsets = [384, 0], sizes = [128, 128], strides = [1, 1]} : vector<512x128xf32> to vector<128x128xf32>
    %209 = arith.maximumf %207, %208 : vector<128x128xf32>
    %210 = arith.maximumf %206, %209 : vector<128x128xf32>
    %211 = vector.broadcast %1 : vector<1x128xf32> to vector<128x128xf32>
    %212 = arith.addf %210, %211 : vector<128x128xf32>
    %cst_85 = arith.constant 0.000000e+00 : f32
    %213 = vector.broadcast %cst_85 : f32 to vector<128x128xf32>
    %214 = arith.maximumf %212, %213 : vector<128x128xf32>
    %c11 = arith.constant 11 : index
    %c0_86 = arith.constant 0 : index
    %c0_87 = arith.constant 0 : index
    %215 = vector.load %arg4[%c11, %c0_86, %c0_87] : memref<16x128x128xf32, #tpu.memory_space<vmem>>, vector<1x128x128xf32>
    %216 = vector.shape_cast %215 : vector<1x128x128xf32> to vector<128x128xf32>
    %cst_88 = arith.constant dense<0.000000e+00> : vector<128x128xf32>
    %217 = tpu.matmul %214, %216, %cst_88 {dimension_numbers = #tpu.dot_dimension_numbers<[1], [0], [0], [1], [0, 0, 1, 1], [], []>} : vector<128x128xf32>, vector<128x128xf32>, vector<128x128xf32> -> vector<128x128xf32>
    %218 = arith.addf %200, %217 : vector<128x128xf32>
    %c0_89 = arith.constant 0 : index
    %c6144 = arith.constant 6144 : index
    %c0_90 = arith.constant 0 : index
    %219 = vector.load %arg1[%c0_89, %c6144, %c0_90] : memref<1x8192x36xf32, #tpu.memory_space<vmem>>, vector<1x512x36xf32>
    %220 = vector.shape_cast %219 : vector<1x512x36xf32> to vector<512x36xf32>
    %cst_91 = arith.constant dense<0.000000e+00> : vector<512x128xf32>
    %221 = tpu.matmul %220, %0, %cst_91 {dimension_numbers = #tpu.dot_dimension_numbers<[1], [0], [0], [1], [0, 0, 1, 1], [], []>} : vector<512x36xf32>, vector<36x128xf32>, vector<512x128xf32> -> vector<512x128xf32>
    %222 = vector.extract_strided_slice %221 {offsets = [0, 0], sizes = [128, 128], strides = [1, 1]} : vector<512x128xf32> to vector<128x128xf32>
    %223 = vector.extract_strided_slice %221 {offsets = [128, 0], sizes = [128, 128], strides = [1, 1]} : vector<512x128xf32> to vector<128x128xf32>
    %224 = arith.maximumf %222, %223 : vector<128x128xf32>
    %225 = vector.extract_strided_slice %221 {offsets = [256, 0], sizes = [128, 128], strides = [1, 1]} : vector<512x128xf32> to vector<128x128xf32>
    %226 = vector.extract_strided_slice %221 {offsets = [384, 0], sizes = [128, 128], strides = [1, 1]} : vector<512x128xf32> to vector<128x128xf32>
    %227 = arith.maximumf %225, %226 : vector<128x128xf32>
    %228 = arith.maximumf %224, %227 : vector<128x128xf32>
    %229 = vector.broadcast %1 : vector<1x128xf32> to vector<128x128xf32>
    %230 = arith.addf %228, %229 : vector<128x128xf32>
    %cst_92 = arith.constant 0.000000e+00 : f32
    %231 = vector.broadcast %cst_92 : f32 to vector<128x128xf32>
    %232 = arith.maximumf %230, %231 : vector<128x128xf32>
    %c12 = arith.constant 12 : index
    %c0_93 = arith.constant 0 : index
    %c0_94 = arith.constant 0 : index
    %233 = vector.load %arg4[%c12, %c0_93, %c0_94] : memref<16x128x128xf32, #tpu.memory_space<vmem>>, vector<1x128x128xf32>
    %234 = vector.shape_cast %233 : vector<1x128x128xf32> to vector<128x128xf32>
    %cst_95 = arith.constant dense<0.000000e+00> : vector<128x128xf32>
    %235 = tpu.matmul %232, %234, %cst_95 {dimension_numbers = #tpu.dot_dimension_numbers<[1], [0], [0], [1], [0, 0, 1, 1], [], []>} : vector<128x128xf32>, vector<128x128xf32>, vector<128x128xf32> -> vector<128x128xf32>
    %236 = arith.addf %218, %235 : vector<128x128xf32>
    %c0_96 = arith.constant 0 : index
    %c6656 = arith.constant 6656 : index
    %c0_97 = arith.constant 0 : index
    %237 = vector.load %arg1[%c0_96, %c6656, %c0_97] : memref<1x8192x36xf32, #tpu.memory_space<vmem>>, vector<1x512x36xf32>
    %238 = vector.shape_cast %237 : vector<1x512x36xf32> to vector<512x36xf32>
    %cst_98 = arith.constant dense<0.000000e+00> : vector<512x128xf32>
    %239 = tpu.matmul %238, %0, %cst_98 {dimension_numbers = #tpu.dot_dimension_numbers<[1], [0], [0], [1], [0, 0, 1, 1], [], []>} : vector<512x36xf32>, vector<36x128xf32>, vector<512x128xf32> -> vector<512x128xf32>
    %240 = vector.extract_strided_slice %239 {offsets = [0, 0], sizes = [128, 128], strides = [1, 1]} : vector<512x128xf32> to vector<128x128xf32>
    %241 = vector.extract_strided_slice %239 {offsets = [128, 0], sizes = [128, 128], strides = [1, 1]} : vector<512x128xf32> to vector<128x128xf32>
    %242 = arith.maximumf %240, %241 : vector<128x128xf32>
    %243 = vector.extract_strided_slice %239 {offsets = [256, 0], sizes = [128, 128], strides = [1, 1]} : vector<512x128xf32> to vector<128x128xf32>
    %244 = vector.extract_strided_slice %239 {offsets = [384, 0], sizes = [128, 128], strides = [1, 1]} : vector<512x128xf32> to vector<128x128xf32>
    %245 = arith.maximumf %243, %244 : vector<128x128xf32>
    %246 = arith.maximumf %242, %245 : vector<128x128xf32>
    %247 = vector.broadcast %1 : vector<1x128xf32> to vector<128x128xf32>
    %248 = arith.addf %246, %247 : vector<128x128xf32>
    %cst_99 = arith.constant 0.000000e+00 : f32
    %249 = vector.broadcast %cst_99 : f32 to vector<128x128xf32>
    %250 = arith.maximumf %248, %249 : vector<128x128xf32>
    %c13 = arith.constant 13 : index
    %c0_100 = arith.constant 0 : index
    %c0_101 = arith.constant 0 : index
    %251 = vector.load %arg4[%c13, %c0_100, %c0_101] : memref<16x128x128xf32, #tpu.memory_space<vmem>>, vector<1x128x128xf32>
    %252 = vector.shape_cast %251 : vector<1x128x128xf32> to vector<128x128xf32>
    %cst_102 = arith.constant dense<0.000000e+00> : vector<128x128xf32>
    %253 = tpu.matmul %250, %252, %cst_102 {dimension_numbers = #tpu.dot_dimension_numbers<[1], [0], [0], [1], [0, 0, 1, 1], [], []>} : vector<128x128xf32>, vector<128x128xf32>, vector<128x128xf32> -> vector<128x128xf32>
    %254 = arith.addf %236, %253 : vector<128x128xf32>
    %c0_103 = arith.constant 0 : index
    %c7168 = arith.constant 7168 : index
    %c0_104 = arith.constant 0 : index
    %255 = vector.load %arg1[%c0_103, %c7168, %c0_104] : memref<1x8192x36xf32, #tpu.memory_space<vmem>>, vector<1x512x36xf32>
    %256 = vector.shape_cast %255 : vector<1x512x36xf32> to vector<512x36xf32>
    %cst_105 = arith.constant dense<0.000000e+00> : vector<512x128xf32>
    %257 = tpu.matmul %256, %0, %cst_105 {dimension_numbers = #tpu.dot_dimension_numbers<[1], [0], [0], [1], [0, 0, 1, 1], [], []>} : vector<512x36xf32>, vector<36x128xf32>, vector<512x128xf32> -> vector<512x128xf32>
    %258 = vector.extract_strided_slice %257 {offsets = [0, 0], sizes = [128, 128], strides = [1, 1]} : vector<512x128xf32> to vector<128x128xf32>
    %259 = vector.extract_strided_slice %257 {offsets = [128, 0], sizes = [128, 128], strides = [1, 1]} : vector<512x128xf32> to vector<128x128xf32>
    %260 = arith.maximumf %258, %259 : vector<128x128xf32>
    %261 = vector.extract_strided_slice %257 {offsets = [256, 0], sizes = [128, 128], strides = [1, 1]} : vector<512x128xf32> to vector<128x128xf32>
    %262 = vector.extract_strided_slice %257 {offsets = [384, 0], sizes = [128, 128], strides = [1, 1]} : vector<512x128xf32> to vector<128x128xf32>
    %263 = arith.maximumf %261, %262 : vector<128x128xf32>
    %264 = arith.maximumf %260, %263 : vector<128x128xf32>
    %265 = vector.broadcast %1 : vector<1x128xf32> to vector<128x128xf32>
    %266 = arith.addf %264, %265 : vector<128x128xf32>
    %cst_106 = arith.constant 0.000000e+00 : f32
    %267 = vector.broadcast %cst_106 : f32 to vector<128x128xf32>
    %268 = arith.maximumf %266, %267 : vector<128x128xf32>
    %c14 = arith.constant 14 : index
    %c0_107 = arith.constant 0 : index
    %c0_108 = arith.constant 0 : index
    %269 = vector.load %arg4[%c14, %c0_107, %c0_108] : memref<16x128x128xf32, #tpu.memory_space<vmem>>, vector<1x128x128xf32>
    %270 = vector.shape_cast %269 : vector<1x128x128xf32> to vector<128x128xf32>
    %cst_109 = arith.constant dense<0.000000e+00> : vector<128x128xf32>
    %271 = tpu.matmul %268, %270, %cst_109 {dimension_numbers = #tpu.dot_dimension_numbers<[1], [0], [0], [1], [0, 0, 1, 1], [], []>} : vector<128x128xf32>, vector<128x128xf32>, vector<128x128xf32> -> vector<128x128xf32>
    %272 = arith.addf %254, %271 : vector<128x128xf32>
    %c0_110 = arith.constant 0 : index
    %c7680 = arith.constant 7680 : index
    %c0_111 = arith.constant 0 : index
    %273 = vector.load %arg1[%c0_110, %c7680, %c0_111] : memref<1x8192x36xf32, #tpu.memory_space<vmem>>, vector<1x512x36xf32>
    %274 = vector.shape_cast %273 : vector<1x512x36xf32> to vector<512x36xf32>
    %cst_112 = arith.constant dense<0.000000e+00> : vector<512x128xf32>
    %275 = tpu.matmul %274, %0, %cst_112 {dimension_numbers = #tpu.dot_dimension_numbers<[1], [0], [0], [1], [0, 0, 1, 1], [], []>} : vector<512x36xf32>, vector<36x128xf32>, vector<512x128xf32> -> vector<512x128xf32>
    %276 = vector.extract_strided_slice %275 {offsets = [0, 0], sizes = [128, 128], strides = [1, 1]} : vector<512x128xf32> to vector<128x128xf32>
    %277 = vector.extract_strided_slice %275 {offsets = [128, 0], sizes = [128, 128], strides = [1, 1]} : vector<512x128xf32> to vector<128x128xf32>
    %278 = arith.maximumf %276, %277 : vector<128x128xf32>
    %279 = vector.extract_strided_slice %275 {offsets = [256, 0], sizes = [128, 128], strides = [1, 1]} : vector<512x128xf32> to vector<128x128xf32>
    %280 = vector.extract_strided_slice %275 {offsets = [384, 0], sizes = [128, 128], strides = [1, 1]} : vector<512x128xf32> to vector<128x128xf32>
    %281 = arith.maximumf %279, %280 : vector<128x128xf32>
    %282 = arith.maximumf %278, %281 : vector<128x128xf32>
    %283 = vector.broadcast %1 : vector<1x128xf32> to vector<128x128xf32>
    %284 = arith.addf %282, %283 : vector<128x128xf32>
    %cst_113 = arith.constant 0.000000e+00 : f32
    %285 = vector.broadcast %cst_113 : f32 to vector<128x128xf32>
    %286 = arith.maximumf %284, %285 : vector<128x128xf32>
    %c15 = arith.constant 15 : index
    %c0_114 = arith.constant 0 : index
    %c0_115 = arith.constant 0 : index
    %287 = vector.load %arg4[%c15, %c0_114, %c0_115] : memref<16x128x128xf32, #tpu.memory_space<vmem>>, vector<1x128x128xf32>
    %288 = vector.shape_cast %287 : vector<1x128x128xf32> to vector<128x128xf32>
    %cst_116 = arith.constant dense<0.000000e+00> : vector<128x128xf32>
    %289 = tpu.matmul %286, %288, %cst_116 {dimension_numbers = #tpu.dot_dimension_numbers<[1], [0], [0], [1], [0, 0, 1, 1], [], []>} : vector<128x128xf32>, vector<128x128xf32>, vector<128x128xf32> -> vector<128x128xf32>
    %290 = arith.addf %272, %289 : vector<128x128xf32>
    %c0_117 = arith.constant 0 : index
    %c0_118 = arith.constant 0 : index
    %291 = vector.load %arg5[%c0_117, %c0_118] : memref<1x128xf32, #tpu.memory_space<vmem>>, vector<1x128xf32>
    %292 = vector.broadcast %291 : vector<1x128xf32> to vector<128x128xf32>
    %293 = arith.addf %290, %292 : vector<128x128xf32>
    %cst_119 = arith.constant 0.000000e+00 : f32
    %294 = vector.broadcast %cst_119 : f32 to vector<128x128xf32>
    %295 = arith.maximumf %293, %294 : vector<128x128xf32>
    %c0_120 = arith.constant 0 : index
    %c0_121 = arith.constant 0 : index
    %296 = vector.load %arg6[%c0_120, %c0_121] : memref<128x128xf32, #tpu.memory_space<vmem>>, vector<128x128xf32>
    %cst_122 = arith.constant dense<0.000000e+00> : vector<128x128xf32>
    %297 = tpu.matmul %295, %296, %cst_122 {dimension_numbers = #tpu.dot_dimension_numbers<[1], [0], [0], [1], [0, 0, 1, 1], [], []>} : vector<128x128xf32>, vector<128x128xf32>, vector<128x128xf32> -> vector<128x128xf32>
    %c0_123 = arith.constant 0 : index
    %c0_124 = arith.constant 0 : index
    %298 = vector.load %arg7[%c0_123, %c0_124] : memref<1x128xf32, #tpu.memory_space<vmem>>, vector<1x128xf32>
    %299 = vector.broadcast %298 : vector<1x128xf32> to vector<128x128xf32>
    %300 = arith.addf %297, %299 : vector<128x128xf32>
    %c0_125 = arith.constant 0 : index
    %c0_126 = arith.constant 0 : index
    %c0_127 = arith.constant 0 : index
    %301 = vector.load %arg8[%c0_125, %c0_126, %c0_127] : memref<1x128x128xf32, #tpu.memory_space<vmem>>, vector<1x128x128xf32>
    %302 = vector.shape_cast %301 : vector<1x128x128xf32> to vector<128x128xf32>
    %303 = vector.shape_cast %300 : vector<128x128xf32> to vector<1x128x128xf32>
    tpu.vector_store %arg8[%c0_125, %c0_126, %c0_127], %303 {strides = array<i32>} : memref<1x128x128xf32, #tpu.memory_space<vmem>>, vector<1x128x128xf32>,
    return
  }
  func.func @transform_0(%arg0: i32) -> (i32, i32, i32) {
    %c0_i32 = arith.constant 0 : i32
    %c0_i32_0 = arith.constant 0 : i32
    %c0_i32_1 = arith.constant 0 : i32
    return %arg0, %c0_i32, %c0_i32_0 : i32, i32, i32
  }
  func.func @transform_1(%arg0: i32) -> (i32, i32) {
    %c0_i32 = arith.constant 0 : i32
    %c0_i32_0 = arith.constant 0 : i32
    %c0_i32_1 = arith.constant 0 : i32
    return %c0_i32, %c0_i32_0 : i32, i32
  }
  func.func @transform_2(%arg0: i32) -> (i32, i32) {
    %c0_i32 = arith.constant 0 : i32
    %c0_i32_0 = arith.constant 0 : i32
    %c0_i32_1 = arith.constant 0 : i32
    return %c0_i32, %c0_i32_0 : i32, i32
  }
  func.func @transform_3(%arg0: i32) -> (i32, i32, i32) {
    %c0_i32 = arith.constant 0 : i32
    %c0_i32_0 = arith.constant 0 : i32
    %c0_i32_1 = arith.constant 0 : i32
    %c0_i32_2 = arith.constant 0 : i32
    return %c0_i32, %c0_i32_0, %c0_i32_1 : i32, i32, i32
  }
  func.func @transform_4(%arg0: i32) -> (i32, i32) {
    %c0_i32 = arith.constant 0 : i32
    %c0_i32_0 = arith.constant 0 : i32
    %c0_i32_1 = arith.constant 0 : i32
    return %c0_i32, %c0_i32_0 : i32, i32
  }
  func.func @transform_5(%arg0: i32) -> (i32, i32) {
    %c0_i32 = arith.constant 0 : i32
    %c0_i32_0 = arith.constant 0 : i32
    %c0_i32_1 = arith.constant 0 : i32
    return %c0_i32, %c0_i32_0 : i32, i32
  }
  func.func @transform_6(%arg0: i32) -> (i32, i32) {
    %c0_i32 = arith.constant 0 : i32
    %c0_i32_0 = arith.constant 0 : i32
    %c0_i32_1 = arith.constant 0 : i32
    return %c0_i32, %c0_i32_0 : i32, i32
  }
  func.func @transform_7(%arg0: i32) -> (i32, i32, i32) {
    %c0_i32 = arith.constant 0 : i32
    %c0_i32_0 = arith.constant 0 : i32
    %c0_i32_1 = arith.constant 0 : i32
    return %arg0, %c0_i32, %c0_i32_0 : i32, i32, i32
  }
}

</mosaic_0001>

<bundles_post_ra>
// kernel: tile.8
= control target key start
LH: loop header
LB: loop body
LE: loop exit
PB: predicated region body
PF: predicated region fallthrough
CT: control target
= control target key end

     0   :  { %s22_s0 = inlined_call_operand.vmem [shape: f32[32], index: 0, kind: input, shape index: {}]   ;;  %s23_s1 = inlined_call_operand.vmem [shape: f32[4,32], index: 1, kind: output, shape index: {}]  }
   0x1   :  { %v4_v0 = vld [vmem:[%s22_s0] ss:$0 sm:$0xff] }
   0x2   :  { %5 = vst [vmem:[%s23_s1] sm:$0xf] %v4_v0 }

// kernel: tile.9
= control target key start
LH: loop header
LB: loop body
LE: loop exit
PB: predicated region body
PF: predicated region fallthrough
CT: control target
= control target key end

     0   :  { %vm8_vm0 = vcmask 261120   ;;  %s40_s8 = smov 32   ;;  %s41_s9 = smov 64   ;;  %vm14_vm1 = vcmask 1048320   ;;  %vm20_vm2 = vcmask 785920   ;;  %vm26_vm3 = vcmask 523520   ;;  %s58_s0 = inlined_call_operand.vmem [shape: f32[4,32], index: 0, kind: input, shape index: {}]   ;;  %s59_s1 = inlined_call_operand.vmem [shape: f32[1,128], index: 1, kind: output, shape index: {}]  }
   0x1   :  { %v5_v0 = vld [vmem:[%s58_s0] sm:$0xf]  ;;  %s39_s0 = smov 96  }
   0x2   :  { %6 = vst [vmem:[#allocation1] sm:$0xf] %v5_v0 }
   0x9   :  { %v11_v1 = vld [vmem:[#allocation1 + $0x3] sm:$0x1]   ;;  %v23_v2 = vld [vmem:[#allocation1 + $0x1] sm:$0x1]   ;;  %v7_v3 = vld [vmem:[#allocation1] sm:$0x1]  }
   0xa   :  { %12 = vrot.lane.b32.xlu0 %v11_v1, %s39_s0  ;;  %24 = vrot.lane.b32.xlu1 %v23_v2, %s40_s8  ;;  %v17_v4 = vld [vmem:[#allocation1 + $0x2] sm:$0x1]   ;;  %9 = vst.msk [vmem:[#allocation0] sm:$0x1] %vm8_vm0, %v7_v3  }
   0xe   :  { %18 = vrot.lane.b32.xlu0 %v17_v4, %s41_s9 }
  0x7c   :  { %v13_v5 = vpop.permute.xlu0 %12   ;;  %v25_v6 = vpop.permute.xlu1 %24  }
  0x7d   :  { %15 = vst.msk [vmem:[#allocation0] sm:$0x1] %vm14_vm1, %v13_v5  }
  0x80   :  { %v19_v7 = vpop.permute.xlu0 %18  }
  0x81   :  { %21 = vst.msk [vmem:[#allocation0] sm:$0x1] %vm20_vm2, %v19_v7  }
  0x82   :  { %27 = vst.msk [vmem:[#allocation0] sm:$0x1] %vm26_vm3, %v25_v6  }
  0x89   :  { %v32_v8 = vld [vmem:[#allocation0] sm:$0x1] }
  0x8a   :  { %35 = vst [vmem:[%s59_s1] sm:$0x1] %v32_v8 }

// kernel: audio_cnn_forward.1
= control target key start
LH: loop header
LB: loop body
LE: loop exit
PB: predicated region body
PF: predicated region fallthrough
CT: control target
= control target key end

     0   :  { %vm289_vm0 = vcmask 1043456   ;;  %vm96_vm1 = vcmask 293888   ;;  %s28651_s1 = inlined_call_operand.vmem [shape: f32[36,128], index: 1, kind: input, shape index: {}]   ;;  %s28652_s0 = inlined_call_operand.vmem [shape: f32[1,8192,36], index: 0, kind: input, shape index: {}]   ;;  %s28653_s3 = inlined_call_operand.vmem [shape: f32[16,128,128], index: 3, kind: input, shape index: {}]   ;;  %s28654_s2 = inlined_call_operand.vmem [shape: f32[1,128], index: 2, kind: input, shape index: {}]   ;;  %s28655_s5 = inlined_call_operand.vmem [shape: f32[128,128], index: 5, kind: input, shape index: {}]   ;;  %s28656_s4 = inlined_call_operand.vmem [shape: f32[1,128], index: 4, kind: input, shape index: {}]   ;;  %s28657_s6 = inlined_call_operand.vmem [shape: f32[1,128], index: 6, kind: input, shape index: {}]   ;;  %s28658_s7 = inlined_call_operand.vmem [shape: f32[1,128,128], index: 7, kind: output, shape index: {}]  }
   0x1   :  { %v20296_v0 = vld [vmem:[%s28651_s1 + $0x20] sm:$0xf]  ;;  %v29_v1 = vld [vmem:[%s28651_s1 + $0x18] sm:$0xff]  ;;  %v28_v2 = vld [vmem:[%s28651_s1 + $0x10] sm:$0xff] }
   0x2   :  { %17552 = vmatprep.subr.msk.mxu0 %vm289_vm0, %v20296_v0  ;;  %20200 = vmatprep.subr.msk.mxu1 %vm289_vm0, %v20296_v0  ;;  %v27_v3 = vld [vmem:[%s28651_s1 + $0x8] sm:$0xff]  ;;  %v26_v4 = vld [vmem:[%s28651_s1] sm:$0xff]  ;;  %v34_v9 = vld [vmem:[%s28652_s0 + $0x10] sm:$0xff] }
   0x3   :  { %17553 = vmatpush3.msk.msra.mxu0 %vm289_vm0, %v20296_v0  ;;  %20205 = vmatpush3.msk.msra.mxu1 %vm289_vm0, %v20296_v0  ;;  %v32_v5 = vld [vmem:[%s28652_s0] sm:$0xff]  ;;  %v33_v7 = vld [vmem:[%s28652_s0 + $0x8] sm:$0xff]  ;;  %v90_v10 = vld [vmem:[%s28652_s0 + $0x1d0] sm:$0xff] }
   0x4   :  { %17554 = vmatprep.subr.mxu0 %v29_v1  ;;  %20201 = vmatprep.subr.mxu1 %v29_v1  ;;  %v88_v6 = vld [vmem:[%s28652_s0 + $0x1c0] sm:$0xff]  ;;  %v89_v8 = vld [vmem:[%s28652_s0 + $0x1c8] sm:$0xff]  ;;  %v35_v11 = vld [vmem:[%s28652_s0 + $0x18] sm:$0xff] }
   0x5   :  { %17555 = vmatpush3.msra.mxu0 %v29_v1  ;;  %20206 = vmatpush3.msra.mxu1 %v29_v1  ;;  %v91_v12 = vld [vmem:[%s28652_s0 + $0x1d8] sm:$0xff]  ;;  %v36_v13 = vld [vmem:[%s28652_s0 + $0x20] sm:$0xff]  ;;  %v37_v15 = vld [vmem:[%s28652_s0 + $0x28] sm:$0xff] }
   0x6   :  { %17556 = vmatprep.subr.mxu0 %v28_v2  ;;  %20202 = vmatprep.subr.mxu1 %v28_v2  ;;  %v92_v14 = vld [vmem:[%s28652_s0 + $0x1e0] sm:$0xff]  ;;  %v93_v16 = vld [vmem:[%s28652_s0 + $0x1e8] sm:$0xff]  ;;  %v38_v17 = vld [vmem:[%s28652_s0 + $0x30] sm:$0xff] }
   0x7   :  { %17557 = vmatpush3.msra.mxu0 %v28_v2  ;;  %20207 = vmatpush3.msra.mxu1 %v28_v2  ;;  %v94_v18 = vld [vmem:[%s28652_s0 + $0x1f0] sm:$0xff]  ;;  %v39_v19 = vld [vmem:[%s28652_s0 + $0x38] sm:$0xff]  ;;  %v40_v21 = vld [vmem:[%s28652_s0 + $0x40] sm:$0xff] }
   0x8   :  { %17558 = vmatprep.subr.mxu0 %v27_v3  ;;  %20203 = vmatprep.subr.mxu1 %v27_v3  ;;  %v95_v20 = vld [vmem:[%s28652_s0 + $0x1f8] sm:$0xff]  ;;  %v780_v22 = vld [vmem:[%s28652_s0 + $0x200] sm:$0xff]  ;;  %v41_v23 = vld [vmem:[%s28652_s0 + $0x48] sm:$0xff] }
   0x9   :  { %17559 = vmatpush3.msra.mxu0 %v27_v3  ;;  %20208 = vmatpush3.msra.mxu1 %v27_v3  ;;  %v781_v24 = vld [vmem:[%s28652_s0 + $0x208] sm:$0xff]  ;;  %v42_v25 = vld [vmem:[%s28652_s0 + $0x50] sm:$0xff]  ;;  %v43_v27 = vld [vmem:[%s28652_s0 + $0x58] sm:$0xff] }
   0xa   :  { %17560 = vmatprep.subr.mxu0 %v26_v4  ;;  %20204 = vmatprep.subr.mxu1 %v26_v4  ;;  %v782_v26 = vld [vmem:[%s28652_s0 + $0x210] sm:$0xff]  ;;  %v783_v28 = vld [vmem:[%s28652_s0 + $0x218] sm:$0xff]  ;;  %v44_v29 = vld [vmem:[%s28652_s0 + $0x60] sm:$0xff] }
   0xb   :  { %17561 = vmatpush3.msra.mxu0 %v26_v4  ;;  %20209 = vmatpush3.msra.mxu1 %v26_v4  ;;  %v784_v30 = vld [vmem:[%s28652_s0 + $0x220] sm:$0xff]  ;;  %v45_v31 = vld [vmem:[%s28652_s0 + $0x68] sm:$0xff]  ;;  %v46_v33 = vld [vmem:[%s28652_s0 + $0x70] sm:$0xff] }
   0xc   :  { %17562 = vmatprep.mubr.msk.f32.mxu0 %vm96_vm1, %v32_v5  ;;  %17646 = vmatprep.mubr.msk.f32.mxu1 %vm96_vm1, %v88_v6  ;;  %v785_v32 = vld [vmem:[%s28652_s0 + $0x228] sm:$0xff]  ;;  %v786_v34 = vld [vmem:[%s28652_s0 + $0x230] sm:$0xff]  ;;  %v47_v35 = vld [vmem:[%s28652_s0 + $0x78] sm:$0xff] }
   0xd   :  { %17563 = vmatmul.mubr.msk.f32.vlgmr.msra.gmra.mxu0 %vm96_vm1, %v33_v7  ;;  %17647 = vmatmul.mubr.msk.f32.vlgmr.msra.gmra.mxu1 %vm96_vm1, %v89_v8  ;;  %v787_v36 = vld [vmem:[%s28652_s0 + $0x238] sm:$0xff]  ;;  %v48_v37 = vld [vmem:[%s28652_s0 + $0x80] sm:$0xff]  ;;  %v49_v39 = vld [vmem:[%s28652_s0 + $0x88] sm:$0xff] }
   0xe   :  { %17658 = vmatprep.subr.msk.mxu1 %vm289_vm0, %v20296_v0  ;;  %17565 = vmatprep.mubr.msk.f32.mxu0 %vm96_vm1, %v34_v9  ;;  %v788_v38 = vld [vmem:[%s28652_s0 + $0x240] sm:$0xff]  ;;  %v789_v40 = vld [vmem:[%s28652_s0 + $0x248] sm:$0xff]  ;;  %v50_v41 = vld [vmem:[%s28652_s0 + $0x90] sm:$0xff] }
   0xf   :  { %17659 = vmatpush3.msk.msra.mxu1 %vm289_vm0, %v20296_v0  ;;  %17649 = vmatprep.mubr.msk.f32.mxu1 %vm96_vm1, %v90_v10  ;;  %v790_v42 = vld [vmem:[%s28652_s0 + $0x250] sm:$0xff]  ;;  %v51_v43 = vld [vmem:[%s28652_s0 + $0x98] sm:$0xff]  ;;  %v52_v45 = vld [vmem:[%s28652_s0 + $0xa0] sm:$0xff] }
  0x10   :  { %17660 = vmatprep.subr.mxu1 %v29_v1  ;;  %v791_v44 = vld [vmem:[%s28652_s0 + $0x258] sm:$0xff]  ;;  %v792_v46 = vld [vmem:[%s28652_s0 + $0x260] sm:$0xff]  ;;  %v53_v47 = vld [vmem:[%s28652_s0 + $0xa8] sm:$0xff] }
  0x11   :  { %17566 = vmatmul.mubr.msk.f32.gmra.mxu0 %vm96_vm1, %v35_v11  ;;  %17650 = vmatmul.mubr.msk.f32.gmra.mxu1 %vm96_vm1, %v91_v12  ;;  %v793_v48 = vld [vmem:[%s28652_s0 + $0x268] sm:$0xff]  ;;  %v54_v49 = vld [vmem:[%s28652_s0 + $0xb0] sm:$0xff]  ;;  %v55_v51 = vld [vmem:[%s28652_s0 + $0xb8] sm:$0xff] }
  0x12   :  { %17661 = vmatpush3.msra.mxu1 %v29_v1  ;;  %17568 = vmatprep.mubr.msk.f32.mxu0 %vm96_vm1, %v36_v13  ;;  %v794_v50 = vld [vmem:[%s28652_s0 + $0x270] sm:$0xff]  ;;  %v795_v52 = vld [vmem:[%s28652_s0 + $0x278] sm:$0xff]  ;;  %v56_v53 = vld [vmem:[%s28652_s0 + $0xc0] sm:$0xff] }
  0x13   :  { %17652 = vmatprep.mubr.msk.f32.mxu1 %vm96_vm1, %v92_v14  ;;  %17662 = vmatprep.subr.mxu1 %v28_v2  ;;  %v796_v54 = vld [vmem:[%s28652_s0 + $0x280] sm:$0xff]  ;;  %v57_v55 = vld [vmem:[%s28652_s0 + $0xc8] sm:$0xff]  ;;  %v58_v57 = vld [vmem:[%s28652_s0 + $0xd0] sm:$0xff] }
  0x14   :  { %17663 = vmatpush3.msra.mxu1 %v28_v2  ;;  %v797_v56 = vld [vmem:[%s28652_s0 + $0x288] sm:$0xff]  ;;  %v798_v58 = vld [vmem:[%s28652_s0 + $0x290] sm:$0xff]  ;;  %v59_v59 = vld [vmem:[%s28652_s0 + $0xd8] sm:$0xff] }
  0x15   :  { %17569 = vmatmul.mubr.msk.f32.gmra.mxu0 %vm96_vm1, %v37_v15  ;;  %17653 = vmatmul.mubr.msk.f32.gmra.mxu1 %vm96_vm1, %v93_v16  ;;  %v799_v60 = vld [vmem:[%s28652_s0 + $0x298] sm:$0xff]  ;;  %v60_v61 = vld [vmem:[%s28652_s0 + $0xe0] sm:$0xff]  ;;  %v61_v63 = vld [vmem:[%s28652_s0 + $0xe8] sm:$0xff] }
  0x16   :  { %17664 = vmatprep.subr.mxu1 %v27_v3  ;;  %17571 = vmatprep.mubr.msk.f32.mxu0 %vm96_vm1, %v38_v17  ;;  %v800_v62 = vld [vmem:[%s28652_s0 + $0x2a0] sm:$0xff]  ;;  %v801_v1 = vld [vmem:[%s28652_s0 + $0x2a8] sm:$0xff]  ;;  %v62_v2 = vld [vmem:[%s28652_s0 + $0xf0] sm:$0xff] }
  0x17   :  { %17655 = vmatprep.mubr.msk.f32.mxu1 %vm96_vm1, %v94_v18  ;;  %17665 = vmatpush3.msra.mxu1 %v27_v3  ;;  %v802_v3 = vld [vmem:[%s28652_s0 + $0x2b0] sm:$0xff]  ;;  %v803_v5 = vld [vmem:[%s28652_s0 + $0x2b8] sm:$0xff]  ;;  %v64_v6 = vld [vmem:[%s28652_s0 + $0x100] sm:$0xff] }
  0x18   :  { %17666 = vmatprep.subr.mxu1 %v26_v4  ;;  %v804_v7 = vld [vmem:[%s28652_s0 + $0x2c0] sm:$0xff]  ;;  %v65_v8 = vld [vmem:[%s28652_s0 + $0x108] sm:$0xff]  ;;  %v66_v10 = vld [vmem:[%s28652_s0 + $0x110] sm:$0xff] }
  0x19   :  { %17572 = vmatmul.mubr.msk.f32.gmra.mxu0 %vm96_vm1, %v39_v19  ;;  %17656 = vmatmul.mubr.msk.f32.gmra.mxu1 %vm96_vm1, %v95_v20  ;;  %v805_v9 = vld [vmem:[%s28652_s0 + $0x2c8] sm:$0xff]  ;;  %v806_v11 = vld [vmem:[%s28652_s0 + $0x2d0] sm:$0xff]  ;;  %v67_v12 = vld [vmem:[%s28652_s0 + $0x118] sm:$0xff] }
  0x1a   :  { %17667 = vmatpush3.msra.mxu1 %v26_v4  ;;  %17574 = vmatprep.mubr.msk.f32.mxu0 %vm96_vm1, %v40_v21  ;;  %v63_v4 = vld [vmem:[%s28652_s0 + $0xf8] sm:$0xff]  ;;  %v68_v14 = vld [vmem:[%s28652_s0 + $0x120] sm:$0xff]  ;;  %v69_v16 = vld [vmem:[%s28652_s0 + $0x128] sm:$0xff] }
  0x1b   :  { %17668 = vmatprep.mubr.msk.f32.mxu1 %vm96_vm1, %v780_v22  ;;  %v807_v13 = vld [vmem:[%s28652_s0 + $0x2d8] sm:$0xff]  ;;  %v808_v15 = vld [vmem:[%s28652_s0 + $0x2e0] sm:$0xff]  ;;  %v809_v17 = vld [vmem:[%s28652_s0 + $0x2e8] sm:$0xff] }
  0x1c   :  { %v70_v18 = vld [vmem:[%s28652_s0 + $0x130] sm:$0xff]  ;;  %v71_v20 = vld [vmem:[%s28652_s0 + $0x138] sm:$0xff]  ;;  %v72_v22 = vld [vmem:[%s28652_s0 + $0x140] sm:$0xff] }
  0x1d   :  { %17575 = vmatmul.mubr.msk.f32.gmra.mxu0 %vm96_vm1, %v41_v23  ;;  %17669 = vmatmul.mubr.msk.f32.vlgmr.msra.gmra.mxu1 %vm96_vm1, %v781_v24  ;;  %v810_v19 = vld [vmem:[%s28652_s0 + $0x2f0] sm:$0xff]  ;;  %v811_v21 = vld [vmem:[%s28652_s0 + $0x2f8] sm:$0xff]  ;;  %v812_v23 = vld [vmem:[%s28652_s0 + $0x300] sm:$0xff] }
  0x1e   :  { %17577 = vmatprep.mubr.msk.f32.mxu0 %vm96_vm1, %v42_v25  ;;  %17671 = vmatprep.mubr.msk.f32.mxu1 %vm96_vm1, %v782_v26  ;;  %v73_v24 = vld [vmem:[%s28652_s0 + $0x148] sm:$0xff]  ;;  %v14767_v26 = vld [vmem:[%s28653_s3 + $0xf8] sm:$0xff] }
  0x1f   :  { %v813_v25 = vld [vmem:[%s28652_s0 + $0x308] sm:$0xff]  ;;  %17764 = vmatprep.subr.mxu0 %v14767_v26 }
  0x20   :  { %17765 = vmatpush3.msra.mxu0 %v14767_v26  ;;  %v14756_v26 = vld [vmem:[%s28653_s3 + $0xa0] sm:$0xff] }
  0x21   :  { %17578 = vmatmul.mubr.msk.f32.gmra.mxu0 %vm96_vm1, %v43_v27  ;;  %17672 = vmatmul.mubr.msk.f32.gmra.mxu1 %vm96_vm1, %v783_v28  ;;  %v74_v27 = vld [vmem:[%s28652_s0 + $0x150] sm:$0xff] }
  0x22   :  { %17580 = vmatprep.mubr.msk.f32.mxu0 %vm96_vm1, %v44_v29  ;;  %17674 = vmatprep.mubr.msk.f32.mxu1 %vm96_vm1, %v784_v30  ;;  %v814_v28 = vld [vmem:[%s28652_s0 + $0x310] sm:$0xff]  ;;  %v75_v29 = vld [vmem:[%s28652_s0 + $0x158] sm:$0xff] }
  0x23   :  { %v815_v30 = vld [vmem:[%s28652_s0 + $0x318] sm:$0xff] }
  0x25   :  { %17581 = vmatmul.mubr.msk.f32.gmra.mxu0 %vm96_vm1, %v45_v31  ;;  %17675 = vmatmul.mubr.msk.f32.gmra.mxu1 %vm96_vm1, %v785_v32  ;;  %v76_v31 = vld [vmem:[%s28652_s0 + $0x160] sm:$0xff] }
  0x26   :  { %17583 = vmatprep.mubr.msk.f32.mxu0 %vm96_vm1, %v46_v33  ;;  %17677 = vmatprep.mubr.msk.f32.mxu1 %vm96_vm1, %v786_v34  ;;  %v816_v32 = vld [vmem:[%s28652_s0 + $0x320] sm:$0xff]  ;;  %v14766_v33 = vld [vmem:[%s28653_s3 + $0xf0] sm:$0xff]  ;;  %v77_v34 = vld [vmem:[%s28652_s0 + $0x168] sm:$0xff] }
  0x27   :  { %17766 = vmatprep.subr.mxu0 %v14766_v33 }
  0x28   :  { %17767 = vmatpush3.msra.mxu0 %v14766_v33  ;;  %v14755_v33 = vld [vmem:[%s28653_s3 + $0x98] sm:$0xff] }
  0x29   :  { %17584 = vmatmul.mubr.msk.f32.gmra.mxu0 %vm96_vm1, %v47_v35  ;;  %17678 = vmatmul.mubr.msk.f32.gmra.mxu1 %vm96_vm1, %v787_v36  ;;  %v817_v35 = vld [vmem:[%s28652_s0 + $0x328] sm:$0xff]  ;;  %v78_v36 = vld [vmem:[%s28652_s0 + $0x170] sm:$0xff] }
  0x2a   :  { %17586 = vmatprep.mubr.msk.f32.mxu0 %vm96_vm1, %v48_v37  ;;  %17680 = vmatprep.mubr.msk.f32.mxu1 %vm96_vm1, %v788_v38  ;;  %v818_v37 = vld [vmem:[%s28652_s0 + $0x330] sm:$0xff]  ;;  %v79_v38 = vld [vmem:[%s28652_s0 + $0x178] sm:$0xff] }
  0x2d   :  { %17587 = vmatmul.mubr.msk.f32.gmra.mxu0 %vm96_vm1, %v49_v39  ;;  %17681 = vmatmul.mubr.msk.f32.gmra.mxu1 %vm96_vm1, %v789_v40  ;;  %v819_v39 = vld [vmem:[%s28652_s0 + $0x338] sm:$0xff]  ;;  %v80_v40 = vld [vmem:[%s28652_s0 + $0x180] sm:$0xff] }
  0x2e   :  { %17589 = vmatprep.mubr.msk.f32.mxu0 %vm96_vm1, %v50_v41  ;;  %17683 = vmatprep.mubr.msk.f32.mxu1 %vm96_vm1, %v790_v42  ;;  %v820_v41 = vld [vmem:[%s28652_s0 + $0x340] sm:$0xff]  ;;  %v14765_v42 = vld [vmem:[%s28653_s3 + $0xe8] sm:$0xff] }
  0x2f   :  { %17768 = vmatprep.subr.mxu0 %v14765_v42 }
  0x30   :  { %17769 = vmatpush3.msra.mxu0 %v14765_v42 }
  0x31   :  { %17590 = vmatmul.mubr.msk.f32.gmra.mxu0 %vm96_vm1, %v51_v43  ;;  %17684 = vmatmul.mubr.msk.f32.gmra.mxu1 %vm96_vm1, %v791_v44  ;;  %v81_v43 = vld [vmem:[%s28652_s0 + $0x188] sm:$0xff] }
  0x32   :  { %17592 = vmatprep.mubr.msk.f32.mxu0 %vm96_vm1, %v52_v45  ;;  %17686 = vmatprep.mubr.msk.f32.mxu1 %vm96_vm1, %v792_v46  ;;  %v821_v44 = vld [vmem:[%s28652_s0 + $0x348] sm:$0xff]  ;;  %v82_v45 = vld [vmem:[%s28652_s0 + $0x190] sm:$0xff] }
  0x33   :  { %v822_v46 = vld [vmem:[%s28652_s0 + $0x350] sm:$0xff] }
  0x35   :  { %17593 = vmatmul.mubr.msk.f32.gmra.mxu0 %vm96_vm1, %v53_v47  ;;  %17687 = vmatmul.mubr.msk.f32.gmra.mxu1 %vm96_vm1, %v793_v48  ;;  %v83_v47 = vld [vmem:[%s28652_s0 + $0x198] sm:$0xff] }
  0x36   :  { %17595 = vmatprep.mubr.msk.f32.mxu0 %vm96_vm1, %v54_v49  ;;  %17689 = vmatprep.mubr.msk.f32.mxu1 %vm96_vm1, %v794_v50  ;;  %v823_v48 = vld [vmem:[%s28652_s0 + $0x358] sm:$0xff]  ;;  %v14764_v49 = vld [vmem:[%s28653_s3 + $0xe0] sm:$0xff] }
  0x37   :  { %v84_v50 = vld [vmem:[%s28652_s0 + $0x1a0] sm:$0xff]  ;;  %17770 = vmatprep.subr.mxu0 %v14764_v49 }
  0x38   :  { %17771 = vmatpush3.msra.mxu0 %v14764_v49 }
  0x39   :  { %17596 = vmatmul.mubr.msk.f32.gmra.mxu0 %vm96_vm1, %v55_v51  ;;  %17690 = vmatmul.mubr.msk.f32.gmra.mxu1 %vm96_vm1, %v795_v52  ;;  %v824_v51 = vld [vmem:[%s28652_s0 + $0x360] sm:$0xff]  ;;  %v85_v52 = vld [vmem:[%s28652_s0 + $0x1a8] sm:$0xff] }
  0x3a   :  { %17598 = vmatprep.mubr.msk.f32.mxu0 %vm96_vm1, %v56_v53  ;;  %17692 = vmatprep.mubr.msk.f32.mxu1 %vm96_vm1, %v796_v54  ;;  %v825_v53 = vld [vmem:[%s28652_s0 + $0x368] sm:$0xff]  ;;  %v86_v54 = vld [vmem:[%s28652_s0 + $0x1b0] sm:$0xff] }
  0x3d   :  { %17599 = vmatmul.mubr.msk.f32.gmra.mxu0 %vm96_vm1, %v57_v55  ;;  %17693 = vmatmul.mubr.msk.f32.gmra.mxu1 %vm96_vm1, %v797_v56  ;;  %v826_v55 = vld [vmem:[%s28652_s0 + $0x370] sm:$0xff]  ;;  %v87_v56 = vld [vmem:[%s28652_s0 + $0x1b8] sm:$0xff] }
  0x3e   :  { %17601 = vmatprep.mubr.msk.f32.mxu0 %vm96_vm1, %v58_v57  ;;  %17695 = vmatprep.mubr.msk.f32.mxu1 %vm96_vm1, %v798_v58  ;;  %v827_v57 = vld [vmem:[%s28652_s0 + $0x378] sm:$0xff] }
  0x3f   :  { %v14763_v58 = vld [vmem:[%s28653_s3 + $0xd8] sm:$0xff] }
  0x40   :  { %17772 = vmatprep.subr.mxu0 %v14763_v58 }
  0x41   :  { %17602 = vmatmul.mubr.msk.f32.gmra.mxu0 %vm96_vm1, %v59_v59  ;;  %17696 = vmatmul.mubr.msk.f32.gmra.mxu1 %vm96_vm1, %v799_v60  ;;  %v828_v59 = vld [vmem:[%s28652_s0 + $0x380] sm:$0xff]  ;;  %v829_v60 = vld [vmem:[%s28652_s0 + $0x388] sm:$0xff] }
  0x42   :  { %17604 = vmatprep.mubr.msk.f32.mxu0 %vm96_vm1, %v60_v61  ;;  %17698 = vmatprep.mubr.msk.f32.mxu1 %vm96_vm1, %v800_v62  ;;  %v830_v61 = vld [vmem:[%s28652_s0 + $0x390] sm:$0xff] }
  0x43   :  { %17773 = vmatpush3.msra.mxu0 %v14763_v58  ;;  %v14762_v62 = vld [vmem:[%s28653_s3 + $0xd0] sm:$0xff] }
  0x44   :  { %17774 = vmatprep.subr.mxu0 %v14762_v62 }
  0x45   :  { %17605 = vmatmul.mubr.msk.f32.gmra.mxu0 %vm96_vm1, %v61_v63  ;;  %17699 = vmatmul.mubr.msk.f32.gmra.mxu1 %vm96_vm1, %v801_v1  ;;  %v831_v63 = vld [vmem:[%s28652_s0 + $0x398] sm:$0xff]  ;;  %v832_v1 = vld [vmem:[%s28652_s0 + $0x3a0] sm:$0xff] }
  0x46   :  { %17607 = vmatprep.mubr.msk.f32.mxu0 %vm96_vm1, %v62_v2  ;;  %17701 = vmatprep.mubr.msk.f32.mxu1 %vm96_vm1, %v802_v3  ;;  %v833_v2 = vld [vmem:[%s28652_s0 + $0x3a8] sm:$0xff]  ;;  %v834_v3 = vld [vmem:[%s28652_s0 + $0x3b0] sm:$0xff] }
  0x47   :  { %17775 = vmatpush3.msra.mxu0 %v14762_v62 }
  0x49   :  { %17608 = vmatmul.mubr.msk.f32.gmra.mxu0 %vm96_vm1, %v63_v4  ;;  %17702 = vmatmul.mubr.msk.f32.gmra.mxu1 %vm96_vm1, %v803_v5  ;;  %v14761_v4 = vld [vmem:[%s28653_s3 + $0xc8] sm:$0xff]  ;;  %v835_v5 = vld [vmem:[%s28652_s0 + $0x3b8] sm:$0xff] }
  0x4a   :  { %17610 = vmatprep.mubr.msk.f32.mxu0 %vm96_vm1, %v64_v6  ;;  %17704 = vmatprep.mubr.msk.f32.mxu1 %vm96_vm1, %v804_v7  ;;  %v836_v6 = vld [vmem:[%s28652_s0 + $0x3c0] sm:$0xff]  ;;  %v837_v7 = vld [vmem:[%s28652_s0 + $0x3c8] sm:$0xff] }
  0x4b   :  { %17776 = vmatprep.subr.mxu0 %v14761_v4 }
  0x4c   :  { %17777 = vmatpush3.msra.mxu0 %v14761_v4 }
  0x4d   :  { %17611 = vmatmul.mubr.msk.f32.gmra.mxu0 %vm96_vm1, %v65_v8  ;;  %17705 = vmatmul.mubr.msk.f32.gmra.mxu1 %vm96_vm1, %v805_v9  ;;  %v14760_v8 = vld [vmem:[%s28653_s3 + $0xc0] sm:$0xff]  ;;  %v838_v9 = vld [vmem:[%s28652_s0 + $0x3d0] sm:$0xff] }
  0x4e   :  { %17613 = vmatprep.mubr.msk.f32.mxu0 %vm96_vm1, %v66_v10  ;;  %17707 = vmatprep.mubr.msk.f32.mxu1 %vm96_vm1, %v806_v11  ;;  %v839_v10 = vld [vmem:[%s28652_s0 + $0x3d8] sm:$0xff]  ;;  %v840_v11 = vld [vmem:[%s28652_s0 + $0x3e0] sm:$0xff] }
  0x4f   :  { %17778 = vmatprep.subr.mxu0 %v14760_v8 }
  0x50   :  { %17779 = vmatpush3.msra.mxu0 %v14760_v8 }
  0x51   :  { %17614 = vmatmul.mubr.msk.f32.gmra.mxu0 %vm96_vm1, %v67_v12  ;;  %17708 = vmatmul.mubr.msk.f32.gmra.mxu1 %vm96_vm1, %v807_v13  ;;  %v841_v12 = vld [vmem:[%s28652_s0 + $0x3e8] sm:$0xff]  ;;  %v14759_v13 = vld [vmem:[%s28653_s3 + $0xb8] sm:$0xff] }
  0x52   :  { %17616 = vmatprep.mubr.msk.f32.mxu0 %vm96_vm1, %v68_v14  ;;  %17710 = vmatprep.mubr.msk.f32.mxu1 %vm96_vm1, %v808_v15  ;;  %v842_v14 = vld [vmem:[%s28652_s0 + $0x3f0] sm:$0xff]  ;;  %v843_v15 = vld [vmem:[%s28652_s0 + $0x3f8] sm:$0xff] }
  0x53   :  { %17780 = vmatprep.subr.mxu0 %v14759_v13 }
  0x54   :  { %17781 = vmatpush3.msra.mxu0 %v14759_v13 }
  0x55   :  { %17617 = vmatmul.mubr.msk.f32.gmra.mxu0 %vm96_vm1, %v69_v16  ;;  %17711 = vmatmul.mubr.msk.f32.gmra.mxu1 %vm96_vm1, %v809_v17  ;;  %v14758_v16 = vld [vmem:[%s28653_s3 + $0xb0] sm:$0xff]  ;;  %v779_v17 = vld [vmem:[%s28653_s3 + $0x78] sm:$0xff] }
  0x56   :  { %17619 = vmatprep.mubr.msk.f32.mxu0 %vm96_vm1, %v70_v18  ;;  %17713 = vmatprep.mubr.msk.f32.mxu1 %vm96_vm1, %v810_v19  ;;  %v778_v18 = vld [vmem:[%s28653_s3 + $0x70] sm:$0xff]  ;;  %v777_v19 = vld [vmem:[%s28653_s3 + $0x68] sm:$0xff] }
  0x57   :  { %17782 = vmatprep.subr.mxu0 %v14758_v16  ;;  %17820 = vmatprep.subr.mxu1 %v779_v17 }
  0x58   :  { %17783 = vmatpush3.msra.mxu0 %v14758_v16  ;;  %17821 = vmatpush3.msra.mxu1 %v779_v17 }
  0x59   :  { %17620 = vmatmul.mubr.msk.f32.gmra.mxu0 %vm96_vm1, %v71_v20  ;;  %17714 = vmatmul.mubr.msk.f32.gmra.mxu1 %vm96_vm1, %v811_v21  ;;  %v776_v20 = vld [vmem:[%s28653_s3 + $0x60] sm:$0xff]  ;;  %v775_v21 = vld [vmem:[%s28653_s3 + $0x58] sm:$0xff] }
  0x5a   :  { %17622 = vmatprep.mubr.msk.f32.mxu0 %vm96_vm1, %v72_v22  ;;  %17716 = vmatprep.mubr.msk.f32.mxu1 %vm96_vm1, %v812_v23  ;;  %v14757_v22 = vld [vmem:[%s28653_s3 + $0xa8] sm:$0xff]  ;;  %v774_v23 = vld [vmem:[%s28653_s3 + $0x50] sm:$0xff] }
  0x5b   :  { %17822 = vmatprep.subr.mxu1 %v778_v18  ;;  %17784 = vmatprep.subr.mxu0 %v14757_v22 }
  0x5c   :  { %17823 = vmatpush3.msra.mxu1 %v778_v18  ;;  %17785 = vmatpush3.msra.mxu0 %v14757_v22 }
  0x5d   :  { %17623 = vmatmul.mubr.msk.f32.gmra.mxu0 %vm96_vm1, %v73_v24  ;;  %17717 = vmatmul.mubr.msk.f32.gmra.mxu1 %vm96_vm1, %v813_v25  ;;  %v773_v24 = vld [vmem:[%s28653_s3 + $0x48] sm:$0xff]  ;;  %v772_v25 = vld [vmem:[%s28653_s3 + $0x40] sm:$0xff] }
  0x5e   :  { %17625 = vmatprep.mubr.msk.f32.mxu0 %vm96_vm1, %v74_v27  ;;  %17719 = vmatprep.mubr.msk.f32.mxu1 %vm96_vm1, %v814_v28  ;;  %v771_v27 = vld [vmem:[%s28653_s3 + $0x38] sm:$0xff]  ;;  %v770_v28 = vld [vmem:[%s28653_s3 + $0x30] sm:$0xff] }
  0x5f   :  { %17824 = vmatprep.subr.mxu1 %v777_v19  ;;  %17786 = vmatprep.subr.mxu0 %v14756_v26 }
  0x60   :  { %17825 = vmatpush3.msra.mxu1 %v777_v19  ;;  %17787 = vmatpush3.msra.mxu0 %v14756_v26 }
  0x61   :  { %17626 = vmatmul.mubr.msk.f32.gmra.mxu0 %vm96_vm1, %v75_v29  ;;  %17720 = vmatmul.mubr.msk.f32.gmra.mxu1 %vm96_vm1, %v815_v30  ;;  %v769_v29 = vld [vmem:[%s28653_s3 + $0x28] sm:$0xff]  ;;  %v768_v30 = vld [vmem:[%s28653_s3 + $0x20] sm:$0xff] }
  0x62   :  { %17628 = vmatprep.mubr.msk.f32.mxu0 %vm96_vm1, %v76_v31  ;;  %17722 = vmatprep.mubr.msk.f32.mxu1 %vm96_vm1, %v816_v32  ;;  %v767_v31 = vld [vmem:[%s28653_s3 + $0x18] sm:$0xff]  ;;  %v766_v32 = vld [vmem:[%s28653_s3 + $0x10] sm:$0xff] }
  0x63   :  { %17826 = vmatprep.subr.mxu1 %v776_v20  ;;  %17788 = vmatprep.subr.mxu0 %v14755_v33 }
  0x64   :  { %17827 = vmatpush3.msra.mxu1 %v776_v20  ;;  %17789 = vmatpush3.msra.mxu0 %v14755_v33 }
  0x65   :  { %17629 = vmatmul.mubr.msk.f32.gmra.mxu0 %vm96_vm1, %v77_v34  ;;  %17723 = vmatmul.mubr.msk.f32.gmra.mxu1 %vm96_vm1, %v817_v35  ;;  %v765_v34 = vld [vmem:[%s28653_s3 + $0x8] sm:$0xff]  ;;  %v14754_v35 = vld [vmem:[%s28653_s3 + $0x90] sm:$0xff] }
  0x66   :  { %17631 = vmatprep.mubr.msk.f32.mxu0 %vm96_vm1, %v78_v36  ;;  %17725 = vmatprep.mubr.msk.f32.mxu1 %vm96_vm1, %v818_v37  ;;  %v764_v36 = vld [vmem:[%s28653_s3] sm:$0xff]  ;;  %v14753_v37 = vld [vmem:[%s28653_s3 + $0x88] sm:$0xff] }
  0x67   :  { %17828 = vmatprep.subr.mxu1 %v775_v21  ;;  %17790 = vmatprep.subr.mxu0 %v14754_v35 }
  0x68   :  { %17829 = vmatpush3.msra.mxu1 %v775_v21  ;;  %17791 = vmatpush3.msra.mxu0 %v14754_v35 }
  0x69   :  { %17632 = vmatmul.mubr.msk.f32.gmra.mxu0 %vm96_vm1, %v79_v38  ;;  %17726 = vmatmul.mubr.msk.f32.gmra.mxu1 %vm96_vm1, %v819_v39  ;;  %v14752_v38 = vld [vmem:[%s28653_s3 + $0x80] sm:$0xff] }
  0x6a   :  { %17634 = vmatprep.mubr.msk.f32.mxu0 %vm96_vm1, %v80_v40  ;;  %17728 = vmatprep.mubr.msk.f32.mxu1 %vm96_vm1, %v820_v41 }
  0x6b   :  { %17830 = vmatprep.subr.mxu1 %v774_v23  ;;  %17792 = vmatprep.subr.mxu0 %v14753_v37 }
  0x6c   :  { %17831 = vmatpush3.msra.mxu1 %v774_v23  ;;  %17793 = vmatpush3.msra.mxu0 %v14753_v37 }
  0x6d   :  { %17635 = vmatmul.mubr.msk.f32.gmra.mxu0 %vm96_vm1, %v81_v43  ;;  %17729 = vmatmul.mubr.msk.f32.gmra.mxu1 %vm96_vm1, %v821_v44 }
  0x6e   :  { %17637 = vmatprep.mubr.msk.f32.mxu0 %vm96_vm1, %v82_v45  ;;  %17731 = vmatprep.mubr.msk.f32.mxu1 %vm96_vm1, %v822_v46 }
  0x6f   :  { %17832 = vmatprep.subr.mxu1 %v773_v24  ;;  %17794 = vmatprep.subr.mxu0 %v14752_v38 }
  0x70   :  { %17833 = vmatpush3.msra.mxu1 %v773_v24  ;;  %17795 = vmatpush3.msra.mxu0 %v14752_v38 }
  0x71   :  { %17638 = vmatmul.mubr.msk.f32.gmra.mxu0 %vm96_vm1, %v83_v47  ;;  %17732 = vmatmul.mubr.msk.f32.gmra.mxu1 %vm96_vm1, %v823_v48 }
  0x72   :  { %17640 = vmatprep.mubr.msk.f32.mxu0 %vm96_vm1, %v84_v50  ;;  %17734 = vmatprep.mubr.msk.f32.mxu1 %vm96_vm1, %v824_v51 }
  0x73   :  { %17834 = vmatprep.subr.mxu1 %v772_v25  ;;  %17876 = vmatprep.subr.msk.mxu0 %vm289_vm0, %v20296_v0 }
  0x74   :  { %17835 = vmatpush3.msra.mxu1 %v772_v25 }
  0x75   :  { %17641 = vmatmul.mubr.msk.f32.gmra.mxu0 %vm96_vm1, %v85_v52  ;;  %17735 = vmatmul.mubr.msk.f32.gmra.mxu1 %vm96_vm1, %v825_v53 }
  0x76   :  { %17643 = vmatprep.mubr.msk.f32.mxu0 %vm96_vm1, %v86_v54  ;;  %17737 = vmatprep.mubr.msk.f32.mxu1 %vm96_vm1, %v826_v55 }
  0x77   :  { %17836 = vmatprep.subr.mxu1 %v771_v27 }
  0x78   :  { %17837 = vmatpush3.msra.mxu1 %v771_v27 }
  0x79   :  { %17644 = vmatmul.mubr.msk.f32.gmra.mxu0 %vm96_vm1, %v87_v56  ;;  %17738 = vmatmul.mubr.msk.f32.gmra.mxu1 %vm96_vm1, %v827_v57 }
  0x7a   :  { %17740 = vmatprep.mubr.msk.f32.mxu1 %vm96_vm1, %v828_v59  ;;  %17838 = vmatprep.subr.mxu1 %v770_v28 }
  0x7b   :  { %17839 = vmatpush3.msra.mxu1 %v770_v28 }
  0x7c   :  { %17840 = vmatprep.subr.mxu1 %v769_v29 }
  0x7d   :  { %17741 = vmatmul.mubr.msk.f32.gmra.mxu1 %vm96_vm1, %v829_v60 }
  0x7e   :  { %17743 = vmatprep.mubr.msk.f32.mxu1 %vm96_vm1, %v830_v61  ;;  %17841 = vmatpush3.msra.mxu1 %v769_v29 }
  0x7f   :  { %17842 = vmatprep.subr.mxu1 %v768_v30 }
  0x80   :  { %17843 = vmatpush3.msra.mxu1 %v768_v30 }
  0x81   :  { %17744 = vmatmul.mubr.msk.f32.gmra.mxu1 %vm96_vm1, %v831_v63  ;;  %17844 = vmatprep.subr.mxu1 %v767_v31 }
  0x82   :  { %17746 = vmatprep.mubr.msk.f32.mxu1 %vm96_vm1, %v832_v1  ;;  %17845 = vmatpush3.msra.mxu1 %v767_v31 }
  0x83   :  { %17846 = vmatprep.subr.mxu1 %v766_v32 }
  0x84   :  { %17847 = vmatpush3.msra.mxu1 %v766_v32 }
  0x85   :  { %17747 = vmatmul.mubr.msk.f32.gmra.mxu1 %vm96_vm1, %v833_v2  ;;  %17848 = vmatprep.subr.mxu1 %v765_v34 }
  0x86   :  { %17749 = vmatprep.mubr.msk.f32.mxu1 %vm96_vm1, %v834_v3  ;;  %17849 = vmatpush3.msra.mxu1 %v765_v34 }
  0x87   :  { %17850 = vmatprep.subr.mxu1 %v764_v36 }
  0x88   :  { %17851 = vmatpush3.msra.mxu1 %v764_v36 }
  0x89   :  { %17750 = vmatmul.mubr.msk.f32.gmra.mxu1 %vm96_vm1, %v835_v5 }
  0x8a   :  { %17752 = vmatprep.mubr.msk.f32.mxu1 %vm96_vm1, %v836_v6 }
  0x8d   :  { %17753 = vmatmul.mubr.msk.f32.gmra.mxu1 %vm96_vm1, %v837_v7 }
  0x8e   :  { %17755 = vmatprep.mubr.msk.f32.mxu1 %vm96_vm1, %v838_v9 }
  0x91   :  { %17756 = vmatmul.mubr.msk.f32.gmra.mxu1 %vm96_vm1, %v839_v10 }
  0x92   :  { %17758 = vmatprep.mubr.msk.f32.mxu1 %vm96_vm1, %v840_v11 }
  0x95   :  { %17759 = vmatmul.mubr.msk.f32.gmra.mxu1 %vm96_vm1, %v841_v12 }
  0x96   :  { %17761 = vmatprep.mubr.msk.f32.mxu1 %vm96_vm1, %v842_v14 }
  0x99   :  { %17762 = vmatmul.mubr.msk.f32.gmra.mxu1 %vm96_vm1, %v843_v15 }
  0xcd   :  { %v20932_v39 = vpop.f32.mrf.mxu0  ;;  %v20934_v40 = vpop.f32.mrf.mxu1 }
  0xcf   :  { %v20936_v41 = vpop.f32.mrf.mxu0  ;;  %v20938_v42 = vpop.f32.mrf.mxu1 }
  0xd1   :  { %v20940_v43 = vpop.f32.mrf.mxu0  ;;  %v20942_v44 = vpop.f32.mrf.mxu1 }
  0xd3   :  { %v20944_v45 = vpop.f32.mrf.mxu0  ;;  %v20946_v46 = vpop.f32.mrf.mxu1 }
  0xd5   :  { %v20948_v47 = vpop.f32.mrf.mxu0  ;;  %v20950_v48 = vpop.f32.mrf.mxu1 }
  0xd6   :  { %28679 = vst [vmem:[#allocation2_spill] sm:$0xff] %v20950_v48 }
  0xd7   :  { %v20952_v0 = vpop.f32.mrf.mxu0  ;;  %v20954_v49 = vpop.f32.mrf.mxu1 }
  0xd9   :  { %v20956_v50 = vpop.f32.mrf.mxu0  ;;  %v20958_v51 = vpop.f32.mrf.mxu1 }
  0xda   :  { %28680 = vst [vmem:[#allocation3_spill] sm:$0xff] %v20958_v51 }
  0xdb   :  { %v20960_v52 = vpop.f32.mrf.mxu0  ;;  %v20962_v53 = vpop.f32.mrf.mxu1 }
  0xdc   :  { %28681 = vst [vmem:[#allocation4_spill] sm:$0xff] %v20962_v53 }
  0xdd   :  { %v20964_v54 = vpop.f32.mrf.mxu0  ;;  %v20966_v55 = vpop.f32.mrf.mxu1 }
  0xdf   :  { %v20968_v56 = vpop.f32.mrf.mxu0  ;;  %v20970_v57 = vpop.f32.mrf.mxu1 }
  0xe1   :  { %v20972_v58 = vpop.f32.mrf.mxu0  ;;  %v20974_v59 = vpop.f32.mrf.mxu1 }
  0xe2   :  { %28682 = vst [vmem:[#allocation5_spill] sm:$0xff] %v20974_v59 }
  0xe3   :  { %v20976_v60 = vpop.f32.mrf.mxu0  ;;  %v20978_v61 = vpop.f32.mrf.mxu1 }
  0xe5   :  { %v20980_v62 = vpop.f32.mrf.mxu0  ;;  %v20982_v63 = vpop.f32.mrf.mxu1 }
  0xe6   :  { %28683 = vst [vmem:[#allocation6_spill] sm:$0xff] %v20980_v62  ;;  %28684 = vst [vmem:[#allocation7_spill] sm:$0xff] %v20982_v63 }
  0xe7   :  { %v20984_v1 = vpop.f32.mrf.mxu0  ;;  %v20986_v2 = vpop.f32.mrf.mxu1 }
  0xe8   :  { %28685 = vst [vmem:[#allocation8_spill] sm:$0xff] %v20986_v2 }
  0xe9   :  { %v20988_v3 = vpop.f32.mrf.mxu0  ;;  %v20990_v4 = vpop.f32.mrf.mxu1 }
  0xea   :  { %28686 = vst [vmem:[#allocation9_spill] sm:$0xff] %v20988_v3  ;;  %28687 = vst [vmem:[#allocation10_spill] sm:$0xff] %v20990_v4 }
  0xeb   :  { %v20992_v5 = vpop.f32.mrf.mxu0  ;;  %v20994_v6 = vpop.f32.mrf.mxu1 }
  0xec   :  { %28688 = vst [vmem:[#allocation11_spill] sm:$0xff] %v20992_v5  ;;  %28689 = vst [vmem:[#allocation12_spill] sm:$0xff] %v20994_v6 }
  0xed   :  { %v20996_v7 = vpop.f32.mrf.mxu0  ;;  %v20998_v8 = vpop.f32.mrf.mxu1 }
  0xee   :  { %28690 = vst [vmem:[#allocation13_spill] sm:$0xff] %v20998_v8 }
  0xef   :  { %v21002_v10 = vpop.f32.mrf.mxu0  ;;  %v21004_v11 = vpop.f32.mrf.mxu1 }
  0xf0   :  { %28691 = vst [vmem:[#allocation14_spill] sm:$0xff] %v21004_v11 }
  0xf1   :  { %v21006_v12 = vpop.f32.mrf.mxu0  ;;  %v21008_v13 = vpop.f32.mrf.mxu1 }
  0xf2   :  { %28692 = vst [vmem:[#allocation15_spill] sm:$0xff] %v21008_v13 }
  0xf3   :  { %v21012_v15 = vpop.f32.mrf.mxu0  ;;  %v21014_v16 = vpop.f32.mrf.mxu1 }
  0xf4   :  { %28693 = vst [vmem:[#allocation16_spill] sm:$0xff] %v21014_v16 }
  0xf5   :  { %v21016_v17 = vpop.f32.mrf.mxu0  ;;  %v21018_v18 = vpop.f32.mrf.mxu1 }
  0xf6   :  { %28694 = vst [vmem:[#allocation17_spill] sm:$0xff] %v21018_v18 }
  0xf7   :  { %v21022_v20 = vpop.f32.mrf.mxu0  ;;  %v21024_v21 = vpop.f32.mrf.mxu1 }
  0xf8   :  { %28695 = vst [vmem:[#allocation18_spill] sm:$0xff] %v21024_v21 }
  0xf9   :  { %v21026_v22 = vpop.f32.mrf.mxu0  ;;  %v21028_v23 = vpop.f32.mrf.mxu1 }
  0xfa   :  { %28696 = vst [vmem:[#allocation19_spill] sm:$0xff] %v21028_v23 }
  0xfb   :  { %v21032_v25 = vpop.f32.mrf.mxu0  ;;  %v21034_v26 = vpop.f32.mrf.mxu1 }
  0xfc   :  { %28697 = vst [vmem:[#allocation20_spill] sm:$0xff] %v21034_v26 }
  0xfd   :  { %v21036_v27 = vpop.f32.mrf.mxu0  ;;  %v21038_v28 = vpop.f32.mrf.mxu1 }
  0xff   :  { %v21044_v31 = vpop.f32.mrf.mxu0  ;;  %v21046_v32 = vpop.f32.mrf.mxu1 }
 0x101   :  { %v21048_v33 = vpop.f32.mrf.mxu0  ;;  %v21050_v34 = vpop.f32.mrf.mxu1 }
 0x102   :  { %28698 = vst [vmem:[#allocation21_spill] sm:$0xff] %v21050_v34 }
 0x103   :  { %v21056_v37 = vpop.f32.mrf.mxu0  ;;  %v21058_v38 = vpop.f32.mrf.mxu1 }
 0x105   :  { %v21060_v29 = vpop.f32.mrf.mxu0  ;;  %v21062_v30 = vpop.f32.mrf.mxu1 }
 0x106   :  { %28699 = vst [vmem:[#allocation22_spill] sm:$0xff] %v21060_v29  ;;  %28700 = vst [vmem:[#allocation23_spill] sm:$0xff] %v21062_v30 }
 0x107   :  { %v21068_v14 = vpop.f32.mrf.mxu0  ;;  %v21070_v35 = vpop.f32.mrf.mxu1 }
 0x108   :  { %28701 = vst [vmem:[#allocation24_spill] sm:$0xff] %v21070_v35 }
 0x109   :  { %v21072_v9 = vpop.f32.mrf.mxu0  ;;  %v21074_v36 = vpop.f32.mrf.mxu1 }
 0x10a   :  { %28702 = vst [vmem:[#allocation25_spill] sm:$0xff] %v21072_v9  ;;  %28703 = vst [vmem:[#allocation26_spill] sm:$0xff] %v21074_v36 }
 0x10b   :  { %v21080_v16 = vpop.f32.mrf.mxu0  ;;  %v21082_v24 = vpop.f32.mrf.mxu1 }
 0x10c   :  { %28704 = vst [vmem:[#allocation27_spill] sm:$0xff] %v21080_v16  ;;  %28705 = vst [vmem:[#allocation28_spill] sm:$0xff] %v21082_v24 }
 0x10d   :  { %v17612_v11 = vpop.f32.mrf.mxu0  ;;  %v21084_v19 = vpop.f32.mrf.mxu1 }
 0x10e   :  { %28706 = vst [vmem:[#allocation29_spill] sm:$0xff] %v21084_v19 }
 0x10f   :  { %v519_v30 = vpop.f32.mrf.mxu0  ;;  %v21088_v63 = vpop.f32.mrf.mxu1 }
 0x110   :  { %28707 = vst [vmem:[#allocation30_spill] sm:$0xff] %v21088_v63 }
 0x111   :  { %v17615_v51 = vpop.f32.mrf.mxu0  ;;  %v21090_v29 = vpop.f32.mrf.mxu1 }
 0x112   :  { %28708 = vst [vmem:[#allocation31_spill] sm:$0xff] %v21090_v29 }
 0x113   :  { %v529_v21 = vpop.f32.mrf.mxu0  ;;  %v21094_v36 = vpop.f32.mrf.mxu1 }
 0x114   :  { %28709 = vst [vmem:[#allocation32_spill] sm:$0xff] %v21094_v36 }
 0x115   :  { %v17618_v4 = vpop.f32.mrf.mxu0  ;;  %v21096_v9 = vpop.f32.mrf.mxu1 }
 0x116   :  { %28710 = vst [vmem:[#allocation33_spill] sm:$0xff] %v21096_v9 }
 0x117   :  { %v21100_v24 = vpop.f32.mrf.mxu0  ;;  %v21102_v6 = vpop.f32.mrf.mxu1 }
 0x118   :  { %28711 = vst [vmem:[#allocation34_spill] sm:$0xff] %v21102_v6 }
 0x119   :  { %v21104_v19 = vpop.f32.mrf.mxu0  ;;  %v21106_v8 = vpop.f32.mrf.mxu1 }
 0x11a   :  { %28712 = vst [vmem:[#allocation35_spill] sm:$0xff] %v21106_v8 }
 0x11b   :  { %v21110_v29 = vpop.f32.mrf.mxu0  ;;  %v21112_v13 = vpop.f32.mrf.mxu1 }
 0x11c   :  { %28713 = vst [vmem:[#allocation36_spill] sm:$0xff] %v21112_v13 }
 0x11d   :  { %v21114_v36 = vpop.f32.mrf.mxu0  ;;  %v21116_v63 = vpop.f32.mrf.mxu1 }
 0x11f   :  { %v21118_v3 = vpop.f32.mrf.mxu0  ;;  %v21120_v9 = vpop.f32.mrf.mxu1 }
 0x121   :  { %v21122_v18 = vpop.f32.mrf.mxu0  ;;  %v21124_v6 = vpop.f32.mrf.mxu1 }
 0x122   :  { %28714 = vst [vmem:[#allocation37_spill] sm:$0xff] %v21124_v6 }
 0x123   :  { %v21126_v62 = vpop.f32.mrf.mxu0  ;;  %v21128_v2 = vpop.f32.mrf.mxu1 }
 0x124   :  { %28715 = vst [vmem:[#allocation38_spill] sm:$0xff] %v21128_v2  ;;  %v678_v2 = vmax.f32 %v20936_v41, %v21002_v10  ;;  %v680_v41 = vmax.f32 %v20944_v45, %v21012_v15 }
 0x125   :  { %v21130_v26 = vpop.f32.mrf.mxu0  ;;  %v21132_v8 = vpop.f32.mrf.mxu1 }
 0x126   :  { %28716 = vst [vmem:[#allocation39_spill] sm:$0xff] %v21130_v26  ;;  %28717 = vst [vmem:[#allocation40_spill] sm:$0xff] %v21132_v8 }
 0x127   :  { %v21134_v23 = vpop.f32.mrf.mxu0  ;;  %v21136_v13 = vpop.f32.mrf.mxu1 }
 0x128   :  { %28718 = vst [vmem:[#allocation41_spill] sm:$0xff] %v21136_v13  ;;  %v28725_v13 = vmax.f32 %v20932_v39, %v20996_v7  ;;  %v28727_v39 = vmax.f32 %v20940_v43, %v21006_v12  ;;  %v702_v43 = vmax.f32 %v21118_v3, %v20938_v42 }
 0x129   :  { %v21138_v35 = vpop.f32.mrf.mxu0  ;;  %v21140_v34 = vpop.f32.mrf.mxu1 }
 0x12a   :  { %28719 = vst [vmem:[#allocation42_spill] sm:$0xff] %v21138_v35  ;;  %28720 = vst [vmem:[#allocation43_spill] sm:$0xff] %v21140_v34  ;;  %v21158_v34 = vld [vmem:[%s28654_s2] ss:$0 sm:$0xff] }
 0x12b   :  { %v21142_v59 = vpop.f32.mrf.mxu0  ;;  %v21144_v53 = vpop.f32.mrf.mxu1 }
 0x12c   :  { %28721 = vst [vmem:[#allocation44_spill] sm:$0xff] %v21142_v59  ;;  %28722 = vst [vmem:[#allocation45_spill] sm:$0xff] %v21144_v53 }
 0x12d   :  { %v17636_v6 = vpop.f32.mrf.mxu0  ;;  %v21146_v5 = vpop.f32.mrf.mxu1 }
 0x12e   :  { %28723 = vst [vmem:[#allocation46_spill] sm:$0xff] %v21146_v5  ;;  %v695_v16 = vmax.f32 %v17612_v11, %v17636_v6 }
 0x12f   :  { %v599_v8 = vpop.f32.mrf.mxu0  ;;  %v21150_v26 = vpop.f32.mrf.mxu1 }
 0x130   :  { %28724 = vst [vmem:[#allocation47_spill] sm:$0xff] %v21150_v26  ;;  %v711_v35 = vmax.f32 %v28725_v13, %v695_v16  ;;  %v694_v48 = vmax.f32 %v519_v30, %v599_v8  ;;  %v682_v16 = vmax.f32 %v20952_v0, %v21022_v20  ;;  %v28728_v0 = vmax.f32 %v20948_v47, %v21016_v17 }
 0x131   :  { %v17639_v53 = vpop.f32.mrf.mxu0  ;;  %v21160_v59 = vpop.f32.mrf.mxu1 }
 0x132   :  { %28726 = vst [vmem:[#allocation48_spill] sm:$0xff] %v21160_v59  ;;  %v733_v6 = vadd.f32 %v21158_v34, %v711_v35  ;;  %v710_v10 = vmax.f32 %v678_v2, %v694_v48  ;;  %v697_v11 = vmax.f32 %v17615_v51, %v17639_v53  ;;  %v686_v2 = vmax.f32 %v20968_v56, %v21044_v31 }
 0x133   :  { %v609_v26 = vpop.f32.mrf.mxu0  ;;  %v21165_v5 = vpop.f32.mrf.mxu1  ;;  %v703_v56 = vmax.f32 %v21114_v36, %v20934_v40  ;;  %v28729_v36 = vmax.f32 %v20956_v50, %v21026_v22 }
 0x134   :  { %v713_v7 = vmax.f32 %v28727_v39, %v697_v11  ;;  %v696_v8 = vmax.f32 %v529_v21, %v609_v26  ;;  %v732_v13 = vadd.f32 %v21158_v34, %v710_v10  ;;  %v749_v30 = vmax.f32 %v733_v6, 0.0 }
 0x135   :  { %v17642_v59 = vpop.f32.mrf.mxu0  ;;  %v21173_v45 = vpop.f32.mrf.mxu1  ;;  %v718_v6 = vmax.f32 %v686_v2, %v702_v43  ;;  %v1421_v39 = vmax.f32 %v20970_v57, %v21046_v32  ;;  %v690_v57 = vmax.f32 %v20984_v1, %v21068_v14  ;;  %v28733_v14 = vld [vmem:[#allocation2_spill] sm:$0xff] }
 0x136   :  { %v712_v15 = vmax.f32 %v680_v41, %v696_v8  ;;  %v699_v48 = vmax.f32 %v17618_v4, %v17642_v59  ;;  %v748_v51 = vmax.f32 %v732_v13, 0.0  ;;  %v735_v53 = vadd.f32 %v21158_v34, %v713_v7 }
 0x137   :  { %v619_v12 = vpop.f32.mrf.mxu0  ;;  %v21180_v21 = vpop.f32.mrf.mxu1  ;;  %v684_v4 = vmax.f32 %v20960_v52, %v21032_v25  ;;  %v688_v41 = vmax.f32 %v20976_v60, %v21056_v37  ;;  %v704_v52 = vmax.f32 %v21126_v62, %v20946_v46  ;;  %v28730_v60 = vmax.f32 %v20964_v54, %v21036_v27 }
 0x138   :  { %v715_v20 = vmax.f32 %v28728_v0, %v699_v48  ;;  %v698_v26 = vmax.f32 %v21100_v24, %v619_v12  ;;  %17852 = vmatprep.mubr.f32.mxu1 %v748_v51  ;;  %v734_v59 = vadd.f32 %v21158_v34, %v712_v15  ;;  %v751_v3 = vmax.f32 %v735_v53, 0.0  ;;  %v28738_v12 = vld [vmem:[#allocation4_spill] sm:$0xff] }
 0x139   :  { %v17645_v31 = vpop.f32.mrf.mxu0  ;;  %v21191_v42 = vpop.f32.mrf.mxu1  ;;  %17853 = vmatmul.mubr.f32.vlgmr.msra.gmra.mxu1 %v749_v30  ;;  %v719_v37 = vmax.f32 %v28730_v60, %v703_v56  ;;  %v705_v46 = vmax.f32 %v21122_v18, %v20942_v44  ;;  %v1423_v13 = vmax.f32 %v20978_v61, %v21058_v38  ;;  %v720_v54 = vmax.f32 %v688_v41, %v704_v52  ;;  %v28734_v38 = vld [vmem:[#allocation39_spill] sm:$0xff]  ;;  %v28739_v0 = vld [vmem:[#allocation44_spill] sm:$0xff]  ;;  %v28740_v56 = vld [vmem:[#allocation5_spill] sm:$0xff] }
 0x13a   :  { %v714_v35 = vmax.f32 %v682_v16, %v698_v26  ;;  %v701_v47 = vmax.f32 %v21104_v19, %v17645_v31  ;;  %v750_v17 = vmax.f32 %v734_v59, 0.0  ;;  %v737_v24 = vadd.f32 %v21158_v34, %v715_v20  ;;  %v28741_v31 = vld [vmem:[#allocation21_spill] sm:$0xff]  ;;  %v28744_v41 = vld [vmem:[#allocation24_spill] sm:$0xff] }
 0x13b   :  { %v629_v25 = vpop.f32.mrf.mxu0  ;;  %v21199_v40 = vpop.f32.mrf.mxu1  ;;  %v740_v32 = vadd.f32 %v21158_v34, %v718_v6  ;;  %v706_v44 = vmax.f32 %v21134_v23, %v20954_v49  ;;  %v28731_v18 = vmax.f32 %v20966_v55, %v21038_v28  ;;  %v28732_v61 = vmax.f32 %v20972_v58, %v21048_v33  ;;  %v28735_v23 = vld [vmem:[#allocation27_spill] sm:$0xff]  ;;  %v28745_v6 = vld [vmem:[#allocation8_spill] sm:$0xff] }
 0x13c   :  { %v717_v10 = vmax.f32 %v28729_v36, %v701_v47  ;;  %v700_v11 = vmax.f32 %v21110_v29, %v629_v25  ;;  %17855 = vmatprep.mubr.f32.mxu1 %v750_v17  ;;  %v736_v19 = vadd.f32 %v21158_v34, %v714_v35  ;;  %v753_v7 = vmax.f32 %v737_v24, 0.0  ;;  %v28736_v55 = vld [vmem:[#allocation11_spill] sm:$0xff]  ;;  %v28743_v47 = vld [vmem:[#allocation38_spill] sm:$0xff] }
 0x13d   :  { %v17742_v62 = vpop.f32.mrf.mxu1  ;;  %17856 = vmatmul.mubr.f32.gmra.mxu1 %v751_v3  ;;  %v721_v1 = vmax.f32 %v28732_v61, %v705_v46  ;;  %v707_v15 = vmax.f32 %v28734_v38, %v28733_v14  ;;  %v741_v49 = vadd.f32 %v21158_v34, %v719_v37  ;;  %v692_v28 = vmax.f32 %v28736_v55, %v28735_v23  ;;  %v28746_v25 = vld [vmem:[#allocation6_spill] sm:$0xff]  ;;  %v28749_v37 = vld [vmem:[#allocation3_spill] sm:$0xff]  ;;  %v28756_v14 = vld [vmem:[#allocation28_spill] sm:$0xff] }
 0x13e   :  { %v716_v50 = vmax.f32 %v684_v4, %v700_v11  ;;  %v1438_v22 = vmax.f32 %v21116_v63, %v17742_v62  ;;  %v752_v29 = vmax.f32 %v736_v19, 0.0  ;;  %v739_v8 = vadd.f32 %v21158_v34, %v717_v10  ;;  %v28747_v36 = vld [vmem:[#allocation22_spill] sm:$0xff]  ;;  %v28757_v38 = vld [vmem:[#allocation12_spill] sm:$0xff]  ;;  %v28758_v23 = vld [vmem:[#allocation43_spill] sm:$0xff] }
 0x13f   :  { %v1342_v27 = vpop.f32.mrf.mxu1  ;;  %v708_v20 = vmax.f32 %v28739_v0, %v28738_v12  ;;  %v756_v26 = vmax.f32 %v740_v32, 0.0  ;;  %v742_v59 = vadd.f32 %v21158_v34, %v720_v54  ;;  %v722_v4 = vmax.f32 %v690_v57, %v706_v44  ;;  %v28750_v46 = vld [vmem:[#allocation42_spill] sm:$0xff]  ;;  %v28752_v44 = vld [vmem:[#allocation7_spill] sm:$0xff] }
 0x140   :  { %v1454_v63 = vmax.f32 %v28731_v18, %v1438_v22  ;;  %v1437_v16 = vmax.f32 %v21120_v9, %v1342_v27  ;;  %17858 = vmatprep.mubr.f32.mxu1 %v752_v29  ;;  %v738_v30 = vadd.f32 %v21158_v34, %v716_v50  ;;  %v755_v51 = vmax.f32 %v739_v8, 0.0  ;;  %v28737_v9 = vld [vmem:[#allocation37_spill] sm:$0xff]  ;;  %v28751_v50 = vld [vmem:[#allocation40_spill] sm:$0xff]  ;;  %v28753_v18 = vld [vmem:[#allocation23_spill] sm:$0xff] }
 0x141   :  { %v17745_v48 = vpop.f32.mrf.mxu1  ;;  %17859 = vmatmul.mubr.f32.gmra.mxu1 %v753_v7  ;;  %v28742_v3 = vmax.f32 %v28740_v56, %v28741_v31  ;;  %v1425_v52 = vmax.f32 %v28745_v6, %v28744_v41  ;;  %v28748_v10 = vmax.f32 %v28746_v25, %v28747_v36  ;;  %v743_v60 = vadd.f32 %v21158_v34, %v721_v1  ;;  %v28763_v56 = vld [vmem:[#allocation26_spill] sm:$0xff] }
 0x142   :  { %v1453_v53 = vmax.f32 %v1421_v39, %v1437_v16  ;;  %v1440_v2 = vmax.f32 %v28737_v9, %v17745_v48  ;;  %v754_v43 = vmax.f32 %v738_v30, 0.0  ;;  %v1470_v58 = vadd.f32 %v21158_v34, %v1454_v63  ;;  %v28755_v30 = vld [vmem:[#allocation41_spill] sm:$0xff]  ;;  %v28766_v6 = vld [vmem:[#allocation30_spill] sm:$0xff] }
 0x143   :  { %v1352_v33 = vpop.f32.mrf.mxu1  ;;  %v723_v11 = vmax.f32 %v28748_v10, %v707_v15  ;;  %v757_v39 = vmax.f32 %v741_v49, 0.0  ;;  %v709_v62 = vmax.f32 %v28750_v46, %v28749_v37  ;;  %v724_v8 = vmax.f32 %v692_v28, %v708_v20  ;;  %v21267_v28 = vld [vmem:[%s28651_s1 + $0x20] sm:$0xf] }
 0x144   :  { %v1456_v35 = vmax.f32 %v28742_v3, %v1440_v2  ;;  %v1439_v17 = vmax.f32 %v28743_v47, %v1352_v33  ;;  %17861 = vmatprep.mubr.f32.mxu1 %v754_v43  ;;  %v1469_v24 = vadd.f32 %v21158_v34, %v1453_v53  ;;  %v1486_v57 = vmax.f32 %v1470_v58, 0.0  ;;  %v28759_v2 = vld [vmem:[#allocation9_spill] sm:$0xff]  ;;  %v28768_v10 = vld [vmem:[#allocation46_spill] sm:$0xff] }
 0x145   :  { %v17748_v19 = vpop.f32.mrf.mxu1  ;;  %17862 = vmatmul.mubr.f32.gmra.mxu1 %v755_v51  ;;  %v758_v27 = vmax.f32 %v742_v59, 0.0  ;;  %v28754_v63 = vmax.f32 %v28752_v44, %v28753_v18  ;;  %v1427_v15 = vmax.f32 %v28757_v38, %v28756_v14  ;;  %v759_v51 = vmax.f32 %v743_v60, 0.0  ;;  %v28760_v43 = vld [vmem:[#allocation25_spill] sm:$0xff]  ;;  %v21309_v44 = vld [vmem:[%s28651_s1 + $0x8] sm:$0xff] }
 0x146   :  { %v1455_v7 = vmax.f32 %v1423_v13, %v1439_v17  ;;  %v1442_v22 = vmax.f32 %v28751_v50, %v17748_v19  ;;  %17864 = vmatprep.mubr.f32.mxu1 %v756_v26  ;;  %v1485_v29 = vmax.f32 %v1469_v24, 0.0  ;;  %v1472_v32 = vadd.f32 %v21158_v34, %v1456_v35  ;;  %v21278_v33 = vld [vmem:[%s28651_s1 + $0x18] sm:$0xff] }
 0x147   :  { %v1362_v54 = vpop.f32.mrf.mxu1  ;;  %v744_v13 = vadd.f32 %v21158_v34, %v722_v4  ;;  %v745_v9 = vadd.f32 %v21158_v34, %v723_v11  ;;  %v28761_v12 = vmax.f32 %v28759_v2, %v28760_v43  ;;  %v746_v59 = vadd.f32 %v21158_v34, %v724_v8  ;;  %v28762_v4 = vld [vmem:[#allocation10_spill] sm:$0xff]  ;;  %v28765_v35 = vld [vmem:[#allocation45_spill] sm:$0xff] }
 0x148   :  { %v1458_v16 = vmax.f32 %v28754_v63, %v1442_v22  ;;  %v1441_v61 = vmax.f32 %v28755_v30, %v1362_v54  ;;  %17796 = vmatprep.mubr.f32.mxu0 %v1485_v29  ;;  %v1471_v1 = vadd.f32 %v21158_v34, %v1455_v7  ;;  %v1488_v58 = vmax.f32 %v1472_v32, 0.0  ;;  %v28769_v50 = vld [vmem:[#allocation13_spill] sm:$0xff] }
 0x149   :  { %v17751_v48 = vpop.f32.mrf.mxu1  ;;  %17797 = vmatmul.mubr.f32.vlgmr.msra.gmra.mxu0 %v1486_v57  ;;  %17865 = vmatmul.mubr.f32.gmra.mxu1 %v757_v39  ;;  %v725_v0 = vmax.f32 %v28761_v12, %v709_v62  ;;  %v28764_v31 = vmax.f32 %v28762_v4, %v28763_v56  ;;  %v760_v17 = vmax.f32 %v744_v13, 0.0  ;;  %v21295_v39 = vld [vmem:[%s28651_s1 + $0x10] sm:$0xff]  ;;  %v761_v46 = vmax.f32 %v745_v9, 0.0  ;;  %v28770_v22 = vld [vmem:[#allocation29_spill] sm:$0xff]  ;;  %v28772_v57 = vld [vmem:[#allocation47_spill] sm:$0xff] }
 0x14a   :  { %v1457_v49 = vmax.f32 %v1425_v52, %v1441_v61  ;;  %v1444_v55 = vmax.f32 %v28758_v23, %v17751_v48  ;;  %17867 = vmatprep.mubr.f32.mxu1 %v758_v27  ;;  %17877 = vmatpush3.msk.msra.mxu0 %vm289_vm0, %v21267_v28  ;;  %v1487_v53 = vmax.f32 %v1471_v1, 0.0  ;;  %v1474_v26 = vadd.f32 %v21158_v34, %v1458_v16  ;;  %v28767_v52 = vld [vmem:[#allocation14_spill] sm:$0xff]  ;;  %v28773_v16 = vld [vmem:[#allocation48_spill] sm:$0xff]  ;;  %v28776_v23 = vld [vmem:[#allocation15_spill] sm:$0xff] }
 0x14b   :  { %v1372_v20 = vpop.f32.mrf.mxu1  ;;  %17878 = vmatprep.subr.mxu0 %v21278_v33  ;;  %v1429_v25 = vmax.f32 %v28767_v52, %v28766_v6  ;;  %v747_v7 = vadd.f32 %v21158_v34, %v725_v0  ;;  %v28771_v29 = vmax.f32 %v28769_v50, %v28770_v22  ;;  %v762_v27 = vmax.f32 %v746_v59, 0.0  ;;  %v28774_v1 = vld [vmem:[#allocation32_spill] sm:$0xff]  ;;  %v28779_v56 = vld [vmem:[#allocation34_spill] sm:$0xff] }
 0x14c   :  { %v1460_v3 = vmax.f32 %v28764_v31, %v1444_v55  ;;  %v1443_v47 = vmax.f32 %v28765_v35, %v1372_v20  ;;  %17799 = vmatprep.mubr.f32.mxu0 %v1487_v53  ;;  %v1473_v24 = vadd.f32 %v21158_v34, %v1457_v49  ;;  %17879 = vmatpush3.msra.mxu0 %v21278_v33  ;;  %v1490_v37 = vmax.f32 %v1474_v26, 0.0  ;;  %v28775_v13 = vld [vmem:[#allocation16_spill] sm:$0xff]  ;;  %v21320_v49 = vld [vmem:[%s28651_s1] sm:$0xff]  ;;  %v28777_v55 = vld [vmem:[#allocation31_spill] sm:$0xff] }
 0x14d   :  { %v17754_v41 = vpop.f32.mrf.mxu1  ;;  %17800 = vmatmul.mubr.f32.gmra.mxu0 %v1488_v58  ;;  %17868 = vmatmul.mubr.f32.gmra.mxu1 %v759_v51  ;;  %v1431_v14 = vmax.f32 %v28775_v13, %v28774_v1  ;;  %v763_v48 = vmax.f32 %v747_v7, 0.0  ;;  %v28778_v53 = vmax.f32 %v28776_v23, %v28777_v55  ;;  %v28780_v31 = vld [vmem:[#allocation18_spill] sm:$0xff]  ;;  %v28782_v35 = vld [vmem:[#allocation33_spill] sm:$0xff]  ;;  %v1814_v1 = vld [vmem:[%s28652_s0 + $0x430] sm:$0xff] }
 0x14e   :  { %v1459_v36 = vmax.f32 %v1427_v15, %v1443_v47  ;;  %v1446_v11 = vmax.f32 %v28768_v10, %v17754_v41  ;;  %17870 = vmatprep.mubr.f32.mxu1 %v760_v17  ;;  %v1489_v19 = vmax.f32 %v1473_v24, 0.0  ;;  %17880 = vmatprep.subr.mxu0 %v21295_v39  ;;  %v1476_v62 = vadd.f32 %v21158_v34, %v1460_v3  ;;  %v1815_v13 = vld [vmem:[%s28652_s0 + $0x438] sm:$0xff]  ;;  %v1821_v23 = vld [vmem:[%s28652_s0 + $0x468] sm:$0xff]  ;;  %v1822_v55 = vld [vmem:[%s28652_s0 + $0x470] sm:$0xff] }
 0x14f   :  { %v1382_v60 = vpop.f32.mrf.mxu1  ;;  %17881 = vmatpush3.msra.mxu0 %v21295_v39  ;;  %v1433_v3 = vmax.f32 %v28780_v31, %v28779_v56  ;;  %v1834_v56 = vld [vmem:[%s28652_s0 + $0x4d0] sm:$0xff]  ;;  %v1835_v31 = vld [vmem:[%s28652_s0 + $0x4d8] sm:$0xff] }
 0x150   :  { %v1462_v8 = vmax.f32 %v28771_v29, %v1446_v11  ;;  %v1445_v54 = vmax.f32 %v28772_v57, %v1382_v60  ;;  %17802 = vmatprep.mubr.f32.mxu0 %v1489_v19  ;;  %v1475_v32 = vadd.f32 %v21158_v34, %v1459_v36  ;;  %17882 = vmatprep.subr.mxu0 %v21309_v44  ;;  %v1492_v15 = vmax.f32 %v1476_v62, 0.0  ;;  %v28784_v19 = vld [vmem:[#allocation36_spill] sm:$0xff]  ;;  %v28787_v62 = vld [vmem:[#allocation35_spill] sm:$0xff] }
 0x151   :  { %v17757_v18 = vpop.f32.mrf.mxu1  ;;  %17803 = vmatmul.mubr.f32.gmra.mxu0 %v1490_v37  ;;  %17871 = vmatmul.mubr.f32.gmra.mxu1 %v761_v46  ;;  %v28785_v60 = vld [vmem:[#allocation20_spill] sm:$0xff]  ;;  %v28786_v46 = vld [vmem:[#allocation19_spill] sm:$0xff] }
 0x152   :  { %v1461_v63 = vmax.f32 %v1429_v25, %v1445_v54  ;;  %v1448_v30 = vmax.f32 %v28773_v16, %v17757_v18  ;;  %17873 = vmatprep.mubr.f32.mxu1 %v762_v27  ;;  %v1491_v61 = vmax.f32 %v1475_v32, 0.0  ;;  %17883 = vmatpush3.msra.mxu0 %v21309_v44  ;;  %v1478_v51 = vadd.f32 %v21158_v34, %v1462_v8  ;;  %v1808_v18 = vld [vmem:[%s28652_s0 + $0x400] sm:$0xff]  ;;  %v1811_v16 = vld [vmem:[%s28652_s0 + $0x418] sm:$0xff] }
 0x153   :  { %v1392_v38 = vpop.f32.mrf.mxu1  ;;  %17884 = vmatprep.subr.mxu0 %v21320_v49  ;;  %v1435_v37 = vmax.f32 %v28785_v60, %v28784_v19  ;;  %v28788_v7 = vmax.f32 %v28786_v46, %v28787_v62  ;;  %v1850_v19 = vld [vmem:[%s28652_s0 + $0x550] sm:$0xff]  ;;  %v1851_v60 = vld [vmem:[%s28652_s0 + $0x558] sm:$0xff]  ;;  %v1853_v46 = vld [vmem:[%s28652_s0 + $0x568] sm:$0xff] }
 0x154   :  { %v1464_v9 = vmax.f32 %v28778_v53, %v1448_v30  ;;  %v1447_v2 = vmax.f32 %v21165_v5, %v1392_v38  ;;  %17805 = vmatprep.mubr.f32.mxu0 %v1491_v61  ;;  %v1477_v43 = vadd.f32 %v21158_v34, %v1461_v63  ;;  %17885 = vmatpush3.msra.mxu0 %v21320_v49  ;;  %v1494_v59 = vmax.f32 %v1478_v51, 0.0  ;;  %v28781_v5 = vld [vmem:[#allocation17_spill] sm:$0xff]  ;;  %v1810_v63 = vld [vmem:[%s28652_s0 + $0x410] sm:$0xff]  ;;  %v1812_v30 = vld [vmem:[%s28652_s0 + $0x420] sm:$0xff] }
 0x155   :  { %v17760_v12 = vpop.f32.mrf.mxu1  ;;  %17806 = vmatmul.mubr.f32.gmra.mxu0 %v1492_v15  ;;  %17874 = vmatmul.mubr.f32.gmra.mxu1 %v763_v48  ;;  %v28783_v47 = vmax.f32 %v28781_v5, %v28782_v35  ;;  %v1813_v61 = vld [vmem:[%s28652_s0 + $0x428] sm:$0xff]  ;;  %v1818_v15 = vld [vmem:[%s28652_s0 + $0x450] sm:$0xff]  ;;  %v1819_v48 = vld [vmem:[%s28652_s0 + $0x458] sm:$0xff] }
 0x156   :  { %v1463_v0 = vmax.f32 %v1431_v14, %v1447_v2  ;;  %v1450_v20 = vmax.f32 %v21173_v45, %v17760_v12  ;;  %v1493_v58 = vmax.f32 %v1477_v43, 0.0  ;;  %v1480_v4 = vadd.f32 %v21158_v34, %v1464_v9  ;;  %v1816_v14 = vld [vmem:[%s28652_s0 + $0x440] sm:$0xff]  ;;  %v1817_v38 = vld [vmem:[%s28652_s0 + $0x448] sm:$0xff]  ;;  %v1823_v53 = vld [vmem:[%s28652_s0 + $0x478] sm:$0xff] }
 0x157   :  { %v1402_v26 = vpop.f32.mrf.mxu1  ;;  %v1820_v51 = vld [vmem:[%s28652_s0 + $0x460] sm:$0xff]  ;;  %v1825_v2 = vld [vmem:[%s28652_s0 + $0x488] sm:$0xff]  ;;  %v1826_v43 = vld [vmem:[%s28652_s0 + $0x490] sm:$0xff] }
 0x158   :  { %v1466_v17 = vmax.f32 %v28783_v47, %v1450_v20  ;;  %v1449_v24 = vmax.f32 %v21180_v21, %v1402_v26  ;;  %17808 = vmatprep.mubr.f32.mxu0 %v1493_v58  ;;  %v1479_v41 = vadd.f32 %v21158_v34, %v1463_v0  ;;  %v1496_v10 = vmax.f32 %v1480_v4, 0.0  ;;  %v1824_v9 = vld [vmem:[%s28652_s0 + $0x480] sm:$0xff]  ;;  %v1827_v12 = vld [vmem:[%s28652_s0 + $0x498] sm:$0xff]  ;;  %v1829_v20 = vld [vmem:[%s28652_s0 + $0x4a8] sm:$0xff] }
 0x159   :  { %v17763_v6 = vpop.f32.mrf.mxu1  ;;  %17809 = vmatmul.mubr.f32.gmra.mxu0 %v1494_v59  ;;  %v1828_v0 = vld [vmem:[%s28652_s0 + $0x4a0] sm:$0xff]  ;;  %v1830_v58 = vld [vmem:[%s28652_s0 + $0x4b0] sm:$0xff]  ;;  %v1831_v26 = vld [vmem:[%s28652_s0 + $0x4b8] sm:$0xff] }
 0x15a   :  { %v1465_v45 = vmax.f32 %v1433_v3, %v1449_v24  ;;  %v1452_v52 = vmax.f32 %v21191_v42, %v17763_v6  ;;  %v1495_v25 = vmax.f32 %v1479_v41, 0.0  ;;  %v1482_v11 = vadd.f32 %v21158_v34, %v1466_v17  ;;  %v1832_v59 = vld [vmem:[%s28652_s0 + $0x4c0] sm:$0xff]  ;;  %v1833_v4 = vld [vmem:[%s28652_s0 + $0x4c8] sm:$0xff]  ;;  %v1838_v35 = vld [vmem:[%s28652_s0 + $0x4f0] sm:$0xff] }
 0x15b   :  { %v1412_v36 = vpop.f32.mrf.mxu1  ;;  %v1836_v3 = vld [vmem:[%s28652_s0 + $0x4e0] sm:$0xff]  ;;  %v1837_v5 = vld [vmem:[%s28652_s0 + $0x4e8] sm:$0xff]  ;;  %v1839_v47 = vld [vmem:[%s28652_s0 + $0x4f8] sm:$0xff] }
 0x15c   :  { %v1468_v21 = vmax.f32 %v28788_v7, %v1452_v52  ;;  %v1451_v50 = vmax.f32 %v21199_v40, %v1412_v36  ;;  %17811 = vmatprep.mubr.f32.mxu0 %v1495_v25  ;;  %v1481_v22 = vadd.f32 %v21158_v34, %v1465_v45  ;;  %v1498_v8 = vmax.f32 %v1482_v11, 0.0  ;;  %v1809_v40 = vld [vmem:[%s28652_s0 + $0x408] sm:$0xff]  ;;  %v1840_v17 = vld [vmem:[%s28652_s0 + $0x500] sm:$0xff]  ;;  %v1842_v41 = vld [vmem:[%s28652_s0 + $0x510] sm:$0xff] }
 0x15d   :  { %17812 = vmatmul.mubr.f32.gmra.mxu0 %v1496_v10  ;;  %v1841_v24 = vld [vmem:[%s28652_s0 + $0x508] sm:$0xff]  ;;  %v1843_v6 = vld [vmem:[%s28652_s0 + $0x518] sm:$0xff]  ;;  %v1844_v45 = vld [vmem:[%s28652_s0 + $0x520] sm:$0xff] }
 0x15e   :  { %v1467_v29 = vmax.f32 %v1435_v37, %v1451_v50  ;;  %v1497_v42 = vmax.f32 %v1481_v22, 0.0  ;;  %v1484_v57 = vadd.f32 %v21158_v34, %v1468_v21  ;;  %v1845_v52 = vld [vmem:[%s28652_s0 + $0x528] sm:$0xff]  ;;  %v1846_v25 = vld [vmem:[%s28652_s0 + $0x530] sm:$0xff]  ;;  %v1847_v36 = vld [vmem:[%s28652_s0 + $0x538] sm:$0xff] }
 0x15f   :  { %v1848_v10 = vld [vmem:[%s28652_s0 + $0x540] sm:$0xff]  ;;  %v1849_v11 = vld [vmem:[%s28652_s0 + $0x548] sm:$0xff]  ;;  %v1854_v62 = vld [vmem:[%s28652_s0 + $0x570] sm:$0xff] }
 0x160   :  { %17814 = vmatprep.mubr.f32.mxu0 %v1497_v42  ;;  %v1483_v54 = vadd.f32 %v21158_v34, %v1467_v29  ;;  %v1500_v32 = vmax.f32 %v1484_v57, 0.0  ;;  %v1852_v37 = vld [vmem:[%s28652_s0 + $0x560] sm:$0xff]  ;;  %v1855_v7 = vld [vmem:[%s28652_s0 + $0x578] sm:$0xff]  ;;  %v1857_v50 = vld [vmem:[%s28652_s0 + $0x588] sm:$0xff] }
 0x161   :  { %17815 = vmatmul.mubr.f32.gmra.mxu0 %v1498_v8  ;;  %v1856_v21 = vld [vmem:[%s28652_s0 + $0x580] sm:$0xff]  ;;  %v1858_v22 = vld [vmem:[%s28652_s0 + $0x590] sm:$0xff]  ;;  %v1859_v29 = vld [vmem:[%s28652_s0 + $0x598] sm:$0xff] }
 0x162   :  { %v1499_v27 = vmax.f32 %v1483_v54, 0.0  ;;  %v1860_v42 = vld [vmem:[%s28652_s0 + $0x5a0] sm:$0xff]  ;;  %v1861_v8 = vld [vmem:[%s28652_s0 + $0x5a8] sm:$0xff]  ;;  %v1862_v57 = vld [vmem:[%s28652_s0 + $0x5b0] sm:$0xff] }
 0x163   :  { %v1863_v54 = vld [vmem:[%s28652_s0 + $0x5b8] sm:$0xff] }
 0x164   :  { %17817 = vmatprep.mubr.f32.mxu0 %v1499_v27  ;;  %v1864_v27 = vld [vmem:[%s28652_s0 + $0x5c0] sm:$0xff] }
 0x165   :  { %17818 = vmatmul.mubr.f32.gmra.mxu0 %v1500_v32  ;;  %v1865_v32 = vld [vmem:[%s28652_s0 + $0x5c8] sm:$0xff] }
 0x166   :  { %17886 = vmatprep.mubr.msk.f32.mxu0 %vm96_vm1, %v1808_v18  ;;  %v1866_v18 = vld [vmem:[%s28652_s0 + $0x5d0] sm:$0xff] }
 0x169   :  { %17887 = vmatmul.mubr.msk.f32.vlgmr.msra.gmra.mxu0 %vm96_vm1, %v1809_v40  ;;  %v1867_v40 = vld [vmem:[%s28652_s0 + $0x5d8] sm:$0xff] }
 0x16a   :  { %17889 = vmatprep.mubr.msk.f32.mxu0 %vm96_vm1, %v1810_v63  ;;  %v1868_v63 = vld [vmem:[%s28652_s0 + $0x5e0] sm:$0xff] }
 0x16d   :  { %17890 = vmatmul.mubr.msk.f32.gmra.mxu0 %vm96_vm1, %v1811_v16  ;;  %v1869_v16 = vld [vmem:[%s28652_s0 + $0x5e8] sm:$0xff] }
 0x16e   :  { %17892 = vmatprep.mubr.msk.f32.mxu0 %vm96_vm1, %v1812_v30  ;;  %v1870_v30 = vld [vmem:[%s28652_s0 + $0x5f0] sm:$0xff] }
 0x171   :  { %17893 = vmatmul.mubr.msk.f32.gmra.mxu0 %vm96_vm1, %v1813_v61  ;;  %v1871_v61 = vld [vmem:[%s28652_s0 + $0x5f8] sm:$0xff] }
 0x172   :  { %17895 = vmatprep.mubr.msk.f32.mxu0 %vm96_vm1, %v1814_v1  ;;  %v14848_v1 = vld [vmem:[%s28653_s3 + $0x178] sm:$0xff] }
 0x173   :  { %17982 = vmatprep.subr.mxu1 %v14848_v1 }
 0x174   :  { %17983 = vmatpush3.msra.mxu1 %v14848_v1 }
 0x175   :  { %17896 = vmatmul.mubr.msk.f32.gmra.mxu0 %vm96_vm1, %v1815_v13  ;;  %v14847_v13 = vld [vmem:[%s28653_s3 + $0x170] sm:$0xff] }
 0x176   :  { %17898 = vmatprep.mubr.msk.f32.mxu0 %vm96_vm1, %v1816_v14  ;;  %17984 = vmatprep.subr.mxu1 %v14847_v13  ;;  %v14846_v14 = vld [vmem:[%s28653_s3 + $0x168] sm:$0xff] }
 0x177   :  { %17985 = vmatpush3.msra.mxu1 %v14847_v13 }
 0x178   :  { %17986 = vmatprep.subr.mxu1 %v14846_v14 }
 0x179   :  { %17899 = vmatmul.mubr.msk.f32.gmra.mxu0 %vm96_vm1, %v1817_v38  ;;  %17987 = vmatpush3.msra.mxu1 %v14846_v14 }
 0x17a   :  { %17901 = vmatprep.mubr.msk.f32.mxu0 %vm96_vm1, %v1818_v15  ;;  %v14845_v15 = vld [vmem:[%s28653_s3 + $0x160] sm:$0xff] }
 0x17b   :  { %17988 = vmatprep.subr.mxu1 %v14845_v15 }
 0x17c   :  { %17989 = vmatpush3.msra.mxu1 %v14845_v15 }
 0x17d   :  { %17902 = vmatmul.mubr.msk.f32.gmra.mxu0 %vm96_vm1, %v1819_v48 }
 0x17e   :  { %17904 = vmatprep.mubr.msk.f32.mxu0 %vm96_vm1, %v1820_v51  ;;  %v14844_v51 = vld [vmem:[%s28653_s3 + $0x158] sm:$0xff] }
 0x17f   :  { %17990 = vmatprep.subr.mxu1 %v14844_v51 }
 0x180   :  { %17991 = vmatpush3.msra.mxu1 %v14844_v51 }
 0x181   :  { %17905 = vmatmul.mubr.msk.f32.gmra.mxu0 %vm96_vm1, %v1821_v23 }
 0x182   :  { %17907 = vmatprep.mubr.msk.f32.mxu0 %vm96_vm1, %v1822_v55  ;;  %v14843_v55 = vld [vmem:[%s28653_s3 + $0x150] sm:$0xff] }
 0x183   :  { %17992 = vmatprep.subr.mxu1 %v14843_v55 }
 0x184   :  { %17993 = vmatpush3.msra.mxu1 %v14843_v55 }
 0x185   :  { %17908 = vmatmul.mubr.msk.f32.gmra.mxu0 %vm96_vm1, %v1823_v53 }
 0x186   :  { %17910 = vmatprep.mubr.msk.f32.mxu0 %vm96_vm1, %v1824_v9  ;;  %v14842_v9 = vld [vmem:[%s28653_s3 + $0x148] sm:$0xff] }
 0x187   :  { %17994 = vmatprep.subr.mxu1 %v14842_v9 }
 0x188   :  { %17995 = vmatpush3.msra.mxu1 %v14842_v9 }
 0x189   :  { %17911 = vmatmul.mubr.msk.f32.gmra.mxu0 %vm96_vm1, %v1825_v2 }
 0x18a   :  { %17913 = vmatprep.mubr.msk.f32.mxu0 %vm96_vm1, %v1826_v43  ;;  %v14841_v43 = vld [vmem:[%s28653_s3 + $0x140] sm:$0xff] }
 0x18b   :  { %17996 = vmatprep.subr.mxu1 %v14841_v43 }
 0x18c   :  { %17997 = vmatpush3.msra.mxu1 %v14841_v43 }
 0x18d   :  { %17914 = vmatmul.mubr.msk.f32.gmra.mxu0 %vm96_vm1, %v1827_v12 }
 0x18e   :  { %17916 = vmatprep.mubr.msk.f32.mxu0 %vm96_vm1, %v1828_v0  ;;  %v14840_v0 = vld [vmem:[%s28653_s3 + $0x138] sm:$0xff] }
 0x18f   :  { %17998 = vmatprep.subr.mxu1 %v14840_v0 }
 0x190   :  { %17999 = vmatpush3.msra.mxu1 %v14840_v0 }
 0x191   :  { %17917 = vmatmul.mubr.msk.f32.gmra.mxu0 %vm96_vm1, %v1829_v20 }
 0x192   :  { %17919 = vmatprep.mubr.msk.f32.mxu0 %vm96_vm1, %v1830_v58  ;;  %v14839_v58 = vld [vmem:[%s28653_s3 + $0x130] sm:$0xff] }
 0x193   :  { %18000 = vmatprep.subr.mxu1 %v14839_v58 }
 0x194   :  { %18001 = vmatpush3.msra.mxu1 %v14839_v58 }
 0x195   :  { %17920 = vmatmul.mubr.msk.f32.gmra.mxu0 %vm96_vm1, %v1831_v26  ;;  %v14838_v26 = vld [vmem:[%s28653_s3 + $0x128] sm:$0xff] }
 0x196   :  { %17922 = vmatprep.mubr.msk.f32.mxu0 %vm96_vm1, %v1832_v59  ;;  %18002 = vmatprep.subr.mxu1 %v14838_v26 }
 0x197   :  { %18003 = vmatpush3.msra.mxu1 %v14838_v26 }
 0x199   :  { %17923 = vmatmul.mubr.msk.f32.gmra.mxu0 %vm96_vm1, %v1833_v4 }
 0x19a   :  { %17925 = vmatprep.mubr.msk.f32.mxu0 %vm96_vm1, %v1834_v56 }
 0x19d   :  { %17926 = vmatmul.mubr.msk.f32.gmra.mxu0 %vm96_vm1, %v1835_v31  ;;  %v14837_v31 = vld [vmem:[%s28653_s3 + $0x120] sm:$0xff] }
 0x19e   :  { %17928 = vmatprep.mubr.msk.f32.mxu0 %vm96_vm1, %v1836_v3  ;;  %18004 = vmatprep.subr.mxu1 %v14837_v31 }
 0x19f   :  { %18005 = vmatpush3.msra.mxu1 %v14837_v31 }
 0x1a1   :  { %17929 = vmatmul.mubr.msk.f32.gmra.mxu0 %vm96_vm1, %v1837_v5  ;;  %v14836_v5 = vld [vmem:[%s28653_s3 + $0x118] sm:$0xff] }
 0x1a2   :  { %17931 = vmatprep.mubr.msk.f32.mxu0 %vm96_vm1, %v1838_v35  ;;  %18006 = vmatprep.subr.mxu1 %v14836_v5 }
 0x1a3   :  { %18007 = vmatpush3.msra.mxu1 %v14836_v5 }
 0x1a5   :  { %17932 = vmatmul.mubr.msk.f32.gmra.mxu0 %vm96_vm1, %v1839_v47 }
 0x1a6   :  { %17934 = vmatprep.mubr.msk.f32.mxu0 %vm96_vm1, %v1840_v17 }
 0x1a9   :  { %17935 = vmatmul.mubr.msk.f32.gmra.mxu0 %vm96_vm1, %v1841_v24  ;;  %v14835_v24 = vld [vmem:[%s28653_s3 + $0x110] sm:$0xff] }
 0x1aa   :  { %17937 = vmatprep.mubr.msk.f32.mxu0 %vm96_vm1, %v1842_v41  ;;  %18008 = vmatprep.subr.mxu1 %v14835_v24 }
 0x1ab   :  { %18009 = vmatpush3.msra.mxu1 %v14835_v24 }
 0x1ad   :  { %17938 = vmatmul.mubr.msk.f32.gmra.mxu0 %vm96_vm1, %v1843_v6  ;;  %v14834_v6 = vld [vmem:[%s28653_s3 + $0x108] sm:$0xff] }
 0x1ae   :  { %17940 = vmatprep.mubr.msk.f32.mxu0 %vm96_vm1, %v1844_v45  ;;  %18010 = vmatprep.subr.mxu1 %v14834_v6 }
 0x1af   :  { %18011 = vmatpush3.msra.mxu1 %v14834_v6 }
 0x1b1   :  { %17941 = vmatmul.mubr.msk.f32.gmra.mxu0 %vm96_vm1, %v1845_v52 }
 0x1b2   :  { %17943 = vmatprep.mubr.msk.f32.mxu0 %vm96_vm1, %v1846_v25 }
 0x1b5   :  { %17944 = vmatmul.mubr.msk.f32.gmra.mxu0 %vm96_vm1, %v1847_v36  ;;  %v14833_v36 = vld [vmem:[%s28653_s3 + $0x100] sm:$0xff] }
 0x1b6   :  { %17946 = vmatprep.mubr.msk.f32.mxu0 %vm96_vm1, %v1848_v10  ;;  %18012 = vmatprep.subr.mxu1 %v14833_v36 }
 0x1b7   :  { %18013 = vmatpush3.msra.mxu1 %v14833_v36 }
 0x1b8   :  { %18038 = vmatprep.subr.msk.mxu1 %vm289_vm0, %v21267_v28 }
 0x1b9   :  { %17947 = vmatmul.mubr.msk.f32.gmra.mxu0 %vm96_vm1, %v1849_v11 }
 0x1ba   :  { %17949 = vmatprep.mubr.msk.f32.mxu0 %vm96_vm1, %v1850_v19 }
 0x1bd   :  { %17950 = vmatmul.mubr.msk.f32.gmra.mxu0 %vm96_vm1, %v1851_v60 }
 0x1be   :  { %17952 = vmatprep.mubr.msk.f32.mxu0 %vm96_vm1, %v1852_v37 }
 0x1c1   :  { %17953 = vmatmul.mubr.msk.f32.gmra.mxu0 %vm96_vm1, %v1853_v46 }
 0x1c2   :  { %17955 = vmatprep.mubr.msk.f32.mxu0 %vm96_vm1, %v1854_v62 }
 0x1c5   :  { %17956 = vmatmul.mubr.msk.f32.gmra.mxu0 %vm96_vm1, %v1855_v7 }
 0x1c6   :  { %17958 = vmatprep.mubr.msk.f32.mxu0 %vm96_vm1, %v1856_v21 }
 0x1c9   :  { %17959 = vmatmul.mubr.msk.f32.gmra.mxu0 %vm96_vm1, %v1857_v50 }
 0x1ca   :  { %17961 = vmatprep.mubr.msk.f32.mxu0 %vm96_vm1, %v1858_v22 }
 0x1cd   :  { %17962 = vmatmul.mubr.msk.f32.gmra.mxu0 %vm96_vm1, %v1859_v29 }
 0x1ce   :  { %17964 = vmatprep.mubr.msk.f32.mxu0 %vm96_vm1, %v1860_v42 }
 0x1d1   :  { %17965 = vmatmul.mubr.msk.f32.gmra.mxu0 %vm96_vm1, %v1861_v8 }
 0x1d2   :  { %17967 = vmatprep.mubr.msk.f32.mxu0 %vm96_vm1, %v1862_v57 }
 0x1d5   :  { %17968 = vmatmul.mubr.msk.f32.gmra.mxu0 %vm96_vm1, %v1863_v54 }
 0x1d6   :  { %17970 = vmatprep.mubr.msk.f32.mxu0 %vm96_vm1, %v1864_v27 }
 0x1d9   :  { %17971 = vmatmul.mubr.msk.f32.gmra.mxu0 %vm96_vm1, %v1865_v32 }
 0x1da   :  { %17973 = vmatprep.mubr.msk.f32.mxu0 %vm96_vm1, %v1866_v18 }
 0x1dd   :  { %17974 = vmatmul.mubr.msk.f32.gmra.mxu0 %vm96_vm1, %v1867_v40 }
 0x1de   :  { %17976 = vmatprep.mubr.msk.f32.mxu0 %vm96_vm1, %v1868_v63 }
 0x1e1   :  { %17977 = vmatmul.mubr.msk.f32.gmra.mxu0 %vm96_vm1, %v1869_v16 }
 0x1e2   :  { %17979 = vmatprep.mubr.msk.f32.mxu0 %vm96_vm1, %v1870_v30 }
 0x1e5   :  { %17980 = vmatmul.mubr.msk.f32.gmra.mxu0 %vm96_vm1, %v1871_v61 }
 0x1f9   :  { %v17854_v38 = vpop.f32.mrf.mxu1 }
 0x1fb   :  { %v21617_v48 = vpop.f32.mrf.mxu1 }
 0x1fc   :  { %28789 = vst [vmem:[#allocation2_spill] sm:$0xff] %v21617_v48 }
 0x1fd   :  { %v17857_v23 = vpop.f32.mrf.mxu1 }
 0x1ff   :  { %v21625_v53 = vpop.f32.mrf.mxu1 }
 0x200   :  { %28790 = vst [vmem:[#allocation39_spill] sm:$0xff] %v21625_v53 }
 0x201   :  { %v17860_v2 = vpop.f32.mrf.mxu1 }
 0x203   :  { %v21633_v12 = vpop.f32.mrf.mxu1 }
 0x204   :  { %28791 = vst [vmem:[#allocation27_spill] sm:$0xff] %v21633_v12 }
 0x205   :  { %v17863_v20 = vpop.f32.mrf.mxu1 }
 0x207   :  { %v21644_v59 = vpop.f32.mrf.mxu1 }
 0x208   :  { %28792 = vst [vmem:[#allocation11_spill] sm:$0xff] %v21644_v59 }
 0x209   :  { %v17798_v4 = vpop.f32.mrf.mxu0  ;;  %v17866_v35 = vpop.f32.mrf.mxu1 }
 0x20a   :  { %v21646_v56 = vadd.f32 %v17854_v38, %v17798_v4 }
 0x20b   :  { %v21651_v3 = vpop.f32.mrf.mxu0  ;;  %v21666_v45 = vpop.f32.mrf.mxu1 }
 0x20c   :  { %28793 = vst [vmem:[#allocation37_spill] sm:$0xff] %v21646_v56  ;;  %28794 = vst [vmem:[#allocation4_spill] sm:$0xff] %v21651_v3 }
 0x20d   :  { %v17801_v47 = vpop.f32.mrf.mxu0  ;;  %28797 = vst [vmem:[#allocation21_spill] sm:$0xff] %v21666_v45  ;;  %v17869_v11 = vpop.f32.mrf.mxu1 }
 0x20e   :  { %v21656_v17 = vadd.f32 %v17857_v23, %v17801_v47 }
 0x20f   :  { %v21661_v41 = vpop.f32.mrf.mxu0  ;;  %v21681_v46 = vpop.f32.mrf.mxu1 }
 0x210   :  { %28795 = vst [vmem:[#allocation44_spill] sm:$0xff] %v21656_v17  ;;  %28796 = vst [vmem:[#allocation5_spill] sm:$0xff] %v21661_v41 }
 0x211   :  { %v17804_v52 = vpop.f32.mrf.mxu0  ;;  %28802 = vst [vmem:[#allocation22_spill] sm:$0xff] %v21681_v46  ;;  %v17872_v50 = vpop.f32.mrf.mxu1 }
 0x212   :  { %v21668_v25 = vadd.f32 %v17860_v2, %v17804_v52 }
 0x213   :  { %v21673_v10 = vpop.f32.mrf.mxu0  ;;  %v21691_v8 = vpop.f32.mrf.mxu1 }
 0x214   :  { %28798 = vst [vmem:[#allocation38_spill] sm:$0xff] %v21668_v25  ;;  %28799 = vst [vmem:[#allocation24_spill] sm:$0xff] %v21673_v10 }
 0x215   :  { %v17807_v19 = vpop.f32.mrf.mxu0  ;;  %28807 = vst [vmem:[#allocation23_spill] sm:$0xff] %v21691_v8  ;;  %v17875_v32 = vpop.f32.mrf.mxu1 }
 0x216   :  { %v21677_v60 = vadd.f32 %v17863_v20, %v17807_v19 }
 0x217   :  { %v21679_v37 = vpop.f32.mrf.mxu0 }
 0x218   :  { %28800 = vst [vmem:[#allocation8_spill] sm:$0xff] %v21677_v60  ;;  %28801 = vst [vmem:[#allocation6_spill] sm:$0xff] %v21679_v37 }
 0x219   :  { %v17810_v62 = vpop.f32.mrf.mxu0 }
 0x21a   :  { %v21683_v7 = vadd.f32 %v17866_v35, %v17810_v62 }
 0x21b   :  { %v21685_v21 = vpop.f32.mrf.mxu0 }
 0x21c   :  { %28803 = vst [vmem:[#allocation3_spill] sm:$0xff] %v21683_v7  ;;  %28804 = vst [vmem:[#allocation42_spill] sm:$0xff] %v21685_v21 }
 0x21d   :  { %v17813_v22 = vpop.f32.mrf.mxu0 }
 0x21e   :  { %v21687_v29 = vadd.f32 %v17869_v11, %v17813_v22 }
 0x21f   :  { %v21689_v42 = vpop.f32.mrf.mxu0 }
 0x220   :  { %28805 = vst [vmem:[#allocation40_spill] sm:$0xff] %v21687_v29  ;;  %28806 = vst [vmem:[#allocation7_spill] sm:$0xff] %v21689_v42 }
 0x221   :  { %v17816_v57 = vpop.f32.mrf.mxu0 }
 0x222   :  { %v21693_v54 = vadd.f32 %v17872_v50, %v17816_v57 }
 0x223   :  { %v21695_v27 = vpop.f32.mrf.mxu0 }
 0x224   :  { %28808 = vst [vmem:[#allocation41_spill] sm:$0xff] %v21693_v54  ;;  %28809 = vst [vmem:[#allocation28_spill] sm:$0xff] %v21695_v27 }
 0x225   :  { %v17819_v18 = vpop.f32.mrf.mxu0 }
 0x226   :  { %v21697_v40 = vadd.f32 %v17875_v32, %v17819_v18 }
 0x227   :  { %v21699_v63 = vpop.f32.mrf.mxu0 }
 0x228   :  { %28810 = vst [vmem:[#allocation12_spill] sm:$0xff] %v21697_v40  ;;  %28811 = vst [vmem:[#allocation43_spill] sm:$0xff] %v21699_v63 }
 0x229   :  { %v17888_v16 = vpop.f32.mrf.mxu0 }
 0x22b   :  { %v21701_v30 = vpop.f32.mrf.mxu0 }
 0x22d   :  { %v21703_v61 = vpop.f32.mrf.mxu0 }
 0x22f   :  { %v21705_v1 = vpop.f32.mrf.mxu0 }
 0x231   :  { %v21707_v13 = vpop.f32.mrf.mxu0 }
 0x233   :  { %v21709_v14 = vpop.f32.mrf.mxu0 }
 0x235   :  { %v21711_v38 = vpop.f32.mrf.mxu0 }
 0x237   :  { %v21713_v15 = vpop.f32.mrf.mxu0 }
 0x239   :  { %v21715_v51 = vpop.f32.mrf.mxu0 }
 0x23b   :  { %v21717_v23 = vpop.f32.mrf.mxu0 }
 0x23d   :  { %v21719_v55 = vpop.f32.mrf.mxu0 }
 0x23f   :  { %v21721_v9 = vpop.f32.mrf.mxu0 }
 0x241   :  { %v21723_v2 = vpop.f32.mrf.mxu0 }
 0x243   :  { %v21725_v43 = vpop.f32.mrf.mxu0 }
 0x245   :  { %v21727_v0 = vpop.f32.mrf.mxu0 }
 0x246   :  { %28812 = vst [vmem:[#allocation9_spill] sm:$0xff] %v21727_v0 }
 0x247   :  { %v21729_v20 = vpop.f32.mrf.mxu0 }
 0x248   :  { %28813 = vst [vmem:[#allocation25_spill] sm:$0xff] %v21729_v20 }
 0x249   :  { %v17912_v58 = vpop.f32.mrf.mxu0 }
 0x24a   :  { %v2450_v26 = vmax.f32 %v17888_v16, %v17912_v58 }
 0x24b   :  { %v2210_v4 = vpop.f32.mrf.mxu0 }
 0x24c   :  { %v2449_v48 = vmax.f32 %v21701_v30, %v2210_v4 }
 0x24d   :  { %v17915_v31 = vpop.f32.mrf.mxu0 }
 0x24e   :  { %v2452_v5 = vmax.f32 %v21703_v61, %v17915_v31 }
 0x24f   :  { %v2220_v35 = vpop.f32.mrf.mxu0 }
 0x250   :  { %v2451_v17 = vmax.f32 %v21705_v1, %v2220_v35 }
 0x251   :  { %v17918_v47 = vpop.f32.mrf.mxu0 }
 0x252   :  { %v2454_v24 = vmax.f32 %v21707_v13, %v17918_v47 }
 0x253   :  { %v2230_v6 = vpop.f32.mrf.mxu0 }
 0x255   :  { %v21733_v52 = vpop.f32.mrf.mxu0 }
 0x257   :  { %v21737_v11 = vpop.f32.mrf.mxu0 }
 0x259   :  { %v21739_v19 = vpop.f32.mrf.mxu0 }
 0x25b   :  { %v21743_v50 = vpop.f32.mrf.mxu0 }
 0x25d   :  { %v21745_v22 = vpop.f32.mrf.mxu0 }
 0x25f   :  { %v21749_v32 = vpop.f32.mrf.mxu0 }
 0x261   :  { %v21751_v18 = vpop.f32.mrf.mxu0 }
 0x263   :  { %v21755_v61 = vpop.f32.mrf.mxu0 }
 0x265   :  { %v21757_v13 = vpop.f32.mrf.mxu0 }
 0x266   :  { %28814 = vst [vmem:[#allocation10_spill] sm:$0xff] %v21757_v13 }
 0x267   :  { %v21761_v31 = vpop.f32.mrf.mxu0 }
 0x268   :  { %28815 = vst [vmem:[#allocation26_spill] sm:$0xff] %v21761_v31 }
 0x269   :  { %v17936_v47 = vpop.f32.mrf.mxu0 }
 0x26b   :  { %v2290_v62 = vpop.f32.mrf.mxu0 }
 0x26d   :  { %v17939_v36 = vpop.f32.mrf.mxu0 }
 0x26f   :  { %v2300_v57 = vpop.f32.mrf.mxu0 }
 0x271   :  { %v17942_v63 = vpop.f32.mrf.mxu0 }
 0x273   :  { %v2310_v8 = vpop.f32.mrf.mxu0 }
 0x275   :  { %v17945_v27 = vpop.f32.mrf.mxu0 }
 0x277   :  { %v2320_v46 = vpop.f32.mrf.mxu0 }
 0x279   :  { %v21763_v42 = vpop.f32.mrf.mxu0 }
 0x27b   :  { %v21765_v16 = vpop.f32.mrf.mxu0 }
 0x27d   :  { %v21767_v45 = vpop.f32.mrf.mxu0 }
 0x27f   :  { %v21769_v21 = vpop.f32.mrf.mxu0 }
 0x281   :  { %v21771_v59 = vpop.f32.mrf.mxu0 }
 0x283   :  { %v21773_v58 = vpop.f32.mrf.mxu0 }
 0x285   :  { %v21775_v37 = vpop.f32.mrf.mxu0 }
 0x287   :  { %v21777_v12 = vpop.f32.mrf.mxu0 }
 0x288   :  { %28816 = vst [vmem:[#allocation45_spill] sm:$0xff] %v21777_v12 }
 0x289   :  { %v17960_v10 = vpop.f32.mrf.mxu0 }
 0x28a   :  { %v2466_v53 = vmax.f32 %v17936_v47, %v17960_v10 }
 0x28b   :  { %v2370_v41 = vpop.f32.mrf.mxu0 }
 0x28c   :  { %v2482_v3 = vmax.f32 %v2450_v26, %v2466_v53  ;;  %v2465_v40 = vmax.f32 %v2290_v62, %v2370_v41 }
 0x28d   :  { %v17963_v54 = vpop.f32.mrf.mxu0 }
 0x28e   :  { %v2481_v29 = vmax.f32 %v2449_v48, %v2465_v40  ;;  %v2468_v7 = vmax.f32 %v17939_v36, %v17963_v54  ;;  %v2498_v60 = vadd.f32 %v21158_v34, %v2482_v3  ;;  %v2453_v48 = vmax.f32 %v21709_v14, %v2230_v6 }
 0x28f   :  { %v2380_v25 = vpop.f32.mrf.mxu0  ;;  %v2459_v36 = vmax.f32 %v21721_v9, %v21749_v32  ;;  %v2461_v9 = vmax.f32 %v21725_v43, %v21755_v61  ;;  %v28821_v43 = vld [vmem:[#allocation26_spill] sm:$0xff]  ;;  %v28822_v61 = vld [vmem:[#allocation25_spill] sm:$0xff] }
 0x290   :  { %v2484_v56 = vmax.f32 %v2452_v5, %v2468_v7  ;;  %v2467_v13 = vmax.f32 %v2300_v57, %v2380_v25  ;;  %v2497_v0 = vadd.f32 %v21158_v34, %v2481_v29  ;;  %v2514_v31 = vmax.f32 %v2498_v60, 0.0  ;;  %v21794_v29 = vld [vmem:[%s28654_s2] ss:$0 sm:$0xff] }
 0x291   :  { %v17966_v12 = vpop.f32.mrf.mxu0 }
 0x292   :  { %v2483_v20 = vmax.f32 %v2451_v17, %v2467_v13  ;;  %v2470_v10 = vmax.f32 %v17942_v63, %v17966_v12  ;;  %v2513_v47 = vmax.f32 %v2497_v0, 0.0  ;;  %v2500_v53 = vadd.f32 %v21158_v34, %v2484_v56 }
 0x293   :  { %v2390_v30 = vpop.f32.mrf.mxu0  ;;  %v2455_v17 = vmax.f32 %v21713_v15, %v21737_v11 }
 0x294   :  { %v2486_v41 = vmax.f32 %v2454_v24, %v2470_v10  ;;  %v2469_v54 = vmax.f32 %v2310_v8, %v2390_v30  ;;  %18014 = vmatprep.mubr.f32.mxu1 %v2513_v47  ;;  %v2499_v3 = vadd.f32 %v21158_v34, %v2483_v20  ;;  %v2516_v56 = vmax.f32 %v2500_v53, 0.0 }
 0x295   :  { %v17969_v40 = vpop.f32.mrf.mxu0  ;;  %18015 = vmatmul.mubr.f32.vlgmr.msra.gmra.mxu1 %v2514_v31  ;;  %v28817_v8 = vmax.f32 %v21711_v38, %v21733_v52  ;;  %v2457_v38 = vmax.f32 %v21717_v23, %v21743_v50 }
 0x296   :  { %v2485_v25 = vmax.f32 %v2453_v48, %v2469_v54  ;;  %v2472_v7 = vmax.f32 %v17945_v27, %v17969_v40  ;;  %18039 = vmatpush3.msk.msra.mxu1 %vm289_vm0, %v21267_v28  ;;  %v2515_v12 = vmax.f32 %v2499_v3, 0.0  ;;  %v2502_v34 = vadd.f32 %v21794_v29, %v2486_v41  ;;  %v28826_v40 = vld [vmem:[#allocation45_spill] sm:$0xff] }
 0x297   :  { %v2400_v60 = vpop.f32.mrf.mxu0  ;;  %18040 = vmatprep.subr.mxu1 %v21278_v33  ;;  %v2463_v54 = vmax.f32 %v28822_v61, %v28821_v43  ;;  %v2748_v43 = vld [vmem:[%s28652_s0 + $0x748] sm:$0xff]  ;;  %v2749_v61 = vld [vmem:[%s28652_s0 + $0x750] sm:$0xff] }
 0x298   :  { %v2488_v27 = vmax.f32 %v28817_v8, %v2472_v7  ;;  %v2471_v28 = vmax.f32 %v2320_v46, %v2400_v60  ;;  %18017 = vmatprep.mubr.f32.mxu1 %v2515_v12  ;;  %v2501_v63 = vadd.f32 %v21794_v29, %v2485_v25  ;;  %18041 = vmatpush3.msra.mxu1 %v21278_v33  ;;  %v2518_v46 = vmax.f32 %v2502_v34, 0.0 }
 0x299   :  { %v17972_v1 = vpop.f32.mrf.mxu0  ;;  %18018 = vmatmul.mubr.f32.gmra.mxu1 %v2516_v56  ;;  %18042 = vmatprep.subr.mxu1 %v21295_v39  ;;  %v28818_v33 = vmax.f32 %v21715_v51, %v21739_v19 }
 0x29a   :  { %v2487_v14 = vmax.f32 %v2455_v17, %v2471_v28  ;;  %v2474_v15 = vmax.f32 %v21763_v42, %v17972_v1  ;;  %v2517_v0 = vmax.f32 %v2501_v63, 0.0  ;;  %18043 = vmatpush3.msra.mxu1 %v21295_v39  ;;  %v2504_v26 = vadd.f32 %v21794_v29, %v2488_v27  ;;  %v2707_v27 = vld [vmem:[%s28652_s0 + $0x600] sm:$0xff]  ;;  %v2708_v28 = vld [vmem:[%s28652_s0 + $0x608] sm:$0xff]  ;;  %v2709_v63 = vld [vmem:[%s28652_s0 + $0x610] sm:$0xff] }
 0x29b   :  { %v2410_v20 = vpop.f32.mrf.mxu0  ;;  %18044 = vmatprep.subr.mxu1 %v21309_v44  ;;  %v2710_v1 = vld [vmem:[%s28652_s0 + $0x618] sm:$0xff] }
 0x29c   :  { %v2490_v4 = vmax.f32 %v28818_v33, %v2474_v15  ;;  %v2473_v5 = vmax.f32 %v21765_v16, %v2410_v20  ;;  %18020 = vmatprep.mubr.f32.mxu1 %v2517_v0  ;;  %v2503_v42 = vadd.f32 %v21794_v29, %v2487_v14  ;;  %18045 = vmatpush3.msra.mxu1 %v21309_v44  ;;  %v2520_v51 = vmax.f32 %v2504_v26, 0.0  ;;  %v2711_v14 = vld [vmem:[%s28652_s0 + $0x620] sm:$0xff]  ;;  %v2712_v15 = vld [vmem:[%s28652_s0 + $0x628] sm:$0xff]  ;;  %v2713_v0 = vld [vmem:[%s28652_s0 + $0x630] sm:$0xff] }
 0x29d   :  { %v17975_v39 = vpop.f32.mrf.mxu0  ;;  %18021 = vmatmul.mubr.f32.gmra.mxu1 %v2518_v46  ;;  %18046 = vmatprep.subr.mxu1 %v21320_v49  ;;  %v28819_v44 = vmax.f32 %v21719_v55, %v21745_v22  ;;  %v28820_v55 = vmax.f32 %v21723_v2, %v21751_v18  ;;  %v28823_v2 = vld [vmem:[#allocation9_spill] sm:$0xff]  ;;  %v28824_v18 = vld [vmem:[#allocation10_spill] sm:$0xff]  ;;  %v2716_v46 = vld [vmem:[%s28652_s0 + $0x648] sm:$0xff] }
 0x29e   :  { %v2489_v23 = vmax.f32 %v2457_v38, %v2473_v5  ;;  %v2476_v35 = vmax.f32 %v21767_v45, %v17975_v39  ;;  %v2519_v24 = vmax.f32 %v2503_v42, 0.0  ;;  %18047 = vmatpush3.msra.mxu1 %v21320_v49  ;;  %v2506_v52 = vadd.f32 %v21794_v29, %v2490_v4  ;;  %v2714_v38 = vld [vmem:[%s28652_s0 + $0x638] sm:$0xff]  ;;  %v2715_v20 = vld [vmem:[%s28652_s0 + $0x640] sm:$0xff]  ;;  %v2717_v26 = vld [vmem:[%s28652_s0 + $0x650] sm:$0xff] }
 0x29f   :  { %v2420_v6 = vpop.f32.mrf.mxu0  ;;  %v28825_v3 = vmax.f32 %v28823_v2, %v28824_v18  ;;  %v2718_v33 = vld [vmem:[%s28652_s0 + $0x658] sm:$0xff]  ;;  %v2719_v4 = vld [vmem:[%s28652_s0 + $0x660] sm:$0xff]  ;;  %v2720_v5 = vld [vmem:[%s28652_s0 + $0x668] sm:$0xff] }
 0x2a0   :  { %v2492_v11 = vmax.f32 %v28819_v44, %v2476_v35  ;;  %v2475_v19 = vmax.f32 %v21769_v21, %v2420_v6  ;;  %18023 = vmatprep.mubr.f32.mxu1 %v2519_v24  ;;  %v2505_v62 = vadd.f32 %v21794_v29, %v2489_v23  ;;  %v2522_v13 = vmax.f32 %v2506_v52, 0.0  ;;  %v2721_v42 = vld [vmem:[%s28652_s0 + $0x670] sm:$0xff]  ;;  %v2722_v39 = vld [vmem:[%s28652_s0 + $0x678] sm:$0xff]  ;;  %v2723_v23 = vld [vmem:[%s28652_s0 + $0x680] sm:$0xff] }
 0x2a1   :  { %v17978_v45 = vpop.f32.mrf.mxu0  ;;  %18024 = vmatmul.mubr.f32.gmra.mxu1 %v2520_v51  ;;  %v2724_v35 = vld [vmem:[%s28652_s0 + $0x688] sm:$0xff]  ;;  %v2725_v24 = vld [vmem:[%s28652_s0 + $0x690] sm:$0xff]  ;;  %v2726_v6 = vld [vmem:[%s28652_s0 + $0x698] sm:$0xff] }
 0x2a2   :  { %v2491_v50 = vmax.f32 %v2459_v36, %v2475_v19  ;;  %v2478_v49 = vmax.f32 %v21771_v59, %v17978_v45  ;;  %v2521_v57 = vmax.f32 %v2505_v62, 0.0  ;;  %v2508_v31 = vadd.f32 %v21794_v29, %v2492_v11  ;;  %v2727_v51 = vld [vmem:[%s28652_s0 + $0x6a0] sm:$0xff]  ;;  %v2728_v52 = vld [vmem:[%s28652_s0 + $0x6a8] sm:$0xff]  ;;  %v2729_v36 = vld [vmem:[%s28652_s0 + $0x6b0] sm:$0xff] }
 0x2a3   :  { %v2430_v16 = vpop.f32.mrf.mxu0  ;;  %v2730_v44 = vld [vmem:[%s28652_s0 + $0x6b8] sm:$0xff]  ;;  %v2731_v11 = vld [vmem:[%s28652_s0 + $0x6c0] sm:$0xff]  ;;  %v2732_v19 = vld [vmem:[%s28652_s0 + $0x6c8] sm:$0xff] }
 0x2a4   :  { %v2494_v21 = vmax.f32 %v28820_v55, %v2478_v49  ;;  %v2477_v22 = vmax.f32 %v21773_v58, %v2430_v16  ;;  %18026 = vmatprep.mubr.f32.mxu1 %v2521_v57  ;;  %v2507_v32 = vadd.f32 %v21794_v29, %v2491_v50  ;;  %v2524_v48 = vmax.f32 %v2508_v31, 0.0  ;;  %v14929_v62 = vld [vmem:[%s28653_s3 + $0x1f8] sm:$0xff]  ;;  %v2733_v45 = vld [vmem:[%s28652_s0 + $0x6d0] sm:$0xff]  ;;  %v2735_v49 = vld [vmem:[%s28652_s0 + $0x6e0] sm:$0xff] }
 0x2a5   :  { %v17981_v10 = vpop.f32.mrf.mxu0  ;;  %18027 = vmatmul.mubr.f32.gmra.mxu1 %v2522_v13  ;;  %18144 = vmatprep.subr.mxu0 %v14929_v62  ;;  %v2734_v50 = vld [vmem:[%s28652_s0 + $0x6d8] sm:$0xff]  ;;  %v2736_v57 = vld [vmem:[%s28652_s0 + $0x6e8] sm:$0xff]  ;;  %v14928_v16 = vld [vmem:[%s28653_s3 + $0x1f0] sm:$0xff] }
 0x2a6   :  { %v2493_v59 = vmax.f32 %v2461_v9, %v2477_v22  ;;  %v2480_v47 = vmax.f32 %v21775_v37, %v17981_v10  ;;  %v2523_v30 = vmax.f32 %v2507_v32, 0.0  ;;  %v2510_v41 = vadd.f32 %v21794_v29, %v2494_v21  ;;  %18145 = vmatpush3.msra.mxu0 %v14929_v62  ;;  %v2737_v13 = vld [vmem:[%s28652_s0 + $0x6f0] sm:$0xff]  ;;  %v2738_v31 = vld [vmem:[%s28652_s0 + $0x6f8] sm:$0xff]  ;;  %v2739_v9 = vld [vmem:[%s28652_s0 + $0x700] sm:$0xff] }
 0x2a7   :  { %v2440_v53 = vpop.f32.mrf.mxu0  ;;  %18146 = vmatprep.subr.mxu0 %v14928_v16  ;;  %v2740_v55 = vld [vmem:[%s28652_s0 + $0x708] sm:$0xff]  ;;  %v2741_v22 = vld [vmem:[%s28652_s0 + $0x710] sm:$0xff]  ;;  %v2742_v32 = vld [vmem:[%s28652_s0 + $0x718] sm:$0xff] }
 0x2a8   :  { %v2496_v58 = vmax.f32 %v28825_v3, %v2480_v47  ;;  %v2479_v25 = vmax.f32 %v28826_v40, %v2440_v53  ;;  %18029 = vmatprep.mubr.f32.mxu1 %v2523_v30  ;;  %v2509_v7 = vadd.f32 %v21794_v29, %v2493_v59  ;;  %v2526_v17 = vmax.f32 %v2510_v41, 0.0  ;;  %18147 = vmatpush3.msra.mxu0 %v14928_v16  ;;  %v14927_v21 = vld [vmem:[%s28653_s3 + $0x1e8] sm:$0xff]  ;;  %v2743_v10 = vld [vmem:[%s28652_s0 + $0x720] sm:$0xff]  ;;  %v2745_v30 = vld [vmem:[%s28652_s0 + $0x730] sm:$0xff] }
 0x2a9   :  { %18030 = vmatmul.mubr.f32.gmra.mxu1 %v2524_v48  ;;  %18148 = vmatprep.subr.mxu0 %v14927_v21  ;;  %v14926_v59 = vld [vmem:[%s28653_s3 + $0x1e0] sm:$0xff]  ;;  %v2744_v47 = vld [vmem:[%s28652_s0 + $0x728] sm:$0xff]  ;;  %v2746_v53 = vld [vmem:[%s28652_s0 + $0x738] sm:$0xff] }
 0x2aa   :  { %v2495_v12 = vmax.f32 %v2463_v54, %v2479_v25  ;;  %v2525_v37 = vmax.f32 %v2509_v7, 0.0  ;;  %v2512_v60 = vadd.f32 %v21794_v29, %v2496_v58  ;;  %18149 = vmatpush3.msra.mxu0 %v14927_v21  ;;  %v2747_v48 = vld [vmem:[%s28652_s0 + $0x740] sm:$0xff]  ;;  %v14925_v41 = vld [vmem:[%s28653_s3 + $0x1d8] sm:$0xff]  ;;  %v14924_v18 = vld [vmem:[%s28653_s3 + $0x1d0] sm:$0xff] }
 0x2ab   :  { %18150 = vmatprep.subr.mxu0 %v14926_v59  ;;  %v2750_v54 = vld [vmem:[%s28652_s0 + $0x758] sm:$0xff]  ;;  %v2751_v2 = vld [vmem:[%s28652_s0 + $0x760] sm:$0xff]  ;;  %v2752_v3 = vld [vmem:[%s28652_s0 + $0x768] sm:$0xff] }
 0x2ac   :  { %18032 = vmatprep.mubr.f32.mxu1 %v2525_v37  ;;  %v2511_v56 = vadd.f32 %v21794_v29, %v2495_v12  ;;  %v2528_v8 = vmax.f32 %v2512_v60, 0.0  ;;  %18151 = vmatpush3.msra.mxu0 %v14926_v59  ;;  %v2753_v58 = vld [vmem:[%s28652_s0 + $0x770] sm:$0xff]  ;;  %v2754_v40 = vld [vmem:[%s28652_s0 + $0x778] sm:$0xff]  ;;  %v2755_v25 = vld [vmem:[%s28652_s0 + $0x780] sm:$0xff] }
 0x2ad   :  { %18033 = vmatmul.mubr.f32.gmra.mxu1 %v2526_v17  ;;  %18152 = vmatprep.subr.mxu0 %v14925_v41  ;;  %v14923_v7 = vld [vmem:[%s28653_s3 + $0x1c8] sm:$0xff]  ;;  %v2757_v37 = vld [vmem:[%s28652_s0 + $0x790] sm:$0xff]  ;;  %v2758_v17 = vld [vmem:[%s28652_s0 + $0x798] sm:$0xff] }
 0x2ae   :  { %v2527_v34 = vmax.f32 %v2511_v56, 0.0  ;;  %18153 = vmatpush3.msra.mxu0 %v14925_v41  ;;  %v2756_v12 = vld [vmem:[%s28652_s0 + $0x788] sm:$0xff]  ;;  %v2759_v60 = vld [vmem:[%s28652_s0 + $0x7a0] sm:$0xff]  ;;  %v28843_v59 = vld [vmem:[#allocation40_spill] sm:$0xff] }
 0x2af   :  { %18154 = vmatprep.subr.mxu0 %v14924_v18  ;;  %v2760_v56 = vld [vmem:[%s28652_s0 + $0x7a8] sm:$0xff]  ;;  %v28834_v62 = vld [vmem:[#allocation38_spill] sm:$0xff] }
 0x2b0   :  { %18035 = vmatprep.mubr.f32.mxu1 %v2527_v34  ;;  %18155 = vmatpush3.msra.mxu0 %v14924_v18  ;;  %v14922_v34 = vld [vmem:[%s28653_s3 + $0x1c0] sm:$0xff]  ;;  %v28840_v21 = vld [vmem:[#allocation3_spill] sm:$0xff] }
 0x2b1   :  { %18036 = vmatmul.mubr.f32.gmra.mxu1 %v2528_v8  ;;  %18156 = vmatprep.subr.mxu0 %v14923_v7  ;;  %v2761_v8 = vld [vmem:[%s28652_s0 + $0x7b0] sm:$0xff]  ;;  %v22170_v16 = vld [vmem:[%s28651_s1 + $0x20] sm:$0xf] }
 0x2b2   :  { %18048 = vmatprep.mubr.msk.f32.mxu1 %vm96_vm1, %v2707_v27  ;;  %18157 = vmatpush3.msra.mxu0 %v14923_v7  ;;  %v2762_v27 = vld [vmem:[%s28652_s0 + $0x7b8] sm:$0xff] }
 0x2b3   :  { %18158 = vmatprep.subr.mxu0 %v14922_v34 }
 0x2b4   :  { %18159 = vmatpush3.msra.mxu0 %v14922_v34 }
 0x2b5   :  { %18049 = vmatmul.mubr.msk.f32.vlgmr.msra.gmra.mxu1 %vm96_vm1, %v2708_v28  ;;  %v2763_v28 = vld [vmem:[%s28652_s0 + $0x7c0] sm:$0xff] }
 0x2b6   :  { %18051 = vmatprep.mubr.msk.f32.mxu1 %vm96_vm1, %v2709_v63  ;;  %v2764_v63 = vld [vmem:[%s28652_s0 + $0x7c8] sm:$0xff] }
 0x2b9   :  { %18052 = vmatmul.mubr.msk.f32.gmra.mxu1 %vm96_vm1, %v2710_v1  ;;  %v14921_v1 = vld [vmem:[%s28653_s3 + $0x1b8] sm:$0xff] }
 0x2ba   :  { %18054 = vmatprep.mubr.msk.f32.mxu1 %vm96_vm1, %v2711_v14  ;;  %v2765_v14 = vld [vmem:[%s28652_s0 + $0x7d0] sm:$0xff]  ;;  %18160 = vmatprep.subr.mxu0 %v14921_v1 }
 0x2bb   :  { %18161 = vmatpush3.msra.mxu0 %v14921_v1 }
 0x2bd   :  { %18055 = vmatmul.mubr.msk.f32.gmra.mxu1 %vm96_vm1, %v2712_v15  ;;  %v2766_v15 = vld [vmem:[%s28652_s0 + $0x7d8] sm:$0xff] }
 0x2be   :  { %18057 = vmatprep.mubr.msk.f32.mxu1 %vm96_vm1, %v2713_v0  ;;  %v2767_v0 = vld [vmem:[%s28652_s0 + $0x7e0] sm:$0xff] }
 0x2c1   :  { %18058 = vmatmul.mubr.msk.f32.gmra.mxu1 %vm96_vm1, %v2714_v38  ;;  %v2768_v38 = vld [vmem:[%s28652_s0 + $0x7e8] sm:$0xff] }
 0x2c2   :  { %18060 = vmatprep.mubr.msk.f32.mxu1 %vm96_vm1, %v2715_v20  ;;  %v14920_v20 = vld [vmem:[%s28653_s3 + $0x1b0] sm:$0xff] }
 0x2c3   :  { %18162 = vmatprep.subr.mxu0 %v14920_v20 }
 0x2c4   :  { %18163 = vmatpush3.msra.mxu0 %v14920_v20 }
 0x2c5   :  { %18061 = vmatmul.mubr.msk.f32.gmra.mxu1 %vm96_vm1, %v2716_v46  ;;  %v2769_v46 = vld [vmem:[%s28652_s0 + $0x7f0] sm:$0xff] }
 0x2c6   :  { %18063 = vmatprep.mubr.msk.f32.mxu1 %vm96_vm1, %v2717_v26  ;;  %v2770_v26 = vld [vmem:[%s28652_s0 + $0x7f8] sm:$0xff] }
 0x2c9   :  { %18064 = vmatmul.mubr.msk.f32.gmra.mxu1 %vm96_vm1, %v2718_v33  ;;  %v14919_v33 = vld [vmem:[%s28653_s3 + $0x1a8] sm:$0xff] }
 0x2ca   :  { %18066 = vmatprep.mubr.msk.f32.mxu1 %vm96_vm1, %v2719_v4  ;;  %18164 = vmatprep.subr.mxu0 %v14919_v33  ;;  %v14918_v4 = vld [vmem:[%s28653_s3 + $0x1a0] sm:$0xff] }
 0x2cb   :  { %18165 = vmatpush3.msra.mxu0 %v14919_v33 }
 0x2cc   :  { %18166 = vmatprep.subr.mxu0 %v14918_v4 }
 0x2cd   :  { %18067 = vmatmul.mubr.msk.f32.gmra.mxu1 %vm96_vm1, %v2720_v5  ;;  %18167 = vmatpush3.msra.mxu0 %v14918_v4  ;;  %v14917_v5 = vld [vmem:[%s28653_s3 + $0x198] sm:$0xff] }
 0x2ce   :  { %18069 = vmatprep.mubr.msk.f32.mxu1 %vm96_vm1, %v2721_v42  ;;  %18168 = vmatprep.subr.mxu0 %v14917_v5  ;;  %v14916_v42 = vld [vmem:[%s28653_s3 + $0x190] sm:$0xff] }
 0x2cf   :  { %18169 = vmatpush3.msra.mxu0 %v14917_v5 }
 0x2d0   :  { %18170 = vmatprep.subr.mxu0 %v14916_v42 }
 0x2d1   :  { %18070 = vmatmul.mubr.msk.f32.gmra.mxu1 %vm96_vm1, %v2722_v39  ;;  %18171 = vmatpush3.msra.mxu0 %v14916_v42  ;;  %v14915_v39 = vld [vmem:[%s28653_s3 + $0x188] sm:$0xff] }
 0x2d2   :  { %18072 = vmatprep.mubr.msk.f32.mxu1 %vm96_vm1, %v2723_v23  ;;  %18172 = vmatprep.subr.mxu0 %v14915_v39  ;;  %v22147_v23 = vpop.f32.mrf.mxu1 }
 0x2d3   :  { %28827 = vst [vmem:[#allocation30_spill] sm:$0xff] %v22147_v23  ;;  %18173 = vmatpush3.msra.mxu0 %v14915_v39 }
 0x2d5   :  { %18073 = vmatmul.mubr.msk.f32.gmra.mxu1 %vm96_vm1, %v2724_v35 }
 0x2d6   :  { %18075 = vmatprep.mubr.msk.f32.mxu1 %vm96_vm1, %v2725_v24  ;;  %v28828_v24 = vld [vmem:[#allocation37_spill] sm:$0xff] }
 0x2d9   :  { %18076 = vmatmul.mubr.msk.f32.gmra.mxu1 %vm96_vm1, %v2726_v6 }
 0x2da   :  { %18078 = vmatprep.mubr.msk.f32.mxu1 %vm96_vm1, %v2727_v51 }
 0x2dd   :  { %18079 = vmatmul.mubr.msk.f32.gmra.mxu1 %vm96_vm1, %v2728_v52 }
 0x2de   :  { %18081 = vmatprep.mubr.msk.f32.mxu1 %vm96_vm1, %v2729_v36  ;;  %v28831_v36 = vld [vmem:[#allocation44_spill] sm:$0xff] }
 0x2e1   :  { %18082 = vmatmul.mubr.msk.f32.gmra.mxu1 %vm96_vm1, %v2730_v44 }
 0x2e2   :  { %18084 = vmatprep.mubr.msk.f32.mxu1 %vm96_vm1, %v2731_v11 }
 0x2e5   :  { %18085 = vmatmul.mubr.msk.f32.gmra.mxu1 %vm96_vm1, %v2732_v19 }
 0x2e6   :  { %18087 = vmatprep.mubr.msk.f32.mxu1 %vm96_vm1, %v2733_v45 }
 0x2e9   :  { %18088 = vmatmul.mubr.msk.f32.gmra.mxu1 %vm96_vm1, %v2734_v50  ;;  %v14914_v50 = vld [vmem:[%s28653_s3 + $0x180] sm:$0xff] }
 0x2ea   :  { %18090 = vmatprep.mubr.msk.f32.mxu1 %vm96_vm1, %v2735_v49  ;;  %18174 = vmatprep.subr.mxu0 %v14914_v50 }
 0x2eb   :  { %18175 = vmatpush3.msra.mxu0 %v14914_v50 }
 0x2ec   :  { %18200 = vmatprep.subr.msk.mxu0 %vm289_vm0, %v22170_v16 }
 0x2ed   :  { %18091 = vmatmul.mubr.msk.f32.gmra.mxu1 %vm96_vm1, %v2736_v57 }
 0x2ee   :  { %18093 = vmatprep.mubr.msk.f32.mxu1 %vm96_vm1, %v2737_v13  ;;  %v28837_v13 = vld [vmem:[#allocation8_spill] sm:$0xff] }
 0x2f1   :  { %18094 = vmatmul.mubr.msk.f32.gmra.mxu1 %vm96_vm1, %v2738_v31 }
 0x2f2   :  { %18096 = vmatprep.mubr.msk.f32.mxu1 %vm96_vm1, %v2739_v9 }
 0x2f5   :  { %18097 = vmatmul.mubr.msk.f32.gmra.mxu1 %vm96_vm1, %v2740_v55 }
 0x2f6   :  { %18099 = vmatprep.mubr.msk.f32.mxu1 %vm96_vm1, %v2741_v22 }
 0x2f9   :  { %18100 = vmatmul.mubr.msk.f32.gmra.mxu1 %vm96_vm1, %v2742_v32 }
 0x2fa   :  { %18102 = vmatprep.mubr.msk.f32.mxu1 %vm96_vm1, %v2743_v10 }
 0x2fd   :  { %18103 = vmatmul.mubr.msk.f32.gmra.mxu1 %vm96_vm1, %v2744_v47 }
 0x2fe   :  { %18105 = vmatprep.mubr.msk.f32.mxu1 %vm96_vm1, %v2745_v30 }
 0x301   :  { %18106 = vmatmul.mubr.msk.f32.gmra.mxu1 %vm96_vm1, %v2746_v53 }
 0x302   :  { %18108 = vmatprep.mubr.msk.f32.mxu1 %vm96_vm1, %v2747_v48  ;;  %v28846_v48 = vld [vmem:[#allocation41_spill] sm:$0xff] }
 0x305   :  { %18109 = vmatmul.mubr.msk.f32.gmra.mxu1 %vm96_vm1, %v2748_v43 }
 0x306   :  { %18111 = vmatprep.mubr.msk.f32.mxu1 %vm96_vm1, %v2749_v61 }
 0x309   :  { %18112 = vmatmul.mubr.msk.f32.gmra.mxu1 %vm96_vm1, %v2750_v54  ;;  %v28849_v54 = vld [vmem:[#allocation12_spill] sm:$0xff] }
 0x30a   :  { %18114 = vmatprep.mubr.msk.f32.mxu1 %vm96_vm1, %v2751_v2 }
 0x30d   :  { %18115 = vmatmul.mubr.msk.f32.gmra.mxu1 %vm96_vm1, %v2752_v3 }
 0x30e   :  { %18117 = vmatprep.mubr.msk.f32.mxu1 %vm96_vm1, %v2753_v58 }
 0x311   :  { %18118 = vmatmul.mubr.msk.f32.gmra.mxu1 %vm96_vm1, %v2754_v40 }
 0x312   :  { %18120 = vmatprep.mubr.msk.f32.mxu1 %vm96_vm1, %v2755_v25 }
 0x315   :  { %18121 = vmatmul.mubr.msk.f32.gmra.mxu1 %vm96_vm1, %v2756_v12 }
 0x316   :  { %18123 = vmatprep.mubr.msk.f32.mxu1 %vm96_vm1, %v2757_v37 }
 0x319   :  { %18124 = vmatmul.mubr.msk.f32.gmra.mxu1 %vm96_vm1, %v2758_v17 }
 0x31a   :  { %18126 = vmatprep.mubr.msk.f32.mxu1 %vm96_vm1, %v2759_v60 }
 0x31d   :  { %18127 = vmatmul.mubr.msk.f32.gmra.mxu1 %vm96_vm1, %v2760_v56 }
 0x31e   :  { %18129 = vmatprep.mubr.msk.f32.mxu1 %vm96_vm1, %v2761_v8 }
 0x321   :  { %18130 = vmatmul.mubr.msk.f32.gmra.mxu1 %vm96_vm1, %v2762_v27 }
 0x322   :  { %18132 = vmatprep.mubr.msk.f32.mxu1 %vm96_vm1, %v2763_v28 }
 0x325   :  { %18133 = vmatmul.mubr.msk.f32.gmra.mxu1 %vm96_vm1, %v2764_v63 }
 0x326   :  { %18135 = vmatprep.mubr.msk.f32.mxu1 %vm96_vm1, %v2765_v14 }
 0x329   :  { %18136 = vmatmul.mubr.msk.f32.gmra.mxu1 %vm96_vm1, %v2766_v15 }
 0x32a   :  { %18138 = vmatprep.mubr.msk.f32.mxu1 %vm96_vm1, %v2767_v0 }
 0x32d   :  { %18139 = vmatmul.mubr.msk.f32.gmra.mxu1 %vm96_vm1, %v2768_v38 }
 0x32e   :  { %18141 = vmatprep.mubr.msk.f32.mxu1 %vm96_vm1, %v2769_v46 }
 0x331   :  { %18142 = vmatmul.mubr.msk.f32.gmra.mxu1 %vm96_vm1, %v2770_v26 }
 0x355   :  { %v18016_v35 = vpop.f32.mrf.mxu1 }
 0x356   :  { %v22150_v6 = vadd.f32 %v18016_v35, %v28828_v24 }
 0x357   :  { %v22152_v51 = vpop.f32.mrf.mxu1 }
 0x358   :  { %28829 = vst [vmem:[#allocation14_spill] sm:$0xff] %v22150_v6  ;;  %28830 = vst [vmem:[#allocation46_spill] sm:$0xff] %v22152_v51 }
 0x359   :  { %v18019_v52 = vpop.f32.mrf.mxu1 }
 0x35a   :  { %v22155_v44 = vadd.f32 %v18019_v52, %v28831_v36 }
 0x35b   :  { %v22157_v11 = vpop.f32.mrf.mxu1 }
 0x35c   :  { %28832 = vst [vmem:[#allocation13_spill] sm:$0xff] %v22155_v44  ;;  %28833 = vst [vmem:[#allocation29_spill] sm:$0xff] %v22157_v11 }
 0x35d   :  { %v18022_v19 = vpop.f32.mrf.mxu1 }
 0x35e   :  { %v22160_v45 = vadd.f32 %v18022_v19, %v28834_v62 }
 0x35f   :  { %v22165_v49 = vpop.f32.mrf.mxu1 }
 0x360   :  { %28835 = vst [vmem:[#allocation47_spill] sm:$0xff] %v22160_v45  ;;  %28836 = vst [vmem:[#allocation48_spill] sm:$0xff] %v22165_v49 }
 0x361   :  { %v18025_v57 = vpop.f32.mrf.mxu1 }
 0x362   :  { %v22175_v31 = vadd.f32 %v18025_v57, %v28837_v13 }
 0x363   :  { %v22177_v9 = vpop.f32.mrf.mxu1 }
 0x364   :  { %28838 = vst [vmem:[#allocation32_spill] sm:$0xff] %v22175_v31  ;;  %28839 = vst [vmem:[#allocation16_spill] sm:$0xff] %v22177_v9 }
 0x365   :  { %v18028_v55 = vpop.f32.mrf.mxu1 }
 0x366   :  { %v22180_v22 = vadd.f32 %v18028_v55, %v28840_v21 }
 0x367   :  { %v22182_v32 = vpop.f32.mrf.mxu1 }
 0x368   :  { %28841 = vst [vmem:[#allocation15_spill] sm:$0xff] %v22180_v22  ;;  %28842 = vst [vmem:[#allocation31_spill] sm:$0xff] %v22182_v32 }
 0x369   :  { %v18031_v10 = vpop.f32.mrf.mxu1 }
 0x36a   :  { %v22185_v47 = vadd.f32 %v18031_v10, %v28843_v59 }
 0x36b   :  { %v22187_v30 = vpop.f32.mrf.mxu1 }
 0x36c   :  { %28844 = vst [vmem:[#allocation34_spill] sm:$0xff] %v22185_v47  ;;  %28845 = vst [vmem:[#allocation18_spill] sm:$0xff] %v22187_v30 }
 0x36d   :  { %v18034_v53 = vpop.f32.mrf.mxu1 }
 0x36e   :  { %v22190_v41 = vadd.f32 %v18034_v53, %v28846_v48 }
 0x36f   :  { %v22192_v43 = vpop.f32.mrf.mxu1 }
 0x370   :  { %28847 = vst [vmem:[#allocation17_spill] sm:$0xff] %v22190_v41  ;;  %28848 = vst [vmem:[#allocation33_spill] sm:$0xff] %v22192_v43 }
 0x371   :  { %v18037_v61 = vpop.f32.mrf.mxu1 }
 0x372   :  { %v22195_v2 = vadd.f32 %v18037_v61, %v28849_v54 }
 0x373   :  { %v22197_v18 = vpop.f32.mrf.mxu1 }
 0x374   :  { %28850 = vst [vmem:[#allocation36_spill] sm:$0xff] %v22195_v2  ;;  %28851 = vst [vmem:[#allocation20_spill] sm:$0xff] %v22197_v18 }
 0x375   :  { %v18050_v3 = vpop.f32.mrf.mxu1 }
 0x377   :  { %v22199_v58 = vpop.f32.mrf.mxu1 }
 0x379   :  { %v22201_v40 = vpop.f32.mrf.mxu1 }
 0x37b   :  { %v22203_v25 = vpop.f32.mrf.mxu1 }
 0x37d   :  { %v22205_v7 = vpop.f32.mrf.mxu1 }
 0x37f   :  { %v22207_v12 = vpop.f32.mrf.mxu1 }
 0x381   :  { %v22209_v37 = vpop.f32.mrf.mxu1 }
 0x383   :  { %v22211_v17 = vpop.f32.mrf.mxu1 }
 0x385   :  { %v22213_v60 = vpop.f32.mrf.mxu1 }
 0x387   :  { %v22215_v56 = vpop.f32.mrf.mxu1 }
 0x389   :  { %v22217_v34 = vpop.f32.mrf.mxu1 }
 0x38b   :  { %v22219_v8 = vpop.f32.mrf.mxu1 }
 0x38d   :  { %v22221_v27 = vpop.f32.mrf.mxu1 }
 0x38f   :  { %v22223_v28 = vpop.f32.mrf.mxu1 }
 0x391   :  { %v22225_v63 = vpop.f32.mrf.mxu1 }
 0x393   :  { %v22227_v1 = vpop.f32.mrf.mxu1 }
 0x395   :  { %v18074_v14 = vpop.f32.mrf.mxu1 }
 0x396   :  { %v3349_v15 = vmax.f32 %v18050_v3, %v18074_v14 }
 0x397   :  { %v3109_v0 = vpop.f32.mrf.mxu1 }
 0x398   :  { %v3348_v30 = vmax.f32 %v22199_v58, %v3109_v0 }
 0x399   :  { %v18077_v38 = vpop.f32.mrf.mxu1 }
 0x39a   :  { %v3351_v20 = vmax.f32 %v22201_v40, %v18077_v38 }
 0x39b   :  { %v3119_v46 = vpop.f32.mrf.mxu1 }
 0x39c   :  { %v3350_v47 = vmax.f32 %v22203_v25, %v3119_v46 }
 0x39d   :  { %v18080_v26 = vpop.f32.mrf.mxu1 }
 0x39e   :  { %v3353_v33 = vmax.f32 %v22205_v7, %v18080_v26 }
 0x39f   :  { %v3129_v4 = vpop.f32.mrf.mxu1 }
 0x3a1   :  { %v22231_v5 = vpop.f32.mrf.mxu1 }
 0x3a3   :  { %v22235_v39 = vpop.f32.mrf.mxu1 }
 0x3a5   :  { %v22237_v35 = vpop.f32.mrf.mxu1 }
 0x3a7   :  { %v22241_v52 = vpop.f32.mrf.mxu1 }
 0x3a8   :  { %v3356_v46 = vmax.f32 %v22215_v56, %v22241_v52 }
 0x3a9   :  { %v22243_v36 = vpop.f32.mrf.mxu1 }
 0x3ab   :  { %v22247_v62 = vpop.f32.mrf.mxu1 }
 0x3ad   :  { %v22249_v50 = vpop.f32.mrf.mxu1 }
 0x3af   :  { %v22253_v13 = vpop.f32.mrf.mxu1 }
 0x3b1   :  { %v22255_v55 = vpop.f32.mrf.mxu1 }
 0x3b3   :  { %v22259_v10 = vpop.f32.mrf.mxu1 }
 0x3b5   :  { %v18098_v59 = vpop.f32.mrf.mxu1 }
 0x3b7   :  { %v3189_v53 = vpop.f32.mrf.mxu1 }
 0x3b9   :  { %v18101_v48 = vpop.f32.mrf.mxu1 }
 0x3bb   :  { %v3199_v61 = vpop.f32.mrf.mxu1 }
 0x3bd   :  { %v18104_v54 = vpop.f32.mrf.mxu1 }
 0x3bf   :  { %v3209_v3 = vpop.f32.mrf.mxu1 }
 0x3c1   :  { %v18107_v40 = vpop.f32.mrf.mxu1 }
 0x3c3   :  { %v3219_v7 = vpop.f32.mrf.mxu1 }
 0x3c5   :  { %v22261_v14 = vpop.f32.mrf.mxu1 }
 0x3c7   :  { %v22263_v38 = vpop.f32.mrf.mxu1 }
 0x3c9   :  { %v22265_v26 = vpop.f32.mrf.mxu1 }
 0x3cb   :  { %v22267_v57 = vpop.f32.mrf.mxu1 }
 0x3cd   :  { %v22269_v19 = vpop.f32.mrf.mxu1 }
 0x3cf   :  { %v22271_v21 = vpop.f32.mrf.mxu1 }
 0x3d1   :  { %v22273_v24 = vpop.f32.mrf.mxu1 }
 0x3d3   :  { %v22275_v42 = vpop.f32.mrf.mxu1 }
 0x3d4   :  { %28852 = vst [vmem:[#allocation19_spill] sm:$0xff] %v22275_v42 }
 0x3d5   :  { %v18122_v18 = vpop.f32.mrf.mxu1 }
 0x3d6   :  { %v3365_v23 = vmax.f32 %v18098_v59, %v18122_v18 }
 0x3d7   :  { %v3269_v43 = vpop.f32.mrf.mxu1 }
 0x3d8   :  { %v3381_v32 = vmax.f32 %v3349_v15, %v3365_v23  ;;  %v3364_v9 = vmax.f32 %v3189_v53, %v3269_v43  ;;  %v22303_v15 = vld [vmem:[%s28651_s1 + $0x10] sm:$0xff] }
 0x3d9   :  { %v18125_v49 = vpop.f32.mrf.mxu1 }
 0x3da   :  { %v3380_v11 = vmax.f32 %v3348_v30, %v3364_v9  ;;  %v3367_v51 = vmax.f32 %v18101_v48, %v18125_v49  ;;  %v3397_v2 = vadd.f32 %v21794_v29, %v3381_v32  ;;  %v3352_v9 = vmax.f32 %v22207_v12, %v3129_v4 }
 0x3db   :  { %v3279_v41 = vpop.f32.mrf.mxu1 }
 0x3dc   :  { %v3383_v22 = vmax.f32 %v3351_v20, %v3367_v51  ;;  %v3366_v31 = vmax.f32 %v3199_v61, %v3279_v41  ;;  %v3396_v45 = vadd.f32 %v21794_v29, %v3380_v11  ;;  %v3413_v42 = vmax.f32 %v3397_v2, 0.0  ;;  %v22326_v61 = vld [vmem:[%s28651_s1] sm:$0xff] }
 0x3dd   :  { %v18128_v44 = vpop.f32.mrf.mxu1  ;;  %v3354_v11 = vmax.f32 %v22211_v17, %v22235_v39  ;;  %v28854_v39 = vmax.f32 %v22213_v60, %v22237_v35 }
 0x3de   :  { %v3382_v6 = vmax.f32 %v3350_v47, %v3366_v31  ;;  %v3369_v18 = vmax.f32 %v18104_v54, %v18128_v44  ;;  %v3412_v59 = vmax.f32 %v3396_v45, 0.0  ;;  %v3399_v23 = vadd.f32 %v21794_v29, %v3383_v22  ;;  %v22292_v47 = vld [vmem:[%s28651_s1 + $0x18] sm:$0xff] }
 0x3df   :  { %v3289_v43 = vpop.f32.mrf.mxu1 }
 0x3e0   :  { %v3385_v49 = vmax.f32 %v3353_v33, %v3369_v18  ;;  %v3368_v30 = vmax.f32 %v3209_v3, %v3289_v43  ;;  %18176 = vmatprep.mubr.f32.mxu0 %v3412_v59  ;;  %v3398_v32 = vadd.f32 %v21794_v29, %v3382_v6  ;;  %v3415_v45 = vmax.f32 %v3399_v23, 0.0 }
 0x3e1   :  { %v18131_v58 = vpop.f32.mrf.mxu1  ;;  %18177 = vmatmul.mubr.f32.vlgmr.msra.gmra.mxu0 %v3413_v42  ;;  %v28853_v6 = vmax.f32 %v22209_v37, %v22231_v5  ;;  %v22314_v42 = vld [vmem:[%s28651_s1 + $0x8] sm:$0xff] }
 0x3e2   :  { %v3384_v51 = vmax.f32 %v3352_v9, %v3368_v30  ;;  %v3371_v41 = vmax.f32 %v18107_v40, %v18131_v58  ;;  %18201 = vmatpush3.msk.msra.mxu0 %vm289_vm0, %v22170_v16  ;;  %v3414_v44 = vmax.f32 %v3398_v32, 0.0  ;;  %v3401_v31 = vadd.f32 %v21794_v29, %v3385_v49 }
 0x3e3   :  { %v3299_v22 = vpop.f32.mrf.mxu1  ;;  %18202 = vmatprep.subr.mxu0 %v22292_v47 }
 0x3e4   :  { %v3387_v2 = vmax.f32 %v28853_v6, %v3371_v41  ;;  %v3370_v25 = vmax.f32 %v3219_v7, %v3299_v22  ;;  %18179 = vmatprep.mubr.f32.mxu0 %v3414_v44  ;;  %v3400_v12 = vadd.f32 %v21794_v29, %v3384_v51  ;;  %18203 = vmatpush3.msra.mxu0 %v22292_v47  ;;  %v3417_v33 = vmax.f32 %v3401_v31, 0.0 }
 0x3e5   :  { %v18134_v17 = vpop.f32.mrf.mxu1  ;;  %18180 = vmatmul.mubr.f32.gmra.mxu0 %v3415_v45  ;;  %18204 = vmatprep.subr.mxu0 %v22303_v15 }
 0x3e6   :  { %v3386_v0 = vmax.f32 %v3354_v11, %v3370_v25  ;;  %v3373_v20 = vmax.f32 %v22261_v14, %v18134_v17  ;;  %v3416_v37 = vmax.f32 %v3400_v12, 0.0  ;;  %18205 = vmatpush3.msra.mxu0 %v22303_v15  ;;  %v3403_v4 = vadd.f32 %v21794_v29, %v3387_v2  ;;  %v3608_v17 = vld [vmem:[%s28652_s0 + $0x810] sm:$0xff] }
 0x3e7   :  { %v3309_v5 = vpop.f32.mrf.mxu1  ;;  %18206 = vmatprep.subr.mxu0 %v22314_v42  ;;  %v3358_v14 = vmax.f32 %v22219_v8, %v22247_v62  ;;  %v3360_v8 = vmax.f32 %v22223_v28, %v22253_v13  ;;  %v3362_v28 = vmax.f32 %v22227_v1, %v22259_v10  ;;  %v28858_v13 = vld [vmem:[#allocation19_spill] sm:$0xff] }
 0x3e8   :  { %v3389_v53 = vmax.f32 %v28854_v39, %v3373_v20  ;;  %v3372_v48 = vmax.f32 %v22263_v38, %v3309_v5  ;;  %18182 = vmatprep.mubr.f32.mxu0 %v3416_v37  ;;  %v3402_v56 = vadd.f32 %v21794_v29, %v3386_v0  ;;  %18207 = vmatpush3.msra.mxu0 %v22314_v42  ;;  %v3419_v3 = vmax.f32 %v3403_v4, 0.0  ;;  %v3610_v0 = vld [vmem:[%s28652_s0 + $0x820] sm:$0xff]  ;;  %v3611_v20 = vld [vmem:[%s28652_s0 + $0x828] sm:$0xff]  ;;  %v3612_v37 = vld [vmem:[%s28652_s0 + $0x830] sm:$0xff] }
 0x3e9   :  { %v18137_v52 = vpop.f32.mrf.mxu1  ;;  %18183 = vmatmul.mubr.f32.gmra.mxu0 %v3417_v33  ;;  %18208 = vmatprep.subr.mxu0 %v22326_v61  ;;  %v28855_v38 = vmax.f32 %v22217_v34, %v22243_v36  ;;  %v28856_v34 = vmax.f32 %v22221_v27, %v22249_v50  ;;  %v28857_v27 = vmax.f32 %v22225_v63, %v22255_v55  ;;  %v3606_v63 = vld [vmem:[%s28652_s0 + $0x800] sm:$0xff]  ;;  %v3607_v55 = vld [vmem:[%s28652_s0 + $0x808] sm:$0xff]  ;;  %v3616_v5 = vld [vmem:[%s28652_s0 + $0x850] sm:$0xff] }
 0x3ea   :  { %v3388_v54 = vmax.f32 %v3356_v46, %v3372_v48  ;;  %v3375_v60 = vmax.f32 %v22265_v26, %v18137_v52  ;;  %v3418_v35 = vmax.f32 %v3402_v56, 0.0  ;;  %18209 = vmatpush3.msra.mxu0 %v22326_v61  ;;  %v3405_v40 = vadd.f32 %v21794_v29, %v3389_v53  ;;  %v3613_v46 = vld [vmem:[%s28652_s0 + $0x838] sm:$0xff]  ;;  %v3614_v33 = vld [vmem:[%s28652_s0 + $0x840] sm:$0xff]  ;;  %v3615_v4 = vld [vmem:[%s28652_s0 + $0x848] sm:$0xff] }
 0x3eb   :  { %v3319_v7 = vpop.f32.mrf.mxu1  ;;  %v3617_v39 = vld [vmem:[%s28652_s0 + $0x858] sm:$0xff]  ;;  %v3618_v53 = vld [vmem:[%s28652_s0 + $0x860] sm:$0xff]  ;;  %v3619_v48 = vld [vmem:[%s28652_s0 + $0x868] sm:$0xff] }
 0x3ec   :  { %v3391_v18 = vmax.f32 %v28855_v38, %v3375_v60  ;;  %v3374_v59 = vmax.f32 %v22267_v57, %v3319_v7  ;;  %18185 = vmatprep.mubr.f32.mxu0 %v3418_v35  ;;  %v3404_v23 = vadd.f32 %v21794_v29, %v3388_v54  ;;  %v3421_v30 = vmax.f32 %v3405_v40, 0.0  ;;  %v3620_v56 = vld [vmem:[%s28652_s0 + $0x870] sm:$0xff]  ;;  %v3621_v52 = vld [vmem:[%s28652_s0 + $0x878] sm:$0xff]  ;;  %v3622_v54 = vld [vmem:[%s28652_s0 + $0x880] sm:$0xff] }
 0x3ed   :  { %v18140_v26 = vpop.f32.mrf.mxu1  ;;  %18186 = vmatmul.mubr.f32.gmra.mxu0 %v3419_v3  ;;  %v3623_v60 = vld [vmem:[%s28652_s0 + $0x888] sm:$0xff]  ;;  %v3624_v35 = vld [vmem:[%s28652_s0 + $0x890] sm:$0xff]  ;;  %v3625_v3 = vld [vmem:[%s28652_s0 + $0x898] sm:$0xff] }
 0x3ee   :  { %v3390_v43 = vmax.f32 %v3358_v14, %v3374_v59  ;;  %v3377_v9 = vmax.f32 %v22269_v19, %v18140_v26  ;;  %v3420_v49 = vmax.f32 %v3404_v23, 0.0  ;;  %v3407_v32 = vadd.f32 %v21794_v29, %v3391_v18  ;;  %v3626_v40 = vld [vmem:[%s28652_s0 + $0x8a0] sm:$0xff]  ;;  %v3627_v7 = vld [vmem:[%s28652_s0 + $0x8a8] sm:$0xff]  ;;  %v3628_v14 = vld [vmem:[%s28652_s0 + $0x8b0] sm:$0xff] }
 0x3ef   :  { %v3329_v58 = vpop.f32.mrf.mxu1  ;;  %v3629_v38 = vld [vmem:[%s28652_s0 + $0x8b8] sm:$0xff]  ;;  %v3630_v18 = vld [vmem:[%s28652_s0 + $0x8c0] sm:$0xff]  ;;  %v3631_v59 = vld [vmem:[%s28652_s0 + $0x8c8] sm:$0xff] }
 0x3f0   :  { %v3393_v36 = vmax.f32 %v28856_v34, %v3377_v9  ;;  %v3376_v62 = vmax.f32 %v22271_v21, %v3329_v58  ;;  %18188 = vmatprep.mubr.f32.mxu0 %v3420_v49  ;;  %v3406_v57 = vadd.f32 %v21794_v29, %v3390_v43  ;;  %v3423_v11 = vmax.f32 %v3407_v32, 0.0  ;;  %v15010_v23 = vld [vmem:[%s28653_s3 + $0x278] sm:$0xff]  ;;  %v3632_v26 = vld [vmem:[%s28652_s0 + $0x8d0] sm:$0xff]  ;;  %v3634_v9 = vld [vmem:[%s28652_s0 + $0x8e0] sm:$0xff] }
 0x3f1   :  { %v18143_v51 = vpop.f32.mrf.mxu1  ;;  %18189 = vmatmul.mubr.f32.gmra.mxu0 %v3421_v30  ;;  %18306 = vmatprep.subr.mxu1 %v15010_v23  ;;  %v3633_v43 = vld [vmem:[%s28652_s0 + $0x8d8] sm:$0xff]  ;;  %v3635_v49 = vld [vmem:[%s28652_s0 + $0x8e8] sm:$0xff]  ;;  %v15009_v30 = vld [vmem:[%s28653_s3 + $0x270] sm:$0xff] }
 0x3f2   :  { %v3392_v19 = vmax.f32 %v3360_v8, %v3376_v62  ;;  %v3379_v41 = vmax.f32 %v22273_v24, %v18143_v51  ;;  %v3422_v44 = vmax.f32 %v3406_v57, 0.0  ;;  %v3409_v45 = vadd.f32 %v21794_v29, %v3393_v36  ;;  %18307 = vmatpush3.msra.mxu1 %v15010_v23  ;;  %v3636_v32 = vld [vmem:[%s28652_s0 + $0x8f0] sm:$0xff]  ;;  %v3637_v58 = vld [vmem:[%s28652_s0 + $0x8f8] sm:$0xff]  ;;  %v3638_v8 = vld [vmem:[%s28652_s0 + $0x900] sm:$0xff] }
 0x3f3   :  { %v3339_v31 = vpop.f32.mrf.mxu1  ;;  %18308 = vmatprep.subr.mxu1 %v15009_v30  ;;  %v3639_v34 = vld [vmem:[%s28652_s0 + $0x908] sm:$0xff]  ;;  %v3640_v62 = vld [vmem:[%s28652_s0 + $0x910] sm:$0xff]  ;;  %v3641_v57 = vld [vmem:[%s28652_s0 + $0x918] sm:$0xff] }
 0x3f4   :  { %v3395_v50 = vmax.f32 %v28857_v27, %v3379_v41  ;;  %v3378_v21 = vmax.f32 %v28858_v13, %v3339_v31  ;;  %18191 = vmatprep.mubr.f32.mxu0 %v3422_v44  ;;  %v3408_v22 = vadd.f32 %v21794_v29, %v3392_v19  ;;  %v3425_v2 = vmax.f32 %v3409_v45, 0.0  ;;  %18309 = vmatpush3.msra.mxu1 %v15009_v30  ;;  %v15008_v36 = vld [vmem:[%s28653_s3 + $0x268] sm:$0xff]  ;;  %v3642_v51 = vld [vmem:[%s28652_s0 + $0x920] sm:$0xff]  ;;  %v3644_v44 = vld [vmem:[%s28652_s0 + $0x930] sm:$0xff] }
 0x3f5   :  { %18192 = vmatmul.mubr.f32.gmra.mxu0 %v3423_v11  ;;  %18310 = vmatprep.subr.mxu1 %v15008_v36  ;;  %v15007_v19 = vld [vmem:[%s28653_s3 + $0x260] sm:$0xff]  ;;  %v3643_v41 = vld [vmem:[%s28652_s0 + $0x928] sm:$0xff]  ;;  %v3645_v11 = vld [vmem:[%s28652_s0 + $0x938] sm:$0xff] }
 0x3f6   :  { %v3394_v6 = vmax.f32 %v3362_v28, %v3378_v21  ;;  %v3424_v24 = vmax.f32 %v3408_v22, 0.0  ;;  %v3411_v25 = vadd.f32 %v21794_v29, %v3395_v50  ;;  %18311 = vmatpush3.msra.mxu1 %v15008_v36  ;;  %v3646_v45 = vld [vmem:[%s28652_s0 + $0x940] sm:$0xff]  ;;  %v15006_v31 = vld [vmem:[%s28653_s3 + $0x258] sm:$0xff]  ;;  %v3647_v28 = vld [vmem:[%s28652_s0 + $0x948] sm:$0xff] }
 0x3f7   :  { %18312 = vmatprep.subr.mxu1 %v15007_v19  ;;  %v3648_v27 = vld [vmem:[%s28652_s0 + $0x950] sm:$0xff]  ;;  %v3649_v50 = vld [vmem:[%s28652_s0 + $0x958] sm:$0xff]  ;;  %v3650_v13 = vld [vmem:[%s28652_s0 + $0x960] sm:$0xff] }
 0x3f8   :  { %18194 = vmatprep.mubr.f32.mxu0 %v3424_v24  ;;  %v3410_v12 = vadd.f32 %v21794_v29, %v3394_v6  ;;  %v3427_v10 = vmax.f32 %v3411_v25, 0.0  ;;  %v3609_v29 = vld [vmem:[%s28652_s0 + $0x818] sm:$0xff]  ;;  %18313 = vmatpush3.msra.mxu1 %v15007_v19  ;;  %v15005_v21 = vld [vmem:[%s28653_s3 + $0x250] sm:$0xff]  ;;  %v3651_v22 = vld [vmem:[%s28652_s0 + $0x968] sm:$0xff] }
 0x3f9   :  { %18195 = vmatmul.mubr.f32.gmra.mxu0 %v3425_v2  ;;  %18314 = vmatprep.subr.mxu1 %v15006_v31  ;;  %v3652_v6 = vld [vmem:[%s28652_s0 + $0x970] sm:$0xff]  ;;  %v3653_v24 = vld [vmem:[%s28652_s0 + $0x978] sm:$0xff]  ;;  %v3654_v2 = vld [vmem:[%s28652_s0 + $0x980] sm:$0xff] }
 0x3fa   :  { %v3426_v1 = vmax.f32 %v3410_v12, 0.0  ;;  %18315 = vmatpush3.msra.mxu1 %v15006_v31  ;;  %v15004_v25 = vld [vmem:[%s28653_s3 + $0x248] sm:$0xff]  ;;  %v14995_v30 = vld [vmem:[%s28653_s3 + $0x200] sm:$0xff] }
 0x3fb   :  { %18316 = vmatprep.subr.mxu1 %v15005_v21  ;;  %v3655_v12 = vld [vmem:[%s28652_s0 + $0x988] sm:$0xff] }
 0x3fc   :  { %18197 = vmatprep.mubr.f32.mxu0 %v3426_v1  ;;  %18317 = vmatpush3.msra.mxu1 %v15005_v21  ;;  %v3656_v1 = vld [vmem:[%s28652_s0 + $0x990] sm:$0xff] }
 0x3fd   :  { %18198 = vmatmul.mubr.f32.gmra.mxu0 %v3427_v10  ;;  %18318 = vmatprep.subr.mxu1 %v15004_v25  ;;  %v3657_v10 = vld [vmem:[%s28652_s0 + $0x998] sm:$0xff]  ;;  %v28880_v21 = vld [vmem:[#allocation36_spill] sm:$0xff] }
 0x3fe   :  { %18210 = vmatprep.mubr.msk.f32.mxu0 %vm96_vm1, %v3606_v63  ;;  %18319 = vmatpush3.msra.mxu1 %v15004_v25  ;;  %v3658_v63 = vld [vmem:[%s28652_s0 + $0x9a0] sm:$0xff] }
 0x401   :  { %18211 = vmatmul.mubr.msk.f32.vlgmr.msra.gmra.mxu0 %vm96_vm1, %v3607_v55  ;;  %v3659_v55 = vld [vmem:[%s28652_s0 + $0x9a8] sm:$0xff] }
 0x402   :  { %18213 = vmatprep.mubr.msk.f32.mxu0 %vm96_vm1, %v3608_v17  ;;  %v15003_v17 = vld [vmem:[%s28653_s3 + $0x240] sm:$0xff] }
 0x403   :  { %18320 = vmatprep.subr.mxu1 %v15003_v17 }
 0x404   :  { %18321 = vmatpush3.msra.mxu1 %v15003_v17 }
 0x405   :  { %18214 = vmatmul.mubr.msk.f32.gmra.mxu0 %vm96_vm1, %v3609_v29  ;;  %v3660_v29 = vld [vmem:[%s28652_s0 + $0x9b0] sm:$0xff] }
 0x406   :  { %18216 = vmatprep.mubr.msk.f32.mxu0 %vm96_vm1, %v3610_v0  ;;  %v3661_v0 = vld [vmem:[%s28652_s0 + $0x9b8] sm:$0xff] }
 0x409   :  { %18217 = vmatmul.mubr.msk.f32.gmra.mxu0 %vm96_vm1, %v3611_v20  ;;  %v3662_v20 = vld [vmem:[%s28652_s0 + $0x9c0] sm:$0xff] }
 0x40a   :  { %18219 = vmatprep.mubr.msk.f32.mxu0 %vm96_vm1, %v3612_v37  ;;  %v3663_v37 = vld [vmem:[%s28652_s0 + $0x9c8] sm:$0xff] }
 0x40d   :  { %18220 = vmatmul.mubr.msk.f32.gmra.mxu0 %vm96_vm1, %v3613_v46  ;;  %v15002_v46 = vld [vmem:[%s28653_s3 + $0x238] sm:$0xff] }
 0x40e   :  { %18222 = vmatprep.mubr.msk.f32.mxu0 %vm96_vm1, %v3614_v33  ;;  %v3664_v33 = vld [vmem:[%s28652_s0 + $0x9d0] sm:$0xff]  ;;  %18322 = vmatprep.subr.mxu1 %v15002_v46 }
 0x40f   :  { %18323 = vmatpush3.msra.mxu1 %v15002_v46 }
 0x411   :  { %18223 = vmatmul.mubr.msk.f32.gmra.mxu0 %vm96_vm1, %v3615_v4  ;;  %v3665_v4 = vld [vmem:[%s28652_s0 + $0x9d8] sm:$0xff] }
 0x412   :  { %18225 = vmatprep.mubr.msk.f32.mxu0 %vm96_vm1, %v3616_v5  ;;  %v3666_v5 = vld [vmem:[%s28652_s0 + $0x9e0] sm:$0xff] }
 0x415   :  { %18226 = vmatmul.mubr.msk.f32.gmra.mxu0 %vm96_vm1, %v3617_v39  ;;  %v3667_v39 = vld [vmem:[%s28652_s0 + $0x9e8] sm:$0xff] }
 0x416   :  { %18228 = vmatprep.mubr.msk.f32.mxu0 %vm96_vm1, %v3618_v53  ;;  %v15001_v53 = vld [vmem:[%s28653_s3 + $0x230] sm:$0xff] }
 0x417   :  { %18324 = vmatprep.subr.mxu1 %v15001_v53 }
 0x418   :  { %18325 = vmatpush3.msra.mxu1 %v15001_v53 }
 0x419   :  { %18229 = vmatmul.mubr.msk.f32.gmra.mxu0 %vm96_vm1, %v3619_v48  ;;  %v3668_v48 = vld [vmem:[%s28652_s0 + $0x9f0] sm:$0xff] }
 0x41a   :  { %18231 = vmatprep.mubr.msk.f32.mxu0 %vm96_vm1, %v3620_v56  ;;  %v3669_v56 = vld [vmem:[%s28652_s0 + $0x9f8] sm:$0xff] }
 0x41d   :  { %18232 = vmatmul.mubr.msk.f32.gmra.mxu0 %vm96_vm1, %v3621_v52  ;;  %v15000_v52 = vld [vmem:[%s28653_s3 + $0x228] sm:$0xff] }
 0x41e   :  { %18234 = vmatprep.mubr.msk.f32.mxu0 %vm96_vm1, %v3622_v54  ;;  %18326 = vmatprep.subr.mxu1 %v15000_v52  ;;  %v14999_v54 = vld [vmem:[%s28653_s3 + $0x220] sm:$0xff] }
 0x41f   :  { %18327 = vmatpush3.msra.mxu1 %v15000_v52 }
 0x420   :  { %18328 = vmatprep.subr.mxu1 %v14999_v54 }
 0x421   :  { %18235 = vmatmul.mubr.msk.f32.gmra.mxu0 %vm96_vm1, %v3623_v60  ;;  %18329 = vmatpush3.msra.mxu1 %v14999_v54  ;;  %v14998_v60 = vld [vmem:[%s28653_s3 + $0x218] sm:$0xff] }
 0x422   :  { %18237 = vmatprep.mubr.msk.f32.mxu0 %vm96_vm1, %v3624_v35  ;;  %18330 = vmatprep.subr.mxu1 %v14998_v60  ;;  %v14997_v35 = vld [vmem:[%s28653_s3 + $0x210] sm:$0xff] }
 0x423   :  { %18331 = vmatpush3.msra.mxu1 %v14998_v60 }
 0x424   :  { %18332 = vmatprep.subr.mxu1 %v14997_v35 }
 0x425   :  { %18238 = vmatmul.mubr.msk.f32.gmra.mxu0 %vm96_vm1, %v3625_v3  ;;  %18333 = vmatpush3.msra.mxu1 %v14997_v35  ;;  %v14996_v3 = vld [vmem:[%s28653_s3 + $0x208] sm:$0xff] }
 0x426   :  { %18240 = vmatprep.mubr.msk.f32.mxu0 %vm96_vm1, %v3626_v40  ;;  %18334 = vmatprep.subr.mxu1 %v14996_v3 }
 0x427   :  { %18335 = vmatpush3.msra.mxu1 %v14996_v3 }
 0x428   :  { %18336 = vmatprep.subr.mxu1 %v14995_v30 }
 0x429   :  { %18241 = vmatmul.mubr.msk.f32.gmra.mxu0 %vm96_vm1, %v3627_v7  ;;  %v28859_v7 = vld [vmem:[#allocation14_spill] sm:$0xff]  ;;  %18337 = vmatpush3.msra.mxu1 %v14995_v30 }
 0x42a   :  { %18243 = vmatprep.mubr.msk.f32.mxu0 %vm96_vm1, %v3628_v14  ;;  %18362 = vmatprep.subr.msk.mxu1 %vm289_vm0, %v22170_v16 }
 0x42d   :  { %18244 = vmatmul.mubr.msk.f32.gmra.mxu0 %vm96_vm1, %v3629_v38 }
 0x42e   :  { %18246 = vmatprep.mubr.msk.f32.mxu0 %vm96_vm1, %v3630_v18 }
 0x431   :  { %18247 = vmatmul.mubr.msk.f32.gmra.mxu0 %vm96_vm1, %v3631_v59  ;;  %v28862_v59 = vld [vmem:[#allocation13_spill] sm:$0xff] }
 0x432   :  { %18249 = vmatprep.mubr.msk.f32.mxu0 %vm96_vm1, %v3632_v26 }
 0x435   :  { %18250 = vmatmul.mubr.msk.f32.gmra.mxu0 %vm96_vm1, %v3633_v43 }
 0x436   :  { %18252 = vmatprep.mubr.msk.f32.mxu0 %vm96_vm1, %v3634_v9  ;;  %v28865_v9 = vld [vmem:[#allocation47_spill] sm:$0xff] }
 0x439   :  { %18253 = vmatmul.mubr.msk.f32.gmra.mxu0 %vm96_vm1, %v3635_v49 }
 0x43a   :  { %18255 = vmatprep.mubr.msk.f32.mxu0 %vm96_vm1, %v3636_v32 }
 0x43d   :  { %18256 = vmatmul.mubr.msk.f32.gmra.mxu0 %vm96_vm1, %v3637_v58 }
 0x43e   :  { %18258 = vmatprep.mubr.msk.f32.mxu0 %vm96_vm1, %v3638_v8  ;;  %v28868_v8 = vld [vmem:[#allocation32_spill] sm:$0xff] }
 0x441   :  { %18259 = vmatmul.mubr.msk.f32.gmra.mxu0 %vm96_vm1, %v3639_v34 }
 0x442   :  { %18261 = vmatprep.mubr.msk.f32.mxu0 %vm96_vm1, %v3640_v62 }
 0x445   :  { %18262 = vmatmul.mubr.msk.f32.gmra.mxu0 %vm96_vm1, %v3641_v57  ;;  %v28871_v57 = vld [vmem:[#allocation15_spill] sm:$0xff] }
 0x446   :  { %18264 = vmatprep.mubr.msk.f32.mxu0 %vm96_vm1, %v3642_v51 }
 0x449   :  { %18265 = vmatmul.mubr.msk.f32.gmra.mxu0 %vm96_vm1, %v3643_v41 }
 0x44a   :  { %18267 = vmatprep.mubr.msk.f32.mxu0 %vm96_vm1, %v3644_v44  ;;  %v28874_v44 = vld [vmem:[#allocation34_spill] sm:$0xff] }
 0x44d   :  { %18268 = vmatmul.mubr.msk.f32.gmra.mxu0 %vm96_vm1, %v3645_v11 }
 0x44e   :  { %18270 = vmatprep.mubr.msk.f32.mxu0 %vm96_vm1, %v3646_v45 }
 0x451   :  { %18271 = vmatmul.mubr.msk.f32.gmra.mxu0 %vm96_vm1, %v3647_v28  ;;  %v28877_v28 = vld [vmem:[#allocation17_spill] sm:$0xff] }
 0x452   :  { %18273 = vmatprep.mubr.msk.f32.mxu0 %vm96_vm1, %v3648_v27 }
 0x455   :  { %18274 = vmatmul.mubr.msk.f32.gmra.mxu0 %vm96_vm1, %v3649_v50 }
 0x456   :  { %18276 = vmatprep.mubr.msk.f32.mxu0 %vm96_vm1, %v3650_v13 }
 0x459   :  { %18277 = vmatmul.mubr.msk.f32.gmra.mxu0 %vm96_vm1, %v3651_v22 }
 0x45a   :  { %18279 = vmatprep.mubr.msk.f32.mxu0 %vm96_vm1, %v3652_v6 }
 0x45d   :  { %18280 = vmatmul.mubr.msk.f32.gmra.mxu0 %vm96_vm1, %v3653_v24 }
 0x45e   :  { %18282 = vmatprep.mubr.msk.f32.mxu0 %vm96_vm1, %v3654_v2 }
 0x461   :  { %18283 = vmatmul.mubr.msk.f32.gmra.mxu0 %vm96_vm1, %v3655_v12 }
 0x462   :  { %18285 = vmatprep.mubr.msk.f32.mxu0 %vm96_vm1, %v3656_v1 }
 0x465   :  { %18286 = vmatmul.mubr.msk.f32.gmra.mxu0 %vm96_vm1, %v3657_v10 }
 0x466   :  { %18288 = vmatprep.mubr.msk.f32.mxu0 %vm96_vm1, %v3658_v63 }
 0x469   :  { %18289 = vmatmul.mubr.msk.f32.gmra.mxu0 %vm96_vm1, %v3659_v55 }
 0x46a   :  { %18291 = vmatprep.mubr.msk.f32.mxu0 %vm96_vm1, %v3660_v29 }
 0x46d   :  { %18292 = vmatmul.mubr.msk.f32.gmra.mxu0 %vm96_vm1, %v3661_v0 }
 0x46e   :  { %18294 = vmatprep.mubr.msk.f32.mxu0 %vm96_vm1, %v3662_v20 }
 0x471   :  { %18295 = vmatmul.mubr.msk.f32.gmra.mxu0 %vm96_vm1, %v3663_v37 }
 0x472   :  { %18297 = vmatprep.mubr.msk.f32.mxu0 %vm96_vm1, %v3664_v33 }
 0x475   :  { %18298 = vmatmul.mubr.msk.f32.gmra.mxu0 %vm96_vm1, %v3665_v4 }
 0x476   :  { %18300 = vmatprep.mubr.msk.f32.mxu0 %vm96_vm1, %v3666_v5 }
 0x479   :  { %18301 = vmatmul.mubr.msk.f32.gmra.mxu0 %vm96_vm1, %v3667_v39 }
 0x47a   :  { %18303 = vmatprep.mubr.msk.f32.mxu0 %vm96_vm1, %v3668_v48 }
 0x47d   :  { %18304 = vmatmul.mubr.msk.f32.gmra.mxu0 %vm96_vm1, %v3669_v56 }
 0x4a1   :  { %v18178_v40 = vpop.f32.mrf.mxu0 }
 0x4a2   :  { %v22661_v14 = vadd.f32 %v18178_v40, %v28859_v7 }
 0x4a3   :  { %v22663_v38 = vpop.f32.mrf.mxu0 }
 0x4a4   :  { %28860 = vst [vmem:[#allocation35_spill] sm:$0xff] %v22661_v14  ;;  %28861 = vst [vmem:[#allocation26_spill] sm:$0xff] %v22663_v38 }
 0x4a5   :  { %v18181_v18 = vpop.f32.mrf.mxu0 }
 0x4a6   :  { %v22666_v23 = vadd.f32 %v18181_v18, %v28862_v59 }
 0x4a7   :  { %v22668_v26 = vpop.f32.mrf.mxu0 }
 0x4a8   :  { %28863 = vst [vmem:[#allocation25_spill] sm:$0xff] %v22666_v23  ;;  %28864 = vst [vmem:[#allocation9_spill] sm:$0xff] %v22668_v26 }
 0x4a9   :  { %v18184_v43 = vpop.f32.mrf.mxu0 }
 0x4aa   :  { %v22671_v49 = vadd.f32 %v18184_v43, %v28865_v9 }
 0x4ab   :  { %v22676_v32 = vpop.f32.mrf.mxu0 }
 0x4ac   :  { %28866 = vst [vmem:[#allocation10_spill] sm:$0xff] %v22671_v49  ;;  %28867 = vst [vmem:[#allocation45_spill] sm:$0xff] %v22676_v32 }
 0x4ad   :  { %v18187_v58 = vpop.f32.mrf.mxu0 }
 0x4ae   :  { %v22681_v34 = vadd.f32 %v18187_v58, %v28868_v8 }
 0x4af   :  { %v22683_v36 = vpop.f32.mrf.mxu0 }
 0x4b0   :  { %28869 = vst [vmem:[#allocation37_spill] sm:$0xff] %v22681_v34  ;;  %28870 = vst [vmem:[#allocation44_spill] sm:$0xff] %v22683_v36 }
 0x4b1   :  { %v18190_v62 = vpop.f32.mrf.mxu0 }
 0x4b2   :  { %v22686_v51 = vadd.f32 %v18190_v62, %v28871_v57 }
 0x4b3   :  { %v22688_v19 = vpop.f32.mrf.mxu0 }
 0x4b4   :  { %28872 = vst [vmem:[#allocation38_spill] sm:$0xff] %v22686_v51  ;;  %28873 = vst [vmem:[#allocation8_spill] sm:$0xff] %v22688_v19  ;;  %v22789_v51 = vld [vmem:[%s28654_s2] ss:$0 sm:$0xff] }
 0x4b5   :  { %v18193_v41 = vpop.f32.mrf.mxu0 }
 0x4b6   :  { %v22691_v11 = vadd.f32 %v18193_v41, %v28874_v44 }
 0x4b7   :  { %v22693_v45 = vpop.f32.mrf.mxu0 }
 0x4b8   :  { %28875 = vst [vmem:[#allocation3_spill] sm:$0xff] %v22691_v11  ;;  %28876 = vst [vmem:[#allocation40_spill] sm:$0xff] %v22693_v45 }
 0x4b9   :  { %v18196_v31 = vpop.f32.mrf.mxu0 }
 0x4ba   :  { %v22696_v27 = vadd.f32 %v18196_v31, %v28877_v28 }
 0x4bb   :  { %v22698_v50 = vpop.f32.mrf.mxu0 }
 0x4bc   :  { %28878 = vst [vmem:[#allocation41_spill] sm:$0xff] %v22696_v27  ;;  %28879 = vst [vmem:[#allocation12_spill] sm:$0xff] %v22698_v50 }
 0x4bd   :  { %v18199_v13 = vpop.f32.mrf.mxu0 }
 0x4be   :  { %v22701_v22 = vadd.f32 %v18199_v13, %v28880_v21 }
 0x4bf   :  { %v22703_v6 = vpop.f32.mrf.mxu0 }
 0x4c0   :  { %28881 = vst [vmem:[#allocation19_spill] sm:$0xff] %v22701_v22  ;;  %28882 = vst [vmem:[#allocation14_spill] sm:$0xff] %v22703_v6 }
 0x4c1   :  { %v18212_v24 = vpop.f32.mrf.mxu0 }
 0x4c3   :  { %v22705_v2 = vpop.f32.mrf.mxu0 }
 0x4c5   :  { %v22707_v25 = vpop.f32.mrf.mxu0 }
 0x4c7   :  { %v22709_v12 = vpop.f32.mrf.mxu0 }
 0x4c9   :  { %v22711_v1 = vpop.f32.mrf.mxu0 }
 0x4cb   :  { %v22713_v10 = vpop.f32.mrf.mxu0 }
 0x4cd   :  { %v22715_v63 = vpop.f32.mrf.mxu0 }
 0x4cf   :  { %v22717_v55 = vpop.f32.mrf.mxu0 }
 0x4d1   :  { %v22719_v17 = vpop.f32.mrf.mxu0 }
 0x4d3   :  { %v22721_v29 = vpop.f32.mrf.mxu0 }
 0x4d5   :  { %v22723_v0 = vpop.f32.mrf.mxu0 }
 0x4d7   :  { %v22725_v20 = vpop.f32.mrf.mxu0 }
 0x4d9   :  { %v22727_v37 = vpop.f32.mrf.mxu0 }
 0x4db   :  { %v22729_v46 = vpop.f32.mrf.mxu0 }
 0x4dd   :  { %v22731_v33 = vpop.f32.mrf.mxu0 }
 0x4df   :  { %v22733_v4 = vpop.f32.mrf.mxu0 }
 0x4e1   :  { %v18236_v5 = vpop.f32.mrf.mxu0 }
 0x4e2   :  { %v4248_v39 = vmax.f32 %v18212_v24, %v18236_v5 }
 0x4e3   :  { %v4008_v53 = vpop.f32.mrf.mxu0 }
 0x4e4   :  { %v4247_v32 = vmax.f32 %v22705_v2, %v4008_v53 }
 0x4e5   :  { %v18239_v48 = vpop.f32.mrf.mxu0 }
 0x4e6   :  { %v4250_v56 = vmax.f32 %v22707_v25, %v18239_v48 }
 0x4e7   :  { %v4018_v52 = vpop.f32.mrf.mxu0 }
 0x4e8   :  { %v4249_v23 = vmax.f32 %v22709_v12, %v4018_v52 }
 0x4e9   :  { %v18242_v54 = vpop.f32.mrf.mxu0 }
 0x4ea   :  { %v4252_v60 = vmax.f32 %v22711_v1, %v18242_v54 }
 0x4eb   :  { %v22737_v35 = vpop.f32.mrf.mxu0 }
 0x4ec   :  { %v4251_v53 = vmax.f32 %v22713_v10, %v22737_v35 }
 0x4ed   :  { %v22739_v3 = vpop.f32.mrf.mxu0 }
 0x4ee   :  { %v28883_v52 = vmax.f32 %v22715_v63, %v22739_v3 }
 0x4ef   :  { %v22743_v7 = vpop.f32.mrf.mxu0 }
 0x4f1   :  { %v22745_v18 = vpop.f32.mrf.mxu0 }
 0x4f3   :  { %v22749_v43 = vpop.f32.mrf.mxu0 }
 0x4f4   :  { %v4255_v63 = vmax.f32 %v22721_v29, %v22749_v43 }
 0x4f5   :  { %v22751_v9 = vpop.f32.mrf.mxu0 }
 0x4f7   :  { %v22755_v58 = vpop.f32.mrf.mxu0 }
 0x4f9   :  { %v22757_v8 = vpop.f32.mrf.mxu0 }
 0x4fb   :  { %v22761_v57 = vpop.f32.mrf.mxu0 }
 0x4fd   :  { %v22763_v41 = vpop.f32.mrf.mxu0 }
 0x4ff   :  { %v22767_v31 = vpop.f32.mrf.mxu0 }
 0x501   :  { %v18260_v28 = vpop.f32.mrf.mxu0 }
 0x503   :  { %v4088_v13 = vpop.f32.mrf.mxu0 }
 0x505   :  { %v18263_v21 = vpop.f32.mrf.mxu0 }
 0x507   :  { %v4098_v24 = vpop.f32.mrf.mxu0 }
 0x509   :  { %v18266_v25 = vpop.f32.mrf.mxu0 }
 0x50b   :  { %v4108_v1 = vpop.f32.mrf.mxu0 }
 0x50d   :  { %v18269_v5 = vpop.f32.mrf.mxu0 }
 0x50f   :  { %v4118_v48 = vpop.f32.mrf.mxu0 }
 0x511   :  { %v22769_v54 = vpop.f32.mrf.mxu0 }
 0x513   :  { %v22771_v62 = vpop.f32.mrf.mxu0 }
 0x515   :  { %v22773_v30 = vpop.f32.mrf.mxu0 }
 0x517   :  { %v22775_v59 = vpop.f32.mrf.mxu0 }
 0x519   :  { %v22777_v40 = vpop.f32.mrf.mxu0 }
 0x51b   :  { %v22779_v44 = vpop.f32.mrf.mxu0 }
 0x51d   :  { %v22781_v6 = vpop.f32.mrf.mxu0 }
 0x51f   :  { %v22783_v50 = vpop.f32.mrf.mxu0 }
 0x521   :  { %v18284_v45 = vpop.f32.mrf.mxu0 }
 0x522   :  { %v4264_v19 = vmax.f32 %v18260_v28, %v18284_v45 }
 0x523   :  { %v4168_v36 = vpop.f32.mrf.mxu0 }
 0x524   :  { %v4280_v26 = vmax.f32 %v4248_v39, %v4264_v19  ;;  %v4263_v38 = vmax.f32 %v4088_v13, %v4168_v36 }
 0x525   :  { %v18287_v22 = vpop.f32.mrf.mxu0 }
 0x526   :  { %v4279_v27 = vmax.f32 %v4247_v32, %v4263_v38  ;;  %v4266_v11 = vmax.f32 %v18263_v21, %v18287_v22  ;;  %v4296_v34 = vadd.f32 %v22789_v51, %v4280_v26 }
 0x527   :  { %v4178_v49 = vpop.f32.mrf.mxu0 }
 0x528   :  { %v4282_v14 = vmax.f32 %v4250_v56, %v4266_v11  ;;  %v4265_v45 = vmax.f32 %v4098_v24, %v4178_v49  ;;  %v4295_v28 = vadd.f32 %v22789_v51, %v4279_v27  ;;  %v4312_v38 = vmax.f32 %v4296_v34, 0.0 }
 0x529   :  { %v18290_v2 = vpop.f32.mrf.mxu0 }
 0x52a   :  { %v4281_v19 = vmax.f32 %v4249_v23, %v4265_v45  ;;  %v4268_v36 = vmax.f32 %v18266_v25, %v18290_v2  ;;  %v4311_v39 = vmax.f32 %v4295_v28, 0.0  ;;  %v4298_v32 = vadd.f32 %v22789_v51, %v4282_v14 }
 0x52b   :  { %v4188_v22 = vpop.f32.mrf.mxu0  ;;  %v4253_v14 = vmax.f32 %v22717_v55, %v22743_v7 }
 0x52c   :  { %v4284_v13 = vmax.f32 %v4252_v60, %v4268_v36  ;;  %v4267_v26 = vmax.f32 %v4108_v1, %v4188_v22  ;;  %18338 = vmatprep.mubr.f32.mxu1 %v4311_v39  ;;  %v4297_v12 = vadd.f32 %v22789_v51, %v4281_v19  ;;  %v4314_v34 = vmax.f32 %v4298_v32, 0.0 }
 0x52d   :  { %v18293_v11 = vpop.f32.mrf.mxu0  ;;  %18339 = vmatmul.mubr.f32.vlgmr.msra.gmra.mxu1 %v4312_v38 }
 0x52e   :  { %v4283_v49 = vmax.f32 %v4251_v53, %v4267_v26  ;;  %v4270_v27 = vmax.f32 %v18269_v5, %v18293_v11  ;;  %18363 = vmatpush3.msk.msra.mxu1 %vm289_vm0, %v22170_v16  ;;  %v4313_v23 = vmax.f32 %v4297_v12, 0.0  ;;  %v4300_v56 = vadd.f32 %v22789_v51, %v4284_v13 }
 0x52f   :  { %v4198_v10 = vpop.f32.mrf.mxu0  ;;  %18364 = vmatprep.subr.mxu1 %v22292_v47 }
 0x530   :  { %v4286_v60 = vmax.f32 %v28883_v52, %v4270_v27  ;;  %v4269_v35 = vmax.f32 %v4118_v48, %v4198_v10  ;;  %18341 = vmatprep.mubr.f32.mxu1 %v4313_v23  ;;  %v4299_v21 = vadd.f32 %v22789_v51, %v4283_v49  ;;  %18365 = vmatpush3.msra.mxu1 %v22292_v47  ;;  %v4316_v3 = vmax.f32 %v4300_v56, 0.0  ;;  %v4508_v10 = vld [vmem:[%s28652_s0 + $0xa18] sm:$0xff]  ;;  %v4509_v52 = vld [vmem:[%s28652_s0 + $0xa20] sm:$0xff] }
 0x531   :  { %v18296_v16 = vpop.f32.mrf.mxu0  ;;  %18342 = vmatmul.mubr.f32.gmra.mxu1 %v4314_v34  ;;  %18366 = vmatprep.subr.mxu1 %v22303_v15  ;;  %v28884_v47 = vmax.f32 %v22719_v17, %v22745_v18 }
 0x532   :  { %v4285_v55 = vmax.f32 %v4253_v14, %v4269_v35  ;;  %v4272_v7 = vmax.f32 %v22769_v54, %v18296_v16  ;;  %v4315_v24 = vmax.f32 %v4299_v21, 0.0  ;;  %18367 = vmatpush3.msra.mxu1 %v22303_v15  ;;  %v4302_v25 = vadd.f32 %v22789_v51, %v4286_v60  ;;  %v4510_v60 = vld [vmem:[%s28652_s0 + $0xa28] sm:$0xff]  ;;  %v4511_v35 = vld [vmem:[%s28652_s0 + $0xa30] sm:$0xff]  ;;  %v4512_v21 = vld [vmem:[%s28652_s0 + $0xa38] sm:$0xff] }
 0x533   :  { %v4208_v1 = vpop.f32.mrf.mxu0  ;;  %18368 = vmatprep.subr.mxu1 %v22314_v42  ;;  %v4513_v16 = vld [vmem:[%s28652_s0 + $0xa40] sm:$0xff] }
 0x534   :  { %v4288_v5 = vmax.f32 %v28884_v47, %v4272_v7  ;;  %v4271_v48 = vmax.f32 %v22771_v62, %v4208_v1  ;;  %18344 = vmatprep.mubr.f32.mxu1 %v4315_v24  ;;  %v4301_v54 = vadd.f32 %v22789_v51, %v4285_v55  ;;  %18369 = vmatpush3.msra.mxu1 %v22314_v42  ;;  %v4318_v28 = vmax.f32 %v4302_v25, 0.0  ;;  %v4514_v55 = vld [vmem:[%s28652_s0 + $0xa48] sm:$0xff]  ;;  %v4515_v7 = vld [vmem:[%s28652_s0 + $0xa50] sm:$0xff]  ;;  %v4516_v24 = vld [vmem:[%s28652_s0 + $0xa58] sm:$0xff] }
 0x535   :  { %v18299_v15 = vpop.f32.mrf.mxu0  ;;  %18345 = vmatmul.mubr.f32.gmra.mxu1 %v4316_v3  ;;  %18370 = vmatprep.subr.mxu1 %v22326_v61  ;;  %v4257_v62 = vmax.f32 %v22725_v20, %v22755_v58  ;;  %v28885_v42 = vmax.f32 %v22723_v0, %v22751_v9  ;;  %v4259_v20 = vmax.f32 %v22729_v46, %v22761_v57  ;;  %v4518_v3 = vld [vmem:[%s28652_s0 + $0xa68] sm:$0xff]  ;;  %v4519_v25 = vld [vmem:[%s28652_s0 + $0xa70] sm:$0xff]  ;;  %v4520_v1 = vld [vmem:[%s28652_s0 + $0xa78] sm:$0xff] }
 0x536   :  { %v4287_v29 = vmax.f32 %v4255_v63, %v4271_v48  ;;  %v4274_v43 = vmax.f32 %v22773_v30, %v18299_v15  ;;  %v4317_v45 = vmax.f32 %v4301_v54, 0.0  ;;  %18371 = vmatpush3.msra.mxu1 %v22326_v61  ;;  %v4304_v17 = vadd.f32 %v22789_v51, %v4288_v5  ;;  %v4517_v63 = vld [vmem:[%s28652_s0 + $0xa60] sm:$0xff]  ;;  %v4522_v5 = vld [vmem:[%s28652_s0 + $0xa88] sm:$0xff]  ;;  %v4523_v48 = vld [vmem:[%s28652_s0 + $0xa90] sm:$0xff] }
 0x537   :  { %v4218_v18 = vpop.f32.mrf.mxu0  ;;  %v28886_v0 = vmax.f32 %v22727_v37, %v22757_v8  ;;  %v4261_v46 = vmax.f32 %v22733_v4, %v22767_v31  ;;  %v28887_v37 = vmax.f32 %v22731_v33, %v22763_v41  ;;  %v4505_v33 = vld [vmem:[%s28652_s0 + $0xa00] sm:$0xff]  ;;  %v4507_v41 = vld [vmem:[%s28652_s0 + $0xa10] sm:$0xff]  ;;  %v4524_v54 = vld [vmem:[%s28652_s0 + $0xa98] sm:$0xff] }
 0x538   :  { %v4290_v2 = vmax.f32 %v28885_v42, %v4274_v43  ;;  %v4273_v19 = vmax.f32 %v22775_v59, %v4218_v18  ;;  %18347 = vmatprep.mubr.f32.mxu1 %v4317_v45  ;;  %v4303_v36 = vadd.f32 %v22789_v51, %v4287_v29  ;;  %v4320_v32 = vmax.f32 %v4304_v17, 0.0  ;;  %v4521_v47 = vld [vmem:[%s28652_s0 + $0xa80] sm:$0xff]  ;;  %v4526_v29 = vld [vmem:[%s28652_s0 + $0xaa8] sm:$0xff]  ;;  %v4527_v43 = vld [vmem:[%s28652_s0 + $0xab0] sm:$0xff] }
 0x539   :  { %v18302_v30 = vpop.f32.mrf.mxu0  ;;  %18348 = vmatmul.mubr.f32.gmra.mxu1 %v4318_v28  ;;  %v4525_v15 = vld [vmem:[%s28652_s0 + $0xaa0] sm:$0xff]  ;;  %v4528_v45 = vld [vmem:[%s28652_s0 + $0xab8] sm:$0xff]  ;;  %v4530_v17 = vld [vmem:[%s28652_s0 + $0xac8] sm:$0xff] }
 0x53a   :  { %v4289_v39 = vmax.f32 %v4257_v62, %v4273_v19  ;;  %v4276_v61 = vmax.f32 %v22777_v40, %v18302_v30  ;;  %v4319_v38 = vmax.f32 %v4303_v36, 0.0  ;;  %v4306_v22 = vadd.f32 %v22789_v51, %v4290_v2  ;;  %v4529_v28 = vld [vmem:[%s28652_s0 + $0xac0] sm:$0xff]  ;;  %v15091_v18 = vld [vmem:[%s28653_s3 + $0x2f8] sm:$0xff]  ;;  %v4531_v62 = vld [vmem:[%s28652_s0 + $0xad0] sm:$0xff] }
 0x53b   :  { %v4228_v53 = vpop.f32.mrf.mxu0  ;;  %18468 = vmatprep.subr.mxu0 %v15091_v18  ;;  %v4532_v42 = vld [vmem:[%s28652_s0 + $0xad8] sm:$0xff]  ;;  %v4533_v2 = vld [vmem:[%s28652_s0 + $0xae0] sm:$0xff]  ;;  %v4534_v19 = vld [vmem:[%s28652_s0 + $0xae8] sm:$0xff] }
 0x53c   :  { %v4292_v59 = vmax.f32 %v28886_v0, %v4276_v61  ;;  %v4275_v9 = vmax.f32 %v22779_v44, %v4228_v53  ;;  %18350 = vmatprep.mubr.f32.mxu1 %v4319_v38  ;;  %v4305_v58 = vadd.f32 %v22789_v51, %v4289_v39  ;;  %v4322_v11 = vmax.f32 %v4306_v22, 0.0  ;;  %18469 = vmatpush3.msra.mxu0 %v15091_v18  ;;  %v15090_v36 = vld [vmem:[%s28653_s3 + $0x2f0] sm:$0xff]  ;;  %v4536_v39 = vld [vmem:[%s28652_s0 + $0xaf8] sm:$0xff]  ;;  %v4537_v61 = vld [vmem:[%s28652_s0 + $0xb00] sm:$0xff] }
 0x53d   :  { %v18305_v13 = vpop.f32.mrf.mxu0  ;;  %18351 = vmatmul.mubr.f32.gmra.mxu1 %v4320_v32  ;;  %v4535_v30 = vld [vmem:[%s28652_s0 + $0xaf0] sm:$0xff]  ;;  %18470 = vmatprep.subr.mxu0 %v15090_v36  ;;  %v4538_v38 = vld [vmem:[%s28652_s0 + $0xb08] sm:$0xff]  ;;  %v4540_v53 = vld [vmem:[%s28652_s0 + $0xb18] sm:$0xff] }
 0x53e   :  { %v4291_v40 = vmax.f32 %v4259_v20, %v4275_v9  ;;  %v4278_v26 = vmax.f32 %v22781_v6, %v18305_v13  ;;  %v4321_v12 = vmax.f32 %v4305_v58, 0.0  ;;  %v4308_v49 = vadd.f32 %v22789_v51, %v4292_v59  ;;  %18471 = vmatpush3.msra.mxu0 %v15090_v36  ;;  %v15089_v32 = vld [vmem:[%s28653_s3 + $0x2e8] sm:$0xff]  ;;  %v4539_v22 = vld [vmem:[%s28652_s0 + $0xb10] sm:$0xff]  ;;  %v4541_v20 = vld [vmem:[%s28652_s0 + $0xb20] sm:$0xff] }
 0x53f   :  { %v4238_v27 = vpop.f32.mrf.mxu0  ;;  %18472 = vmatprep.subr.mxu0 %v15089_v32  ;;  %v15088_v0 = vld [vmem:[%s28653_s3 + $0x2e0] sm:$0xff]  ;;  %v4542_v59 = vld [vmem:[%s28652_s0 + $0xb28] sm:$0xff]  ;;  %v4543_v9 = vld [vmem:[%s28652_s0 + $0xb30] sm:$0xff] }
 0x540   :  { %v4294_v8 = vmax.f32 %v28887_v37, %v4278_v26  ;;  %v4277_v57 = vmax.f32 %v22783_v50, %v4238_v27  ;;  %18353 = vmatprep.mubr.f32.mxu1 %v4321_v12  ;;  %v4307_v44 = vadd.f32 %v22789_v51, %v4291_v40  ;;  %v4324_v14 = vmax.f32 %v4308_v49, 0.0  ;;  %v4506_v50 = vld [vmem:[%s28652_s0 + $0xa08] sm:$0xff]  ;;  %18473 = vmatpush3.msra.mxu0 %v15089_v32  ;;  %v4544_v58 = vld [vmem:[%s28652_s0 + $0xb38] sm:$0xff]  ;;  %v4545_v13 = vld [vmem:[%s28652_s0 + $0xb40] sm:$0xff] }
 0x541   :  { %18354 = vmatmul.mubr.f32.gmra.mxu1 %v4322_v11  ;;  %18474 = vmatprep.subr.mxu0 %v15088_v0  ;;  %v15087_v40 = vld [vmem:[%s28653_s3 + $0x2d8] sm:$0xff]  ;;  %v4546_v26 = vld [vmem:[%s28652_s0 + $0xb48] sm:$0xff]  ;;  %v4547_v12 = vld [vmem:[%s28652_s0 + $0xb50] sm:$0xff] }
 0x542   :  { %v4293_v23 = vmax.f32 %v4261_v46, %v4277_v57  ;;  %v4323_v6 = vmax.f32 %v4307_v44, 0.0  ;;  %v4310_v34 = vadd.f32 %v22789_v51, %v4294_v8  ;;  %18475 = vmatpush3.msra.mxu0 %v15088_v0  ;;  %v4548_v11 = vld [vmem:[%s28652_s0 + $0xb58] sm:$0xff]  ;;  %v4549_v49 = vld [vmem:[%s28652_s0 + $0xb60] sm:$0xff]  ;;  %v15086_v27 = vld [vmem:[%s28653_s3 + $0x2d0] sm:$0xff] }
 0x543   :  { %18476 = vmatprep.subr.mxu0 %v15087_v40  ;;  %v4550_v46 = vld [vmem:[%s28652_s0 + $0xb68] sm:$0xff]  ;;  %v4551_v37 = vld [vmem:[%s28652_s0 + $0xb70] sm:$0xff]  ;;  %v4552_v8 = vld [vmem:[%s28652_s0 + $0xb78] sm:$0xff] }
 0x544   :  { %18356 = vmatprep.mubr.f32.mxu1 %v4323_v6  ;;  %v4309_v56 = vadd.f32 %v22789_v51, %v4293_v23  ;;  %v4326_v31 = vmax.f32 %v4310_v34, 0.0  ;;  %18477 = vmatpush3.msra.mxu0 %v15087_v40  ;;  %v4553_v57 = vld [vmem:[%s28652_s0 + $0xb80] sm:$0xff]  ;;  %v15085_v44 = vld [vmem:[%s28653_s3 + $0x2c8] sm:$0xff]  ;;  %v4555_v6 = vld [vmem:[%s28652_s0 + $0xb90] sm:$0xff] }
 0x545   :  { %18357 = vmatmul.mubr.f32.gmra.mxu1 %v4324_v14  ;;  %18478 = vmatprep.subr.mxu0 %v15086_v27  ;;  %v4554_v23 = vld [vmem:[%s28652_s0 + $0xb88] sm:$0xff]  ;;  %v4556_v14 = vld [vmem:[%s28652_s0 + $0xb98] sm:$0xff]  ;;  %v4557_v34 = vld [vmem:[%s28652_s0 + $0xba0] sm:$0xff] }
 0x546   :  { %v4325_v4 = vmax.f32 %v4309_v56, 0.0  ;;  %18479 = vmatpush3.msra.mxu0 %v15086_v27  ;;  %v4558_v56 = vld [vmem:[%s28652_s0 + $0xba8] sm:$0xff]  ;;  %v28897_v36 = vld [vmem:[#allocation37_spill] sm:$0xff] }
 0x547   :  { %18480 = vmatprep.subr.mxu0 %v15085_v44 }
 0x548   :  { %18359 = vmatprep.mubr.f32.mxu1 %v4325_v4  ;;  %18481 = vmatpush3.msra.mxu0 %v15085_v44  ;;  %v15084_v4 = vld [vmem:[%s28653_s3 + $0x2c0] sm:$0xff] }
 0x549   :  { %18360 = vmatmul.mubr.f32.gmra.mxu1 %v4326_v31  ;;  %v4559_v31 = vld [vmem:[%s28652_s0 + $0xbb0] sm:$0xff]  ;;  %18482 = vmatprep.subr.mxu0 %v15084_v4 }
 0x54a   :  { %18372 = vmatprep.mubr.msk.f32.mxu1 %vm96_vm1, %v4505_v33  ;;  %18483 = vmatpush3.msra.mxu0 %v15084_v4  ;;  %v4560_v33 = vld [vmem:[%s28652_s0 + $0xbb8] sm:$0xff] }
 0x54d   :  { %18373 = vmatmul.mubr.msk.f32.vlgmr.msra.gmra.mxu1 %vm96_vm1, %v4506_v50  ;;  %v4561_v50 = vld [vmem:[%s28652_s0 + $0xbc0] sm:$0xff] }
 0x54e   :  { %18375 = vmatprep.mubr.msk.f32.mxu1 %vm96_vm1, %v4507_v41  ;;  %v4562_v41 = vld [vmem:[%s28652_s0 + $0xbc8] sm:$0xff] }
 0x551   :  { %18376 = vmatmul.mubr.msk.f32.gmra.mxu1 %vm96_vm1, %v4508_v10  ;;  %v15083_v10 = vld [vmem:[%s28653_s3 + $0x2b8] sm:$0xff] }
 0x552   :  { %18378 = vmatprep.mubr.msk.f32.mxu1 %vm96_vm1, %v4509_v52  ;;  %v4563_v52 = vld [vmem:[%s28652_s0 + $0xbd0] sm:$0xff]  ;;  %18484 = vmatprep.subr.mxu0 %v15083_v10 }
 0x553   :  { %18485 = vmatpush3.msra.mxu0 %v15083_v10 }
 0x555   :  { %18379 = vmatmul.mubr.msk.f32.gmra.mxu1 %vm96_vm1, %v4510_v60  ;;  %v4564_v60 = vld [vmem:[%s28652_s0 + $0xbd8] sm:$0xff] }
 0x556   :  { %18381 = vmatprep.mubr.msk.f32.mxu1 %vm96_vm1, %v4511_v35  ;;  %v4565_v35 = vld [vmem:[%s28652_s0 + $0xbe0] sm:$0xff] }
 0x559   :  { %18382 = vmatmul.mubr.msk.f32.gmra.mxu1 %vm96_vm1, %v4512_v21  ;;  %v4566_v21 = vld [vmem:[%s28652_s0 + $0xbe8] sm:$0xff] }
 0x55a   :  { %18384 = vmatprep.mubr.msk.f32.mxu1 %vm96_vm1, %v4513_v16  ;;  %v15082_v16 = vld [vmem:[%s28653_s3 + $0x2b0] sm:$0xff] }
 0x55b   :  { %18486 = vmatprep.subr.mxu0 %v15082_v16 }
 0x55c   :  { %18487 = vmatpush3.msra.mxu0 %v15082_v16 }
 0x55d   :  { %18385 = vmatmul.mubr.msk.f32.gmra.mxu1 %vm96_vm1, %v4514_v55  ;;  %v4567_v55 = vld [vmem:[%s28652_s0 + $0xbf0] sm:$0xff] }
 0x55e   :  { %18387 = vmatprep.mubr.msk.f32.mxu1 %vm96_vm1, %v4515_v7  ;;  %v4568_v7 = vld [vmem:[%s28652_s0 + $0xbf8] sm:$0xff] }
 0x561   :  { %18388 = vmatmul.mubr.msk.f32.gmra.mxu1 %vm96_vm1, %v4516_v24  ;;  %v15081_v24 = vld [vmem:[%s28653_s3 + $0x2a8] sm:$0xff] }
 0x562   :  { %18390 = vmatprep.mubr.msk.f32.mxu1 %vm96_vm1, %v4517_v63  ;;  %18488 = vmatprep.subr.mxu0 %v15081_v24  ;;  %v15080_v63 = vld [vmem:[%s28653_s3 + $0x2a0] sm:$0xff] }
 0x563   :  { %18489 = vmatpush3.msra.mxu0 %v15081_v24 }
 0x564   :  { %18490 = vmatprep.subr.mxu0 %v15080_v63 }
 0x565   :  { %18391 = vmatmul.mubr.msk.f32.gmra.mxu1 %vm96_vm1, %v4518_v3  ;;  %18491 = vmatpush3.msra.mxu0 %v15080_v63  ;;  %v15079_v3 = vld [vmem:[%s28653_s3 + $0x298] sm:$0xff] }
 0x566   :  { %18393 = vmatprep.mubr.msk.f32.mxu1 %vm96_vm1, %v4519_v25  ;;  %18492 = vmatprep.subr.mxu0 %v15079_v3  ;;  %v15078_v25 = vld [vmem:[%s28653_s3 + $0x290] sm:$0xff] }
 0x567   :  { %18493 = vmatpush3.msra.mxu0 %v15079_v3 }
 0x568   :  { %18494 = vmatprep.subr.mxu0 %v15078_v25 }
 0x569   :  { %18394 = vmatmul.mubr.msk.f32.gmra.mxu1 %vm96_vm1, %v4520_v1  ;;  %18495 = vmatpush3.msra.mxu0 %v15078_v25  ;;  %v15077_v1 = vld [vmem:[%s28653_s3 + $0x288] sm:$0xff] }
 0x56a   :  { %18396 = vmatprep.mubr.msk.f32.mxu1 %vm96_vm1, %v4521_v47  ;;  %18496 = vmatprep.subr.mxu0 %v15077_v1 }
 0x56b   :  { %18497 = vmatpush3.msra.mxu0 %v15077_v1 }
 0x56d   :  { %18397 = vmatmul.mubr.msk.f32.gmra.mxu1 %vm96_vm1, %v4522_v5  ;;  %v28888_v5 = vld [vmem:[#allocation35_spill] sm:$0xff] }
 0x56e   :  { %18399 = vmatprep.mubr.msk.f32.mxu1 %vm96_vm1, %v4523_v48 }
 0x571   :  { %18400 = vmatmul.mubr.msk.f32.gmra.mxu1 %vm96_vm1, %v4524_v54 }
 0x572   :  { %18402 = vmatprep.mubr.msk.f32.mxu1 %vm96_vm1, %v4525_v15 }
 0x575   :  { %18403 = vmatmul.mubr.msk.f32.gmra.mxu1 %vm96_vm1, %v4526_v29  ;;  %v28891_v29 = vld [vmem:[#allocation25_spill] sm:$0xff] }
 0x576   :  { %18405 = vmatprep.mubr.msk.f32.mxu1 %vm96_vm1, %v4527_v43 }
 0x579   :  { %18406 = vmatmul.mubr.msk.f32.gmra.mxu1 %vm96_vm1, %v4528_v45 }
 0x57a   :  { %18408 = vmatprep.mubr.msk.f32.mxu1 %vm96_vm1, %v4529_v28 }
 0x57d   :  { %18409 = vmatmul.mubr.msk.f32.gmra.mxu1 %vm96_vm1, %v4530_v17  ;;  %v28894_v17 = vld [vmem:[#allocation10_spill] sm:$0xff] }
 0x57e   :  { %18411 = vmatprep.mubr.msk.f32.mxu1 %vm96_vm1, %v4531_v62  ;;  %v15076_v62 = vld [vmem:[%s28653_s3 + $0x280] sm:$0xff] }
 0x57f   :  { %18498 = vmatprep.subr.mxu0 %v15076_v62 }
 0x580   :  { %18499 = vmatpush3.msra.mxu0 %v15076_v62 }
 0x581   :  { %18412 = vmatmul.mubr.msk.f32.gmra.mxu1 %vm96_vm1, %v4532_v42 }
 0x582   :  { %18414 = vmatprep.mubr.msk.f32.mxu1 %vm96_vm1, %v4533_v2 }
 0x585   :  { %18415 = vmatmul.mubr.msk.f32.gmra.mxu1 %vm96_vm1, %v4534_v19  ;;  %v23175_v19 = vld [vmem:[%s28651_s1 + $0x20] sm:$0xf] }
 0x586   :  { %18417 = vmatprep.mubr.msk.f32.mxu1 %vm96_vm1, %v4535_v30  ;;  %18524 = vmatprep.subr.msk.mxu0 %vm289_vm0, %v23175_v19 }
 0x589   :  { %18418 = vmatmul.mubr.msk.f32.gmra.mxu1 %vm96_vm1, %v4536_v39 }
 0x58a   :  { %18420 = vmatprep.mubr.msk.f32.mxu1 %vm96_vm1, %v4537_v61 }
 0x58d   :  { %18421 = vmatmul.mubr.msk.f32.gmra.mxu1 %vm96_vm1, %v4538_v38  ;;  %v28900_v38 = vld [vmem:[#allocation38_spill] sm:$0xff] }
 0x58e   :  { %18423 = vmatprep.mubr.msk.f32.mxu1 %vm96_vm1, %v4539_v22 }
 0x591   :  { %18424 = vmatmul.mubr.msk.f32.gmra.mxu1 %vm96_vm1, %v4540_v53 }
 0x592   :  { %18426 = vmatprep.mubr.msk.f32.mxu1 %vm96_vm1, %v4541_v20  ;;  %v28903_v20 = vld [vmem:[#allocation3_spill] sm:$0xff] }
 0x595   :  { %18427 = vmatmul.mubr.msk.f32.gmra.mxu1 %vm96_vm1, %v4542_v59 }
 0x596   :  { %18429 = vmatprep.mubr.msk.f32.mxu1 %vm96_vm1, %v4543_v9 }
 0x599   :  { %18430 = vmatmul.mubr.msk.f32.gmra.mxu1 %vm96_vm1, %v4544_v58  ;;  %v28906_v58 = vld [vmem:[#allocation41_spill] sm:$0xff] }
 0x59a   :  { %18432 = vmatprep.mubr.msk.f32.mxu1 %vm96_vm1, %v4545_v13 }
 0x59d   :  { %18433 = vmatmul.mubr.msk.f32.gmra.mxu1 %vm96_vm1, %v4546_v26 }
 0x59e   :  { %18435 = vmatprep.mubr.msk.f32.mxu1 %vm96_vm1, %v4547_v12  ;;  %v28909_v12 = vld [vmem:[#allocation19_spill] sm:$0xff] }
 0x5a1   :  { %18436 = vmatmul.mubr.msk.f32.gmra.mxu1 %vm96_vm1, %v4548_v11 }
 0x5a2   :  { %18438 = vmatprep.mubr.msk.f32.mxu1 %vm96_vm1, %v4549_v49 }
 0x5a5   :  { %18439 = vmatmul.mubr.msk.f32.gmra.mxu1 %vm96_vm1, %v4550_v46 }
 0x5a6   :  { %18441 = vmatprep.mubr.msk.f32.mxu1 %vm96_vm1, %v4551_v37 }
 0x5a9   :  { %18442 = vmatmul.mubr.msk.f32.gmra.mxu1 %vm96_vm1, %v4552_v8 }
 0x5aa   :  { %18444 = vmatprep.mubr.msk.f32.mxu1 %vm96_vm1, %v4553_v57 }
 0x5ad   :  { %18445 = vmatmul.mubr.msk.f32.gmra.mxu1 %vm96_vm1, %v4554_v23 }
 0x5ae   :  { %18447 = vmatprep.mubr.msk.f32.mxu1 %vm96_vm1, %v4555_v6 }
 0x5b1   :  { %18448 = vmatmul.mubr.msk.f32.gmra.mxu1 %vm96_vm1, %v4556_v14 }
 0x5b2   :  { %18450 = vmatprep.mubr.msk.f32.mxu1 %vm96_vm1, %v4557_v34 }
 0x5b5   :  { %18451 = vmatmul.mubr.msk.f32.gmra.mxu1 %vm96_vm1, %v4558_v56 }
 0x5b6   :  { %18453 = vmatprep.mubr.msk.f32.mxu1 %vm96_vm1, %v4559_v31 }
 0x5b9   :  { %18454 = vmatmul.mubr.msk.f32.gmra.mxu1 %vm96_vm1, %v4560_v33 }
 0x5ba   :  { %18456 = vmatprep.mubr.msk.f32.mxu1 %vm96_vm1, %v4561_v50 }
 0x5bd   :  { %18457 = vmatmul.mubr.msk.f32.gmra.mxu1 %vm96_vm1, %v4562_v41 }
 0x5be   :  { %18459 = vmatprep.mubr.msk.f32.mxu1 %vm96_vm1, %v4563_v52 }
 0x5c1   :  { %18460 = vmatmul.mubr.msk.f32.gmra.mxu1 %vm96_vm1, %v4564_v60 }
 0x5c2   :  { %18462 = vmatprep.mubr.msk.f32.mxu1 %vm96_vm1, %v4565_v35 }
 0x5c5   :  { %18463 = vmatmul.mubr.msk.f32.gmra.mxu1 %vm96_vm1, %v4566_v21 }
 0x5c6   :  { %18465 = vmatprep.mubr.msk.f32.mxu1 %vm96_vm1, %v4567_v55 }
 0x5c9   :  { %18466 = vmatmul.mubr.msk.f32.gmra.mxu1 %vm96_vm1, %v4568_v7 }
 0x5ed   :  { %v18340_v47 = vpop.f32.mrf.mxu1 }
 0x5ee   :  { %v23155_v48 = vadd.f32 %v18340_v47, %v28888_v5 }
 0x5ef   :  { %v23157_v54 = vpop.f32.mrf.mxu1 }
 0x5f0   :  { %28889 = vst [vmem:[#allocation13_spill] sm:$0xff] %v23155_v48  ;;  %28890 = vst [vmem:[#allocation47_spill] sm:$0xff] %v23157_v54 }
 0x5f1   :  { %v18343_v15 = vpop.f32.mrf.mxu1 }
 0x5f2   :  { %v23160_v43 = vadd.f32 %v18343_v15, %v28891_v29 }
 0x5f3   :  { %v23162_v45 = vpop.f32.mrf.mxu1 }
 0x5f4   :  { %28892 = vst [vmem:[#allocation32_spill] sm:$0xff] %v23160_v43  ;;  %28893 = vst [vmem:[#allocation15_spill] sm:$0xff] %v23162_v45 }
 0x5f5   :  { %v18346_v28 = vpop.f32.mrf.mxu1 }
 0x5f6   :  { %v23165_v18 = vadd.f32 %v18346_v28, %v28894_v17 }
 0x5f7   :  { %v23170_v42 = vpop.f32.mrf.mxu1 }
 0x5f8   :  { %28895 = vst [vmem:[#allocation34_spill] sm:$0xff] %v23165_v18  ;;  %28896 = vst [vmem:[#allocation17_spill] sm:$0xff] %v23170_v42 }
 0x5f9   :  { %v18349_v2 = vpop.f32.mrf.mxu1 }
 0x5fa   :  { %v23180_v30 = vadd.f32 %v18349_v2, %v28897_v36 }
 0x5fb   :  { %v23182_v39 = vpop.f32.mrf.mxu1 }
 0x5fc   :  { %28898 = vst [vmem:[#allocation36_spill] sm:$0xff] %v23180_v30  ;;  %28899 = vst [vmem:[#allocation35_spill] sm:$0xff] %v23182_v39 }
 0x5fd   :  { %v18352_v61 = vpop.f32.mrf.mxu1 }
 0x5fe   :  { %v23185_v32 = vadd.f32 %v18352_v61, %v28900_v38 }
 0x5ff   :  { %v23187_v22 = vpop.f32.mrf.mxu1 }
 0x600   :  { %28901 = vst [vmem:[#allocation25_spill] sm:$0xff] %v23185_v32  ;;  %28902 = vst [vmem:[#allocation10_spill] sm:$0xff] %v23187_v22 }
 0x601   :  { %v18355_v53 = vpop.f32.mrf.mxu1 }
 0x602   :  { %v23190_v0 = vadd.f32 %v18355_v53, %v28903_v20 }
 0x603   :  { %v23192_v59 = vpop.f32.mrf.mxu1 }
 0x604   :  { %28904 = vst [vmem:[#allocation37_spill] sm:$0xff] %v23190_v0  ;;  %28905 = vst [vmem:[#allocation38_spill] sm:$0xff] %v23192_v59 }
 0x605   :  { %v18358_v9 = vpop.f32.mrf.mxu1 }
 0x606   :  { %v23195_v13 = vadd.f32 %v18358_v9, %v28906_v58 }
 0x607   :  { %v23197_v40 = vpop.f32.mrf.mxu1 }
 0x608   :  { %28907 = vst [vmem:[#allocation3_spill] sm:$0xff] %v23195_v13  ;;  %28908 = vst [vmem:[#allocation41_spill] sm:$0xff] %v23197_v40 }
 0x609   :  { %v18361_v26 = vpop.f32.mrf.mxu1 }
 0x60a   :  { %v23200_v11 = vadd.f32 %v18361_v26, %v28909_v12 }
 0x60b   :  { %v23202_v49 = vpop.f32.mrf.mxu1 }
 0x60c   :  { %28910 = vst [vmem:[#allocation19_spill] sm:$0xff] %v23200_v11  ;;  %28911 = vst [vmem:[#allocation49_spill] sm:$0xff] %v23202_v49 }
 0x60d   :  { %v18374_v27 = vpop.f32.mrf.mxu1 }
 0x60f   :  { %v23204_v46 = vpop.f32.mrf.mxu1 }
 0x611   :  { %v23206_v37 = vpop.f32.mrf.mxu1 }
 0x613   :  { %v23208_v8 = vpop.f32.mrf.mxu1 }
 0x615   :  { %v23210_v57 = vpop.f32.mrf.mxu1 }
 0x617   :  { %v23212_v44 = vpop.f32.mrf.mxu1 }
 0x619   :  { %v23214_v23 = vpop.f32.mrf.mxu1 }
 0x61b   :  { %v23216_v6 = vpop.f32.mrf.mxu1 }
 0x61d   :  { %v23218_v14 = vpop.f32.mrf.mxu1 }
 0x61f   :  { %v23220_v34 = vpop.f32.mrf.mxu1 }
 0x621   :  { %v23222_v56 = vpop.f32.mrf.mxu1 }
 0x623   :  { %v23224_v4 = vpop.f32.mrf.mxu1 }
 0x625   :  { %v23226_v31 = vpop.f32.mrf.mxu1 }
 0x627   :  { %v23228_v33 = vpop.f32.mrf.mxu1 }
 0x629   :  { %v23230_v50 = vpop.f32.mrf.mxu1 }
 0x62b   :  { %v23232_v41 = vpop.f32.mrf.mxu1 }
 0x62d   :  { %v18398_v10 = vpop.f32.mrf.mxu1 }
 0x62e   :  { %v5147_v52 = vmax.f32 %v18374_v27, %v18398_v10 }
 0x62f   :  { %v4907_v60 = vpop.f32.mrf.mxu1 }
 0x630   :  { %v5146_v59 = vmax.f32 %v23204_v46, %v4907_v60 }
 0x631   :  { %v18401_v35 = vpop.f32.mrf.mxu1 }
 0x632   :  { %v5149_v21 = vmax.f32 %v23206_v37, %v18401_v35 }
 0x633   :  { %v4917_v16 = vpop.f32.mrf.mxu1 }
 0x634   :  { %v5148_v0 = vmax.f32 %v23208_v8, %v4917_v16 }
 0x635   :  { %v18404_v55 = vpop.f32.mrf.mxu1 }
 0x636   :  { %v5151_v7 = vmax.f32 %v23210_v57, %v18404_v55 }
 0x637   :  { %v4927_v24 = vpop.f32.mrf.mxu1 }
 0x639   :  { %v23236_v63 = vpop.f32.mrf.mxu1 }
 0x63b   :  { %v23240_v25 = vpop.f32.mrf.mxu1 }
 0x63d   :  { %v23242_v1 = vpop.f32.mrf.mxu1 }
 0x63f   :  { %v23246_v5 = vpop.f32.mrf.mxu1 }
 0x640   :  { %v5154_v16 = vmax.f32 %v23220_v34, %v23246_v5 }
 0x641   :  { %v23248_v15 = vpop.f32.mrf.mxu1 }
 0x643   :  { %v23252_v28 = vpop.f32.mrf.mxu1 }
 0x645   :  { %v23254_v17 = vpop.f32.mrf.mxu1 }
 0x647   :  { %v23258_v2 = vpop.f32.mrf.mxu1 }
 0x649   :  { %v23260_v36 = vpop.f32.mrf.mxu1 }
 0x64b   :  { %v23264_v38 = vpop.f32.mrf.mxu1 }
 0x64d   :  { %v18422_v53 = vpop.f32.mrf.mxu1 }
 0x64f   :  { %v4987_v20 = vpop.f32.mrf.mxu1 }
 0x651   :  { %v18425_v9 = vpop.f32.mrf.mxu1 }
 0x653   :  { %v4997_v58 = vpop.f32.mrf.mxu1 }
 0x655   :  { %v18428_v26 = vpop.f32.mrf.mxu1 }
 0x657   :  { %v5007_v12 = vpop.f32.mrf.mxu1 }
 0x659   :  { %v18431_v27 = vpop.f32.mrf.mxu1 }
 0x65b   :  { %v5017_v37 = vpop.f32.mrf.mxu1 }
 0x65d   :  { %v23266_v57 = vpop.f32.mrf.mxu1 }
 0x65f   :  { %v23268_v10 = vpop.f32.mrf.mxu1 }
 0x661   :  { %v23270_v35 = vpop.f32.mrf.mxu1 }
 0x663   :  { %v23272_v55 = vpop.f32.mrf.mxu1 }
 0x665   :  { %v23274_v62 = vpop.f32.mrf.mxu1 }
 0x667   :  { %v23276_v61 = vpop.f32.mrf.mxu1 }
 0x669   :  { %v23278_v29 = vpop.f32.mrf.mxu1 }
 0x66b   :  { %v23280_v47 = vpop.f32.mrf.mxu1 }
 0x66c   :  { %28912 = vst [vmem:[#allocation50_spill] sm:$0xff] %v23280_v47 }
 0x66d   :  { %v18446_v3 = vpop.f32.mrf.mxu1 }
 0x66e   :  { %v5163_v49 = vmax.f32 %v18422_v53, %v18446_v3 }
 0x66f   :  { %v5067_v40 = vpop.f32.mrf.mxu1 }
 0x670   :  { %v5179_v22 = vmax.f32 %v5147_v52, %v5163_v49  ;;  %v5162_v39 = vmax.f32 %v4987_v20, %v5067_v40  ;;  %v23308_v52 = vld [vmem:[%s28651_s1 + $0x10] sm:$0xff] }
 0x671   :  { %v18449_v42 = vpop.f32.mrf.mxu1 }
 0x672   :  { %v5178_v45 = vmax.f32 %v5146_v59, %v5162_v39  ;;  %v5165_v54 = vmax.f32 %v18425_v9, %v18449_v42  ;;  %v5195_v11 = vadd.f32 %v22789_v51, %v5179_v22  ;;  %v5150_v39 = vmax.f32 %v23212_v44, %v4927_v24 }
 0x673   :  { %v5077_v13 = vpop.f32.mrf.mxu1 }
 0x674   :  { %v5181_v32 = vmax.f32 %v5149_v21, %v5165_v54  ;;  %v5164_v30 = vmax.f32 %v4997_v58, %v5077_v13  ;;  %v5194_v18 = vadd.f32 %v22789_v51, %v5178_v45  ;;  %v5211_v47 = vmax.f32 %v5195_v11, 0.0  ;;  %v23331_v58 = vld [vmem:[%s28651_s1] sm:$0xff] }
 0x675   :  { %v18452_v43 = vpop.f32.mrf.mxu1  ;;  %v5152_v45 = vmax.f32 %v23216_v6, %v23240_v25  ;;  %v23319_v25 = vld [vmem:[%s28651_s1 + $0x8] sm:$0xff] }
 0x676   :  { %v5180_v48 = vmax.f32 %v5148_v0, %v5164_v30  ;;  %v5167_v3 = vmax.f32 %v18428_v26, %v18452_v43  ;;  %v5210_v53 = vmax.f32 %v5194_v18, 0.0  ;;  %v5197_v49 = vadd.f32 %v22789_v51, %v5181_v32  ;;  %v23297_v0 = vld [vmem:[%s28651_s1 + $0x18] sm:$0xff] }
 0x677   :  { %v5087_v40 = vpop.f32.mrf.mxu1 }
 0x678   :  { %v5183_v42 = vmax.f32 %v5151_v7, %v5167_v3  ;;  %v5166_v59 = vmax.f32 %v5007_v12, %v5087_v40  ;;  %18500 = vmatprep.mubr.f32.mxu0 %v5210_v53  ;;  %v5196_v22 = vadd.f32 %v22789_v51, %v5180_v48  ;;  %v5213_v18 = vmax.f32 %v5197_v49, 0.0 }
 0x679   :  { %v18455_v46 = vpop.f32.mrf.mxu1  ;;  %18501 = vmatmul.mubr.f32.vlgmr.msra.gmra.mxu0 %v5211_v47  ;;  %v28913_v48 = vmax.f32 %v23214_v23, %v23236_v63  ;;  %v28914_v47 = vmax.f32 %v23218_v14, %v23242_v1 }
 0x67a   :  { %v5182_v54 = vmax.f32 %v5150_v39, %v5166_v59  ;;  %v5169_v13 = vmax.f32 %v18431_v27, %v18455_v46  ;;  %18525 = vmatpush3.msk.msra.mxu0 %vm289_vm0, %v23175_v19  ;;  %v5212_v43 = vmax.f32 %v5196_v22, 0.0  ;;  %v5199_v30 = vadd.f32 %v22789_v51, %v5183_v42 }
 0x67b   :  { %v5097_v32 = vpop.f32.mrf.mxu1  ;;  %18526 = vmatprep.subr.mxu0 %v23297_v0 }
 0x67c   :  { %v5185_v11 = vmax.f32 %v28913_v48, %v5169_v13  ;;  %v5168_v8 = vmax.f32 %v5017_v37, %v5097_v32  ;;  %18503 = vmatprep.mubr.f32.mxu0 %v5212_v43  ;;  %v5198_v44 = vadd.f32 %v22789_v51, %v5182_v54  ;;  %18527 = vmatpush3.msra.mxu0 %v23297_v0  ;;  %v5215_v7 = vmax.f32 %v5199_v30, 0.0 }
 0x67d   :  { %v18458_v6 = vpop.f32.mrf.mxu1  ;;  %18504 = vmatmul.mubr.f32.gmra.mxu0 %v5213_v18  ;;  %18528 = vmatprep.subr.mxu0 %v23308_v52 }
 0x67e   :  { %v5184_v60 = vmax.f32 %v5152_v45, %v5168_v8  ;;  %v5171_v21 = vmax.f32 %v23266_v57, %v18458_v6  ;;  %v5214_v23 = vmax.f32 %v5198_v44, 0.0  ;;  %18529 = vmatpush3.msra.mxu0 %v23308_v52  ;;  %v5201_v24 = vadd.f32 %v22789_v51, %v5185_v11  ;;  %v5406_v6 = vld [vmem:[%s28652_s0 + $0xc10] sm:$0xff] }
 0x67f   :  { %v5107_v63 = vpop.f32.mrf.mxu1  ;;  %18530 = vmatprep.subr.mxu0 %v23319_v25  ;;  %v5156_v57 = vmax.f32 %v23224_v4, %v23252_v28  ;;  %v5158_v4 = vmax.f32 %v23228_v33, %v23258_v2  ;;  %v5160_v33 = vmax.f32 %v23232_v41, %v23264_v38  ;;  %v28918_v2 = vld [vmem:[#allocation50_spill] sm:$0xff] }
 0x680   :  { %v5187_v20 = vmax.f32 %v28914_v47, %v5171_v21  ;;  %v5170_v9 = vmax.f32 %v23268_v10, %v5107_v63  ;;  %18506 = vmatprep.mubr.f32.mxu0 %v5214_v23  ;;  %v5200_v34 = vadd.f32 %v22789_v51, %v5184_v60  ;;  %18531 = vmatpush3.msra.mxu0 %v23319_v25  ;;  %v5217_v12 = vmax.f32 %v5201_v24, 0.0  ;;  %v5408_v60 = vld [vmem:[%s28652_s0 + $0xc20] sm:$0xff]  ;;  %v5409_v21 = vld [vmem:[%s28652_s0 + $0xc28] sm:$0xff]  ;;  %v5410_v23 = vld [vmem:[%s28652_s0 + $0xc30] sm:$0xff] }
 0x681   :  { %v18461_v5 = vpop.f32.mrf.mxu1  ;;  %18507 = vmatmul.mubr.f32.gmra.mxu0 %v5215_v7  ;;  %18532 = vmatprep.subr.mxu0 %v23331_v58  ;;  %v28915_v10 = vmax.f32 %v23222_v56, %v23248_v15  ;;  %v28916_v56 = vmax.f32 %v23226_v31, %v23254_v17  ;;  %v28917_v31 = vmax.f32 %v23230_v50, %v23260_v36  ;;  %v5404_v50 = vld [vmem:[%s28652_s0 + $0xc00] sm:$0xff]  ;;  %v5405_v36 = vld [vmem:[%s28652_s0 + $0xc08] sm:$0xff]  ;;  %v5414_v63 = vld [vmem:[%s28652_s0 + $0xc50] sm:$0xff] }
 0x682   :  { %v5186_v26 = vmax.f32 %v5154_v16, %v5170_v9  ;;  %v5173_v14 = vmax.f32 %v23270_v35, %v18461_v5  ;;  %v5216_v1 = vmax.f32 %v5200_v34, 0.0  ;;  %18533 = vmatpush3.msra.mxu0 %v23331_v58  ;;  %v5203_v27 = vadd.f32 %v22789_v51, %v5187_v20  ;;  %v5411_v16 = vld [vmem:[%s28652_s0 + $0xc38] sm:$0xff]  ;;  %v5412_v7 = vld [vmem:[%s28652_s0 + $0xc40] sm:$0xff]  ;;  %v5413_v24 = vld [vmem:[%s28652_s0 + $0xc48] sm:$0xff] }
 0x683   :  { %v5117_v37 = vpop.f32.mrf.mxu1  ;;  %v5415_v47 = vld [vmem:[%s28652_s0 + $0xc58] sm:$0xff]  ;;  %v5416_v20 = vld [vmem:[%s28652_s0 + $0xc60] sm:$0xff]  ;;  %v5417_v9 = vld [vmem:[%s28652_s0 + $0xc68] sm:$0xff] }
 0x684   :  { %v5189_v3 = vmax.f32 %v28915_v10, %v5173_v14  ;;  %v5172_v53 = vmax.f32 %v23272_v55, %v5117_v37  ;;  %18509 = vmatprep.mubr.f32.mxu0 %v5216_v1  ;;  %v5202_v49 = vadd.f32 %v22789_v51, %v5186_v26  ;;  %v5219_v59 = vmax.f32 %v5203_v27, 0.0  ;;  %v5418_v34 = vld [vmem:[%s28652_s0 + $0xc70] sm:$0xff]  ;;  %v5419_v5 = vld [vmem:[%s28652_s0 + $0xc78] sm:$0xff]  ;;  %v5420_v26 = vld [vmem:[%s28652_s0 + $0xc80] sm:$0xff] }
 0x685   :  { %v18464_v35 = vpop.f32.mrf.mxu1  ;;  %18510 = vmatmul.mubr.f32.gmra.mxu0 %v5217_v12  ;;  %v5421_v14 = vld [vmem:[%s28652_s0 + $0xc88] sm:$0xff]  ;;  %v5422_v1 = vld [vmem:[%s28652_s0 + $0xc90] sm:$0xff]  ;;  %v5423_v12 = vld [vmem:[%s28652_s0 + $0xc98] sm:$0xff] }
 0x686   :  { %v5188_v40 = vmax.f32 %v5156_v57, %v5172_v53  ;;  %v5175_v39 = vmax.f32 %v23274_v62, %v18464_v35  ;;  %v5218_v42 = vmax.f32 %v5202_v49, 0.0  ;;  %v5205_v22 = vadd.f32 %v22789_v51, %v5189_v3  ;;  %v5424_v27 = vld [vmem:[%s28652_s0 + $0xca0] sm:$0xff]  ;;  %v5425_v37 = vld [vmem:[%s28652_s0 + $0xca8] sm:$0xff]  ;;  %v5426_v57 = vld [vmem:[%s28652_s0 + $0xcb0] sm:$0xff] }
 0x687   :  { %v5127_v46 = vpop.f32.mrf.mxu1  ;;  %v5427_v10 = vld [vmem:[%s28652_s0 + $0xcb8] sm:$0xff]  ;;  %v5428_v3 = vld [vmem:[%s28652_s0 + $0xcc0] sm:$0xff]  ;;  %v5429_v53 = vld [vmem:[%s28652_s0 + $0xcc8] sm:$0xff] }
 0x688   :  { %v5191_v15 = vmax.f32 %v28916_v56, %v5175_v39  ;;  %v5174_v28 = vmax.f32 %v23276_v61, %v5127_v46  ;;  %18512 = vmatprep.mubr.f32.mxu0 %v5218_v42  ;;  %v5204_v55 = vadd.f32 %v22789_v51, %v5188_v40  ;;  %v5221_v45 = vmax.f32 %v5205_v22, 0.0  ;;  %v15172_v49 = vld [vmem:[%s28653_s3 + $0x378] sm:$0xff]  ;;  %v5430_v35 = vld [vmem:[%s28652_s0 + $0xcd0] sm:$0xff]  ;;  %v5432_v39 = vld [vmem:[%s28652_s0 + $0xce0] sm:$0xff] }
 0x689   :  { %v18467_v54 = vpop.f32.mrf.mxu1  ;;  %18513 = vmatmul.mubr.f32.gmra.mxu0 %v5219_v59  ;;  %18630 = vmatprep.subr.mxu1 %v15172_v49  ;;  %v5431_v40 = vld [vmem:[%s28652_s0 + $0xcd8] sm:$0xff]  ;;  %v5433_v42 = vld [vmem:[%s28652_s0 + $0xce8] sm:$0xff]  ;;  %v15171_v59 = vld [vmem:[%s28653_s3 + $0x370] sm:$0xff] }
 0x68a   :  { %v5190_v62 = vmax.f32 %v5158_v4, %v5174_v28  ;;  %v5177_v13 = vmax.f32 %v23278_v29, %v18467_v54  ;;  %v5220_v43 = vmax.f32 %v5204_v55, 0.0  ;;  %v5207_v18 = vadd.f32 %v22789_v51, %v5191_v15  ;;  %18631 = vmatpush3.msra.mxu1 %v15172_v49  ;;  %v5434_v22 = vld [vmem:[%s28652_s0 + $0xcf0] sm:$0xff]  ;;  %v5435_v46 = vld [vmem:[%s28652_s0 + $0xcf8] sm:$0xff]  ;;  %v5436_v4 = vld [vmem:[%s28652_s0 + $0xd00] sm:$0xff] }
 0x68b   :  { %v5137_v30 = vpop.f32.mrf.mxu1  ;;  %18632 = vmatprep.subr.mxu1 %v15171_v59  ;;  %v5437_v56 = vld [vmem:[%s28652_s0 + $0xd08] sm:$0xff]  ;;  %v5438_v28 = vld [vmem:[%s28652_s0 + $0xd10] sm:$0xff]  ;;  %v5439_v55 = vld [vmem:[%s28652_s0 + $0xd18] sm:$0xff] }
 0x68c   :  { %v5193_v17 = vmax.f32 %v28917_v31, %v5177_v13  ;;  %v5176_v61 = vmax.f32 %v28918_v2, %v5137_v30  ;;  %18515 = vmatprep.mubr.f32.mxu0 %v5220_v43  ;;  %v5206_v32 = vadd.f32 %v22789_v51, %v5190_v62  ;;  %v5223_v11 = vmax.f32 %v5207_v18, 0.0  ;;  %18633 = vmatpush3.msra.mxu1 %v15171_v59  ;;  %v15170_v15 = vld [vmem:[%s28653_s3 + $0x368] sm:$0xff]  ;;  %v5440_v54 = vld [vmem:[%s28652_s0 + $0xd20] sm:$0xff]  ;;  %v5442_v43 = vld [vmem:[%s28652_s0 + $0xd30] sm:$0xff] }
 0x68d   :  { %18516 = vmatmul.mubr.f32.gmra.mxu0 %v5221_v45  ;;  %18634 = vmatprep.subr.mxu1 %v15170_v15  ;;  %v15169_v62 = vld [vmem:[%s28653_s3 + $0x360] sm:$0xff]  ;;  %v5441_v13 = vld [vmem:[%s28652_s0 + $0xd28] sm:$0xff]  ;;  %v5443_v45 = vld [vmem:[%s28652_s0 + $0xd38] sm:$0xff] }
 0x68e   :  { %v5192_v48 = vmax.f32 %v5160_v33, %v5176_v61  ;;  %v5222_v29 = vmax.f32 %v5206_v32, 0.0  ;;  %v5209_v8 = vadd.f32 %v22789_v51, %v5193_v17  ;;  %18635 = vmatpush3.msra.mxu1 %v15170_v15  ;;  %v5444_v18 = vld [vmem:[%s28652_s0 + $0xd40] sm:$0xff]  ;;  %v15168_v30 = vld [vmem:[%s28653_s3 + $0x358] sm:$0xff]  ;;  %v5445_v33 = vld [vmem:[%s28652_s0 + $0xd48] sm:$0xff] }
 0x68f   :  { %18636 = vmatprep.subr.mxu1 %v15169_v62  ;;  %v5446_v31 = vld [vmem:[%s28652_s0 + $0xd50] sm:$0xff]  ;;  %v5447_v17 = vld [vmem:[%s28652_s0 + $0xd58] sm:$0xff]  ;;  %v5448_v2 = vld [vmem:[%s28652_s0 + $0xd60] sm:$0xff] }
 0x690   :  { %18518 = vmatprep.mubr.f32.mxu0 %v5222_v29  ;;  %v5208_v44 = vadd.f32 %v22789_v51, %v5192_v48  ;;  %v5225_v38 = vmax.f32 %v5209_v8, 0.0  ;;  %v5407_v51 = vld [vmem:[%s28652_s0 + $0xc18] sm:$0xff]  ;;  %18637 = vmatpush3.msra.mxu1 %v15169_v62  ;;  %v15167_v61 = vld [vmem:[%s28653_s3 + $0x350] sm:$0xff]  ;;  %v5449_v32 = vld [vmem:[%s28652_s0 + $0xd68] sm:$0xff] }
 0x691   :  { %18519 = vmatmul.mubr.f32.gmra.mxu0 %v5223_v11  ;;  %18638 = vmatprep.subr.mxu1 %v15168_v30  ;;  %v5450_v48 = vld [vmem:[%s28652_s0 + $0xd70] sm:$0xff]  ;;  %v5451_v29 = vld [vmem:[%s28652_s0 + $0xd78] sm:$0xff]  ;;  %v5452_v11 = vld [vmem:[%s28652_s0 + $0xd80] sm:$0xff] }
 0x692   :  { %v5224_v41 = vmax.f32 %v5208_v44, 0.0  ;;  %18639 = vmatpush3.msra.mxu1 %v15168_v30  ;;  %v15166_v8 = vld [vmem:[%s28653_s3 + $0x348] sm:$0xff]  ;;  %v15157_v59 = vld [vmem:[%s28653_s3 + $0x300] sm:$0xff] }
 0x693   :  { %18640 = vmatprep.subr.mxu1 %v15167_v61  ;;  %v5453_v44 = vld [vmem:[%s28652_s0 + $0xd88] sm:$0xff] }
 0x694   :  { %18521 = vmatprep.mubr.f32.mxu0 %v5224_v41  ;;  %18641 = vmatpush3.msra.mxu1 %v15167_v61  ;;  %v5454_v41 = vld [vmem:[%s28652_s0 + $0xd90] sm:$0xff]  ;;  %v28940_v61 = vld [vmem:[#allocation19_spill] sm:$0xff] }
 0x695   :  { %18522 = vmatmul.mubr.f32.gmra.mxu0 %v5225_v38  ;;  %18642 = vmatprep.subr.mxu1 %v15166_v8  ;;  %v5455_v38 = vld [vmem:[%s28652_s0 + $0xd98] sm:$0xff] }
 0x696   :  { %18534 = vmatprep.mubr.msk.f32.mxu0 %vm96_vm1, %v5404_v50  ;;  %18643 = vmatpush3.msra.mxu1 %v15166_v8  ;;  %v5456_v50 = vld [vmem:[%s28652_s0 + $0xda0] sm:$0xff] }
 0x699   :  { %18535 = vmatmul.mubr.msk.f32.vlgmr.msra.gmra.mxu0 %vm96_vm1, %v5405_v36  ;;  %v5457_v36 = vld [vmem:[%s28652_s0 + $0xda8] sm:$0xff] }
 0x69a   :  { %18537 = vmatprep.mubr.msk.f32.mxu0 %vm96_vm1, %v5406_v6  ;;  %v15165_v6 = vld [vmem:[%s28653_s3 + $0x340] sm:$0xff] }
 0x69b   :  { %18644 = vmatprep.subr.mxu1 %v15165_v6 }
 0x69c   :  { %18645 = vmatpush3.msra.mxu1 %v15165_v6 }
 0x69d   :  { %18538 = vmatmul.mubr.msk.f32.gmra.mxu0 %vm96_vm1, %v5407_v51  ;;  %v5458_v51 = vld [vmem:[%s28652_s0 + $0xdb0] sm:$0xff] }
 0x69e   :  { %18540 = vmatprep.mubr.msk.f32.mxu0 %vm96_vm1, %v5408_v60  ;;  %v5459_v60 = vld [vmem:[%s28652_s0 + $0xdb8] sm:$0xff] }
 0x6a1   :  { %18541 = vmatmul.mubr.msk.f32.gmra.mxu0 %vm96_vm1, %v5409_v21  ;;  %v5460_v21 = vld [vmem:[%s28652_s0 + $0xdc0] sm:$0xff] }
 0x6a2   :  { %18543 = vmatprep.mubr.msk.f32.mxu0 %vm96_vm1, %v5410_v23  ;;  %v5461_v23 = vld [vmem:[%s28652_s0 + $0xdc8] sm:$0xff] }
 0x6a5   :  { %18544 = vmatmul.mubr.msk.f32.gmra.mxu0 %vm96_vm1, %v5411_v16  ;;  %v15164_v16 = vld [vmem:[%s28653_s3 + $0x338] sm:$0xff] }
 0x6a6   :  { %18546 = vmatprep.mubr.msk.f32.mxu0 %vm96_vm1, %v5412_v7  ;;  %v5462_v7 = vld [vmem:[%s28652_s0 + $0xdd0] sm:$0xff]  ;;  %18646 = vmatprep.subr.mxu1 %v15164_v16 }
 0x6a7   :  { %18647 = vmatpush3.msra.mxu1 %v15164_v16 }
 0x6a9   :  { %18547 = vmatmul.mubr.msk.f32.gmra.mxu0 %vm96_vm1, %v5413_v24  ;;  %v5463_v24 = vld [vmem:[%s28652_s0 + $0xdd8] sm:$0xff] }
 0x6aa   :  { %18549 = vmatprep.mubr.msk.f32.mxu0 %vm96_vm1, %v5414_v63  ;;  %v5464_v63 = vld [vmem:[%s28652_s0 + $0xde0] sm:$0xff] }
 0x6ad   :  { %18550 = vmatmul.mubr.msk.f32.gmra.mxu0 %vm96_vm1, %v5415_v47  ;;  %v5465_v47 = vld [vmem:[%s28652_s0 + $0xde8] sm:$0xff] }
 0x6ae   :  { %18552 = vmatprep.mubr.msk.f32.mxu0 %vm96_vm1, %v5416_v20  ;;  %v15163_v20 = vld [vmem:[%s28653_s3 + $0x330] sm:$0xff] }
 0x6af   :  { %18648 = vmatprep.subr.mxu1 %v15163_v20 }
 0x6b0   :  { %18649 = vmatpush3.msra.mxu1 %v15163_v20 }
 0x6b1   :  { %18553 = vmatmul.mubr.msk.f32.gmra.mxu0 %vm96_vm1, %v5417_v9  ;;  %v5466_v9 = vld [vmem:[%s28652_s0 + $0xdf0] sm:$0xff] }
 0x6b2   :  { %18555 = vmatprep.mubr.msk.f32.mxu0 %vm96_vm1, %v5418_v34  ;;  %v5467_v34 = vld [vmem:[%s28652_s0 + $0xdf8] sm:$0xff] }
 0x6b5   :  { %18556 = vmatmul.mubr.msk.f32.gmra.mxu0 %vm96_vm1, %v5419_v5  ;;  %v15162_v5 = vld [vmem:[%s28653_s3 + $0x328] sm:$0xff] }
 0x6b6   :  { %18558 = vmatprep.mubr.msk.f32.mxu0 %vm96_vm1, %v5420_v26  ;;  %18650 = vmatprep.subr.mxu1 %v15162_v5  ;;  %v15161_v26 = vld [vmem:[%s28653_s3 + $0x320] sm:$0xff] }
 0x6b7   :  { %18651 = vmatpush3.msra.mxu1 %v15162_v5 }
 0x6b8   :  { %18652 = vmatprep.subr.mxu1 %v15161_v26 }
 0x6b9   :  { %18559 = vmatmul.mubr.msk.f32.gmra.mxu0 %vm96_vm1, %v5421_v14  ;;  %18653 = vmatpush3.msra.mxu1 %v15161_v26  ;;  %v15160_v14 = vld [vmem:[%s28653_s3 + $0x318] sm:$0xff] }
 0x6ba   :  { %18561 = vmatprep.mubr.msk.f32.mxu0 %vm96_vm1, %v5422_v1  ;;  %18654 = vmatprep.subr.mxu1 %v15160_v14  ;;  %v15159_v1 = vld [vmem:[%s28653_s3 + $0x310] sm:$0xff] }
 0x6bb   :  { %18655 = vmatpush3.msra.mxu1 %v15160_v14 }
 0x6bc   :  { %18656 = vmatprep.subr.mxu1 %v15159_v1 }
 0x6bd   :  { %18562 = vmatmul.mubr.msk.f32.gmra.mxu0 %vm96_vm1, %v5423_v12  ;;  %18657 = vmatpush3.msra.mxu1 %v15159_v1  ;;  %v15158_v12 = vld [vmem:[%s28653_s3 + $0x308] sm:$0xff] }
 0x6be   :  { %18564 = vmatprep.mubr.msk.f32.mxu0 %vm96_vm1, %v5424_v27  ;;  %18658 = vmatprep.subr.mxu1 %v15158_v12 }
 0x6bf   :  { %18659 = vmatpush3.msra.mxu1 %v15158_v12 }
 0x6c0   :  { %18660 = vmatprep.subr.mxu1 %v15157_v59 }
 0x6c1   :  { %18565 = vmatmul.mubr.msk.f32.gmra.mxu0 %vm96_vm1, %v5425_v37  ;;  %v28919_v37 = vld [vmem:[#allocation13_spill] sm:$0xff]  ;;  %18661 = vmatpush3.msra.mxu1 %v15157_v59 }
 0x6c2   :  { %18567 = vmatprep.mubr.msk.f32.mxu0 %vm96_vm1, %v5426_v57  ;;  %18686 = vmatprep.subr.msk.mxu1 %vm289_vm0, %v23175_v19 }
 0x6c5   :  { %18568 = vmatmul.mubr.msk.f32.gmra.mxu0 %vm96_vm1, %v5427_v10 }
 0x6c6   :  { %18570 = vmatprep.mubr.msk.f32.mxu0 %vm96_vm1, %v5428_v3 }
 0x6c9   :  { %18571 = vmatmul.mubr.msk.f32.gmra.mxu0 %vm96_vm1, %v5429_v53  ;;  %v28922_v53 = vld [vmem:[#allocation32_spill] sm:$0xff] }
 0x6ca   :  { %18573 = vmatprep.mubr.msk.f32.mxu0 %vm96_vm1, %v5430_v35 }
 0x6cd   :  { %18574 = vmatmul.mubr.msk.f32.gmra.mxu0 %vm96_vm1, %v5431_v40 }
 0x6ce   :  { %18576 = vmatprep.mubr.msk.f32.mxu0 %vm96_vm1, %v5432_v39  ;;  %v28925_v39 = vld [vmem:[#allocation34_spill] sm:$0xff] }
 0x6d1   :  { %18577 = vmatmul.mubr.msk.f32.gmra.mxu0 %vm96_vm1, %v5433_v42 }
 0x6d2   :  { %18579 = vmatprep.mubr.msk.f32.mxu0 %vm96_vm1, %v5434_v22 }
 0x6d5   :  { %18580 = vmatmul.mubr.msk.f32.gmra.mxu0 %vm96_vm1, %v5435_v46 }
 0x6d6   :  { %18582 = vmatprep.mubr.msk.f32.mxu0 %vm96_vm1, %v5436_v4  ;;  %v28928_v4 = vld [vmem:[#allocation36_spill] sm:$0xff] }
 0x6d9   :  { %18583 = vmatmul.mubr.msk.f32.gmra.mxu0 %vm96_vm1, %v5437_v56 }
 0x6da   :  { %18585 = vmatprep.mubr.msk.f32.mxu0 %vm96_vm1, %v5438_v28 }
 0x6dd   :  { %18586 = vmatmul.mubr.msk.f32.gmra.mxu0 %vm96_vm1, %v5439_v55  ;;  %v28931_v55 = vld [vmem:[#allocation25_spill] sm:$0xff] }
 0x6de   :  { %18588 = vmatprep.mubr.msk.f32.mxu0 %vm96_vm1, %v5440_v54 }
 0x6e1   :  { %18589 = vmatmul.mubr.msk.f32.gmra.mxu0 %vm96_vm1, %v5441_v13 }
 0x6e2   :  { %18591 = vmatprep.mubr.msk.f32.mxu0 %vm96_vm1, %v5442_v43  ;;  %v28934_v43 = vld [vmem:[#allocation37_spill] sm:$0xff] }
 0x6e5   :  { %18592 = vmatmul.mubr.msk.f32.gmra.mxu0 %vm96_vm1, %v5443_v45 }
 0x6e6   :  { %18594 = vmatprep.mubr.msk.f32.mxu0 %vm96_vm1, %v5444_v18 }
 0x6e9   :  { %18595 = vmatmul.mubr.msk.f32.gmra.mxu0 %vm96_vm1, %v5445_v33  ;;  %v28937_v33 = vld [vmem:[#allocation3_spill] sm:$0xff] }
 0x6ea   :  { %18597 = vmatprep.mubr.msk.f32.mxu0 %vm96_vm1, %v5446_v31 }
 0x6ed   :  { %18598 = vmatmul.mubr.msk.f32.gmra.mxu0 %vm96_vm1, %v5447_v17 }
 0x6ee   :  { %18600 = vmatprep.mubr.msk.f32.mxu0 %vm96_vm1, %v5448_v2 }
 0x6f1   :  { %18601 = vmatmul.mubr.msk.f32.gmra.mxu0 %vm96_vm1, %v5449_v32 }
 0x6f2   :  { %18603 = vmatprep.mubr.msk.f32.mxu0 %vm96_vm1, %v5450_v48 }
 0x6f5   :  { %18604 = vmatmul.mubr.msk.f32.gmra.mxu0 %vm96_vm1, %v5451_v29 }
 0x6f6   :  { %18606 = vmatprep.mubr.msk.f32.mxu0 %vm96_vm1, %v5452_v11 }
 0x6f9   :  { %18607 = vmatmul.mubr.msk.f32.gmra.mxu0 %vm96_vm1, %v5453_v44 }
 0x6fa   :  { %18609 = vmatprep.mubr.msk.f32.mxu0 %vm96_vm1, %v5454_v41 }
 0x6fd   :  { %18610 = vmatmul.mubr.msk.f32.gmra.mxu0 %vm96_vm1, %v5455_v38 }
 0x6fe   :  { %18612 = vmatprep.mubr.msk.f32.mxu0 %vm96_vm1, %v5456_v50 }
 0x701   :  { %18613 = vmatmul.mubr.msk.f32.gmra.mxu0 %vm96_vm1, %v5457_v36 }
 0x702   :  { %18615 = vmatprep.mubr.msk.f32.mxu0 %vm96_vm1, %v5458_v51 }
 0x705   :  { %18616 = vmatmul.mubr.msk.f32.gmra.mxu0 %vm96_vm1, %v5459_v60 }
 0x706   :  { %18618 = vmatprep.mubr.msk.f32.mxu0 %vm96_vm1, %v5460_v21 }
 0x709   :  { %18619 = vmatmul.mubr.msk.f32.gmra.mxu0 %vm96_vm1, %v5461_v23 }
 0x70a   :  { %18621 = vmatprep.mubr.msk.f32.mxu0 %vm96_vm1, %v5462_v7 }
 0x70d   :  { %18622 = vmatmul.mubr.msk.f32.gmra.mxu0 %vm96_vm1, %v5463_v24 }
 0x70e   :  { %18624 = vmatprep.mubr.msk.f32.mxu0 %vm96_vm1, %v5464_v63 }
 0x711   :  { %18625 = vmatmul.mubr.msk.f32.gmra.mxu0 %vm96_vm1, %v5465_v47 }
 0x712   :  { %18627 = vmatprep.mubr.msk.f32.mxu0 %vm96_vm1, %v5466_v9 }
 0x715   :  { %18628 = vmatmul.mubr.msk.f32.gmra.mxu0 %vm96_vm1, %v5467_v34 }
 0x739   :  { %v18502_v27 = vpop.f32.mrf.mxu0 }
 0x73a   :  { %v23666_v57 = vadd.f32 %v18502_v27, %v28919_v37 }
 0x73b   :  { %v23668_v10 = vpop.f32.mrf.mxu0 }
 0x73c   :  { %28920 = vst [vmem:[#allocation50_spill] sm:$0xff] %v23666_v57  ;;  %28921 = vst [vmem:[#allocation13_spill] sm:$0xff] %v23668_v10 }
 0x73d   :  { %v18505_v3 = vpop.f32.mrf.mxu0 }
 0x73e   :  { %v23671_v49 = vadd.f32 %v18505_v3, %v28922_v53 }
 0x73f   :  { %v23673_v35 = vpop.f32.mrf.mxu0 }
 0x740   :  { %28923 = vst [vmem:[#allocation32_spill] sm:$0xff] %v23671_v49  ;;  %28924 = vst [vmem:[#allocation51_spill] sm:$0xff] %v23673_v35 }
 0x741   :  { %v18508_v40 = vpop.f32.mrf.mxu0 }
 0x742   :  { %v23676_v42 = vadd.f32 %v18508_v40, %v28925_v39 }
 0x743   :  { %v23681_v22 = vpop.f32.mrf.mxu0 }
 0x744   :  { %28926 = vst [vmem:[#allocation34_spill] sm:$0xff] %v23676_v42  ;;  %28927 = vst [vmem:[#allocation52_spill] sm:$0xff] %v23681_v22 }
 0x745   :  { %v18511_v46 = vpop.f32.mrf.mxu0 }
 0x746   :  { %v23686_v56 = vadd.f32 %v18511_v46, %v28928_v4 }
 0x747   :  { %v23688_v15 = vpop.f32.mrf.mxu0 }
 0x748   :  { %28929 = vst [vmem:[#allocation36_spill] sm:$0xff] %v23686_v56  ;;  %28930 = vst [vmem:[#allocation53_spill] sm:$0xff] %v23688_v15 }
 0x749   :  { %v18514_v28 = vpop.f32.mrf.mxu0 }
 0x74a   :  { %v23691_v54 = vadd.f32 %v18514_v28, %v28931_v55 }
 0x74b   :  { %v23693_v62 = vpop.f32.mrf.mxu0 }
 0x74c   :  { %28932 = vst [vmem:[#allocation25_spill] sm:$0xff] %v23691_v54  ;;  %28933 = vst [vmem:[#allocation54_spill] sm:$0xff] %v23693_v62  ;;  %v23794_v54 = vld [vmem:[%s28654_s2] ss:$0 sm:$0xff] }
 0x74d   :  { %v18517_v13 = vpop.f32.mrf.mxu0 }
 0x74e   :  { %v23696_v45 = vadd.f32 %v18517_v13, %v28934_v43 }
 0x74f   :  { %v23698_v18 = vpop.f32.mrf.mxu0 }
 0x750   :  { %28935 = vst [vmem:[#allocation37_spill] sm:$0xff] %v23696_v45  ;;  %28936 = vst [vmem:[#allocation55_spill] sm:$0xff] %v23698_v18 }
 0x751   :  { %v18520_v30 = vpop.f32.mrf.mxu0 }
 0x752   :  { %v23701_v31 = vadd.f32 %v18520_v30, %v28937_v33 }
 0x753   :  { %v23703_v17 = vpop.f32.mrf.mxu0 }
 0x754   :  { %28938 = vst [vmem:[#allocation3_spill] sm:$0xff] %v23701_v31  ;;  %28939 = vst [vmem:[#allocation56_spill] sm:$0xff] %v23703_v17 }
 0x755   :  { %v18523_v2 = vpop.f32.mrf.mxu0 }
 0x756   :  { %v23706_v32 = vadd.f32 %v18523_v2, %v28940_v61 }
 0x757   :  { %v23708_v48 = vpop.f32.mrf.mxu0 }
 0x758   :  { %28941 = vst [vmem:[#allocation19_spill] sm:$0xff] %v23706_v32  ;;  %28942 = vst [vmem:[#allocation57_spill] sm:$0xff] %v23708_v48 }
 0x759   :  { %v18536_v29 = vpop.f32.mrf.mxu0 }
 0x75b   :  { %v23710_v11 = vpop.f32.mrf.mxu0 }
 0x75d   :  { %v23712_v8 = vpop.f32.mrf.mxu0 }
 0x75f   :  { %v23714_v44 = vpop.f32.mrf.mxu0 }
 0x761   :  { %v23716_v41 = vpop.f32.mrf.mxu0 }
 0x763   :  { %v23718_v38 = vpop.f32.mrf.mxu0 }
 0x765   :  { %v23720_v50 = vpop.f32.mrf.mxu0 }
 0x767   :  { %v23722_v36 = vpop.f32.mrf.mxu0 }
 0x769   :  { %v23724_v6 = vpop.f32.mrf.mxu0 }
 0x76b   :  { %v23726_v51 = vpop.f32.mrf.mxu0 }
 0x76d   :  { %v23728_v60 = vpop.f32.mrf.mxu0 }
 0x76f   :  { %v23730_v21 = vpop.f32.mrf.mxu0 }
 0x771   :  { %v23732_v23 = vpop.f32.mrf.mxu0 }
 0x773   :  { %v23734_v16 = vpop.f32.mrf.mxu0 }
 0x775   :  { %v23736_v7 = vpop.f32.mrf.mxu0 }
 0x777   :  { %v23738_v24 = vpop.f32.mrf.mxu0 }
 0x779   :  { %v18560_v63 = vpop.f32.mrf.mxu0 }
 0x77a   :  { %v6046_v47 = vmax.f32 %v18536_v29, %v18560_v63 }
 0x77b   :  { %v5806_v20 = vpop.f32.mrf.mxu0 }
 0x77c   :  { %v6045_v22 = vmax.f32 %v23710_v11, %v5806_v20 }
 0x77d   :  { %v18563_v9 = vpop.f32.mrf.mxu0 }
 0x77e   :  { %v6048_v34 = vmax.f32 %v23712_v8, %v18563_v9 }
 0x77f   :  { %v5816_v5 = vpop.f32.mrf.mxu0 }
 0x780   :  { %v6047_v49 = vmax.f32 %v23714_v44, %v5816_v5 }
 0x781   :  { %v18566_v26 = vpop.f32.mrf.mxu0 }
 0x782   :  { %v6050_v14 = vmax.f32 %v23716_v41, %v18566_v26 }
 0x783   :  { %v23742_v1 = vpop.f32.mrf.mxu0 }
 0x784   :  { %v6049_v20 = vmax.f32 %v23718_v38, %v23742_v1 }
 0x785   :  { %v23744_v12 = vpop.f32.mrf.mxu0 }
 0x786   :  { %v28943_v5 = vmax.f32 %v23720_v50, %v23744_v12 }
 0x787   :  { %v23748_v37 = vpop.f32.mrf.mxu0 }
 0x789   :  { %v23750_v3 = vpop.f32.mrf.mxu0 }
 0x78b   :  { %v23754_v40 = vpop.f32.mrf.mxu0 }
 0x78c   :  { %v6053_v50 = vmax.f32 %v23726_v51, %v23754_v40 }
 0x78d   :  { %v23756_v39 = vpop.f32.mrf.mxu0 }
 0x78f   :  { %v23760_v46 = vpop.f32.mrf.mxu0 }
 0x791   :  { %v23762_v4 = vpop.f32.mrf.mxu0 }
 0x793   :  { %v23766_v55 = vpop.f32.mrf.mxu0 }
 0x795   :  { %v23768_v13 = vpop.f32.mrf.mxu0 }
 0x797   :  { %v23772_v30 = vpop.f32.mrf.mxu0 }
 0x799   :  { %v18584_v33 = vpop.f32.mrf.mxu0 }
 0x79b   :  { %v5886_v2 = vpop.f32.mrf.mxu0 }
 0x79d   :  { %v18587_v61 = vpop.f32.mrf.mxu0 }
 0x79f   :  { %v5896_v29 = vpop.f32.mrf.mxu0 }
 0x7a1   :  { %v18590_v8 = vpop.f32.mrf.mxu0 }
 0x7a3   :  { %v5906_v41 = vpop.f32.mrf.mxu0 }
 0x7a5   :  { %v18593_v63 = vpop.f32.mrf.mxu0 }
 0x7a7   :  { %v5916_v9 = vpop.f32.mrf.mxu0 }
 0x7a9   :  { %v23774_v26 = vpop.f32.mrf.mxu0 }
 0x7ab   :  { %v23776_v28 = vpop.f32.mrf.mxu0 }
 0x7ad   :  { %v23778_v59 = vpop.f32.mrf.mxu0 }
 0x7af   :  { %v23780_v53 = vpop.f32.mrf.mxu0 }
 0x7b1   :  { %v23782_v27 = vpop.f32.mrf.mxu0 }
 0x7b3   :  { %v23784_v43 = vpop.f32.mrf.mxu0 }
 0x7b5   :  { %v23786_v48 = vpop.f32.mrf.mxu0 }
 0x7b7   :  { %v23788_v17 = vpop.f32.mrf.mxu0 }
 0x7b9   :  { %v18608_v18 = vpop.f32.mrf.mxu0 }
 0x7ba   :  { %v6062_v62 = vmax.f32 %v18584_v33, %v18608_v18 }
 0x7bb   :  { %v5966_v15 = vpop.f32.mrf.mxu0 }
 0x7bc   :  { %v6078_v35 = vmax.f32 %v6046_v47, %v6062_v62  ;;  %v6061_v10 = vmax.f32 %v5886_v2, %v5966_v15 }
 0x7bd   :  { %v18611_v32 = vpop.f32.mrf.mxu0 }
 0x7be   :  { %v6077_v31 = vmax.f32 %v6045_v22, %v6061_v10  ;;  %v6064_v45 = vmax.f32 %v18587_v61, %v18611_v32  ;;  %v6094_v56 = vadd.f32 %v23794_v54, %v6078_v35 }
 0x7bf   :  { %v5976_v42 = vpop.f32.mrf.mxu0 }
 0x7c0   :  { %v6080_v57 = vmax.f32 %v6048_v34, %v6064_v45  ;;  %v6063_v18 = vmax.f32 %v5896_v29, %v5976_v42  ;;  %v6093_v33 = vadd.f32 %v23794_v54, %v6077_v31  ;;  %v6110_v10 = vmax.f32 %v6094_v56, 0.0 }
 0x7c1   :  { %v18614_v11 = vpop.f32.mrf.mxu0 }
 0x7c2   :  { %v6079_v62 = vmax.f32 %v6047_v49, %v6063_v18  ;;  %v6066_v15 = vmax.f32 %v18590_v8, %v18614_v11  ;;  %v6109_v47 = vmax.f32 %v6093_v33, 0.0  ;;  %v6096_v22 = vadd.f32 %v23794_v54, %v6080_v57 }
 0x7c3   :  { %v5986_v32 = vpop.f32.mrf.mxu0  ;;  %v6051_v57 = vmax.f32 %v23722_v36, %v23748_v37 }
 0x7c4   :  { %v6082_v2 = vmax.f32 %v6050_v14, %v6066_v15  ;;  %v6065_v35 = vmax.f32 %v5906_v41, %v5986_v32  ;;  %18662 = vmatprep.mubr.f32.mxu1 %v6109_v47  ;;  %v6095_v44 = vadd.f32 %v23794_v54, %v6079_v62  ;;  %v6112_v56 = vmax.f32 %v6096_v22, 0.0 }
 0x7c5   :  { %v18617_v45 = vpop.f32.mrf.mxu0  ;;  %18663 = vmatmul.mubr.f32.vlgmr.msra.gmra.mxu1 %v6110_v10 }
 0x7c6   :  { %v6081_v42 = vmax.f32 %v6049_v20, %v6065_v35  ;;  %v6068_v31 = vmax.f32 %v18593_v63, %v18617_v45  ;;  %18687 = vmatpush3.msk.msra.mxu1 %vm289_vm0, %v23175_v19  ;;  %v6111_v49 = vmax.f32 %v6095_v44, 0.0  ;;  %v6098_v34 = vadd.f32 %v23794_v54, %v6082_v2 }
 0x7c7   :  { %v5996_v38 = vpop.f32.mrf.mxu0  ;;  %18688 = vmatprep.subr.mxu1 %v23297_v0 }
 0x7c8   :  { %v6084_v14 = vmax.f32 %v28943_v5, %v6068_v31  ;;  %v6067_v1 = vmax.f32 %v5916_v9, %v5996_v38  ;;  %18665 = vmatprep.mubr.f32.mxu1 %v6111_v49  ;;  %v6097_v61 = vadd.f32 %v23794_v54, %v6081_v42  ;;  %18689 = vmatpush3.msra.mxu1 %v23297_v0  ;;  %v6114_v12 = vmax.f32 %v6098_v34, 0.0  ;;  %v6306_v38 = vld [vmem:[%s28652_s0 + $0xe18] sm:$0xff]  ;;  %v6307_v5 = vld [vmem:[%s28652_s0 + $0xe20] sm:$0xff] }
 0x7c9   :  { %v18620_v19 = vpop.f32.mrf.mxu0  ;;  %18666 = vmatmul.mubr.f32.gmra.mxu1 %v6112_v56  ;;  %18690 = vmatprep.subr.mxu1 %v23308_v52  ;;  %v28944_v0 = vmax.f32 %v23724_v6, %v23750_v3 }
 0x7ca   :  { %v6083_v36 = vmax.f32 %v6051_v57, %v6067_v1  ;;  %v6070_v37 = vmax.f32 %v23774_v26, %v18620_v19  ;;  %v6113_v29 = vmax.f32 %v6097_v61, 0.0  ;;  %18691 = vmatpush3.msra.mxu1 %v23308_v52  ;;  %v6100_v8 = vadd.f32 %v23794_v54, %v6084_v14  ;;  %v6308_v14 = vld [vmem:[%s28652_s0 + $0xe28] sm:$0xff]  ;;  %v6309_v1 = vld [vmem:[%s28652_s0 + $0xe30] sm:$0xff]  ;;  %v6310_v61 = vld [vmem:[%s28652_s0 + $0xe38] sm:$0xff] }
 0x7cb   :  { %v6006_v41 = vpop.f32.mrf.mxu0  ;;  %18692 = vmatprep.subr.mxu1 %v23319_v25  ;;  %v6311_v19 = vld [vmem:[%s28652_s0 + $0xe40] sm:$0xff] }
 0x7cc   :  { %v6086_v63 = vmax.f32 %v28944_v0, %v6070_v37  ;;  %v6069_v9 = vmax.f32 %v23776_v28, %v6006_v41  ;;  %18668 = vmatprep.mubr.f32.mxu1 %v6113_v29  ;;  %v6099_v26 = vadd.f32 %v23794_v54, %v6083_v36  ;;  %18693 = vmatpush3.msra.mxu1 %v23319_v25  ;;  %v6116_v33 = vmax.f32 %v6100_v8, 0.0  ;;  %v6312_v36 = vld [vmem:[%s28652_s0 + $0xe48] sm:$0xff]  ;;  %v6313_v37 = vld [vmem:[%s28652_s0 + $0xe50] sm:$0xff]  ;;  %v6314_v29 = vld [vmem:[%s28652_s0 + $0xe58] sm:$0xff] }
 0x7cd   :  { %v18623_v52 = vpop.f32.mrf.mxu0  ;;  %18669 = vmatmul.mubr.f32.gmra.mxu1 %v6114_v12  ;;  %18694 = vmatprep.subr.mxu1 %v23331_v58  ;;  %v6055_v28 = vmax.f32 %v23730_v21, %v23760_v46  ;;  %v28945_v25 = vmax.f32 %v23728_v60, %v23756_v39  ;;  %v6057_v21 = vmax.f32 %v23734_v16, %v23766_v55  ;;  %v6316_v12 = vld [vmem:[%s28652_s0 + $0xe68] sm:$0xff]  ;;  %v6317_v8 = vld [vmem:[%s28652_s0 + $0xe70] sm:$0xff]  ;;  %v6318_v41 = vld [vmem:[%s28652_s0 + $0xe78] sm:$0xff] }
 0x7ce   :  { %v6085_v51 = vmax.f32 %v6053_v50, %v6069_v9  ;;  %v6072_v40 = vmax.f32 %v23778_v59, %v18623_v52  ;;  %v6115_v18 = vmax.f32 %v6099_v26, 0.0  ;;  %18695 = vmatpush3.msra.mxu1 %v23331_v58  ;;  %v6102_v6 = vadd.f32 %v23794_v54, %v6086_v63  ;;  %v6315_v50 = vld [vmem:[%s28652_s0 + $0xe60] sm:$0xff]  ;;  %v6320_v63 = vld [vmem:[%s28652_s0 + $0xe88] sm:$0xff]  ;;  %v6321_v9 = vld [vmem:[%s28652_s0 + $0xe90] sm:$0xff] }
 0x7cf   :  { %v6016_v3 = vpop.f32.mrf.mxu0  ;;  %v28946_v60 = vmax.f32 %v23732_v23, %v23762_v4  ;;  %v6059_v16 = vmax.f32 %v23738_v24, %v23772_v30  ;;  %v28947_v23 = vmax.f32 %v23736_v7, %v23768_v13  ;;  %v6303_v7 = vld [vmem:[%s28652_s0 + $0xe00] sm:$0xff]  ;;  %v6305_v13 = vld [vmem:[%s28652_s0 + $0xe10] sm:$0xff]  ;;  %v6322_v26 = vld [vmem:[%s28652_s0 + $0xe98] sm:$0xff] }
 0x7d0   :  { %v6088_v11 = vmax.f32 %v28945_v25, %v6072_v40  ;;  %v6071_v62 = vmax.f32 %v23780_v53, %v6016_v3  ;;  %18671 = vmatprep.mubr.f32.mxu1 %v6115_v18  ;;  %v6101_v15 = vadd.f32 %v23794_v54, %v6085_v51  ;;  %v6118_v22 = vmax.f32 %v6102_v6, 0.0  ;;  %v6319_v0 = vld [vmem:[%s28652_s0 + $0xe80] sm:$0xff]  ;;  %v6324_v51 = vld [vmem:[%s28652_s0 + $0xea8] sm:$0xff]  ;;  %v6325_v40 = vld [vmem:[%s28652_s0 + $0xeb0] sm:$0xff] }
 0x7d1   :  { %v18626_v59 = vpop.f32.mrf.mxu0  ;;  %18672 = vmatmul.mubr.f32.gmra.mxu1 %v6116_v33  ;;  %v6323_v52 = vld [vmem:[%s28652_s0 + $0xea0] sm:$0xff]  ;;  %v6326_v18 = vld [vmem:[%s28652_s0 + $0xeb8] sm:$0xff]  ;;  %v6328_v6 = vld [vmem:[%s28652_s0 + $0xec8] sm:$0xff] }
 0x7d2   :  { %v6087_v47 = vmax.f32 %v6055_v28, %v6071_v62  ;;  %v6074_v58 = vmax.f32 %v23782_v27, %v18626_v59  ;;  %v6117_v10 = vmax.f32 %v6101_v15, 0.0  ;;  %v6104_v32 = vadd.f32 %v23794_v54, %v6088_v11  ;;  %v6327_v33 = vld [vmem:[%s28652_s0 + $0xec0] sm:$0xff]  ;;  %v15253_v3 = vld [vmem:[%s28653_s3 + $0x3f8] sm:$0xff]  ;;  %v6329_v28 = vld [vmem:[%s28652_s0 + $0xed0] sm:$0xff] }
 0x7d3   :  { %v6026_v20 = vpop.f32.mrf.mxu0  ;;  %18792 = vmatprep.subr.mxu0 %v15253_v3  ;;  %v6330_v25 = vld [vmem:[%s28652_s0 + $0xed8] sm:$0xff]  ;;  %v6331_v11 = vld [vmem:[%s28652_s0 + $0xee0] sm:$0xff]  ;;  %v6332_v62 = vld [vmem:[%s28652_s0 + $0xee8] sm:$0xff] }
 0x7d4   :  { %v6090_v53 = vmax.f32 %v28946_v60, %v6074_v58  ;;  %v6073_v39 = vmax.f32 %v23784_v43, %v6026_v20  ;;  %18674 = vmatprep.mubr.f32.mxu1 %v6117_v10  ;;  %v6103_v46 = vadd.f32 %v23794_v54, %v6087_v47  ;;  %v6120_v45 = vmax.f32 %v6104_v32, 0.0  ;;  %18793 = vmatpush3.msra.mxu0 %v15253_v3  ;;  %v15252_v15 = vld [vmem:[%s28653_s3 + $0x3f0] sm:$0xff]  ;;  %v6334_v47 = vld [vmem:[%s28652_s0 + $0xef8] sm:$0xff]  ;;  %v6335_v58 = vld [vmem:[%s28652_s0 + $0xf00] sm:$0xff] }
 0x7d5   :  { %v18629_v2 = vpop.f32.mrf.mxu0  ;;  %18675 = vmatmul.mubr.f32.gmra.mxu1 %v6118_v22  ;;  %v6333_v59 = vld [vmem:[%s28652_s0 + $0xef0] sm:$0xff]  ;;  %18794 = vmatprep.subr.mxu0 %v15252_v15  ;;  %v6336_v10 = vld [vmem:[%s28652_s0 + $0xf08] sm:$0xff]  ;;  %v6338_v20 = vld [vmem:[%s28652_s0 + $0xf18] sm:$0xff] }
 0x7d6   :  { %v6089_v27 = vmax.f32 %v6057_v21, %v6073_v39  ;;  %v6076_v35 = vmax.f32 %v23786_v48, %v18629_v2  ;;  %v6119_v44 = vmax.f32 %v6103_v46, 0.0  ;;  %v6106_v42 = vadd.f32 %v23794_v54, %v6090_v53  ;;  %18795 = vmatpush3.msra.mxu0 %v15252_v15  ;;  %v15251_v22 = vld [vmem:[%s28653_s3 + $0x3e8] sm:$0xff]  ;;  %v6337_v32 = vld [vmem:[%s28652_s0 + $0xf10] sm:$0xff]  ;;  %v6339_v21 = vld [vmem:[%s28652_s0 + $0xf20] sm:$0xff] }
 0x7d7   :  { %v6036_v31 = vpop.f32.mrf.mxu0  ;;  %18796 = vmatprep.subr.mxu0 %v15251_v22  ;;  %v15250_v60 = vld [vmem:[%s28653_s3 + $0x3e0] sm:$0xff]  ;;  %v6340_v53 = vld [vmem:[%s28652_s0 + $0xf28] sm:$0xff]  ;;  %v6341_v39 = vld [vmem:[%s28652_s0 + $0xf30] sm:$0xff] }
 0x7d8   :  { %v6092_v4 = vmax.f32 %v28947_v23, %v6076_v35  ;;  %v6075_v55 = vmax.f32 %v23788_v17, %v6036_v31  ;;  %18677 = vmatprep.mubr.f32.mxu1 %v6119_v44  ;;  %v6105_v43 = vadd.f32 %v23794_v54, %v6089_v27  ;;  %v6122_v57 = vmax.f32 %v6106_v42, 0.0  ;;  %v6304_v17 = vld [vmem:[%s28652_s0 + $0xe08] sm:$0xff]  ;;  %18797 = vmatpush3.msra.mxu0 %v15251_v22  ;;  %v6342_v46 = vld [vmem:[%s28652_s0 + $0xf38] sm:$0xff]  ;;  %v6343_v2 = vld [vmem:[%s28652_s0 + $0xf40] sm:$0xff] }
 0x7d9   :  { %18678 = vmatmul.mubr.f32.gmra.mxu1 %v6120_v45  ;;  %18798 = vmatprep.subr.mxu0 %v15250_v60  ;;  %v15249_v27 = vld [vmem:[%s28653_s3 + $0x3d8] sm:$0xff]  ;;  %v6344_v35 = vld [vmem:[%s28652_s0 + $0xf48] sm:$0xff]  ;;  %v6345_v44 = vld [vmem:[%s28652_s0 + $0xf50] sm:$0xff] }
 0x7da   :  { %v6091_v49 = vmax.f32 %v6059_v16, %v6075_v55  ;;  %v6121_v48 = vmax.f32 %v6105_v43, 0.0  ;;  %v6108_v56 = vadd.f32 %v23794_v54, %v6092_v4  ;;  %18799 = vmatpush3.msra.mxu0 %v15250_v60  ;;  %v6346_v45 = vld [vmem:[%s28652_s0 + $0xf58] sm:$0xff]  ;;  %v6347_v42 = vld [vmem:[%s28652_s0 + $0xf60] sm:$0xff]  ;;  %v15248_v31 = vld [vmem:[%s28653_s3 + $0x3d0] sm:$0xff] }
 0x7db   :  { %18800 = vmatprep.subr.mxu0 %v15249_v27  ;;  %v6348_v16 = vld [vmem:[%s28652_s0 + $0xf68] sm:$0xff]  ;;  %v6349_v23 = vld [vmem:[%s28652_s0 + $0xf70] sm:$0xff]  ;;  %v6350_v4 = vld [vmem:[%s28652_s0 + $0xf78] sm:$0xff] }
 0x7dc   :  { %18680 = vmatprep.mubr.f32.mxu1 %v6121_v48  ;;  %v6107_v34 = vadd.f32 %v23794_v54, %v6091_v49  ;;  %v6124_v30 = vmax.f32 %v6108_v56, 0.0  ;;  %18801 = vmatpush3.msra.mxu0 %v15249_v27  ;;  %v6351_v55 = vld [vmem:[%s28652_s0 + $0xf80] sm:$0xff]  ;;  %v15247_v43 = vld [vmem:[%s28653_s3 + $0x3c8] sm:$0xff]  ;;  %v6353_v48 = vld [vmem:[%s28652_s0 + $0xf90] sm:$0xff] }
 0x7dd   :  { %18681 = vmatmul.mubr.f32.gmra.mxu1 %v6122_v57  ;;  %18802 = vmatprep.subr.mxu0 %v15248_v31  ;;  %v6352_v49 = vld [vmem:[%s28652_s0 + $0xf88] sm:$0xff]  ;;  %v6354_v57 = vld [vmem:[%s28652_s0 + $0xf98] sm:$0xff]  ;;  %v6355_v56 = vld [vmem:[%s28652_s0 + $0xfa0] sm:$0xff] }
 0x7de   :  { %v6123_v24 = vmax.f32 %v6107_v34, 0.0  ;;  %18803 = vmatpush3.msra.mxu0 %v15248_v31  ;;  %v6356_v34 = vld [vmem:[%s28652_s0 + $0xfa8] sm:$0xff]  ;;  %v28957_v15 = vld [vmem:[#allocation36_spill] sm:$0xff] }
 0x7df   :  { %18804 = vmatprep.subr.mxu0 %v15247_v43 }
 0x7e0   :  { %18683 = vmatprep.mubr.f32.mxu1 %v6123_v24  ;;  %18805 = vmatpush3.msra.mxu0 %v15247_v43  ;;  %v15246_v24 = vld [vmem:[%s28653_s3 + $0x3c0] sm:$0xff] }
 0x7e1   :  { %18684 = vmatmul.mubr.f32.gmra.mxu1 %v6124_v30  ;;  %v6357_v30 = vld [vmem:[%s28652_s0 + $0xfb0] sm:$0xff]  ;;  %18806 = vmatprep.subr.mxu0 %v15246_v24 }
 0x7e2   :  { %18696 = vmatprep.mubr.msk.f32.mxu1 %vm96_vm1, %v6303_v7  ;;  %18807 = vmatpush3.msra.mxu0 %v15246_v24  ;;  %v6358_v7 = vld [vmem:[%s28652_s0 + $0xfb8] sm:$0xff] }
 0x7e5   :  { %18697 = vmatmul.mubr.msk.f32.vlgmr.msra.gmra.mxu1 %vm96_vm1, %v6304_v17  ;;  %v6359_v17 = vld [vmem:[%s28652_s0 + $0xfc0] sm:$0xff] }
 0x7e6   :  { %18699 = vmatprep.mubr.msk.f32.mxu1 %vm96_vm1, %v6305_v13  ;;  %v6360_v13 = vld [vmem:[%s28652_s0 + $0xfc8] sm:$0xff] }
 0x7e9   :  { %18700 = vmatmul.mubr.msk.f32.gmra.mxu1 %vm96_vm1, %v6306_v38  ;;  %v15245_v38 = vld [vmem:[%s28653_s3 + $0x3b8] sm:$0xff] }
 0x7ea   :  { %18702 = vmatprep.mubr.msk.f32.mxu1 %vm96_vm1, %v6307_v5  ;;  %v6361_v5 = vld [vmem:[%s28652_s0 + $0xfd0] sm:$0xff]  ;;  %18808 = vmatprep.subr.mxu0 %v15245_v38 }
 0x7eb   :  { %18809 = vmatpush3.msra.mxu0 %v15245_v38 }
 0x7ed   :  { %18703 = vmatmul.mubr.msk.f32.gmra.mxu1 %vm96_vm1, %v6308_v14  ;;  %v6362_v14 = vld [vmem:[%s28652_s0 + $0xfd8] sm:$0xff] }
 0x7ee   :  { %18705 = vmatprep.mubr.msk.f32.mxu1 %vm96_vm1, %v6309_v1  ;;  %v6363_v1 = vld [vmem:[%s28652_s0 + $0xfe0] sm:$0xff] }
 0x7f1   :  { %18706 = vmatmul.mubr.msk.f32.gmra.mxu1 %vm96_vm1, %v6310_v61  ;;  %v6364_v61 = vld [vmem:[%s28652_s0 + $0xfe8] sm:$0xff] }
 0x7f2   :  { %18708 = vmatprep.mubr.msk.f32.mxu1 %vm96_vm1, %v6311_v19  ;;  %v15244_v19 = vld [vmem:[%s28653_s3 + $0x3b0] sm:$0xff] }
 0x7f3   :  { %18810 = vmatprep.subr.mxu0 %v15244_v19 }
 0x7f4   :  { %18811 = vmatpush3.msra.mxu0 %v15244_v19 }
 0x7f5   :  { %18709 = vmatmul.mubr.msk.f32.gmra.mxu1 %vm96_vm1, %v6312_v36  ;;  %v6365_v36 = vld [vmem:[%s28652_s0 + $0xff0] sm:$0xff] }
 0x7f6   :  { %18711 = vmatprep.mubr.msk.f32.mxu1 %vm96_vm1, %v6313_v37  ;;  %v6366_v37 = vld [vmem:[%s28652_s0 + $0xff8] sm:$0xff] }
 0x7f9   :  { %18712 = vmatmul.mubr.msk.f32.gmra.mxu1 %vm96_vm1, %v6314_v29  ;;  %v15243_v29 = vld [vmem:[%s28653_s3 + $0x3a8] sm:$0xff] }
 0x7fa   :  { %18714 = vmatprep.mubr.msk.f32.mxu1 %vm96_vm1, %v6315_v50  ;;  %18812 = vmatprep.subr.mxu0 %v15243_v29  ;;  %v15242_v50 = vld [vmem:[%s28653_s3 + $0x3a0] sm:$0xff] }
 0x7fb   :  { %18813 = vmatpush3.msra.mxu0 %v15243_v29 }
 0x7fc   :  { %18814 = vmatprep.subr.mxu0 %v15242_v50 }
 0x7fd   :  { %18715 = vmatmul.mubr.msk.f32.gmra.mxu1 %vm96_vm1, %v6316_v12  ;;  %18815 = vmatpush3.msra.mxu0 %v15242_v50  ;;  %v15241_v12 = vld [vmem:[%s28653_s3 + $0x398] sm:$0xff] }
 0x7fe   :  { %18717 = vmatprep.mubr.msk.f32.mxu1 %vm96_vm1, %v6317_v8  ;;  %18816 = vmatprep.subr.mxu0 %v15241_v12  ;;  %v15240_v8 = vld [vmem:[%s28653_s3 + $0x390] sm:$0xff] }
 0x7ff   :  { %18817 = vmatpush3.msra.mxu0 %v15241_v12 }
 0x800   :  { %18818 = vmatprep.subr.mxu0 %v15240_v8 }
 0x801   :  { %18718 = vmatmul.mubr.msk.f32.gmra.mxu1 %vm96_vm1, %v6318_v41  ;;  %18819 = vmatpush3.msra.mxu0 %v15240_v8  ;;  %v15239_v41 = vld [vmem:[%s28653_s3 + $0x388] sm:$0xff] }
 0x802   :  { %18720 = vmatprep.mubr.msk.f32.mxu1 %vm96_vm1, %v6319_v0  ;;  %18820 = vmatprep.subr.mxu0 %v15239_v41 }
 0x803   :  { %18821 = vmatpush3.msra.mxu0 %v15239_v41 }
 0x805   :  { %18721 = vmatmul.mubr.msk.f32.gmra.mxu1 %vm96_vm1, %v6320_v63  ;;  %v28948_v63 = vld [vmem:[#allocation50_spill] sm:$0xff] }
 0x806   :  { %18723 = vmatprep.mubr.msk.f32.mxu1 %vm96_vm1, %v6321_v9 }
 0x809   :  { %18724 = vmatmul.mubr.msk.f32.gmra.mxu1 %vm96_vm1, %v6322_v26 }
 0x80a   :  { %18726 = vmatprep.mubr.msk.f32.mxu1 %vm96_vm1, %v6323_v52 }
 0x80d   :  { %18727 = vmatmul.mubr.msk.f32.gmra.mxu1 %vm96_vm1, %v6324_v51  ;;  %v28951_v51 = vld [vmem:[#allocation32_spill] sm:$0xff] }
 0x80e   :  { %18729 = vmatprep.mubr.msk.f32.mxu1 %vm96_vm1, %v6325_v40 }
 0x811   :  { %18730 = vmatmul.mubr.msk.f32.gmra.mxu1 %vm96_vm1, %v6326_v18 }
 0x812   :  { %18732 = vmatprep.mubr.msk.f32.mxu1 %vm96_vm1, %v6327_v33 }
 0x815   :  { %18733 = vmatmul.mubr.msk.f32.gmra.mxu1 %vm96_vm1, %v6328_v6  ;;  %v28954_v6 = vld [vmem:[#allocation34_spill] sm:$0xff] }
 0x816   :  { %18735 = vmatprep.mubr.msk.f32.mxu1 %vm96_vm1, %v6329_v28  ;;  %v15238_v28 = vld [vmem:[%s28653_s3 + $0x380] sm:$0xff] }
 0x817   :  { %18822 = vmatprep.subr.mxu0 %v15238_v28 }
 0x818   :  { %18823 = vmatpush3.msra.mxu0 %v15238_v28 }
 0x819   :  { %18736 = vmatmul.mubr.msk.f32.gmra.mxu1 %vm96_vm1, %v6330_v25 }
 0x81a   :  { %18738 = vmatprep.mubr.msk.f32.mxu1 %vm96_vm1, %v6331_v11 }
 0x81d   :  { %18739 = vmatmul.mubr.msk.f32.gmra.mxu1 %vm96_vm1, %v6332_v62  ;;  %v24180_v62 = vld [vmem:[%s28651_s1 + $0x20] sm:$0xf] }
 0x81e   :  { %18741 = vmatprep.mubr.msk.f32.mxu1 %vm96_vm1, %v6333_v59  ;;  %18848 = vmatprep.subr.msk.mxu0 %vm289_vm0, %v24180_v62 }
 0x821   :  { %18742 = vmatmul.mubr.msk.f32.gmra.mxu1 %vm96_vm1, %v6334_v47 }
 0x822   :  { %18744 = vmatprep.mubr.msk.f32.mxu1 %vm96_vm1, %v6335_v58 }
 0x825   :  { %18745 = vmatmul.mubr.msk.f32.gmra.mxu1 %vm96_vm1, %v6336_v10  ;;  %v28960_v10 = vld [vmem:[#allocation25_spill] sm:$0xff] }
 0x826   :  { %18747 = vmatprep.mubr.msk.f32.mxu1 %vm96_vm1, %v6337_v32 }
 0x829   :  { %18748 = vmatmul.mubr.msk.f32.gmra.mxu1 %vm96_vm1, %v6338_v20 }
 0x82a   :  { %18750 = vmatprep.mubr.msk.f32.mxu1 %vm96_vm1, %v6339_v21  ;;  %v28963_v21 = vld [vmem:[#allocation37_spill] sm:$0xff] }
 0x82d   :  { %18751 = vmatmul.mubr.msk.f32.gmra.mxu1 %vm96_vm1, %v6340_v53 }
 0x82e   :  { %18753 = vmatprep.mubr.msk.f32.mxu1 %vm96_vm1, %v6341_v39 }
 0x831   :  { %18754 = vmatmul.mubr.msk.f32.gmra.mxu1 %vm96_vm1, %v6342_v46  ;;  %v28966_v46 = vld [vmem:[#allocation3_spill] sm:$0xff] }
 0x832   :  { %18756 = vmatprep.mubr.msk.f32.mxu1 %vm96_vm1, %v6343_v2 }
 0x835   :  { %18757 = vmatmul.mubr.msk.f32.gmra.mxu1 %vm96_vm1, %v6344_v35 }
 0x836   :  { %18759 = vmatprep.mubr.msk.f32.mxu1 %vm96_vm1, %v6345_v44  ;;  %v28969_v44 = vld [vmem:[#allocation19_spill] sm:$0xff] }
 0x839   :  { %18760 = vmatmul.mubr.msk.f32.gmra.mxu1 %vm96_vm1, %v6346_v45 }
 0x83a   :  { %18762 = vmatprep.mubr.msk.f32.mxu1 %vm96_vm1, %v6347_v42 }
 0x83d   :  { %18763 = vmatmul.mubr.msk.f32.gmra.mxu1 %vm96_vm1, %v6348_v16 }
 0x83e   :  { %18765 = vmatprep.mubr.msk.f32.mxu1 %vm96_vm1, %v6349_v23 }
 0x841   :  { %18766 = vmatmul.mubr.msk.f32.gmra.mxu1 %vm96_vm1, %v6350_v4 }
 0x842   :  { %18768 = vmatprep.mubr.msk.f32.mxu1 %vm96_vm1, %v6351_v55 }
 0x845   :  { %18769 = vmatmul.mubr.msk.f32.gmra.mxu1 %vm96_vm1, %v6352_v49 }
 0x846   :  { %18771 = vmatprep.mubr.msk.f32.mxu1 %vm96_vm1, %v6353_v48 }
 0x849   :  { %18772 = vmatmul.mubr.msk.f32.gmra.mxu1 %vm96_vm1, %v6354_v57 }
 0x84a   :  { %18774 = vmatprep.mubr.msk.f32.mxu1 %vm96_vm1, %v6355_v56 }
 0x84d   :  { %18775 = vmatmul.mubr.msk.f32.gmra.mxu1 %vm96_vm1, %v6356_v34 }
 0x84e   :  { %18777 = vmatprep.mubr.msk.f32.mxu1 %vm96_vm1, %v6357_v30 }
 0x851   :  { %18778 = vmatmul.mubr.msk.f32.gmra.mxu1 %vm96_vm1, %v6358_v7 }
 0x852   :  { %18780 = vmatprep.mubr.msk.f32.mxu1 %vm96_vm1, %v6359_v17 }
 0x855   :  { %18781 = vmatmul.mubr.msk.f32.gmra.mxu1 %vm96_vm1, %v6360_v13 }
 0x856   :  { %18783 = vmatprep.mubr.msk.f32.mxu1 %vm96_vm1, %v6361_v5 }
 0x859   :  { %18784 = vmatmul.mubr.msk.f32.gmra.mxu1 %vm96_vm1, %v6362_v14 }
 0x85a   :  { %18786 = vmatprep.mubr.msk.f32.mxu1 %vm96_vm1, %v6363_v1 }
 0x85d   :  { %18787 = vmatmul.mubr.msk.f32.gmra.mxu1 %vm96_vm1, %v6364_v61 }
 0x85e   :  { %18789 = vmatprep.mubr.msk.f32.mxu1 %vm96_vm1, %v6365_v36 }
 0x861   :  { %18790 = vmatmul.mubr.msk.f32.gmra.mxu1 %vm96_vm1, %v6366_v37 }
 0x885   :  { %v18664_v0 = vpop.f32.mrf.mxu1 }
 0x886   :  { %v24160_v9 = vadd.f32 %v18664_v0, %v28948_v63 }
 0x887   :  { %v24162_v26 = vpop.f32.mrf.mxu1 }
 0x888   :  { %28949 = vst [vmem:[#allocation50_spill] sm:$0xff] %v24160_v9  ;;  %28950 = vst [vmem:[#allocation58_spill] sm:$0xff] %v24162_v26 }
 0x889   :  { %v18667_v52 = vpop.f32.mrf.mxu1 }
 0x88a   :  { %v24165_v40 = vadd.f32 %v18667_v52, %v28951_v51 }
 0x88b   :  { %v24167_v18 = vpop.f32.mrf.mxu1 }
 0x88c   :  { %28952 = vst [vmem:[#allocation32_spill] sm:$0xff] %v24165_v40  ;;  %28953 = vst [vmem:[#allocation59_spill] sm:$0xff] %v24167_v18 }
 0x88d   :  { %v18670_v33 = vpop.f32.mrf.mxu1 }
 0x88e   :  { %v24170_v3 = vadd.f32 %v18670_v33, %v28954_v6 }
 0x88f   :  { %v24175_v25 = vpop.f32.mrf.mxu1 }
 0x890   :  { %28955 = vst [vmem:[#allocation34_spill] sm:$0xff] %v24170_v3  ;;  %28956 = vst [vmem:[#allocation60_spill] sm:$0xff] %v24175_v25 }
 0x891   :  { %v18673_v11 = vpop.f32.mrf.mxu1 }
 0x892   :  { %v24185_v59 = vadd.f32 %v18673_v11, %v28957_v15 }
 0x893   :  { %v24187_v47 = vpop.f32.mrf.mxu1 }
 0x894   :  { %28958 = vst [vmem:[#allocation36_spill] sm:$0xff] %v24185_v59  ;;  %28959 = vst [vmem:[#allocation61_spill] sm:$0xff] %v24187_v47 }
 0x895   :  { %v18676_v58 = vpop.f32.mrf.mxu1 }
 0x896   :  { %v24190_v22 = vadd.f32 %v18676_v58, %v28960_v10 }
 0x897   :  { %v24192_v32 = vpop.f32.mrf.mxu1 }
 0x898   :  { %28961 = vst [vmem:[#allocation25_spill] sm:$0xff] %v24190_v22  ;;  %28962 = vst [vmem:[#allocation62_spill] sm:$0xff] %v24192_v32 }
 0x899   :  { %v18679_v20 = vpop.f32.mrf.mxu1 }
 0x89a   :  { %v24195_v60 = vadd.f32 %v18679_v20, %v28963_v21 }
 0x89b   :  { %v24197_v53 = vpop.f32.mrf.mxu1 }
 0x89c   :  { %28964 = vst [vmem:[#allocation37_spill] sm:$0xff] %v24195_v60  ;;  %28965 = vst [vmem:[#allocation63_spill] sm:$0xff] %v24197_v53 }
 0x89d   :  { %v18682_v39 = vpop.f32.mrf.mxu1 }
 0x89e   :  { %v24200_v2 = vadd.f32 %v18682_v39, %v28966_v46 }
 0x89f   :  { %v24202_v27 = vpop.f32.mrf.mxu1 }
 0x8a0   :  { %28967 = vst [vmem:[#allocation3_spill] sm:$0xff] %v24200_v2  ;;  %28968 = vst [vmem:[#allocation64_spill] sm:$0xff] %v24202_v27 }
 0x8a1   :  { %v18685_v35 = vpop.f32.mrf.mxu1 }
 0x8a2   :  { %v24205_v45 = vadd.f32 %v18685_v35, %v28969_v44 }
 0x8a3   :  { %v24207_v42 = vpop.f32.mrf.mxu1 }
 0x8a4   :  { %28970 = vst [vmem:[#allocation19_spill] sm:$0xff] %v24205_v45  ;;  %28971 = vst [vmem:[#allocation65_spill] sm:$0xff] %v24207_v42 }
 0x8a5   :  { %v18698_v31 = vpop.f32.mrf.mxu1 }
 0x8a7   :  { %v24209_v16 = vpop.f32.mrf.mxu1 }
 0x8a9   :  { %v24211_v23 = vpop.f32.mrf.mxu1 }
 0x8ab   :  { %v24213_v4 = vpop.f32.mrf.mxu1 }
 0x8ad   :  { %v24215_v55 = vpop.f32.mrf.mxu1 }
 0x8af   :  { %v24217_v43 = vpop.f32.mrf.mxu1 }
 0x8b1   :  { %v24219_v49 = vpop.f32.mrf.mxu1 }
 0x8b3   :  { %v24221_v48 = vpop.f32.mrf.mxu1 }
 0x8b5   :  { %v24223_v57 = vpop.f32.mrf.mxu1 }
 0x8b7   :  { %v24225_v56 = vpop.f32.mrf.mxu1 }
 0x8b9   :  { %v24227_v34 = vpop.f32.mrf.mxu1 }
 0x8bb   :  { %v24229_v24 = vpop.f32.mrf.mxu1 }
 0x8bd   :  { %v24231_v30 = vpop.f32.mrf.mxu1 }
 0x8bf   :  { %v24233_v7 = vpop.f32.mrf.mxu1 }
 0x8c1   :  { %v24235_v17 = vpop.f32.mrf.mxu1 }
 0x8c3   :  { %v24237_v13 = vpop.f32.mrf.mxu1 }
 0x8c5   :  { %v18722_v38 = vpop.f32.mrf.mxu1 }
 0x8c6   :  { %v6945_v5 = vmax.f32 %v18698_v31, %v18722_v38 }
 0x8c7   :  { %v6705_v14 = vpop.f32.mrf.mxu1 }
 0x8c8   :  { %v6944_v53 = vmax.f32 %v24209_v16, %v6705_v14 }
 0x8c9   :  { %v18725_v1 = vpop.f32.mrf.mxu1 }
 0x8ca   :  { %v6947_v61 = vmax.f32 %v24211_v23, %v18725_v1 }
 0x8cb   :  { %v6715_v19 = vpop.f32.mrf.mxu1 }
 0x8cc   :  { %v6946_v60 = vmax.f32 %v24213_v4, %v6715_v19 }
 0x8cd   :  { %v18728_v36 = vpop.f32.mrf.mxu1 }
 0x8ce   :  { %v6949_v37 = vmax.f32 %v24215_v55, %v18728_v36 }
 0x8cf   :  { %v6725_v29 = vpop.f32.mrf.mxu1 }
 0x8d1   :  { %v24241_v50 = vpop.f32.mrf.mxu1 }
 0x8d3   :  { %v24245_v8 = vpop.f32.mrf.mxu1 }
 0x8d5   :  { %v24247_v41 = vpop.f32.mrf.mxu1 }
 0x8d7   :  { %v24251_v63 = vpop.f32.mrf.mxu1 }
 0x8d8   :  { %v6952_v19 = vmax.f32 %v24225_v56, %v24251_v63 }
 0x8d9   :  { %v24253_v52 = vpop.f32.mrf.mxu1 }
 0x8db   :  { %v24257_v33 = vpop.f32.mrf.mxu1 }
 0x8dd   :  { %v24259_v6 = vpop.f32.mrf.mxu1 }
 0x8df   :  { %v24263_v11 = vpop.f32.mrf.mxu1 }
 0x8e1   :  { %v24265_v15 = vpop.f32.mrf.mxu1 }
 0x8e3   :  { %v24269_v10 = vpop.f32.mrf.mxu1 }
 0x8e5   :  { %v18746_v20 = vpop.f32.mrf.mxu1 }
 0x8e7   :  { %v6785_v21 = vpop.f32.mrf.mxu1 }
 0x8e9   :  { %v18749_v39 = vpop.f32.mrf.mxu1 }
 0x8eb   :  { %v6795_v46 = vpop.f32.mrf.mxu1 }
 0x8ed   :  { %v18752_v35 = vpop.f32.mrf.mxu1 }
 0x8ef   :  { %v6805_v44 = vpop.f32.mrf.mxu1 }
 0x8f1   :  { %v18755_v31 = vpop.f32.mrf.mxu1 }
 0x8f3   :  { %v6815_v23 = vpop.f32.mrf.mxu1 }
 0x8f5   :  { %v24271_v55 = vpop.f32.mrf.mxu1 }
 0x8f7   :  { %v24273_v38 = vpop.f32.mrf.mxu1 }
 0x8f9   :  { %v24275_v1 = vpop.f32.mrf.mxu1 }
 0x8fb   :  { %v24277_v36 = vpop.f32.mrf.mxu1 }
 0x8fd   :  { %v24279_v28 = vpop.f32.mrf.mxu1 }
 0x8ff   :  { %v24281_v58 = vpop.f32.mrf.mxu1 }
 0x901   :  { %v24283_v51 = vpop.f32.mrf.mxu1 }
 0x903   :  { %v24285_v0 = vpop.f32.mrf.mxu1 }
 0x904   :  { %28972 = vst [vmem:[#allocation66_spill] sm:$0xff] %v24285_v0 }
 0x905   :  { %v18770_v12 = vpop.f32.mrf.mxu1 }
 0x906   :  { %v6961_v42 = vmax.f32 %v18746_v20, %v18770_v12 }
 0x907   :  { %v6865_v27 = vpop.f32.mrf.mxu1 }
 0x908   :  { %v6977_v32 = vmax.f32 %v6945_v5, %v6961_v42  ;;  %v6960_v47 = vmax.f32 %v6785_v21, %v6865_v27  ;;  %v24313_v5 = vld [vmem:[%s28651_s1 + $0x10] sm:$0xff] }
 0x909   :  { %v18773_v25 = vpop.f32.mrf.mxu1 }
 0x90a   :  { %v6976_v18 = vmax.f32 %v6944_v53, %v6960_v47  ;;  %v6963_v26 = vmax.f32 %v18749_v39, %v18773_v25  ;;  %v6993_v45 = vadd.f32 %v23794_v54, %v6977_v32  ;;  %v6948_v47 = vmax.f32 %v24217_v43, %v6725_v29 }
 0x90b   :  { %v6875_v2 = vpop.f32.mrf.mxu1 }
 0x90c   :  { %v6979_v22 = vmax.f32 %v6947_v61, %v6963_v26  ;;  %v6962_v59 = vmax.f32 %v6795_v46, %v6875_v2  ;;  %v6992_v3 = vadd.f32 %v23794_v54, %v6976_v18  ;;  %v7009_v0 = vmax.f32 %v6993_v45, 0.0  ;;  %v24336_v46 = vld [vmem:[%s28651_s1] sm:$0xff] }
 0x90d   :  { %v18776_v40 = vpop.f32.mrf.mxu1  ;;  %v6950_v18 = vmax.f32 %v24221_v48, %v24245_v8  ;;  %v24324_v8 = vld [vmem:[%s28651_s1 + $0x8] sm:$0xff] }
 0x90e   :  { %v6978_v9 = vmax.f32 %v6946_v60, %v6962_v59  ;;  %v6965_v12 = vmax.f32 %v18752_v35, %v18776_v40  ;;  %v7008_v20 = vmax.f32 %v6992_v3, 0.0  ;;  %v6995_v42 = vadd.f32 %v23794_v54, %v6979_v22  ;;  %v24302_v60 = vld [vmem:[%s28651_s1 + $0x18] sm:$0xff] }
 0x90f   :  { %v6885_v27 = vpop.f32.mrf.mxu1 }
 0x910   :  { %v6981_v25 = vmax.f32 %v6949_v37, %v6965_v12  ;;  %v6964_v53 = vmax.f32 %v6805_v44, %v6885_v27  ;;  %18824 = vmatprep.mubr.f32.mxu0 %v7008_v20  ;;  %v6994_v32 = vadd.f32 %v23794_v54, %v6978_v9  ;;  %v7011_v3 = vmax.f32 %v6995_v42, 0.0 }
 0x911   :  { %v18779_v16 = vpop.f32.mrf.mxu1  ;;  %18825 = vmatmul.mubr.f32.vlgmr.msra.gmra.mxu0 %v7009_v0  ;;  %v28973_v9 = vmax.f32 %v24219_v49, %v24241_v50  ;;  %v28974_v0 = vmax.f32 %v24223_v57, %v24247_v41 }
 0x912   :  { %v6980_v26 = vmax.f32 %v6948_v47, %v6964_v53  ;;  %v6967_v2 = vmax.f32 %v18755_v31, %v18779_v16  ;;  %18849 = vmatpush3.msk.msra.mxu0 %vm289_vm0, %v24180_v62  ;;  %v7010_v40 = vmax.f32 %v6994_v32, 0.0  ;;  %v6997_v59 = vadd.f32 %v23794_v54, %v6981_v25 }
 0x913   :  { %v6895_v22 = vpop.f32.mrf.mxu1  ;;  %18850 = vmatprep.subr.mxu0 %v24302_v60 }
 0x914   :  { %v6983_v45 = vmax.f32 %v28973_v9, %v6967_v2  ;;  %v6966_v4 = vmax.f32 %v6815_v23, %v6895_v22  ;;  %18827 = vmatprep.mubr.f32.mxu0 %v7010_v40  ;;  %v6996_v43 = vadd.f32 %v23794_v54, %v6980_v26  ;;  %18851 = vmatpush3.msra.mxu0 %v24302_v60  ;;  %v7013_v37 = vmax.f32 %v6997_v59, 0.0 }
 0x915   :  { %v18782_v48 = vpop.f32.mrf.mxu1  ;;  %18828 = vmatmul.mubr.f32.gmra.mxu0 %v7011_v3  ;;  %18852 = vmatprep.subr.mxu0 %v24313_v5 }
 0x916   :  { %v6982_v14 = vmax.f32 %v6950_v18, %v6966_v4  ;;  %v6969_v61 = vmax.f32 %v24271_v55, %v18782_v48  ;;  %v7012_v49 = vmax.f32 %v6996_v43, 0.0  ;;  %18853 = vmatpush3.msra.mxu0 %v24313_v5  ;;  %v6999_v29 = vadd.f32 %v23794_v54, %v6983_v45  ;;  %v7204_v48 = vld [vmem:[%s28652_s0 + $0x1010] sm:$0xff] }
 0x917   :  { %v6905_v50 = vpop.f32.mrf.mxu1  ;;  %18854 = vmatprep.subr.mxu0 %v24324_v8  ;;  %v6954_v55 = vmax.f32 %v24229_v24, %v24257_v33  ;;  %v6956_v24 = vmax.f32 %v24233_v7, %v24263_v11  ;;  %v6958_v7 = vmax.f32 %v24237_v13, %v24269_v10  ;;  %v28978_v11 = vld [vmem:[#allocation66_spill] sm:$0xff] }
 0x918   :  { %v6985_v21 = vmax.f32 %v28974_v0, %v6969_v61  ;;  %v6968_v39 = vmax.f32 %v24273_v38, %v6905_v50  ;;  %18830 = vmatprep.mubr.f32.mxu0 %v7012_v49  ;;  %v6998_v56 = vadd.f32 %v23794_v54, %v6982_v14  ;;  %18855 = vmatpush3.msra.mxu0 %v24324_v8  ;;  %v7015_v44 = vmax.f32 %v6999_v29, 0.0  ;;  %v7206_v14 = vld [vmem:[%s28652_s0 + $0x1020] sm:$0xff]  ;;  %v7207_v61 = vld [vmem:[%s28652_s0 + $0x1028] sm:$0xff]  ;;  %v7208_v49 = vld [vmem:[%s28652_s0 + $0x1030] sm:$0xff] }
 0x919   :  { %v18785_v63 = vpop.f32.mrf.mxu1  ;;  %18831 = vmatmul.mubr.f32.gmra.mxu0 %v7013_v37  ;;  %18856 = vmatprep.subr.mxu0 %v24336_v46  ;;  %v28975_v38 = vmax.f32 %v24227_v34, %v24253_v52  ;;  %v28976_v34 = vmax.f32 %v24231_v30, %v24259_v6  ;;  %v28977_v30 = vmax.f32 %v24235_v17, %v24265_v15  ;;  %v7202_v17 = vld [vmem:[%s28652_s0 + $0x1000] sm:$0xff]  ;;  %v7203_v15 = vld [vmem:[%s28652_s0 + $0x1008] sm:$0xff]  ;;  %v7212_v50 = vld [vmem:[%s28652_s0 + $0x1050] sm:$0xff] }
 0x91a   :  { %v6984_v35 = vmax.f32 %v6952_v19, %v6968_v39  ;;  %v6971_v57 = vmax.f32 %v24275_v1, %v18785_v63  ;;  %v7014_v41 = vmax.f32 %v6998_v56, 0.0  ;;  %18857 = vmatpush3.msra.mxu0 %v24336_v46  ;;  %v7001_v31 = vadd.f32 %v23794_v54, %v6985_v21  ;;  %v7209_v19 = vld [vmem:[%s28652_s0 + $0x1038] sm:$0xff]  ;;  %v7210_v37 = vld [vmem:[%s28652_s0 + $0x1040] sm:$0xff]  ;;  %v7211_v29 = vld [vmem:[%s28652_s0 + $0x1048] sm:$0xff] }
 0x91b   :  { %v6915_v23 = vpop.f32.mrf.mxu1  ;;  %v7213_v0 = vld [vmem:[%s28652_s0 + $0x1058] sm:$0xff]  ;;  %v7214_v21 = vld [vmem:[%s28652_s0 + $0x1060] sm:$0xff]  ;;  %v7215_v39 = vld [vmem:[%s28652_s0 + $0x1068] sm:$0xff] }
 0x91c   :  { %v6987_v12 = vmax.f32 %v28975_v38, %v6971_v57  ;;  %v6970_v20 = vmax.f32 %v24277_v36, %v6915_v23  ;;  %18833 = vmatprep.mubr.f32.mxu0 %v7014_v41  ;;  %v7000_v42 = vadd.f32 %v23794_v54, %v6984_v35  ;;  %v7017_v53 = vmax.f32 %v7001_v31, 0.0  ;;  %v7216_v56 = vld [vmem:[%s28652_s0 + $0x1070] sm:$0xff]  ;;  %v7217_v63 = vld [vmem:[%s28652_s0 + $0x1078] sm:$0xff]  ;;  %v7218_v35 = vld [vmem:[%s28652_s0 + $0x1080] sm:$0xff] }
 0x91d   :  { %v18788_v1 = vpop.f32.mrf.mxu1  ;;  %18834 = vmatmul.mubr.f32.gmra.mxu0 %v7015_v44  ;;  %v7219_v57 = vld [vmem:[%s28652_s0 + $0x1088] sm:$0xff]  ;;  %v7220_v41 = vld [vmem:[%s28652_s0 + $0x1090] sm:$0xff]  ;;  %v7221_v44 = vld [vmem:[%s28652_s0 + $0x1098] sm:$0xff] }
 0x91e   :  { %v6986_v27 = vmax.f32 %v6954_v55, %v6970_v20  ;;  %v6973_v47 = vmax.f32 %v24279_v28, %v18788_v1  ;;  %v7016_v25 = vmax.f32 %v7000_v42, 0.0  ;;  %v7003_v32 = vadd.f32 %v23794_v54, %v6987_v12  ;;  %v7222_v31 = vld [vmem:[%s28652_s0 + $0x10a0] sm:$0xff]  ;;  %v7223_v23 = vld [vmem:[%s28652_s0 + $0x10a8] sm:$0xff]  ;;  %v7224_v55 = vld [vmem:[%s28652_s0 + $0x10b0] sm:$0xff] }
 0x91f   :  { %v6925_v16 = vpop.f32.mrf.mxu1  ;;  %v7225_v38 = vld [vmem:[%s28652_s0 + $0x10b8] sm:$0xff]  ;;  %v7226_v12 = vld [vmem:[%s28652_s0 + $0x10c0] sm:$0xff]  ;;  %v7227_v20 = vld [vmem:[%s28652_s0 + $0x10c8] sm:$0xff] }
 0x920   :  { %v6989_v52 = vmax.f32 %v28976_v34, %v6973_v47  ;;  %v6972_v33 = vmax.f32 %v24281_v58, %v6925_v16  ;;  %18836 = vmatprep.mubr.f32.mxu0 %v7016_v25  ;;  %v7002_v36 = vadd.f32 %v23794_v54, %v6986_v27  ;;  %v7019_v18 = vmax.f32 %v7003_v32, 0.0  ;;  %v15334_v42 = vld [vmem:[%s28653_s3 + $0x478] sm:$0xff]  ;;  %v7228_v1 = vld [vmem:[%s28652_s0 + $0x10d0] sm:$0xff]  ;;  %v7230_v47 = vld [vmem:[%s28652_s0 + $0x10e0] sm:$0xff] }
 0x921   :  { %v18791_v26 = vpop.f32.mrf.mxu1  ;;  %18837 = vmatmul.mubr.f32.gmra.mxu0 %v7017_v53  ;;  %18954 = vmatprep.subr.mxu1 %v15334_v42  ;;  %v7229_v27 = vld [vmem:[%s28652_s0 + $0x10d8] sm:$0xff]  ;;  %v7231_v25 = vld [vmem:[%s28652_s0 + $0x10e8] sm:$0xff]  ;;  %v15333_v53 = vld [vmem:[%s28653_s3 + $0x470] sm:$0xff] }
 0x922   :  { %v6988_v28 = vmax.f32 %v6956_v24, %v6972_v33  ;;  %v6975_v2 = vmax.f32 %v24283_v51, %v18791_v26  ;;  %v7018_v40 = vmax.f32 %v7002_v36, 0.0  ;;  %v7005_v3 = vadd.f32 %v23794_v54, %v6989_v52  ;;  %18955 = vmatpush3.msra.mxu1 %v15334_v42  ;;  %v7232_v32 = vld [vmem:[%s28652_s0 + $0x10f0] sm:$0xff]  ;;  %v7233_v16 = vld [vmem:[%s28652_s0 + $0x10f8] sm:$0xff]  ;;  %v7234_v24 = vld [vmem:[%s28652_s0 + $0x1100] sm:$0xff] }
 0x923   :  { %v6935_v59 = vpop.f32.mrf.mxu1  ;;  %18956 = vmatprep.subr.mxu1 %v15333_v53  ;;  %v7235_v34 = vld [vmem:[%s28652_s0 + $0x1108] sm:$0xff]  ;;  %v7236_v33 = vld [vmem:[%s28652_s0 + $0x1110] sm:$0xff]  ;;  %v7237_v36 = vld [vmem:[%s28652_s0 + $0x1118] sm:$0xff] }
 0x924   :  { %v6991_v6 = vmax.f32 %v28977_v30, %v6975_v2  ;;  %v6974_v58 = vmax.f32 %v28978_v11, %v6935_v59  ;;  %18839 = vmatprep.mubr.f32.mxu0 %v7018_v40  ;;  %v7004_v22 = vadd.f32 %v23794_v54, %v6988_v28  ;;  %v7021_v45 = vmax.f32 %v7005_v3, 0.0  ;;  %18957 = vmatpush3.msra.mxu1 %v15333_v53  ;;  %v15332_v52 = vld [vmem:[%s28653_s3 + $0x468] sm:$0xff]  ;;  %v7238_v26 = vld [vmem:[%s28652_s0 + $0x1120] sm:$0xff]  ;;  %v7240_v40 = vld [vmem:[%s28652_s0 + $0x1130] sm:$0xff] }
 0x925   :  { %18840 = vmatmul.mubr.f32.gmra.mxu0 %v7019_v18  ;;  %18958 = vmatprep.subr.mxu1 %v15332_v52  ;;  %v15331_v28 = vld [vmem:[%s28653_s3 + $0x460] sm:$0xff]  ;;  %v7239_v2 = vld [vmem:[%s28652_s0 + $0x1128] sm:$0xff]  ;;  %v7241_v18 = vld [vmem:[%s28652_s0 + $0x1138] sm:$0xff] }
 0x926   :  { %v6990_v9 = vmax.f32 %v6958_v7, %v6974_v58  ;;  %v7020_v51 = vmax.f32 %v7004_v22, 0.0  ;;  %v7007_v4 = vadd.f32 %v23794_v54, %v6991_v6  ;;  %18959 = vmatpush3.msra.mxu1 %v15332_v52  ;;  %v7242_v3 = vld [vmem:[%s28652_s0 + $0x1140] sm:$0xff]  ;;  %v15330_v59 = vld [vmem:[%s28653_s3 + $0x458] sm:$0xff]  ;;  %v7243_v7 = vld [vmem:[%s28652_s0 + $0x1148] sm:$0xff] }
 0x927   :  { %18960 = vmatprep.subr.mxu1 %v15331_v28  ;;  %v7244_v30 = vld [vmem:[%s28652_s0 + $0x1150] sm:$0xff]  ;;  %v7245_v6 = vld [vmem:[%s28652_s0 + $0x1158] sm:$0xff]  ;;  %v7246_v11 = vld [vmem:[%s28652_s0 + $0x1160] sm:$0xff] }
 0x928   :  { %18842 = vmatprep.mubr.f32.mxu0 %v7020_v51  ;;  %v7006_v43 = vadd.f32 %v23794_v54, %v6990_v9  ;;  %v7023_v10 = vmax.f32 %v7007_v4, 0.0  ;;  %v7205_v54 = vld [vmem:[%s28652_s0 + $0x1018] sm:$0xff]  ;;  %18961 = vmatpush3.msra.mxu1 %v15331_v28  ;;  %v15329_v58 = vld [vmem:[%s28653_s3 + $0x450] sm:$0xff]  ;;  %v7247_v22 = vld [vmem:[%s28652_s0 + $0x1168] sm:$0xff] }
 0x929   :  { %18843 = vmatmul.mubr.f32.gmra.mxu0 %v7021_v45  ;;  %18962 = vmatprep.subr.mxu1 %v15330_v59  ;;  %v7248_v9 = vld [vmem:[%s28652_s0 + $0x1170] sm:$0xff]  ;;  %v7249_v51 = vld [vmem:[%s28652_s0 + $0x1178] sm:$0xff]  ;;  %v7250_v45 = vld [vmem:[%s28652_s0 + $0x1180] sm:$0xff] }
 0x92a   :  { %v7022_v13 = vmax.f32 %v7006_v43, 0.0  ;;  %18963 = vmatpush3.msra.mxu1 %v15330_v59  ;;  %v15328_v4 = vld [vmem:[%s28653_s3 + $0x448] sm:$0xff]  ;;  %v15319_v53 = vld [vmem:[%s28653_s3 + $0x400] sm:$0xff] }
 0x92b   :  { %18964 = vmatprep.subr.mxu1 %v15329_v58  ;;  %v7251_v43 = vld [vmem:[%s28652_s0 + $0x1188] sm:$0xff] }
 0x92c   :  { %18845 = vmatprep.mubr.f32.mxu0 %v7022_v13  ;;  %18965 = vmatpush3.msra.mxu1 %v15329_v58  ;;  %v7252_v13 = vld [vmem:[%s28652_s0 + $0x1190] sm:$0xff]  ;;  %v29000_v58 = vld [vmem:[#allocation19_spill] sm:$0xff] }
 0x92d   :  { %18846 = vmatmul.mubr.f32.gmra.mxu0 %v7023_v10  ;;  %18966 = vmatprep.subr.mxu1 %v15328_v4  ;;  %v7253_v10 = vld [vmem:[%s28652_s0 + $0x1198] sm:$0xff] }
 0x92e   :  { %18858 = vmatprep.mubr.msk.f32.mxu0 %vm96_vm1, %v7202_v17  ;;  %18967 = vmatpush3.msra.mxu1 %v15328_v4  ;;  %v7254_v17 = vld [vmem:[%s28652_s0 + $0x11a0] sm:$0xff] }
 0x931   :  { %18859 = vmatmul.mubr.msk.f32.vlgmr.msra.gmra.mxu0 %vm96_vm1, %v7203_v15  ;;  %v7255_v15 = vld [vmem:[%s28652_s0 + $0x11a8] sm:$0xff] }
 0x932   :  { %18861 = vmatprep.mubr.msk.f32.mxu0 %vm96_vm1, %v7204_v48  ;;  %v15327_v48 = vld [vmem:[%s28653_s3 + $0x440] sm:$0xff] }
 0x933   :  { %18968 = vmatprep.subr.mxu1 %v15327_v48 }
 0x934   :  { %18969 = vmatpush3.msra.mxu1 %v15327_v48 }
 0x935   :  { %18862 = vmatmul.mubr.msk.f32.gmra.mxu0 %vm96_vm1, %v7205_v54  ;;  %v7256_v54 = vld [vmem:[%s28652_s0 + $0x11b0] sm:$0xff] }
 0x936   :  { %18864 = vmatprep.mubr.msk.f32.mxu0 %vm96_vm1, %v7206_v14  ;;  %v7257_v14 = vld [vmem:[%s28652_s0 + $0x11b8] sm:$0xff] }
 0x939   :  { %18865 = vmatmul.mubr.msk.f32.gmra.mxu0 %vm96_vm1, %v7207_v61  ;;  %v7258_v61 = vld [vmem:[%s28652_s0 + $0x11c0] sm:$0xff] }
 0x93a   :  { %18867 = vmatprep.mubr.msk.f32.mxu0 %vm96_vm1, %v7208_v49  ;;  %v7259_v49 = vld [vmem:[%s28652_s0 + $0x11c8] sm:$0xff] }
 0x93d   :  { %18868 = vmatmul.mubr.msk.f32.gmra.mxu0 %vm96_vm1, %v7209_v19  ;;  %v15326_v19 = vld [vmem:[%s28653_s3 + $0x438] sm:$0xff] }
 0x93e   :  { %18870 = vmatprep.mubr.msk.f32.mxu0 %vm96_vm1, %v7210_v37  ;;  %v7260_v37 = vld [vmem:[%s28652_s0 + $0x11d0] sm:$0xff]  ;;  %18970 = vmatprep.subr.mxu1 %v15326_v19 }
 0x93f   :  { %18971 = vmatpush3.msra.mxu1 %v15326_v19 }
 0x941   :  { %18871 = vmatmul.mubr.msk.f32.gmra.mxu0 %vm96_vm1, %v7211_v29  ;;  %v7261_v29 = vld [vmem:[%s28652_s0 + $0x11d8] sm:$0xff] }
 0x942   :  { %18873 = vmatprep.mubr.msk.f32.mxu0 %vm96_vm1, %v7212_v50  ;;  %v7262_v50 = vld [vmem:[%s28652_s0 + $0x11e0] sm:$0xff] }
 0x945   :  { %18874 = vmatmul.mubr.msk.f32.gmra.mxu0 %vm96_vm1, %v7213_v0  ;;  %v7263_v0 = vld [vmem:[%s28652_s0 + $0x11e8] sm:$0xff] }
 0x946   :  { %18876 = vmatprep.mubr.msk.f32.mxu0 %vm96_vm1, %v7214_v21  ;;  %v15325_v21 = vld [vmem:[%s28653_s3 + $0x430] sm:$0xff] }
 0x947   :  { %18972 = vmatprep.subr.mxu1 %v15325_v21 }
 0x948   :  { %18973 = vmatpush3.msra.mxu1 %v15325_v21 }
 0x949   :  { %18877 = vmatmul.mubr.msk.f32.gmra.mxu0 %vm96_vm1, %v7215_v39  ;;  %v7264_v39 = vld [vmem:[%s28652_s0 + $0x11f0] sm:$0xff] }
 0x94a   :  { %18879 = vmatprep.mubr.msk.f32.mxu0 %vm96_vm1, %v7216_v56  ;;  %v7265_v56 = vld [vmem:[%s28652_s0 + $0x11f8] sm:$0xff] }
 0x94d   :  { %18880 = vmatmul.mubr.msk.f32.gmra.mxu0 %vm96_vm1, %v7217_v63  ;;  %v15324_v63 = vld [vmem:[%s28653_s3 + $0x428] sm:$0xff] }
 0x94e   :  { %18882 = vmatprep.mubr.msk.f32.mxu0 %vm96_vm1, %v7218_v35  ;;  %18974 = vmatprep.subr.mxu1 %v15324_v63  ;;  %v15323_v35 = vld [vmem:[%s28653_s3 + $0x420] sm:$0xff] }
 0x94f   :  { %18975 = vmatpush3.msra.mxu1 %v15324_v63 }
 0x950   :  { %18976 = vmatprep.subr.mxu1 %v15323_v35 }
 0x951   :  { %18883 = vmatmul.mubr.msk.f32.gmra.mxu0 %vm96_vm1, %v7219_v57  ;;  %18977 = vmatpush3.msra.mxu1 %v15323_v35  ;;  %v15322_v57 = vld [vmem:[%s28653_s3 + $0x418] sm:$0xff] }
 0x952   :  { %18885 = vmatprep.mubr.msk.f32.mxu0 %vm96_vm1, %v7220_v41  ;;  %18978 = vmatprep.subr.mxu1 %v15322_v57  ;;  %v15321_v41 = vld [vmem:[%s28653_s3 + $0x410] sm:$0xff] }
 0x953   :  { %18979 = vmatpush3.msra.mxu1 %v15322_v57 }
 0x954   :  { %18980 = vmatprep.subr.mxu1 %v15321_v41 }
 0x955   :  { %18886 = vmatmul.mubr.msk.f32.gmra.mxu0 %vm96_vm1, %v7221_v44  ;;  %18981 = vmatpush3.msra.mxu1 %v15321_v41  ;;  %v15320_v44 = vld [vmem:[%s28653_s3 + $0x408] sm:$0xff] }
 0x956   :  { %18888 = vmatprep.mubr.msk.f32.mxu0 %vm96_vm1, %v7222_v31  ;;  %18982 = vmatprep.subr.mxu1 %v15320_v44 }
 0x957   :  { %18983 = vmatpush3.msra.mxu1 %v15320_v44 }
 0x958   :  { %18984 = vmatprep.subr.mxu1 %v15319_v53 }
 0x959   :  { %18889 = vmatmul.mubr.msk.f32.gmra.mxu0 %vm96_vm1, %v7223_v23  ;;  %v28979_v23 = vld [vmem:[#allocation50_spill] sm:$0xff]  ;;  %18985 = vmatpush3.msra.mxu1 %v15319_v53 }
 0x95a   :  { %18891 = vmatprep.mubr.msk.f32.mxu0 %vm96_vm1, %v7224_v55  ;;  %19010 = vmatprep.subr.msk.mxu1 %vm289_vm0, %v24180_v62 }
 0x95d   :  { %18892 = vmatmul.mubr.msk.f32.gmra.mxu0 %vm96_vm1, %v7225_v38 }
 0x95e   :  { %18894 = vmatprep.mubr.msk.f32.mxu0 %vm96_vm1, %v7226_v12 }
 0x961   :  { %18895 = vmatmul.mubr.msk.f32.gmra.mxu0 %vm96_vm1, %v7227_v20  ;;  %v28982_v20 = vld [vmem:[#allocation32_spill] sm:$0xff] }
 0x962   :  { %18897 = vmatprep.mubr.msk.f32.mxu0 %vm96_vm1, %v7228_v1 }
 0x965   :  { %18898 = vmatmul.mubr.msk.f32.gmra.mxu0 %vm96_vm1, %v7229_v27 }
 0x966   :  { %18900 = vmatprep.mubr.msk.f32.mxu0 %vm96_vm1, %v7230_v47  ;;  %v28985_v47 = vld [vmem:[#allocation34_spill] sm:$0xff] }
 0x969   :  { %18901 = vmatmul.mubr.msk.f32.gmra.mxu0 %vm96_vm1, %v7231_v25 }
 0x96a   :  { %18903 = vmatprep.mubr.msk.f32.mxu0 %vm96_vm1, %v7232_v32 }
 0x96d   :  { %18904 = vmatmul.mubr.msk.f32.gmra.mxu0 %vm96_vm1, %v7233_v16 }
 0x96e   :  { %18906 = vmatprep.mubr.msk.f32.mxu0 %vm96_vm1, %v7234_v24  ;;  %v28988_v24 = vld [vmem:[#allocation36_spill] sm:$0xff] }
 0x971   :  { %18907 = vmatmul.mubr.msk.f32.gmra.mxu0 %vm96_vm1, %v7235_v34 }
 0x972   :  { %18909 = vmatprep.mubr.msk.f32.mxu0 %vm96_vm1, %v7236_v33 }
 0x975   :  { %18910 = vmatmul.mubr.msk.f32.gmra.mxu0 %vm96_vm1, %v7237_v36  ;;  %v28991_v36 = vld [vmem:[#allocation25_spill] sm:$0xff] }
 0x976   :  { %18912 = vmatprep.mubr.msk.f32.mxu0 %vm96_vm1, %v7238_v26 }
 0x979   :  { %18913 = vmatmul.mubr.msk.f32.gmra.mxu0 %vm96_vm1, %v7239_v2 }
 0x97a   :  { %18915 = vmatprep.mubr.msk.f32.mxu0 %vm96_vm1, %v7240_v40  ;;  %v28994_v40 = vld [vmem:[#allocation37_spill] sm:$0xff] }
 0x97d   :  { %18916 = vmatmul.mubr.msk.f32.gmra.mxu0 %vm96_vm1, %v7241_v18 }
 0x97e   :  { %18918 = vmatprep.mubr.msk.f32.mxu0 %vm96_vm1, %v7242_v3 }
 0x981   :  { %18919 = vmatmul.mubr.msk.f32.gmra.mxu0 %vm96_vm1, %v7243_v7  ;;  %v28997_v7 = vld [vmem:[#allocation3_spill] sm:$0xff] }
 0x982   :  { %18921 = vmatprep.mubr.msk.f32.mxu0 %vm96_vm1, %v7244_v30 }
 0x985   :  { %18922 = vmatmul.mubr.msk.f32.gmra.mxu0 %vm96_vm1, %v7245_v6 }
 0x986   :  { %18924 = vmatprep.mubr.msk.f32.mxu0 %vm96_vm1, %v7246_v11 }
 0x989   :  { %18925 = vmatmul.mubr.msk.f32.gmra.mxu0 %vm96_vm1, %v7247_v22 }
 0x98a   :  { %18927 = vmatprep.mubr.msk.f32.mxu0 %vm96_vm1, %v7248_v9 }
 0x98d   :  { %18928 = vmatmul.mubr.msk.f32.gmra.mxu0 %vm96_vm1, %v7249_v51 }
 0x98e   :  { %18930 = vmatprep.mubr.msk.f32.mxu0 %vm96_vm1, %v7250_v45 }
 0x991   :  { %18931 = vmatmul.mubr.msk.f32.gmra.mxu0 %vm96_vm1, %v7251_v43 }
 0x992   :  { %18933 = vmatprep.mubr.msk.f32.mxu0 %vm96_vm1, %v7252_v13 }
 0x995   :  { %18934 = vmatmul.mubr.msk.f32.gmra.mxu0 %vm96_vm1, %v7253_v10 }
 0x996   :  { %18936 = vmatprep.mubr.msk.f32.mxu0 %vm96_vm1, %v7254_v17 }
 0x999   :  { %18937 = vmatmul.mubr.msk.f32.gmra.mxu0 %vm96_vm1, %v7255_v15 }
 0x99a   :  { %18939 = vmatprep.mubr.msk.f32.mxu0 %vm96_vm1, %v7256_v54 }
 0x99d   :  { %18940 = vmatmul.mubr.msk.f32.gmra.mxu0 %vm96_vm1, %v7257_v14 }
 0x99e   :  { %18942 = vmatprep.mubr.msk.f32.mxu0 %vm96_vm1, %v7258_v61 }
 0x9a1   :  { %18943 = vmatmul.mubr.msk.f32.gmra.mxu0 %vm96_vm1, %v7259_v49 }
 0x9a2   :  { %18945 = vmatprep.mubr.msk.f32.mxu0 %vm96_vm1, %v7260_v37 }
 0x9a5   :  { %18946 = vmatmul.mubr.msk.f32.gmra.mxu0 %vm96_vm1, %v7261_v29 }
 0x9a6   :  { %18948 = vmatprep.mubr.msk.f32.mxu0 %vm96_vm1, %v7262_v50 }
 0x9a9   :  { %18949 = vmatmul.mubr.msk.f32.gmra.mxu0 %vm96_vm1, %v7263_v0 }
 0x9aa   :  { %18951 = vmatprep.mubr.msk.f32.mxu0 %vm96_vm1, %v7264_v39 }
 0x9ad   :  { %18952 = vmatmul.mubr.msk.f32.gmra.mxu0 %vm96_vm1, %v7265_v56 }
 0x9d1   :  { %v18826_v31 = vpop.f32.mrf.mxu0 }
 0x9d2   :  { %v24671_v55 = vadd.f32 %v18826_v31, %v28979_v23 }
 0x9d3   :  { %v24673_v38 = vpop.f32.mrf.mxu0 }
 0x9d4   :  { %28980 = vst [vmem:[#allocation66_spill] sm:$0xff] %v24671_v55  ;;  %28981 = vst [vmem:[#allocation50_spill] sm:$0xff] %v24673_v38 }
 0x9d5   :  { %v18829_v12 = vpop.f32.mrf.mxu0 }
 0x9d6   :  { %v24676_v42 = vadd.f32 %v18829_v12, %v28982_v20 }
 0x9d7   :  { %v24678_v1 = vpop.f32.mrf.mxu0 }
 0x9d8   :  { %28983 = vst [vmem:[#allocation32_spill] sm:$0xff] %v24676_v42  ;;  %28984 = vst [vmem:[#allocation67_spill] sm:$0xff] %v24678_v1 }
 0x9d9   :  { %v18832_v27 = vpop.f32.mrf.mxu0 }
 0x9da   :  { %v24681_v25 = vadd.f32 %v18832_v27, %v28985_v47 }
 0x9db   :  { %v24686_v32 = vpop.f32.mrf.mxu0 }
 0x9dc   :  { %28986 = vst [vmem:[#allocation34_spill] sm:$0xff] %v24681_v25  ;;  %28987 = vst [vmem:[#allocation68_spill] sm:$0xff] %v24686_v32 }
 0x9dd   :  { %v18835_v16 = vpop.f32.mrf.mxu0 }
 0x9de   :  { %v24691_v34 = vadd.f32 %v18835_v16, %v28988_v24 }
 0x9df   :  { %v24693_v52 = vpop.f32.mrf.mxu0 }
 0x9e0   :  { %28989 = vst [vmem:[#allocation36_spill] sm:$0xff] %v24691_v34  ;;  %28990 = vst [vmem:[#allocation69_spill] sm:$0xff] %v24693_v52 }
 0x9e1   :  { %v18838_v33 = vpop.f32.mrf.mxu0 }
 0x9e2   :  { %v24696_v26 = vadd.f32 %v18838_v33, %v28991_v36 }
 0x9e3   :  { %v24698_v28 = vpop.f32.mrf.mxu0 }
 0x9e4   :  { %28992 = vst [vmem:[#allocation25_spill] sm:$0xff] %v24696_v26  ;;  %28993 = vst [vmem:[#allocation70_spill] sm:$0xff] %v24698_v28  ;;  %v24799_v26 = vld [vmem:[%s28654_s2] ss:$0 sm:$0xff] }
 0x9e5   :  { %v18841_v2 = vpop.f32.mrf.mxu0 }
 0x9e6   :  { %v24701_v18 = vadd.f32 %v18841_v2, %v28994_v40 }
 0x9e7   :  { %v24703_v3 = vpop.f32.mrf.mxu0 }
 0x9e8   :  { %28995 = vst [vmem:[#allocation37_spill] sm:$0xff] %v24701_v18  ;;  %28996 = vst [vmem:[#allocation71_spill] sm:$0xff] %v24703_v3 }
 0x9e9   :  { %v18844_v59 = vpop.f32.mrf.mxu0 }
 0x9ea   :  { %v24706_v30 = vadd.f32 %v18844_v59, %v28997_v7 }
 0x9eb   :  { %v24708_v6 = vpop.f32.mrf.mxu0 }
 0x9ec   :  { %28998 = vst [vmem:[#allocation3_spill] sm:$0xff] %v24706_v30  ;;  %28999 = vst [vmem:[#allocation72_spill] sm:$0xff] %v24708_v6 }
 0x9ed   :  { %v18847_v11 = vpop.f32.mrf.mxu0 }
 0x9ee   :  { %v24711_v22 = vadd.f32 %v18847_v11, %v29000_v58 }
 0x9ef   :  { %v24713_v9 = vpop.f32.mrf.mxu0 }
 0x9f0   :  { %29001 = vst [vmem:[#allocation19_spill] sm:$0xff] %v24711_v22  ;;  %29002 = vst [vmem:[#allocation73_spill] sm:$0xff] %v24713_v9 }
 0x9f1   :  { %v18860_v51 = vpop.f32.mrf.mxu0 }
 0x9f3   :  { %v24715_v45 = vpop.f32.mrf.mxu0 }
 0x9f5   :  { %v24717_v4 = vpop.f32.mrf.mxu0 }
 0x9f7   :  { %v24719_v43 = vpop.f32.mrf.mxu0 }
 0x9f9   :  { %v24721_v13 = vpop.f32.mrf.mxu0 }
 0x9fb   :  { %v24723_v10 = vpop.f32.mrf.mxu0 }
 0x9fd   :  { %v24725_v17 = vpop.f32.mrf.mxu0 }
 0x9ff   :  { %v24727_v15 = vpop.f32.mrf.mxu0 }
 0xa01   :  { %v24729_v48 = vpop.f32.mrf.mxu0 }
 0xa03   :  { %v24731_v54 = vpop.f32.mrf.mxu0 }
 0xa05   :  { %v24733_v14 = vpop.f32.mrf.mxu0 }
 0xa07   :  { %v24735_v61 = vpop.f32.mrf.mxu0 }
 0xa09   :  { %v24737_v49 = vpop.f32.mrf.mxu0 }
 0xa0b   :  { %v24739_v19 = vpop.f32.mrf.mxu0 }
 0xa0d   :  { %v24741_v37 = vpop.f32.mrf.mxu0 }
 0xa0f   :  { %v24743_v29 = vpop.f32.mrf.mxu0 }
 0xa11   :  { %v18884_v50 = vpop.f32.mrf.mxu0 }
 0xa12   :  { %v7844_v0 = vmax.f32 %v18860_v51, %v18884_v50 }
 0xa13   :  { %v7604_v21 = vpop.f32.mrf.mxu0 }
 0xa14   :  { %v7843_v32 = vmax.f32 %v24715_v45, %v7604_v21 }
 0xa15   :  { %v18887_v39 = vpop.f32.mrf.mxu0 }
 0xa16   :  { %v7846_v56 = vmax.f32 %v24717_v4, %v18887_v39 }
 0xa17   :  { %v7614_v63 = vpop.f32.mrf.mxu0 }
 0xa18   :  { %v7845_v42 = vmax.f32 %v24719_v43, %v7614_v63 }
 0xa19   :  { %v18890_v35 = vpop.f32.mrf.mxu0 }
 0xa1a   :  { %v7848_v57 = vmax.f32 %v24721_v13, %v18890_v35 }
 0xa1b   :  { %v24747_v41 = vpop.f32.mrf.mxu0 }
 0xa1c   :  { %v7847_v21 = vmax.f32 %v24723_v10, %v24747_v41 }
 0xa1d   :  { %v24749_v44 = vpop.f32.mrf.mxu0 }
 0xa1e   :  { %v29003_v63 = vmax.f32 %v24725_v17, %v24749_v44 }
 0xa1f   :  { %v24753_v23 = vpop.f32.mrf.mxu0 }
 0xa21   :  { %v24755_v12 = vpop.f32.mrf.mxu0 }
 0xa23   :  { %v24759_v27 = vpop.f32.mrf.mxu0 }
 0xa24   :  { %v7851_v17 = vmax.f32 %v24731_v54, %v24759_v27 }
 0xa25   :  { %v24761_v47 = vpop.f32.mrf.mxu0 }
 0xa27   :  { %v24765_v16 = vpop.f32.mrf.mxu0 }
 0xa29   :  { %v24767_v24 = vpop.f32.mrf.mxu0 }
 0xa2b   :  { %v24771_v36 = vpop.f32.mrf.mxu0 }
 0xa2d   :  { %v24773_v2 = vpop.f32.mrf.mxu0 }
 0xa2f   :  { %v24777_v59 = vpop.f32.mrf.mxu0 }
 0xa31   :  { %v18908_v7 = vpop.f32.mrf.mxu0 }
 0xa33   :  { %v7684_v11 = vpop.f32.mrf.mxu0 }
 0xa35   :  { %v18911_v58 = vpop.f32.mrf.mxu0 }
 0xa37   :  { %v7694_v51 = vpop.f32.mrf.mxu0 }
 0xa39   :  { %v18914_v4 = vpop.f32.mrf.mxu0 }
 0xa3b   :  { %v7704_v13 = vpop.f32.mrf.mxu0 }
 0xa3d   :  { %v18917_v50 = vpop.f32.mrf.mxu0 }
 0xa3f   :  { %v7714_v39 = vpop.f32.mrf.mxu0 }
 0xa41   :  { %v24779_v35 = vpop.f32.mrf.mxu0 }
 0xa43   :  { %v24781_v33 = vpop.f32.mrf.mxu0 }
 0xa45   :  { %v24783_v53 = vpop.f32.mrf.mxu0 }
 0xa47   :  { %v24785_v20 = vpop.f32.mrf.mxu0 }
 0xa49   :  { %v24787_v31 = vpop.f32.mrf.mxu0 }
 0xa4b   :  { %v24789_v40 = vpop.f32.mrf.mxu0 }
 0xa4d   :  { %v24791_v9 = vpop.f32.mrf.mxu0 }
 0xa4f   :  { %v24793_v6 = vpop.f32.mrf.mxu0 }
 0xa51   :  { %v18932_v3 = vpop.f32.mrf.mxu0 }
 0xa52   :  { %v7860_v28 = vmax.f32 %v18908_v7, %v18932_v3 }
 0xa53   :  { %v7764_v52 = vpop.f32.mrf.mxu0 }
 0xa54   :  { %v7876_v1 = vmax.f32 %v7844_v0, %v7860_v28  ;;  %v7859_v38 = vmax.f32 %v7684_v11, %v7764_v52 }
 0xa55   :  { %v18935_v22 = vpop.f32.mrf.mxu0 }
 0xa56   :  { %v7875_v30 = vmax.f32 %v7843_v32, %v7859_v38  ;;  %v7862_v18 = vmax.f32 %v18911_v58, %v18935_v22  ;;  %v7892_v34 = vadd.f32 %v24799_v26, %v7876_v1 }
 0xa57   :  { %v7774_v25 = vpop.f32.mrf.mxu0 }
 0xa58   :  { %v7878_v55 = vmax.f32 %v7846_v56, %v7862_v18  ;;  %v7861_v3 = vmax.f32 %v7694_v51, %v7774_v25  ;;  %v7891_v7 = vadd.f32 %v24799_v26, %v7875_v30  ;;  %v7908_v38 = vmax.f32 %v7892_v34, 0.0 }
 0xa59   :  { %v18938_v45 = vpop.f32.mrf.mxu0 }
 0xa5a   :  { %v7877_v28 = vmax.f32 %v7845_v42, %v7861_v3  ;;  %v7864_v52 = vmax.f32 %v18914_v4, %v18938_v45  ;;  %v7907_v0 = vmax.f32 %v7891_v7, 0.0  ;;  %v7894_v32 = vadd.f32 %v24799_v26, %v7878_v55 }
 0xa5b   :  { %v7784_v22 = vpop.f32.mrf.mxu0  ;;  %v7849_v55 = vmax.f32 %v24727_v15, %v24753_v23 }
 0xa5c   :  { %v7880_v11 = vmax.f32 %v7848_v57, %v7864_v52  ;;  %v7863_v1 = vmax.f32 %v7704_v13, %v7784_v22  ;;  %18986 = vmatprep.mubr.f32.mxu1 %v7907_v0  ;;  %v7893_v43 = vadd.f32 %v24799_v26, %v7877_v28  ;;  %v7910_v34 = vmax.f32 %v7894_v32, 0.0 }
 0xa5d   :  { %v18941_v18 = vpop.f32.mrf.mxu0  ;;  %18987 = vmatmul.mubr.f32.vlgmr.msra.gmra.mxu1 %v7908_v38 }
 0xa5e   :  { %v7879_v25 = vmax.f32 %v7847_v21, %v7863_v1  ;;  %v7866_v30 = vmax.f32 %v18917_v50, %v18941_v18  ;;  %19011 = vmatpush3.msk.msra.mxu1 %vm289_vm0, %v24180_v62  ;;  %v7909_v42 = vmax.f32 %v7893_v43, 0.0  ;;  %v7896_v56 = vadd.f32 %v24799_v26, %v7880_v11 }
 0xa5f   :  { %v7794_v10 = vpop.f32.mrf.mxu0  ;;  %19012 = vmatprep.subr.mxu1 %v24302_v60 }
 0xa60   :  { %v7882_v57 = vmax.f32 %v29003_v63, %v7866_v30  ;;  %v7865_v41 = vmax.f32 %v7714_v39, %v7794_v10  ;;  %18989 = vmatprep.mubr.f32.mxu1 %v7909_v42  ;;  %v7895_v58 = vadd.f32 %v24799_v26, %v7879_v25  ;;  %19013 = vmatpush3.msra.mxu1 %v24302_v60  ;;  %v7912_v44 = vmax.f32 %v7896_v56, 0.0  ;;  %v8104_v10 = vld [vmem:[%s28652_s0 + $0x1218] sm:$0xff]  ;;  %v8105_v63 = vld [vmem:[%s28652_s0 + $0x1220] sm:$0xff] }
 0xa61   :  { %v18944_v62 = vpop.f32.mrf.mxu0  ;;  %18990 = vmatmul.mubr.f32.gmra.mxu1 %v7910_v34  ;;  %19014 = vmatprep.subr.mxu1 %v24313_v5  ;;  %v29004_v60 = vmax.f32 %v24729_v48, %v24755_v12 }
 0xa62   :  { %v7881_v15 = vmax.f32 %v7849_v55, %v7865_v41  ;;  %v7868_v23 = vmax.f32 %v24779_v35, %v18944_v62  ;;  %v7911_v51 = vmax.f32 %v7895_v58, 0.0  ;;  %19015 = vmatpush3.msra.mxu1 %v24313_v5  ;;  %v7898_v4 = vadd.f32 %v24799_v26, %v7882_v57  ;;  %v8106_v57 = vld [vmem:[%s28652_s0 + $0x1228] sm:$0xff]  ;;  %v8107_v41 = vld [vmem:[%s28652_s0 + $0x1230] sm:$0xff]  ;;  %v8108_v58 = vld [vmem:[%s28652_s0 + $0x1238] sm:$0xff] }
 0xa63   :  { %v7804_v13 = vpop.f32.mrf.mxu0  ;;  %19016 = vmatprep.subr.mxu1 %v24324_v8  ;;  %v8109_v62 = vld [vmem:[%s28652_s0 + $0x1240] sm:$0xff] }
 0xa64   :  { %v7884_v50 = vmax.f32 %v29004_v60, %v7868_v23  ;;  %v7867_v39 = vmax.f32 %v24781_v33, %v7804_v13  ;;  %18992 = vmatprep.mubr.f32.mxu1 %v7911_v51  ;;  %v7897_v35 = vadd.f32 %v24799_v26, %v7881_v15  ;;  %19017 = vmatpush3.msra.mxu1 %v24324_v8  ;;  %v7914_v7 = vmax.f32 %v7898_v4, 0.0  ;;  %v8110_v15 = vld [vmem:[%s28652_s0 + $0x1248] sm:$0xff]  ;;  %v8111_v23 = vld [vmem:[%s28652_s0 + $0x1250] sm:$0xff]  ;;  %v8112_v51 = vld [vmem:[%s28652_s0 + $0x1258] sm:$0xff] }
 0xa65   :  { %v18947_v5 = vpop.f32.mrf.mxu0  ;;  %18993 = vmatmul.mubr.f32.gmra.mxu1 %v7912_v44  ;;  %19018 = vmatprep.subr.mxu1 %v24336_v46  ;;  %v7853_v33 = vmax.f32 %v24735_v61, %v24765_v16  ;;  %v29005_v8 = vmax.f32 %v24733_v14, %v24761_v47  ;;  %v7855_v61 = vmax.f32 %v24739_v19, %v24771_v36  ;;  %v8114_v44 = vld [vmem:[%s28652_s0 + $0x1268] sm:$0xff]  ;;  %v8115_v4 = vld [vmem:[%s28652_s0 + $0x1270] sm:$0xff]  ;;  %v8116_v13 = vld [vmem:[%s28652_s0 + $0x1278] sm:$0xff] }
 0xa66   :  { %v7883_v54 = vmax.f32 %v7851_v17, %v7867_v39  ;;  %v7870_v27 = vmax.f32 %v24783_v53, %v18947_v5  ;;  %v7913_v3 = vmax.f32 %v7897_v35, 0.0  ;;  %19019 = vmatpush3.msra.mxu1 %v24336_v46  ;;  %v7900_v48 = vadd.f32 %v24799_v26, %v7884_v50  ;;  %v8113_v17 = vld [vmem:[%s28652_s0 + $0x1260] sm:$0xff]  ;;  %v8118_v50 = vld [vmem:[%s28652_s0 + $0x1288] sm:$0xff]  ;;  %v8119_v39 = vld [vmem:[%s28652_s0 + $0x1290] sm:$0xff] }
 0xa67   :  { %v7814_v12 = vpop.f32.mrf.mxu0  ;;  %v29006_v14 = vmax.f32 %v24737_v49, %v24767_v24  ;;  %v7857_v19 = vmax.f32 %v24743_v29, %v24777_v59  ;;  %v29007_v49 = vmax.f32 %v24741_v37, %v24773_v2  ;;  %v8101_v37 = vld [vmem:[%s28652_s0 + $0x1200] sm:$0xff]  ;;  %v8103_v2 = vld [vmem:[%s28652_s0 + $0x1210] sm:$0xff]  ;;  %v8120_v35 = vld [vmem:[%s28652_s0 + $0x1298] sm:$0xff] }
 0xa68   :  { %v7886_v45 = vmax.f32 %v29005_v8, %v7870_v27  ;;  %v7869_v28 = vmax.f32 %v24785_v20, %v7814_v12  ;;  %18995 = vmatprep.mubr.f32.mxu1 %v7913_v3  ;;  %v7899_v52 = vadd.f32 %v24799_v26, %v7883_v54  ;;  %v7916_v32 = vmax.f32 %v7900_v48, 0.0  ;;  %v8117_v60 = vld [vmem:[%s28652_s0 + $0x1280] sm:$0xff]  ;;  %v8122_v54 = vld [vmem:[%s28652_s0 + $0x12a8] sm:$0xff]  ;;  %v8123_v27 = vld [vmem:[%s28652_s0 + $0x12b0] sm:$0xff] }
 0xa69   :  { %v18950_v53 = vpop.f32.mrf.mxu0  ;;  %18996 = vmatmul.mubr.f32.gmra.mxu1 %v7914_v7  ;;  %v8121_v5 = vld [vmem:[%s28652_s0 + $0x12a0] sm:$0xff]  ;;  %v8124_v3 = vld [vmem:[%s28652_s0 + $0x12b8] sm:$0xff]  ;;  %v8126_v48 = vld [vmem:[%s28652_s0 + $0x12c8] sm:$0xff] }
 0xa6a   :  { %v7885_v0 = vmax.f32 %v7853_v33, %v7869_v28  ;;  %v7872_v46 = vmax.f32 %v24787_v31, %v18950_v53  ;;  %v7915_v38 = vmax.f32 %v7899_v52, 0.0  ;;  %v7902_v22 = vadd.f32 %v24799_v26, %v7886_v45  ;;  %v8125_v7 = vld [vmem:[%s28652_s0 + $0x12c0] sm:$0xff]  ;;  %v15415_v12 = vld [vmem:[%s28653_s3 + $0x4f8] sm:$0xff]  ;;  %v8127_v33 = vld [vmem:[%s28652_s0 + $0x12d0] sm:$0xff] }
 0xa6b   :  { %v7824_v21 = vpop.f32.mrf.mxu0  ;;  %19116 = vmatprep.subr.mxu0 %v15415_v12  ;;  %v8128_v8 = vld [vmem:[%s28652_s0 + $0x12d8] sm:$0xff]  ;;  %v8129_v45 = vld [vmem:[%s28652_s0 + $0x12e0] sm:$0xff]  ;;  %v8130_v28 = vld [vmem:[%s28652_s0 + $0x12e8] sm:$0xff] }
 0xa6c   :  { %v7888_v20 = vmax.f32 %v29006_v14, %v7872_v46  ;;  %v7871_v47 = vmax.f32 %v24789_v40, %v7824_v21  ;;  %18998 = vmatprep.mubr.f32.mxu1 %v7915_v38  ;;  %v7901_v16 = vadd.f32 %v24799_v26, %v7885_v0  ;;  %v7918_v18 = vmax.f32 %v7902_v22, 0.0  ;;  %19117 = vmatpush3.msra.mxu0 %v15415_v12  ;;  %v15414_v52 = vld [vmem:[%s28653_s3 + $0x4f0] sm:$0xff]  ;;  %v8132_v0 = vld [vmem:[%s28652_s0 + $0x12f8] sm:$0xff]  ;;  %v8133_v46 = vld [vmem:[%s28652_s0 + $0x1300] sm:$0xff] }
 0xa6d   :  { %v18953_v11 = vpop.f32.mrf.mxu0  ;;  %18999 = vmatmul.mubr.f32.gmra.mxu1 %v7916_v32  ;;  %v8131_v53 = vld [vmem:[%s28652_s0 + $0x12f0] sm:$0xff]  ;;  %19118 = vmatprep.subr.mxu0 %v15414_v52  ;;  %v8134_v38 = vld [vmem:[%s28652_s0 + $0x1308] sm:$0xff]  ;;  %v8136_v21 = vld [vmem:[%s28652_s0 + $0x1318] sm:$0xff] }
 0xa6e   :  { %v7887_v31 = vmax.f32 %v7855_v61, %v7871_v47  ;;  %v7874_v1 = vmax.f32 %v24791_v9, %v18953_v11  ;;  %v7917_v43 = vmax.f32 %v7901_v16, 0.0  ;;  %v7904_v25 = vadd.f32 %v24799_v26, %v7888_v20  ;;  %19119 = vmatpush3.msra.mxu0 %v15414_v52  ;;  %v15413_v32 = vld [vmem:[%s28653_s3 + $0x4e8] sm:$0xff]  ;;  %v8135_v22 = vld [vmem:[%s28652_s0 + $0x1310] sm:$0xff]  ;;  %v8137_v61 = vld [vmem:[%s28652_s0 + $0x1320] sm:$0xff] }
 0xa6f   :  { %v7834_v30 = vpop.f32.mrf.mxu0  ;;  %19120 = vmatprep.subr.mxu0 %v15413_v32  ;;  %v15412_v14 = vld [vmem:[%s28653_s3 + $0x4e0] sm:$0xff]  ;;  %v8138_v20 = vld [vmem:[%s28652_s0 + $0x1328] sm:$0xff]  ;;  %v8139_v47 = vld [vmem:[%s28652_s0 + $0x1330] sm:$0xff] }
 0xa70   :  { %v7890_v24 = vmax.f32 %v29007_v49, %v7874_v1  ;;  %v7873_v36 = vmax.f32 %v24793_v6, %v7834_v30  ;;  %19001 = vmatprep.mubr.f32.mxu1 %v7917_v43  ;;  %v7903_v40 = vadd.f32 %v24799_v26, %v7887_v31  ;;  %v7920_v55 = vmax.f32 %v7904_v25, 0.0  ;;  %v8102_v6 = vld [vmem:[%s28652_s0 + $0x1208] sm:$0xff]  ;;  %19121 = vmatpush3.msra.mxu0 %v15413_v32  ;;  %v8140_v16 = vld [vmem:[%s28652_s0 + $0x1338] sm:$0xff]  ;;  %v8141_v11 = vld [vmem:[%s28652_s0 + $0x1340] sm:$0xff] }
 0xa71   :  { %19002 = vmatmul.mubr.f32.gmra.mxu1 %v7918_v18  ;;  %19122 = vmatprep.subr.mxu0 %v15412_v14  ;;  %v15411_v31 = vld [vmem:[%s28653_s3 + $0x4d8] sm:$0xff]  ;;  %v8142_v1 = vld [vmem:[%s28652_s0 + $0x1348] sm:$0xff]  ;;  %v8143_v43 = vld [vmem:[%s28652_s0 + $0x1350] sm:$0xff] }
 0xa72   :  { %v7889_v42 = vmax.f32 %v7857_v19, %v7873_v36  ;;  %v7919_v9 = vmax.f32 %v7903_v40, 0.0  ;;  %v7906_v34 = vadd.f32 %v24799_v26, %v7890_v24  ;;  %19123 = vmatpush3.msra.mxu0 %v15412_v14  ;;  %v8144_v18 = vld [vmem:[%s28652_s0 + $0x1358] sm:$0xff]  ;;  %v8145_v25 = vld [vmem:[%s28652_s0 + $0x1360] sm:$0xff]  ;;  %v15410_v30 = vld [vmem:[%s28653_s3 + $0x4d0] sm:$0xff] }
 0xa73   :  { %19124 = vmatprep.subr.mxu0 %v15411_v31  ;;  %v8146_v19 = vld [vmem:[%s28652_s0 + $0x1368] sm:$0xff]  ;;  %v8147_v49 = vld [vmem:[%s28652_s0 + $0x1370] sm:$0xff]  ;;  %v8148_v24 = vld [vmem:[%s28652_s0 + $0x1378] sm:$0xff] }
 0xa74   :  { %19004 = vmatprep.mubr.f32.mxu1 %v7919_v9  ;;  %v7905_v56 = vadd.f32 %v24799_v26, %v7889_v42  ;;  %v7922_v59 = vmax.f32 %v7906_v34, 0.0  ;;  %19125 = vmatpush3.msra.mxu0 %v15411_v31  ;;  %v8149_v36 = vld [vmem:[%s28652_s0 + $0x1380] sm:$0xff]  ;;  %v15409_v40 = vld [vmem:[%s28653_s3 + $0x4c8] sm:$0xff]  ;;  %v8151_v9 = vld [vmem:[%s28652_s0 + $0x1390] sm:$0xff] }
 0xa75   :  { %19005 = vmatmul.mubr.f32.gmra.mxu1 %v7920_v55  ;;  %19126 = vmatprep.subr.mxu0 %v15410_v30  ;;  %v8150_v42 = vld [vmem:[%s28652_s0 + $0x1388] sm:$0xff]  ;;  %v8152_v55 = vld [vmem:[%s28652_s0 + $0x1398] sm:$0xff]  ;;  %v8153_v34 = vld [vmem:[%s28652_s0 + $0x13a0] sm:$0xff] }
 0xa76   :  { %v7921_v29 = vmax.f32 %v7905_v56, 0.0  ;;  %19127 = vmatpush3.msra.mxu0 %v15410_v30  ;;  %v8154_v56 = vld [vmem:[%s28652_s0 + $0x13a8] sm:$0xff]  ;;  %v29017_v52 = vld [vmem:[#allocation36_spill] sm:$0xff] }
 0xa77   :  { %19128 = vmatprep.subr.mxu0 %v15409_v40 }
 0xa78   :  { %19007 = vmatprep.mubr.f32.mxu1 %v7921_v29  ;;  %19129 = vmatpush3.msra.mxu0 %v15409_v40  ;;  %v15408_v29 = vld [vmem:[%s28653_s3 + $0x4c0] sm:$0xff] }
 0xa79   :  { %19008 = vmatmul.mubr.f32.gmra.mxu1 %v7922_v59  ;;  %v8155_v59 = vld [vmem:[%s28652_s0 + $0x13b0] sm:$0xff]  ;;  %19130 = vmatprep.subr.mxu0 %v15408_v29 }
 0xa7a   :  { %19020 = vmatprep.mubr.msk.f32.mxu1 %vm96_vm1, %v8101_v37  ;;  %19131 = vmatpush3.msra.mxu0 %v15408_v29  ;;  %v8156_v37 = vld [vmem:[%s28652_s0 + $0x13b8] sm:$0xff] }
 0xa7d   :  { %19021 = vmatmul.mubr.msk.f32.vlgmr.msra.gmra.mxu1 %vm96_vm1, %v8102_v6  ;;  %v8157_v6 = vld [vmem:[%s28652_s0 + $0x13c0] sm:$0xff] }
 0xa7e   :  { %19023 = vmatprep.mubr.msk.f32.mxu1 %vm96_vm1, %v8103_v2  ;;  %v8158_v2 = vld [vmem:[%s28652_s0 + $0x13c8] sm:$0xff] }
 0xa81   :  { %19024 = vmatmul.mubr.msk.f32.gmra.mxu1 %vm96_vm1, %v8104_v10  ;;  %v15407_v10 = vld [vmem:[%s28653_s3 + $0x4b8] sm:$0xff] }
 0xa82   :  { %19026 = vmatprep.mubr.msk.f32.mxu1 %vm96_vm1, %v8105_v63  ;;  %v8159_v63 = vld [vmem:[%s28652_s0 + $0x13d0] sm:$0xff]  ;;  %19132 = vmatprep.subr.mxu0 %v15407_v10 }
 0xa83   :  { %19133 = vmatpush3.msra.mxu0 %v15407_v10 }
 0xa85   :  { %19027 = vmatmul.mubr.msk.f32.gmra.mxu1 %vm96_vm1, %v8106_v57  ;;  %v8160_v57 = vld [vmem:[%s28652_s0 + $0x13d8] sm:$0xff] }
 0xa86   :  { %19029 = vmatprep.mubr.msk.f32.mxu1 %vm96_vm1, %v8107_v41  ;;  %v8161_v41 = vld [vmem:[%s28652_s0 + $0x13e0] sm:$0xff] }
 0xa89   :  { %19030 = vmatmul.mubr.msk.f32.gmra.mxu1 %vm96_vm1, %v8108_v58  ;;  %v8162_v58 = vld [vmem:[%s28652_s0 + $0x13e8] sm:$0xff] }
 0xa8a   :  { %19032 = vmatprep.mubr.msk.f32.mxu1 %vm96_vm1, %v8109_v62  ;;  %v15406_v62 = vld [vmem:[%s28653_s3 + $0x4b0] sm:$0xff] }
 0xa8b   :  { %19134 = vmatprep.subr.mxu0 %v15406_v62 }
 0xa8c   :  { %19135 = vmatpush3.msra.mxu0 %v15406_v62 }
 0xa8d   :  { %19033 = vmatmul.mubr.msk.f32.gmra.mxu1 %vm96_vm1, %v8110_v15  ;;  %v8163_v15 = vld [vmem:[%s28652_s0 + $0x13f0] sm:$0xff] }
 0xa8e   :  { %19035 = vmatprep.mubr.msk.f32.mxu1 %vm96_vm1, %v8111_v23  ;;  %v8164_v23 = vld [vmem:[%s28652_s0 + $0x13f8] sm:$0xff] }
 0xa91   :  { %19036 = vmatmul.mubr.msk.f32.gmra.mxu1 %vm96_vm1, %v8112_v51  ;;  %v15405_v51 = vld [vmem:[%s28653_s3 + $0x4a8] sm:$0xff] }
 0xa92   :  { %19038 = vmatprep.mubr.msk.f32.mxu1 %vm96_vm1, %v8113_v17  ;;  %19136 = vmatprep.subr.mxu0 %v15405_v51  ;;  %v15404_v17 = vld [vmem:[%s28653_s3 + $0x4a0] sm:$0xff] }
 0xa93   :  { %19137 = vmatpush3.msra.mxu0 %v15405_v51 }
 0xa94   :  { %19138 = vmatprep.subr.mxu0 %v15404_v17 }
 0xa95   :  { %19039 = vmatmul.mubr.msk.f32.gmra.mxu1 %vm96_vm1, %v8114_v44  ;;  %19139 = vmatpush3.msra.mxu0 %v15404_v17  ;;  %v15403_v44 = vld [vmem:[%s28653_s3 + $0x498] sm:$0xff] }
 0xa96   :  { %19041 = vmatprep.mubr.msk.f32.mxu1 %vm96_vm1, %v8115_v4  ;;  %19140 = vmatprep.subr.mxu0 %v15403_v44  ;;  %v15402_v4 = vld [vmem:[%s28653_s3 + $0x490] sm:$0xff] }
 0xa97   :  { %19141 = vmatpush3.msra.mxu0 %v15403_v44 }
 0xa98   :  { %19142 = vmatprep.subr.mxu0 %v15402_v4 }
 0xa99   :  { %19042 = vmatmul.mubr.msk.f32.gmra.mxu1 %vm96_vm1, %v8116_v13  ;;  %19143 = vmatpush3.msra.mxu0 %v15402_v4  ;;  %v15401_v13 = vld [vmem:[%s28653_s3 + $0x488] sm:$0xff] }
 0xa9a   :  { %19044 = vmatprep.mubr.msk.f32.mxu1 %vm96_vm1, %v8117_v60  ;;  %19144 = vmatprep.subr.mxu0 %v15401_v13 }
 0xa9b   :  { %19145 = vmatpush3.msra.mxu0 %v15401_v13 }
 0xa9d   :  { %19045 = vmatmul.mubr.msk.f32.gmra.mxu1 %vm96_vm1, %v8118_v50  ;;  %v29008_v50 = vld [vmem:[#allocation66_spill] sm:$0xff] }
 0xa9e   :  { %19047 = vmatprep.mubr.msk.f32.mxu1 %vm96_vm1, %v8119_v39 }
 0xaa1   :  { %19048 = vmatmul.mubr.msk.f32.gmra.mxu1 %vm96_vm1, %v8120_v35 }
 0xaa2   :  { %19050 = vmatprep.mubr.msk.f32.mxu1 %vm96_vm1, %v8121_v5 }
 0xaa5   :  { %19051 = vmatmul.mubr.msk.f32.gmra.mxu1 %vm96_vm1, %v8122_v54  ;;  %v29011_v54 = vld [vmem:[#allocation32_spill] sm:$0xff] }
 0xaa6   :  { %19053 = vmatprep.mubr.msk.f32.mxu1 %vm96_vm1, %v8123_v27 }
 0xaa9   :  { %19054 = vmatmul.mubr.msk.f32.gmra.mxu1 %vm96_vm1, %v8124_v3 }
 0xaaa   :  { %19056 = vmatprep.mubr.msk.f32.mxu1 %vm96_vm1, %v8125_v7 }
 0xaad   :  { %19057 = vmatmul.mubr.msk.f32.gmra.mxu1 %vm96_vm1, %v8126_v48  ;;  %v29014_v48 = vld [vmem:[#allocation34_spill] sm:$0xff] }
 0xaae   :  { %19059 = vmatprep.mubr.msk.f32.mxu1 %vm96_vm1, %v8127_v33  ;;  %v15400_v33 = vld [vmem:[%s28653_s3 + $0x480] sm:$0xff] }
 0xaaf   :  { %19146 = vmatprep.subr.mxu0 %v15400_v33 }
 0xab0   :  { %19147 = vmatpush3.msra.mxu0 %v15400_v33 }
 0xab1   :  { %19060 = vmatmul.mubr.msk.f32.gmra.mxu1 %vm96_vm1, %v8128_v8 }
 0xab2   :  { %19062 = vmatprep.mubr.msk.f32.mxu1 %vm96_vm1, %v8129_v45 }
 0xab5   :  { %19063 = vmatmul.mubr.msk.f32.gmra.mxu1 %vm96_vm1, %v8130_v28  ;;  %v25185_v28 = vld [vmem:[%s28651_s1 + $0x20] sm:$0xf] }
 0xab6   :  { %19065 = vmatprep.mubr.msk.f32.mxu1 %vm96_vm1, %v8131_v53  ;;  %19172 = vmatprep.subr.msk.mxu0 %vm289_vm0, %v25185_v28 }
 0xab9   :  { %19066 = vmatmul.mubr.msk.f32.gmra.mxu1 %vm96_vm1, %v8132_v0 }
 0xaba   :  { %19068 = vmatprep.mubr.msk.f32.mxu1 %vm96_vm1, %v8133_v46 }
 0xabd   :  { %19069 = vmatmul.mubr.msk.f32.gmra.mxu1 %vm96_vm1, %v8134_v38  ;;  %v29020_v38 = vld [vmem:[#allocation25_spill] sm:$0xff] }
 0xabe   :  { %19071 = vmatprep.mubr.msk.f32.mxu1 %vm96_vm1, %v8135_v22 }
 0xac1   :  { %19072 = vmatmul.mubr.msk.f32.gmra.mxu1 %vm96_vm1, %v8136_v21 }
 0xac2   :  { %19074 = vmatprep.mubr.msk.f32.mxu1 %vm96_vm1, %v8137_v61  ;;  %v29023_v61 = vld [vmem:[#allocation37_spill] sm:$0xff] }
 0xac5   :  { %19075 = vmatmul.mubr.msk.f32.gmra.mxu1 %vm96_vm1, %v8138_v20 }
 0xac6   :  { %19077 = vmatprep.mubr.msk.f32.mxu1 %vm96_vm1, %v8139_v47 }
 0xac9   :  { %19078 = vmatmul.mubr.msk.f32.gmra.mxu1 %vm96_vm1, %v8140_v16  ;;  %v29026_v16 = vld [vmem:[#allocation3_spill] sm:$0xff] }
 0xaca   :  { %19080 = vmatprep.mubr.msk.f32.mxu1 %vm96_vm1, %v8141_v11 }
 0xacd   :  { %19081 = vmatmul.mubr.msk.f32.gmra.mxu1 %vm96_vm1, %v8142_v1 }
 0xace   :  { %19083 = vmatprep.mubr.msk.f32.mxu1 %vm96_vm1, %v8143_v43  ;;  %v29029_v43 = vld [vmem:[#allocation19_spill] sm:$0xff] }
 0xad1   :  { %19084 = vmatmul.mubr.msk.f32.gmra.mxu1 %vm96_vm1, %v8144_v18 }
 0xad2   :  { %19086 = vmatprep.mubr.msk.f32.mxu1 %vm96_vm1, %v8145_v25 }
 0xad5   :  { %19087 = vmatmul.mubr.msk.f32.gmra.mxu1 %vm96_vm1, %v8146_v19 }
 0xad6   :  { %19089 = vmatprep.mubr.msk.f32.mxu1 %vm96_vm1, %v8147_v49 }
 0xad9   :  { %19090 = vmatmul.mubr.msk.f32.gmra.mxu1 %vm96_vm1, %v8148_v24 }
 0xada   :  { %19092 = vmatprep.mubr.msk.f32.mxu1 %vm96_vm1, %v8149_v36 }
 0xadd   :  { %19093 = vmatmul.mubr.msk.f32.gmra.mxu1 %vm96_vm1, %v8150_v42 }
 0xade   :  { %19095 = vmatprep.mubr.msk.f32.mxu1 %vm96_vm1, %v8151_v9 }
 0xae1   :  { %19096 = vmatmul.mubr.msk.f32.gmra.mxu1 %vm96_vm1, %v8152_v55 }
 0xae2   :  { %19098 = vmatprep.mubr.msk.f32.mxu1 %vm96_vm1, %v8153_v34 }
 0xae5   :  { %19099 = vmatmul.mubr.msk.f32.gmra.mxu1 %vm96_vm1, %v8154_v56 }
 0xae6   :  { %19101 = vmatprep.mubr.msk.f32.mxu1 %vm96_vm1, %v8155_v59 }
 0xae9   :  { %19102 = vmatmul.mubr.msk.f32.gmra.mxu1 %vm96_vm1, %v8156_v37 }
 0xaea   :  { %19104 = vmatprep.mubr.msk.f32.mxu1 %vm96_vm1, %v8157_v6 }
 0xaed   :  { %19105 = vmatmul.mubr.msk.f32.gmra.mxu1 %vm96_vm1, %v8158_v2 }
 0xaee   :  { %19107 = vmatprep.mubr.msk.f32.mxu1 %vm96_vm1, %v8159_v63 }
 0xaf1   :  { %19108 = vmatmul.mubr.msk.f32.gmra.mxu1 %vm96_vm1, %v8160_v57 }
 0xaf2   :  { %19110 = vmatprep.mubr.msk.f32.mxu1 %vm96_vm1, %v8161_v41 }
 0xaf5   :  { %19111 = vmatmul.mubr.msk.f32.gmra.mxu1 %vm96_vm1, %v8162_v58 }
 0xaf6   :  { %19113 = vmatprep.mubr.msk.f32.mxu1 %vm96_vm1, %v8163_v15 }
 0xaf9   :  { %19114 = vmatmul.mubr.msk.f32.gmra.mxu1 %vm96_vm1, %v8164_v23 }
 0xb1d   :  { %v18988_v60 = vpop.f32.mrf.mxu1 }
 0xb1e   :  { %v25165_v39 = vadd.f32 %v18988_v60, %v29008_v50 }
 0xb1f   :  { %v25167_v35 = vpop.f32.mrf.mxu1 }
 0xb20   :  { %29009 = vst [vmem:[#allocation66_spill] sm:$0xff] %v25165_v39  ;;  %29010 = vst [vmem:[#allocation74_spill] sm:$0xff] %v25167_v35 }
 0xb21   :  { %v18991_v5 = vpop.f32.mrf.mxu1 }
 0xb22   :  { %v25170_v27 = vadd.f32 %v18991_v5, %v29011_v54 }
 0xb23   :  { %v25172_v3 = vpop.f32.mrf.mxu1 }
 0xb24   :  { %29012 = vst [vmem:[#allocation32_spill] sm:$0xff] %v25170_v27  ;;  %29013 = vst [vmem:[#allocation75_spill] sm:$0xff] %v25172_v3 }
 0xb25   :  { %v18994_v7 = vpop.f32.mrf.mxu1 }
 0xb26   :  { %v25175_v12 = vadd.f32 %v18994_v7, %v29014_v48 }
 0xb27   :  { %v25180_v8 = vpop.f32.mrf.mxu1 }
 0xb28   :  { %29015 = vst [vmem:[#allocation34_spill] sm:$0xff] %v25175_v12  ;;  %29016 = vst [vmem:[#allocation76_spill] sm:$0xff] %v25180_v8 }
 0xb29   :  { %v18997_v45 = vpop.f32.mrf.mxu1 }
 0xb2a   :  { %v25190_v53 = vadd.f32 %v18997_v45, %v29017_v52 }
 0xb2b   :  { %v25192_v0 = vpop.f32.mrf.mxu1 }
 0xb2c   :  { %29018 = vst [vmem:[#allocation36_spill] sm:$0xff] %v25190_v53  ;;  %29019 = vst [vmem:[#allocation77_spill] sm:$0xff] %v25192_v0 }
 0xb2d   :  { %v19000_v46 = vpop.f32.mrf.mxu1 }
 0xb2e   :  { %v25195_v32 = vadd.f32 %v19000_v46, %v29020_v38 }
 0xb2f   :  { %v25197_v22 = vpop.f32.mrf.mxu1 }
 0xb30   :  { %29021 = vst [vmem:[#allocation25_spill] sm:$0xff] %v25195_v32  ;;  %29022 = vst [vmem:[#allocation78_spill] sm:$0xff] %v25197_v22 }
 0xb31   :  { %v19003_v21 = vpop.f32.mrf.mxu1 }
 0xb32   :  { %v25200_v14 = vadd.f32 %v19003_v21, %v29023_v61 }
 0xb33   :  { %v25202_v20 = vpop.f32.mrf.mxu1 }
 0xb34   :  { %29024 = vst [vmem:[#allocation37_spill] sm:$0xff] %v25200_v14  ;;  %29025 = vst [vmem:[#allocation79_spill] sm:$0xff] %v25202_v20 }
 0xb35   :  { %v19006_v47 = vpop.f32.mrf.mxu1 }
 0xb36   :  { %v25205_v11 = vadd.f32 %v19006_v47, %v29026_v16 }
 0xb37   :  { %v25207_v31 = vpop.f32.mrf.mxu1 }
 0xb38   :  { %29027 = vst [vmem:[#allocation3_spill] sm:$0xff] %v25205_v11  ;;  %29028 = vst [vmem:[#allocation80_spill] sm:$0xff] %v25207_v31 }
 0xb39   :  { %v19009_v1 = vpop.f32.mrf.mxu1 }
 0xb3a   :  { %v25210_v18 = vadd.f32 %v19009_v1, %v29029_v43 }
 0xb3b   :  { %v25212_v25 = vpop.f32.mrf.mxu1 }
 0xb3c   :  { %29030 = vst [vmem:[#allocation19_spill] sm:$0xff] %v25210_v18  ;;  %29031 = vst [vmem:[#allocation81_spill] sm:$0xff] %v25212_v25 }
 0xb3d   :  { %v19022_v30 = vpop.f32.mrf.mxu1 }
 0xb3f   :  { %v25214_v19 = vpop.f32.mrf.mxu1 }
 0xb41   :  { %v25216_v49 = vpop.f32.mrf.mxu1 }
 0xb43   :  { %v25218_v24 = vpop.f32.mrf.mxu1 }
 0xb45   :  { %v25220_v36 = vpop.f32.mrf.mxu1 }
 0xb47   :  { %v25222_v40 = vpop.f32.mrf.mxu1 }
 0xb49   :  { %v25224_v42 = vpop.f32.mrf.mxu1 }
 0xb4b   :  { %v25226_v9 = vpop.f32.mrf.mxu1 }
 0xb4d   :  { %v25228_v55 = vpop.f32.mrf.mxu1 }
 0xb4f   :  { %v25230_v34 = vpop.f32.mrf.mxu1 }
 0xb51   :  { %v25232_v56 = vpop.f32.mrf.mxu1 }
 0xb53   :  { %v25234_v29 = vpop.f32.mrf.mxu1 }
 0xb55   :  { %v25236_v59 = vpop.f32.mrf.mxu1 }
 0xb57   :  { %v25238_v37 = vpop.f32.mrf.mxu1 }
 0xb59   :  { %v25240_v6 = vpop.f32.mrf.mxu1 }
 0xb5b   :  { %v25242_v2 = vpop.f32.mrf.mxu1 }
 0xb5d   :  { %v19046_v10 = vpop.f32.mrf.mxu1 }
 0xb5e   :  { %v8743_v63 = vmax.f32 %v19022_v30, %v19046_v10 }
 0xb5f   :  { %v8503_v57 = vpop.f32.mrf.mxu1 }
 0xb60   :  { %v8742_v20 = vmax.f32 %v25214_v19, %v8503_v57 }
 0xb61   :  { %v19049_v41 = vpop.f32.mrf.mxu1 }
 0xb62   :  { %v8745_v58 = vmax.f32 %v25216_v49, %v19049_v41 }
 0xb63   :  { %v8513_v62 = vpop.f32.mrf.mxu1 }
 0xb64   :  { %v8744_v14 = vmax.f32 %v25218_v24, %v8513_v62 }
 0xb65   :  { %v19052_v15 = vpop.f32.mrf.mxu1 }
 0xb66   :  { %v8747_v23 = vmax.f32 %v25220_v36, %v19052_v15 }
 0xb67   :  { %v8523_v51 = vpop.f32.mrf.mxu1 }
 0xb69   :  { %v25246_v17 = vpop.f32.mrf.mxu1 }
 0xb6b   :  { %v25250_v4 = vpop.f32.mrf.mxu1 }
 0xb6d   :  { %v25252_v13 = vpop.f32.mrf.mxu1 }
 0xb6f   :  { %v25256_v50 = vpop.f32.mrf.mxu1 }
 0xb70   :  { %v8750_v62 = vmax.f32 %v25230_v34, %v25256_v50 }
 0xb71   :  { %v25258_v5 = vpop.f32.mrf.mxu1 }
 0xb73   :  { %v25262_v7 = vpop.f32.mrf.mxu1 }
 0xb75   :  { %v25264_v48 = vpop.f32.mrf.mxu1 }
 0xb77   :  { %v25268_v45 = vpop.f32.mrf.mxu1 }
 0xb79   :  { %v25270_v52 = vpop.f32.mrf.mxu1 }
 0xb7b   :  { %v25274_v38 = vpop.f32.mrf.mxu1 }
 0xb7d   :  { %v19070_v21 = vpop.f32.mrf.mxu1 }
 0xb7f   :  { %v8583_v61 = vpop.f32.mrf.mxu1 }
 0xb81   :  { %v19073_v47 = vpop.f32.mrf.mxu1 }
 0xb83   :  { %v8593_v16 = vpop.f32.mrf.mxu1 }
 0xb85   :  { %v19076_v1 = vpop.f32.mrf.mxu1 }
 0xb87   :  { %v8603_v43 = vpop.f32.mrf.mxu1 }
 0xb89   :  { %v19079_v30 = vpop.f32.mrf.mxu1 }
 0xb8b   :  { %v8613_v49 = vpop.f32.mrf.mxu1 }
 0xb8d   :  { %v25276_v36 = vpop.f32.mrf.mxu1 }
 0xb8f   :  { %v25278_v10 = vpop.f32.mrf.mxu1 }
 0xb91   :  { %v25280_v41 = vpop.f32.mrf.mxu1 }
 0xb93   :  { %v25282_v15 = vpop.f32.mrf.mxu1 }
 0xb95   :  { %v25284_v33 = vpop.f32.mrf.mxu1 }
 0xb97   :  { %v25286_v46 = vpop.f32.mrf.mxu1 }
 0xb99   :  { %v25288_v54 = vpop.f32.mrf.mxu1 }
 0xb9b   :  { %v25290_v60 = vpop.f32.mrf.mxu1 }
 0xb9c   :  { %29032 = vst [vmem:[#allocation82_spill] sm:$0xff] %v25290_v60 }
 0xb9d   :  { %v19094_v44 = vpop.f32.mrf.mxu1 }
 0xb9e   :  { %v8759_v25 = vmax.f32 %v19070_v21, %v19094_v44 }
 0xb9f   :  { %v8663_v31 = vpop.f32.mrf.mxu1 }
 0xba0   :  { %v8775_v22 = vmax.f32 %v8743_v63, %v8759_v25  ;;  %v8758_v0 = vmax.f32 %v8583_v61, %v8663_v31  ;;  %v25318_v63 = vld [vmem:[%s28651_s1 + $0x10] sm:$0xff] }
 0xba1   :  { %v19097_v8 = vpop.f32.mrf.mxu1 }
 0xba2   :  { %v8774_v3 = vmax.f32 %v8742_v20, %v8758_v0  ;;  %v8761_v35 = vmax.f32 %v19073_v47, %v19097_v8  ;;  %v8791_v18 = vadd.f32 %v24799_v26, %v8775_v22  ;;  %v8746_v0 = vmax.f32 %v25222_v40, %v8523_v51 }
 0xba3   :  { %v8673_v11 = vpop.f32.mrf.mxu1 }
 0xba4   :  { %v8777_v32 = vmax.f32 %v8745_v58, %v8761_v35  ;;  %v8760_v53 = vmax.f32 %v8593_v16, %v8673_v11  ;;  %v8790_v12 = vadd.f32 %v24799_v26, %v8774_v3  ;;  %v8807_v60 = vmax.f32 %v8791_v18, 0.0  ;;  %v25341_v16 = vld [vmem:[%s28651_s1] sm:$0xff] }
 0xba5   :  { %v19100_v27 = vpop.f32.mrf.mxu1  ;;  %v8748_v3 = vmax.f32 %v25226_v9, %v25250_v4  ;;  %v25329_v4 = vld [vmem:[%s28651_s1 + $0x8] sm:$0xff] }
 0xba6   :  { %v8776_v39 = vmax.f32 %v8744_v14, %v8760_v53  ;;  %v8763_v44 = vmax.f32 %v19076_v1, %v19100_v27  ;;  %v8806_v21 = vmax.f32 %v8790_v12, 0.0  ;;  %v8793_v25 = vadd.f32 %v24799_v26, %v8777_v32  ;;  %v25307_v14 = vld [vmem:[%s28651_s1 + $0x18] sm:$0xff] }
 0xba7   :  { %v8683_v31 = vpop.f32.mrf.mxu1 }
 0xba8   :  { %v8779_v8 = vmax.f32 %v8747_v23, %v8763_v44  ;;  %v8762_v20 = vmax.f32 %v8603_v43, %v8683_v31  ;;  %19148 = vmatprep.mubr.f32.mxu0 %v8806_v21  ;;  %v8792_v22 = vadd.f32 %v24799_v26, %v8776_v39  ;;  %v8809_v12 = vmax.f32 %v8793_v25, 0.0 }
 0xba9   :  { %v19103_v19 = vpop.f32.mrf.mxu1  ;;  %19149 = vmatmul.mubr.f32.vlgmr.msra.gmra.mxu0 %v8807_v60  ;;  %v29033_v39 = vmax.f32 %v25224_v42, %v25246_v17  ;;  %v29034_v60 = vmax.f32 %v25228_v55, %v25252_v13 }
 0xbaa   :  { %v8778_v35 = vmax.f32 %v8746_v0, %v8762_v20  ;;  %v8765_v11 = vmax.f32 %v19079_v30, %v19103_v19  ;;  %19173 = vmatpush3.msk.msra.mxu0 %vm289_vm0, %v25185_v28  ;;  %v8808_v27 = vmax.f32 %v8792_v22, 0.0  ;;  %v8795_v53 = vadd.f32 %v24799_v26, %v8779_v8 }
 0xbab   :  { %v8693_v32 = vpop.f32.mrf.mxu1  ;;  %19174 = vmatprep.subr.mxu0 %v25307_v14 }
 0xbac   :  { %v8781_v18 = vmax.f32 %v29033_v39, %v8765_v11  ;;  %v8764_v24 = vmax.f32 %v8613_v49, %v8693_v32  ;;  %19151 = vmatprep.mubr.f32.mxu0 %v8808_v27  ;;  %v8794_v40 = vadd.f32 %v24799_v26, %v8778_v35  ;;  %19175 = vmatpush3.msra.mxu0 %v25307_v14  ;;  %v8811_v23 = vmax.f32 %v8795_v53, 0.0 }
 0xbad   :  { %v19106_v9 = vpop.f32.mrf.mxu1  ;;  %19152 = vmatmul.mubr.f32.gmra.mxu0 %v8809_v12  ;;  %19176 = vmatprep.subr.mxu0 %v25318_v63 }
 0xbae   :  { %v8780_v57 = vmax.f32 %v8748_v3, %v8764_v24  ;;  %v8767_v58 = vmax.f32 %v25276_v36, %v19106_v9  ;;  %v8810_v42 = vmax.f32 %v8794_v40, 0.0  ;;  %19177 = vmatpush3.msra.mxu0 %v25318_v63  ;;  %v8797_v51 = vadd.f32 %v24799_v26, %v8781_v18  ;;  %v9002_v9 = vld [vmem:[%s28652_s0 + $0x1410] sm:$0xff] }
 0xbaf   :  { %v8703_v17 = vpop.f32.mrf.mxu1  ;;  %19178 = vmatprep.subr.mxu0 %v25329_v4  ;;  %v8752_v36 = vmax.f32 %v25234_v29, %v25262_v7  ;;  %v8754_v29 = vmax.f32 %v25238_v37, %v25268_v45  ;;  %v8756_v37 = vmax.f32 %v25242_v2, %v25274_v38  ;;  %v29038_v45 = vld [vmem:[#allocation82_spill] sm:$0xff] }
 0xbb0   :  { %v8783_v61 = vmax.f32 %v29034_v60, %v8767_v58  ;;  %v8766_v47 = vmax.f32 %v25278_v10, %v8703_v17  ;;  %19154 = vmatprep.mubr.f32.mxu0 %v8810_v42  ;;  %v8796_v34 = vadd.f32 %v24799_v26, %v8780_v57  ;;  %19179 = vmatpush3.msra.mxu0 %v25329_v4  ;;  %v8813_v43 = vmax.f32 %v8797_v51, 0.0  ;;  %v9004_v57 = vld [vmem:[%s28652_s0 + $0x1420] sm:$0xff]  ;;  %v9005_v58 = vld [vmem:[%s28652_s0 + $0x1428] sm:$0xff]  ;;  %v9006_v42 = vld [vmem:[%s28652_s0 + $0x1430] sm:$0xff] }
 0xbb1   :  { %v19109_v50 = vpop.f32.mrf.mxu1  ;;  %19155 = vmatmul.mubr.f32.gmra.mxu0 %v8811_v23  ;;  %19180 = vmatprep.subr.mxu0 %v25341_v16  ;;  %v29035_v10 = vmax.f32 %v25232_v56, %v25258_v5  ;;  %v29036_v56 = vmax.f32 %v25236_v59, %v25264_v48  ;;  %v29037_v59 = vmax.f32 %v25240_v6, %v25270_v52  ;;  %v9000_v6 = vld [vmem:[%s28652_s0 + $0x1400] sm:$0xff]  ;;  %v9001_v52 = vld [vmem:[%s28652_s0 + $0x1408] sm:$0xff]  ;;  %v9010_v17 = vld [vmem:[%s28652_s0 + $0x1450] sm:$0xff] }
 0xbb2   :  { %v8782_v1 = vmax.f32 %v8750_v62, %v8766_v47  ;;  %v8769_v55 = vmax.f32 %v25280_v41, %v19109_v50  ;;  %v8812_v13 = vmax.f32 %v8796_v34, 0.0  ;;  %19181 = vmatpush3.msra.mxu0 %v25341_v16  ;;  %v8799_v30 = vadd.f32 %v24799_v26, %v8783_v61  ;;  %v9007_v62 = vld [vmem:[%s28652_s0 + $0x1438] sm:$0xff]  ;;  %v9008_v23 = vld [vmem:[%s28652_s0 + $0x1440] sm:$0xff]  ;;  %v9009_v51 = vld [vmem:[%s28652_s0 + $0x1448] sm:$0xff] }
 0xbb3   :  { %v8713_v49 = vpop.f32.mrf.mxu1  ;;  %v9011_v60 = vld [vmem:[%s28652_s0 + $0x1458] sm:$0xff]  ;;  %v9012_v61 = vld [vmem:[%s28652_s0 + $0x1460] sm:$0xff]  ;;  %v9013_v47 = vld [vmem:[%s28652_s0 + $0x1468] sm:$0xff] }
 0xbb4   :  { %v8785_v44 = vmax.f32 %v29035_v10, %v8769_v55  ;;  %v8768_v21 = vmax.f32 %v25282_v15, %v8713_v49  ;;  %19157 = vmatprep.mubr.f32.mxu0 %v8812_v13  ;;  %v8798_v25 = vadd.f32 %v24799_v26, %v8782_v1  ;;  %v8815_v20 = vmax.f32 %v8799_v30, 0.0  ;;  %v9014_v34 = vld [vmem:[%s28652_s0 + $0x1470] sm:$0xff]  ;;  %v9015_v50 = vld [vmem:[%s28652_s0 + $0x1478] sm:$0xff]  ;;  %v9016_v1 = vld [vmem:[%s28652_s0 + $0x1480] sm:$0xff] }
 0xbb5   :  { %v19112_v41 = vpop.f32.mrf.mxu1  ;;  %19158 = vmatmul.mubr.f32.gmra.mxu0 %v8813_v43  ;;  %v9017_v55 = vld [vmem:[%s28652_s0 + $0x1488] sm:$0xff]  ;;  %v9018_v13 = vld [vmem:[%s28652_s0 + $0x1490] sm:$0xff]  ;;  %v9019_v43 = vld [vmem:[%s28652_s0 + $0x1498] sm:$0xff] }
 0xbb6   :  { %v8784_v31 = vmax.f32 %v8752_v36, %v8768_v21  ;;  %v8771_v0 = vmax.f32 %v25284_v33, %v19112_v41  ;;  %v8814_v8 = vmax.f32 %v8798_v25, 0.0  ;;  %v8801_v22 = vadd.f32 %v24799_v26, %v8785_v44  ;;  %v9020_v30 = vld [vmem:[%s28652_s0 + $0x14a0] sm:$0xff]  ;;  %v9021_v49 = vld [vmem:[%s28652_s0 + $0x14a8] sm:$0xff]  ;;  %v9022_v36 = vld [vmem:[%s28652_s0 + $0x14b0] sm:$0xff] }
 0xbb7   :  { %v8723_v19 = vpop.f32.mrf.mxu1  ;;  %v9023_v10 = vld [vmem:[%s28652_s0 + $0x14b8] sm:$0xff]  ;;  %v9024_v44 = vld [vmem:[%s28652_s0 + $0x14c0] sm:$0xff]  ;;  %v9025_v21 = vld [vmem:[%s28652_s0 + $0x14c8] sm:$0xff] }
 0xbb8   :  { %v8787_v5 = vmax.f32 %v29036_v56, %v8771_v0  ;;  %v8770_v7 = vmax.f32 %v25286_v46, %v8723_v19  ;;  %19160 = vmatprep.mubr.f32.mxu0 %v8814_v8  ;;  %v8800_v15 = vadd.f32 %v24799_v26, %v8784_v31  ;;  %v8817_v3 = vmax.f32 %v8801_v22, 0.0  ;;  %v15496_v25 = vld [vmem:[%s28653_s3 + $0x578] sm:$0xff]  ;;  %v9026_v41 = vld [vmem:[%s28652_s0 + $0x14d0] sm:$0xff]  ;;  %v9028_v0 = vld [vmem:[%s28652_s0 + $0x14e0] sm:$0xff] }
 0xbb9   :  { %v19115_v35 = vpop.f32.mrf.mxu1  ;;  %19161 = vmatmul.mubr.f32.gmra.mxu0 %v8815_v20  ;;  %19278 = vmatprep.subr.mxu1 %v15496_v25  ;;  %v9027_v31 = vld [vmem:[%s28652_s0 + $0x14d8] sm:$0xff]  ;;  %v9029_v8 = vld [vmem:[%s28652_s0 + $0x14e8] sm:$0xff]  ;;  %v15495_v20 = vld [vmem:[%s28653_s3 + $0x570] sm:$0xff] }
 0xbba   :  { %v8786_v33 = vmax.f32 %v8754_v29, %v8770_v7  ;;  %v8773_v11 = vmax.f32 %v25288_v54, %v19115_v35  ;;  %v8816_v27 = vmax.f32 %v8800_v15, 0.0  ;;  %v8803_v12 = vadd.f32 %v24799_v26, %v8787_v5  ;;  %19279 = vmatpush3.msra.mxu1 %v15496_v25  ;;  %v9030_v22 = vld [vmem:[%s28652_s0 + $0x14f0] sm:$0xff]  ;;  %v9031_v19 = vld [vmem:[%s28652_s0 + $0x14f8] sm:$0xff]  ;;  %v9032_v29 = vld [vmem:[%s28652_s0 + $0x1500] sm:$0xff] }
 0xbbb   :  { %v8733_v53 = vpop.f32.mrf.mxu1  ;;  %19280 = vmatprep.subr.mxu1 %v15495_v20  ;;  %v9033_v56 = vld [vmem:[%s28652_s0 + $0x1508] sm:$0xff]  ;;  %v9034_v7 = vld [vmem:[%s28652_s0 + $0x1510] sm:$0xff]  ;;  %v9035_v15 = vld [vmem:[%s28652_s0 + $0x1518] sm:$0xff] }
 0xbbc   :  { %v8789_v48 = vmax.f32 %v29037_v59, %v8773_v11  ;;  %v8772_v46 = vmax.f32 %v29038_v45, %v8733_v53  ;;  %19163 = vmatprep.mubr.f32.mxu0 %v8816_v27  ;;  %v8802_v32 = vadd.f32 %v24799_v26, %v8786_v33  ;;  %v8819_v18 = vmax.f32 %v8803_v12, 0.0  ;;  %19281 = vmatpush3.msra.mxu1 %v15495_v20  ;;  %v15494_v5 = vld [vmem:[%s28653_s3 + $0x568] sm:$0xff]  ;;  %v9036_v35 = vld [vmem:[%s28652_s0 + $0x1520] sm:$0xff]  ;;  %v9038_v27 = vld [vmem:[%s28652_s0 + $0x1530] sm:$0xff] }
 0xbbd   :  { %19164 = vmatmul.mubr.f32.gmra.mxu0 %v8817_v3  ;;  %19282 = vmatprep.subr.mxu1 %v15494_v5  ;;  %v15493_v33 = vld [vmem:[%s28653_s3 + $0x560] sm:$0xff]  ;;  %v9037_v11 = vld [vmem:[%s28652_s0 + $0x1528] sm:$0xff]  ;;  %v9039_v3 = vld [vmem:[%s28652_s0 + $0x1538] sm:$0xff] }
 0xbbe   :  { %v8788_v39 = vmax.f32 %v8756_v37, %v8772_v46  ;;  %v8818_v54 = vmax.f32 %v8802_v32, 0.0  ;;  %v8805_v24 = vadd.f32 %v24799_v26, %v8789_v48  ;;  %19283 = vmatpush3.msra.mxu1 %v15494_v5  ;;  %v9040_v12 = vld [vmem:[%s28652_s0 + $0x1540] sm:$0xff]  ;;  %v15492_v53 = vld [vmem:[%s28653_s3 + $0x558] sm:$0xff]  ;;  %v9041_v37 = vld [vmem:[%s28652_s0 + $0x1548] sm:$0xff] }
 0xbbf   :  { %19284 = vmatprep.subr.mxu1 %v15493_v33  ;;  %v9042_v59 = vld [vmem:[%s28652_s0 + $0x1550] sm:$0xff]  ;;  %v9043_v48 = vld [vmem:[%s28652_s0 + $0x1558] sm:$0xff]  ;;  %v9044_v45 = vld [vmem:[%s28652_s0 + $0x1560] sm:$0xff] }
 0xbc0   :  { %19166 = vmatprep.mubr.f32.mxu0 %v8818_v54  ;;  %v8804_v40 = vadd.f32 %v24799_v26, %v8788_v39  ;;  %v8821_v38 = vmax.f32 %v8805_v24, 0.0  ;;  %v9003_v26 = vld [vmem:[%s28652_s0 + $0x1418] sm:$0xff]  ;;  %19285 = vmatpush3.msra.mxu1 %v15493_v33  ;;  %v15491_v46 = vld [vmem:[%s28653_s3 + $0x550] sm:$0xff]  ;;  %v9045_v32 = vld [vmem:[%s28652_s0 + $0x1568] sm:$0xff] }
 0xbc1   :  { %19167 = vmatmul.mubr.f32.gmra.mxu0 %v8819_v18  ;;  %19286 = vmatprep.subr.mxu1 %v15492_v53  ;;  %v9046_v39 = vld [vmem:[%s28652_s0 + $0x1570] sm:$0xff]  ;;  %v9047_v54 = vld [vmem:[%s28652_s0 + $0x1578] sm:$0xff]  ;;  %v9048_v18 = vld [vmem:[%s28652_s0 + $0x1580] sm:$0xff] }
 0xbc2   :  { %v8820_v2 = vmax.f32 %v8804_v40, 0.0  ;;  %19287 = vmatpush3.msra.mxu1 %v15492_v53  ;;  %v15490_v24 = vld [vmem:[%s28653_s3 + $0x548] sm:$0xff]  ;;  %v15481_v20 = vld [vmem:[%s28653_s3 + $0x500] sm:$0xff] }
 0xbc3   :  { %19288 = vmatprep.subr.mxu1 %v15491_v46  ;;  %v9049_v40 = vld [vmem:[%s28652_s0 + $0x1588] sm:$0xff] }
 0xbc4   :  { %19169 = vmatprep.mubr.f32.mxu0 %v8820_v2  ;;  %19289 = vmatpush3.msra.mxu1 %v15491_v46  ;;  %v9050_v2 = vld [vmem:[%s28652_s0 + $0x1590] sm:$0xff]  ;;  %v29060_v46 = vld [vmem:[#allocation19_spill] sm:$0xff] }
 0xbc5   :  { %19170 = vmatmul.mubr.f32.gmra.mxu0 %v8821_v38  ;;  %19290 = vmatprep.subr.mxu1 %v15490_v24  ;;  %v9051_v38 = vld [vmem:[%s28652_s0 + $0x1598] sm:$0xff] }
 0xbc6   :  { %19182 = vmatprep.mubr.msk.f32.mxu0 %vm96_vm1, %v9000_v6  ;;  %19291 = vmatpush3.msra.mxu1 %v15490_v24  ;;  %v9052_v6 = vld [vmem:[%s28652_s0 + $0x15a0] sm:$0xff] }
 0xbc9   :  { %19183 = vmatmul.mubr.msk.f32.vlgmr.msra.gmra.mxu0 %vm96_vm1, %v9001_v52  ;;  %v9053_v52 = vld [vmem:[%s28652_s0 + $0x15a8] sm:$0xff] }
 0xbca   :  { %19185 = vmatprep.mubr.msk.f32.mxu0 %vm96_vm1, %v9002_v9  ;;  %v15489_v9 = vld [vmem:[%s28653_s3 + $0x540] sm:$0xff] }
 0xbcb   :  { %19292 = vmatprep.subr.mxu1 %v15489_v9 }
 0xbcc   :  { %19293 = vmatpush3.msra.mxu1 %v15489_v9 }
 0xbcd   :  { %19186 = vmatmul.mubr.msk.f32.gmra.mxu0 %vm96_vm1, %v9003_v26  ;;  %v9054_v26 = vld [vmem:[%s28652_s0 + $0x15b0] sm:$0xff] }
 0xbce   :  { %19188 = vmatprep.mubr.msk.f32.mxu0 %vm96_vm1, %v9004_v57  ;;  %v9055_v57 = vld [vmem:[%s28652_s0 + $0x15b8] sm:$0xff] }
 0xbd1   :  { %19189 = vmatmul.mubr.msk.f32.gmra.mxu0 %vm96_vm1, %v9005_v58  ;;  %v9056_v58 = vld [vmem:[%s28652_s0 + $0x15c0] sm:$0xff] }
 0xbd2   :  { %19191 = vmatprep.mubr.msk.f32.mxu0 %vm96_vm1, %v9006_v42  ;;  %v9057_v42 = vld [vmem:[%s28652_s0 + $0x15c8] sm:$0xff] }
 0xbd5   :  { %19192 = vmatmul.mubr.msk.f32.gmra.mxu0 %vm96_vm1, %v9007_v62  ;;  %v15488_v62 = vld [vmem:[%s28653_s3 + $0x538] sm:$0xff] }
 0xbd6   :  { %19194 = vmatprep.mubr.msk.f32.mxu0 %vm96_vm1, %v9008_v23  ;;  %v9058_v23 = vld [vmem:[%s28652_s0 + $0x15d0] sm:$0xff]  ;;  %19294 = vmatprep.subr.mxu1 %v15488_v62 }
 0xbd7   :  { %19295 = vmatpush3.msra.mxu1 %v15488_v62 }
 0xbd9   :  { %19195 = vmatmul.mubr.msk.f32.gmra.mxu0 %vm96_vm1, %v9009_v51  ;;  %v9059_v51 = vld [vmem:[%s28652_s0 + $0x15d8] sm:$0xff] }
 0xbda   :  { %19197 = vmatprep.mubr.msk.f32.mxu0 %vm96_vm1, %v9010_v17  ;;  %v9060_v17 = vld [vmem:[%s28652_s0 + $0x15e0] sm:$0xff] }
 0xbdd   :  { %19198 = vmatmul.mubr.msk.f32.gmra.mxu0 %vm96_vm1, %v9011_v60  ;;  %v9061_v60 = vld [vmem:[%s28652_s0 + $0x15e8] sm:$0xff] }
 0xbde   :  { %19200 = vmatprep.mubr.msk.f32.mxu0 %vm96_vm1, %v9012_v61  ;;  %v15487_v61 = vld [vmem:[%s28653_s3 + $0x530] sm:$0xff] }
 0xbdf   :  { %19296 = vmatprep.subr.mxu1 %v15487_v61 }
 0xbe0   :  { %19297 = vmatpush3.msra.mxu1 %v15487_v61 }
 0xbe1   :  { %19201 = vmatmul.mubr.msk.f32.gmra.mxu0 %vm96_vm1, %v9013_v47  ;;  %v9062_v47 = vld [vmem:[%s28652_s0 + $0x15f0] sm:$0xff] }
 0xbe2   :  { %19203 = vmatprep.mubr.msk.f32.mxu0 %vm96_vm1, %v9014_v34  ;;  %v9063_v34 = vld [vmem:[%s28652_s0 + $0x15f8] sm:$0xff] }
 0xbe5   :  { %19204 = vmatmul.mubr.msk.f32.gmra.mxu0 %vm96_vm1, %v9015_v50  ;;  %v15486_v50 = vld [vmem:[%s28653_s3 + $0x528] sm:$0xff] }
 0xbe6   :  { %19206 = vmatprep.mubr.msk.f32.mxu0 %vm96_vm1, %v9016_v1  ;;  %19298 = vmatprep.subr.mxu1 %v15486_v50  ;;  %v15485_v1 = vld [vmem:[%s28653_s3 + $0x520] sm:$0xff] }
 0xbe7   :  { %19299 = vmatpush3.msra.mxu1 %v15486_v50 }
 0xbe8   :  { %19300 = vmatprep.subr.mxu1 %v15485_v1 }
 0xbe9   :  { %19207 = vmatmul.mubr.msk.f32.gmra.mxu0 %vm96_vm1, %v9017_v55  ;;  %19301 = vmatpush3.msra.mxu1 %v15485_v1  ;;  %v15484_v55 = vld [vmem:[%s28653_s3 + $0x518] sm:$0xff] }
 0xbea   :  { %19209 = vmatprep.mubr.msk.f32.mxu0 %vm96_vm1, %v9018_v13  ;;  %19302 = vmatprep.subr.mxu1 %v15484_v55  ;;  %v15483_v13 = vld [vmem:[%s28653_s3 + $0x510] sm:$0xff] }
 0xbeb   :  { %19303 = vmatpush3.msra.mxu1 %v15484_v55 }
 0xbec   :  { %19304 = vmatprep.subr.mxu1 %v15483_v13 }
 0xbed   :  { %19210 = vmatmul.mubr.msk.f32.gmra.mxu0 %vm96_vm1, %v9019_v43  ;;  %19305 = vmatpush3.msra.mxu1 %v15483_v13  ;;  %v15482_v43 = vld [vmem:[%s28653_s3 + $0x508] sm:$0xff] }
 0xbee   :  { %19212 = vmatprep.mubr.msk.f32.mxu0 %vm96_vm1, %v9020_v30  ;;  %19306 = vmatprep.subr.mxu1 %v15482_v43 }
 0xbef   :  { %19307 = vmatpush3.msra.mxu1 %v15482_v43 }
 0xbf0   :  { %19308 = vmatprep.subr.mxu1 %v15481_v20 }
 0xbf1   :  { %19213 = vmatmul.mubr.msk.f32.gmra.mxu0 %vm96_vm1, %v9021_v49  ;;  %v29039_v49 = vld [vmem:[#allocation66_spill] sm:$0xff]  ;;  %19309 = vmatpush3.msra.mxu1 %v15481_v20 }
 0xbf2   :  { %19215 = vmatprep.mubr.msk.f32.mxu0 %vm96_vm1, %v9022_v36  ;;  %19334 = vmatprep.subr.msk.mxu1 %vm289_vm0, %v25185_v28 }
 0xbf5   :  { %19216 = vmatmul.mubr.msk.f32.gmra.mxu0 %vm96_vm1, %v9023_v10 }
 0xbf6   :  { %19218 = vmatprep.mubr.msk.f32.mxu0 %vm96_vm1, %v9024_v44 }
 0xbf9   :  { %19219 = vmatmul.mubr.msk.f32.gmra.mxu0 %vm96_vm1, %v9025_v21  ;;  %v29042_v21 = vld [vmem:[#allocation32_spill] sm:$0xff] }
 0xbfa   :  { %19221 = vmatprep.mubr.msk.f32.mxu0 %vm96_vm1, %v9026_v41 }
 0xbfd   :  { %19222 = vmatmul.mubr.msk.f32.gmra.mxu0 %vm96_vm1, %v9027_v31 }
 0xbfe   :  { %19224 = vmatprep.mubr.msk.f32.mxu0 %vm96_vm1, %v9028_v0  ;;  %v29045_v0 = vld [vmem:[#allocation34_spill] sm:$0xff] }
 0xc01   :  { %19225 = vmatmul.mubr.msk.f32.gmra.mxu0 %vm96_vm1, %v9029_v8 }
 0xc02   :  { %19227 = vmatprep.mubr.msk.f32.mxu0 %vm96_vm1, %v9030_v22 }
 0xc05   :  { %19228 = vmatmul.mubr.msk.f32.gmra.mxu0 %vm96_vm1, %v9031_v19 }
 0xc06   :  { %19230 = vmatprep.mubr.msk.f32.mxu0 %vm96_vm1, %v9032_v29  ;;  %v29048_v29 = vld [vmem:[#allocation36_spill] sm:$0xff] }
 0xc09   :  { %19231 = vmatmul.mubr.msk.f32.gmra.mxu0 %vm96_vm1, %v9033_v56 }
 0xc0a   :  { %19233 = vmatprep.mubr.msk.f32.mxu0 %vm96_vm1, %v9034_v7 }
 0xc0d   :  { %19234 = vmatmul.mubr.msk.f32.gmra.mxu0 %vm96_vm1, %v9035_v15  ;;  %v29051_v15 = vld [vmem:[#allocation25_spill] sm:$0xff] }
 0xc0e   :  { %19236 = vmatprep.mubr.msk.f32.mxu0 %vm96_vm1, %v9036_v35 }
 0xc11   :  { %19237 = vmatmul.mubr.msk.f32.gmra.mxu0 %vm96_vm1, %v9037_v11 }
 0xc12   :  { %19239 = vmatprep.mubr.msk.f32.mxu0 %vm96_vm1, %v9038_v27  ;;  %v29054_v27 = vld [vmem:[#allocation37_spill] sm:$0xff] }
 0xc15   :  { %19240 = vmatmul.mubr.msk.f32.gmra.mxu0 %vm96_vm1, %v9039_v3 }
 0xc16   :  { %19242 = vmatprep.mubr.msk.f32.mxu0 %vm96_vm1, %v9040_v12 }
 0xc19   :  { %19243 = vmatmul.mubr.msk.f32.gmra.mxu0 %vm96_vm1, %v9041_v37  ;;  %v29057_v37 = vld [vmem:[#allocation3_spill] sm:$0xff] }
 0xc1a   :  { %19245 = vmatprep.mubr.msk.f32.mxu0 %vm96_vm1, %v9042_v59 }
 0xc1d   :  { %19246 = vmatmul.mubr.msk.f32.gmra.mxu0 %vm96_vm1, %v9043_v48 }
 0xc1e   :  { %19248 = vmatprep.mubr.msk.f32.mxu0 %vm96_vm1, %v9044_v45 }
 0xc21   :  { %19249 = vmatmul.mubr.msk.f32.gmra.mxu0 %vm96_vm1, %v9045_v32 }
 0xc22   :  { %19251 = vmatprep.mubr.msk.f32.mxu0 %vm96_vm1, %v9046_v39 }
 0xc25   :  { %19252 = vmatmul.mubr.msk.f32.gmra.mxu0 %vm96_vm1, %v9047_v54 }
 0xc26   :  { %19254 = vmatprep.mubr.msk.f32.mxu0 %vm96_vm1, %v9048_v18 }
 0xc29   :  { %19255 = vmatmul.mubr.msk.f32.gmra.mxu0 %vm96_vm1, %v9049_v40 }
 0xc2a   :  { %19257 = vmatprep.mubr.msk.f32.mxu0 %vm96_vm1, %v9050_v2 }
 0xc2d   :  { %19258 = vmatmul.mubr.msk.f32.gmra.mxu0 %vm96_vm1, %v9051_v38 }
 0xc2e   :  { %19260 = vmatprep.mubr.msk.f32.mxu0 %vm96_vm1, %v9052_v6 }
 0xc31   :  { %19261 = vmatmul.mubr.msk.f32.gmra.mxu0 %vm96_vm1, %v9053_v52 }
 0xc32   :  { %19263 = vmatprep.mubr.msk.f32.mxu0 %vm96_vm1, %v9054_v26 }
 0xc35   :  { %19264 = vmatmul.mubr.msk.f32.gmra.mxu0 %vm96_vm1, %v9055_v57 }
 0xc36   :  { %19266 = vmatprep.mubr.msk.f32.mxu0 %vm96_vm1, %v9056_v58 }
 0xc39   :  { %19267 = vmatmul.mubr.msk.f32.gmra.mxu0 %vm96_vm1, %v9057_v42 }
 0xc3a   :  { %19269 = vmatprep.mubr.msk.f32.mxu0 %vm96_vm1, %v9058_v23 }
 0xc3d   :  { %19270 = vmatmul.mubr.msk.f32.gmra.mxu0 %vm96_vm1, %v9059_v51 }
 0xc3e   :  { %19272 = vmatprep.mubr.msk.f32.mxu0 %vm96_vm1, %v9060_v17 }
 0xc41   :  { %19273 = vmatmul.mubr.msk.f32.gmra.mxu0 %vm96_vm1, %v9061_v60 }
 0xc42   :  { %19275 = vmatprep.mubr.msk.f32.mxu0 %vm96_vm1, %v9062_v47 }
 0xc45   :  { %19276 = vmatmul.mubr.msk.f32.gmra.mxu0 %vm96_vm1, %v9063_v34 }
 0xc69   :  { %v19150_v30 = vpop.f32.mrf.mxu0 }
 0xc6a   :  { %v25676_v36 = vadd.f32 %v19150_v30, %v29039_v49 }
 0xc6b   :  { %v25678_v10 = vpop.f32.mrf.mxu0 }
 0xc6c   :  { %29040 = vst [vmem:[#allocation82_spill] sm:$0xff] %v25676_v36  ;;  %29041 = vst [vmem:[#allocation66_spill] sm:$0xff] %v25678_v10 }
 0xc6d   :  { %v19153_v44 = vpop.f32.mrf.mxu0 }
 0xc6e   :  { %v25681_v25 = vadd.f32 %v19153_v44, %v29042_v21 }
 0xc6f   :  { %v25683_v41 = vpop.f32.mrf.mxu0 }
 0xc70   :  { %29043 = vst [vmem:[#allocation32_spill] sm:$0xff] %v25681_v25  ;;  %29044 = vst [vmem:[#allocation83_spill] sm:$0xff] %v25683_v41 }
 0xc71   :  { %v19156_v31 = vpop.f32.mrf.mxu0 }
 0xc72   :  { %v25686_v8 = vadd.f32 %v19156_v31, %v29045_v0 }
 0xc73   :  { %v25691_v22 = vpop.f32.mrf.mxu0 }
 0xc74   :  { %29046 = vst [vmem:[#allocation34_spill] sm:$0xff] %v25686_v8  ;;  %29047 = vst [vmem:[#allocation84_spill] sm:$0xff] %v25691_v22 }
 0xc75   :  { %v19159_v19 = vpop.f32.mrf.mxu0 }
 0xc76   :  { %v25696_v56 = vadd.f32 %v19159_v19, %v29048_v29 }
 0xc77   :  { %v25698_v5 = vpop.f32.mrf.mxu0 }
 0xc78   :  { %29049 = vst [vmem:[#allocation36_spill] sm:$0xff] %v25696_v56  ;;  %29050 = vst [vmem:[#allocation85_spill] sm:$0xff] %v25698_v5 }
 0xc79   :  { %v19162_v7 = vpop.f32.mrf.mxu0 }
 0xc7a   :  { %v25701_v35 = vadd.f32 %v19162_v7, %v29051_v15 }
 0xc7b   :  { %v25703_v33 = vpop.f32.mrf.mxu0 }
 0xc7c   :  { %29052 = vst [vmem:[#allocation25_spill] sm:$0xff] %v25701_v35  ;;  %29053 = vst [vmem:[#allocation86_spill] sm:$0xff] %v25703_v33  ;;  %v25804_v35 = vld [vmem:[%s28654_s2] ss:$0 sm:$0xff] }
 0xc7d   :  { %v19165_v11 = vpop.f32.mrf.mxu0 }
 0xc7e   :  { %v25706_v3 = vadd.f32 %v19165_v11, %v29054_v27 }
 0xc7f   :  { %v25708_v12 = vpop.f32.mrf.mxu0 }
 0xc80   :  { %29055 = vst [vmem:[#allocation37_spill] sm:$0xff] %v25706_v3  ;;  %29056 = vst [vmem:[#allocation87_spill] sm:$0xff] %v25708_v12 }
 0xc81   :  { %v19168_v53 = vpop.f32.mrf.mxu0 }
 0xc82   :  { %v25711_v59 = vadd.f32 %v19168_v53, %v29057_v37 }
 0xc83   :  { %v25713_v48 = vpop.f32.mrf.mxu0 }
 0xc84   :  { %29058 = vst [vmem:[#allocation3_spill] sm:$0xff] %v25711_v59  ;;  %29059 = vst [vmem:[#allocation88_spill] sm:$0xff] %v25713_v48 }
 0xc85   :  { %v19171_v45 = vpop.f32.mrf.mxu0 }
 0xc86   :  { %v25716_v32 = vadd.f32 %v19171_v45, %v29060_v46 }
 0xc87   :  { %v25718_v39 = vpop.f32.mrf.mxu0 }
 0xc88   :  { %29061 = vst [vmem:[#allocation19_spill] sm:$0xff] %v25716_v32  ;;  %29062 = vst [vmem:[#allocation89_spill] sm:$0xff] %v25718_v39 }
 0xc89   :  { %v19184_v54 = vpop.f32.mrf.mxu0 }
 0xc8b   :  { %v25720_v18 = vpop.f32.mrf.mxu0 }
 0xc8d   :  { %v25722_v24 = vpop.f32.mrf.mxu0 }
 0xc8f   :  { %v25724_v40 = vpop.f32.mrf.mxu0 }
 0xc91   :  { %v25726_v2 = vpop.f32.mrf.mxu0 }
 0xc93   :  { %v25728_v38 = vpop.f32.mrf.mxu0 }
 0xc95   :  { %v25730_v6 = vpop.f32.mrf.mxu0 }
 0xc97   :  { %v25732_v52 = vpop.f32.mrf.mxu0 }
 0xc99   :  { %v25734_v9 = vpop.f32.mrf.mxu0 }
 0xc9b   :  { %v25736_v26 = vpop.f32.mrf.mxu0 }
 0xc9d   :  { %v25738_v57 = vpop.f32.mrf.mxu0 }
 0xc9f   :  { %v25740_v58 = vpop.f32.mrf.mxu0 }
 0xca1   :  { %v25742_v42 = vpop.f32.mrf.mxu0 }
 0xca3   :  { %v25744_v62 = vpop.f32.mrf.mxu0 }
 0xca5   :  { %v25746_v23 = vpop.f32.mrf.mxu0 }
 0xca7   :  { %v25748_v51 = vpop.f32.mrf.mxu0 }
 0xca9   :  { %v19208_v17 = vpop.f32.mrf.mxu0 }
 0xcaa   :  { %v9642_v60 = vmax.f32 %v19184_v54, %v19208_v17 }
 0xcab   :  { %v9402_v61 = vpop.f32.mrf.mxu0 }
 0xcac   :  { %v9641_v22 = vmax.f32 %v25720_v18, %v9402_v61 }
 0xcad   :  { %v19211_v47 = vpop.f32.mrf.mxu0 }
 0xcae   :  { %v9644_v34 = vmax.f32 %v25722_v24, %v19211_v47 }
 0xcaf   :  { %v9412_v50 = vpop.f32.mrf.mxu0 }
 0xcb0   :  { %v9643_v25 = vmax.f32 %v25724_v40, %v9412_v50 }
 0xcb1   :  { %v19214_v1 = vpop.f32.mrf.mxu0 }
 0xcb2   :  { %v9646_v55 = vmax.f32 %v25726_v2, %v19214_v1 }
 0xcb3   :  { %v25752_v13 = vpop.f32.mrf.mxu0 }
 0xcb4   :  { %v9645_v61 = vmax.f32 %v25728_v38, %v25752_v13 }
 0xcb5   :  { %v25754_v43 = vpop.f32.mrf.mxu0 }
 0xcb6   :  { %v29063_v50 = vmax.f32 %v25730_v6, %v25754_v43 }
 0xcb7   :  { %v25758_v49 = vpop.f32.mrf.mxu0 }
 0xcb9   :  { %v25760_v44 = vpop.f32.mrf.mxu0 }
 0xcbb   :  { %v25764_v31 = vpop.f32.mrf.mxu0 }
 0xcbc   :  { %v9649_v6 = vmax.f32 %v25736_v26, %v25764_v31 }
 0xcbd   :  { %v25766_v0 = vpop.f32.mrf.mxu0 }
 0xcbf   :  { %v25770_v19 = vpop.f32.mrf.mxu0 }
 0xcc1   :  { %v25772_v29 = vpop.f32.mrf.mxu0 }
 0xcc3   :  { %v25776_v15 = vpop.f32.mrf.mxu0 }
 0xcc5   :  { %v25778_v11 = vpop.f32.mrf.mxu0 }
 0xcc7   :  { %v25782_v53 = vpop.f32.mrf.mxu0 }
 0xcc9   :  { %v19232_v37 = vpop.f32.mrf.mxu0 }
 0xccb   :  { %v9482_v45 = vpop.f32.mrf.mxu0 }
 0xccd   :  { %v19235_v46 = vpop.f32.mrf.mxu0 }
 0xccf   :  { %v9492_v54 = vpop.f32.mrf.mxu0 }
 0xcd1   :  { %v19238_v24 = vpop.f32.mrf.mxu0 }
 0xcd3   :  { %v9502_v2 = vpop.f32.mrf.mxu0 }
 0xcd5   :  { %v19241_v17 = vpop.f32.mrf.mxu0 }
 0xcd7   :  { %v9512_v47 = vpop.f32.mrf.mxu0 }
 0xcd9   :  { %v25784_v1 = vpop.f32.mrf.mxu0 }
 0xcdb   :  { %v25786_v7 = vpop.f32.mrf.mxu0 }
 0xcdd   :  { %v25788_v20 = vpop.f32.mrf.mxu0 }
 0xcdf   :  { %v25790_v21 = vpop.f32.mrf.mxu0 }
 0xce1   :  { %v25792_v30 = vpop.f32.mrf.mxu0 }
 0xce3   :  { %v25794_v27 = vpop.f32.mrf.mxu0 }
 0xce5   :  { %v25796_v39 = vpop.f32.mrf.mxu0 }
 0xce7   :  { %v25798_v48 = vpop.f32.mrf.mxu0 }
 0xce9   :  { %v19256_v12 = vpop.f32.mrf.mxu0 }
 0xcea   :  { %v9658_v33 = vmax.f32 %v19232_v37, %v19256_v12 }
 0xceb   :  { %v9562_v5 = vpop.f32.mrf.mxu0 }
 0xcec   :  { %v9674_v41 = vmax.f32 %v9642_v60, %v9658_v33  ;;  %v9657_v10 = vmax.f32 %v9482_v45, %v9562_v5 }
 0xced   :  { %v19259_v32 = vpop.f32.mrf.mxu0 }
 0xcee   :  { %v9673_v59 = vmax.f32 %v9641_v22, %v9657_v10  ;;  %v9660_v3 = vmax.f32 %v19235_v46, %v19259_v32  ;;  %v9690_v56 = vadd.f32 %v25804_v35, %v9674_v41 }
 0xcef   :  { %v9572_v8 = vpop.f32.mrf.mxu0 }
 0xcf0   :  { %v9676_v36 = vmax.f32 %v9644_v34, %v9660_v3  ;;  %v9659_v12 = vmax.f32 %v9492_v54, %v9572_v8  ;;  %v9689_v37 = vadd.f32 %v25804_v35, %v9673_v59  ;;  %v9706_v10 = vmax.f32 %v9690_v56, 0.0 }
 0xcf1   :  { %v19262_v18 = vpop.f32.mrf.mxu0 }
 0xcf2   :  { %v9675_v33 = vmax.f32 %v9643_v25, %v9659_v12  ;;  %v9662_v5 = vmax.f32 %v19238_v24, %v19262_v18  ;;  %v9705_v60 = vmax.f32 %v9689_v37, 0.0  ;;  %v9692_v22 = vadd.f32 %v25804_v35, %v9676_v36 }
 0xcf3   :  { %v9582_v32 = vpop.f32.mrf.mxu0  ;;  %v9647_v36 = vmax.f32 %v25732_v52, %v25758_v49 }
 0xcf4   :  { %v9678_v45 = vmax.f32 %v9646_v55, %v9662_v5  ;;  %v9661_v41 = vmax.f32 %v9502_v2, %v9582_v32  ;;  %19310 = vmatprep.mubr.f32.mxu1 %v9705_v60  ;;  %v9691_v40 = vadd.f32 %v25804_v35, %v9675_v33  ;;  %v9708_v56 = vmax.f32 %v9692_v22, 0.0 }
 0xcf5   :  { %v19265_v3 = vpop.f32.mrf.mxu0  ;;  %19311 = vmatmul.mubr.f32.vlgmr.msra.gmra.mxu1 %v9706_v10 }
 0xcf6   :  { %v9677_v8 = vmax.f32 %v9645_v61, %v9661_v41  ;;  %v9664_v59 = vmax.f32 %v19241_v17, %v19265_v3  ;;  %19335 = vmatpush3.msk.msra.mxu1 %vm289_vm0, %v25185_v28  ;;  %v9707_v25 = vmax.f32 %v9691_v40, 0.0  ;;  %v9694_v34 = vadd.f32 %v25804_v35, %v9678_v45 }
 0xcf7   :  { %v9592_v38 = vpop.f32.mrf.mxu0  ;;  %19336 = vmatprep.subr.mxu1 %v25307_v14 }
 0xcf8   :  { %v9680_v55 = vmax.f32 %v29063_v50, %v9664_v59  ;;  %v9663_v13 = vmax.f32 %v9512_v47, %v9592_v38  ;;  %19313 = vmatprep.mubr.f32.mxu1 %v9707_v25  ;;  %v9693_v46 = vadd.f32 %v25804_v35, %v9677_v8  ;;  %19337 = vmatpush3.msra.mxu1 %v25307_v14  ;;  %v9710_v43 = vmax.f32 %v9694_v34, 0.0  ;;  %v9902_v38 = vld [vmem:[%s28652_s0 + $0x1618] sm:$0xff]  ;;  %v9903_v50 = vld [vmem:[%s28652_s0 + $0x1620] sm:$0xff] }
 0xcf9   :  { %v19268_v28 = vpop.f32.mrf.mxu0  ;;  %19314 = vmatmul.mubr.f32.gmra.mxu1 %v9708_v56  ;;  %19338 = vmatprep.subr.mxu1 %v25318_v63  ;;  %v29064_v14 = vmax.f32 %v25734_v9, %v25760_v44 }
 0xcfa   :  { %v9679_v52 = vmax.f32 %v9647_v36, %v9663_v13  ;;  %v9666_v49 = vmax.f32 %v25784_v1, %v19268_v28  ;;  %v9709_v54 = vmax.f32 %v9693_v46, 0.0  ;;  %19339 = vmatpush3.msra.mxu1 %v25318_v63  ;;  %v9696_v24 = vadd.f32 %v25804_v35, %v9680_v55  ;;  %v9904_v55 = vld [vmem:[%s28652_s0 + $0x1628] sm:$0xff]  ;;  %v9905_v13 = vld [vmem:[%s28652_s0 + $0x1630] sm:$0xff]  ;;  %v9906_v46 = vld [vmem:[%s28652_s0 + $0x1638] sm:$0xff] }
 0xcfb   :  { %v9602_v2 = vpop.f32.mrf.mxu0  ;;  %19340 = vmatprep.subr.mxu1 %v25329_v4  ;;  %v9907_v28 = vld [vmem:[%s28652_s0 + $0x1640] sm:$0xff] }
 0xcfc   :  { %v9682_v17 = vmax.f32 %v29064_v14, %v9666_v49  ;;  %v9665_v47 = vmax.f32 %v25786_v7, %v9602_v2  ;;  %19316 = vmatprep.mubr.f32.mxu1 %v9709_v54  ;;  %v9695_v1 = vadd.f32 %v25804_v35, %v9679_v52  ;;  %19341 = vmatpush3.msra.mxu1 %v25329_v4  ;;  %v9712_v37 = vmax.f32 %v9696_v24, 0.0  ;;  %v9908_v52 = vld [vmem:[%s28652_s0 + $0x1648] sm:$0xff]  ;;  %v9909_v49 = vld [vmem:[%s28652_s0 + $0x1650] sm:$0xff]  ;;  %v9910_v54 = vld [vmem:[%s28652_s0 + $0x1658] sm:$0xff] }
 0xcfd   :  { %v19271_v63 = vpop.f32.mrf.mxu0  ;;  %19317 = vmatmul.mubr.f32.gmra.mxu1 %v9710_v43  ;;  %19342 = vmatprep.subr.mxu1 %v25341_v16  ;;  %v9651_v7 = vmax.f32 %v25740_v58, %v25770_v19  ;;  %v29065_v4 = vmax.f32 %v25738_v57, %v25766_v0  ;;  %v9653_v58 = vmax.f32 %v25744_v62, %v25776_v15  ;;  %v9912_v43 = vld [vmem:[%s28652_s0 + $0x1668] sm:$0xff]  ;;  %v9913_v24 = vld [vmem:[%s28652_s0 + $0x1670] sm:$0xff]  ;;  %v9914_v2 = vld [vmem:[%s28652_s0 + $0x1678] sm:$0xff] }
 0xcfe   :  { %v9681_v26 = vmax.f32 %v9649_v6, %v9665_v47  ;;  %v9668_v31 = vmax.f32 %v25788_v20, %v19271_v63  ;;  %v9711_v12 = vmax.f32 %v9695_v1, 0.0  ;;  %19343 = vmatpush3.msra.mxu1 %v25341_v16  ;;  %v9698_v9 = vadd.f32 %v25804_v35, %v9682_v17  ;;  %v9911_v6 = vld [vmem:[%s28652_s0 + $0x1660] sm:$0xff]  ;;  %v9916_v17 = vld [vmem:[%s28652_s0 + $0x1688] sm:$0xff]  ;;  %v9917_v47 = vld [vmem:[%s28652_s0 + $0x1690] sm:$0xff] }
 0xcff   :  { %v9612_v44 = vpop.f32.mrf.mxu0  ;;  %v29066_v57 = vmax.f32 %v25742_v42, %v25772_v29  ;;  %v9655_v62 = vmax.f32 %v25748_v51, %v25782_v53  ;;  %v29067_v42 = vmax.f32 %v25746_v23, %v25778_v11  ;;  %v9899_v23 = vld [vmem:[%s28652_s0 + $0x1600] sm:$0xff]  ;;  %v9901_v11 = vld [vmem:[%s28652_s0 + $0x1610] sm:$0xff]  ;;  %v9918_v1 = vld [vmem:[%s28652_s0 + $0x1698] sm:$0xff] }
 0xd00   :  { %v9684_v18 = vmax.f32 %v29065_v4, %v9668_v31  ;;  %v9667_v33 = vmax.f32 %v25790_v21, %v9612_v44  ;;  %19319 = vmatprep.mubr.f32.mxu1 %v9711_v12  ;;  %v9697_v5 = vadd.f32 %v25804_v35, %v9681_v26  ;;  %v9714_v22 = vmax.f32 %v9698_v9, 0.0  ;;  %v9915_v14 = vld [vmem:[%s28652_s0 + $0x1680] sm:$0xff]  ;;  %v9920_v26 = vld [vmem:[%s28652_s0 + $0x16a8] sm:$0xff]  ;;  %v9921_v31 = vld [vmem:[%s28652_s0 + $0x16b0] sm:$0xff] }
 0xd01   :  { %v19274_v20 = vpop.f32.mrf.mxu0  ;;  %19320 = vmatmul.mubr.f32.gmra.mxu1 %v9712_v37  ;;  %v9919_v63 = vld [vmem:[%s28652_s0 + $0x16a0] sm:$0xff]  ;;  %v9922_v12 = vld [vmem:[%s28652_s0 + $0x16b8] sm:$0xff]  ;;  %v9924_v9 = vld [vmem:[%s28652_s0 + $0x16c8] sm:$0xff] }
 0xd02   :  { %v9683_v60 = vmax.f32 %v9651_v7, %v9667_v33  ;;  %v9670_v16 = vmax.f32 %v25792_v30, %v19274_v20  ;;  %v9713_v10 = vmax.f32 %v9697_v5, 0.0  ;;  %v9700_v32 = vadd.f32 %v25804_v35, %v9684_v18  ;;  %v9923_v37 = vld [vmem:[%s28652_s0 + $0x16c0] sm:$0xff]  ;;  %v15577_v44 = vld [vmem:[%s28653_s3 + $0x5f8] sm:$0xff]  ;;  %v9925_v7 = vld [vmem:[%s28652_s0 + $0x16d0] sm:$0xff] }
 0xd03   :  { %v9622_v61 = vpop.f32.mrf.mxu0  ;;  %19440 = vmatprep.subr.mxu0 %v15577_v44  ;;  %v9926_v4 = vld [vmem:[%s28652_s0 + $0x16d8] sm:$0xff]  ;;  %v9927_v18 = vld [vmem:[%s28652_s0 + $0x16e0] sm:$0xff]  ;;  %v9928_v33 = vld [vmem:[%s28652_s0 + $0x16e8] sm:$0xff] }
 0xd04   :  { %v9686_v21 = vmax.f32 %v29066_v57, %v9670_v16  ;;  %v9669_v0 = vmax.f32 %v25794_v27, %v9622_v61  ;;  %19322 = vmatprep.mubr.f32.mxu1 %v9713_v10  ;;  %v9699_v19 = vadd.f32 %v25804_v35, %v9683_v60  ;;  %v9716_v3 = vmax.f32 %v9700_v32, 0.0  ;;  %19441 = vmatpush3.msra.mxu0 %v15577_v44  ;;  %v15576_v5 = vld [vmem:[%s28653_s3 + $0x5f0] sm:$0xff]  ;;  %v9930_v60 = vld [vmem:[%s28652_s0 + $0x16f8] sm:$0xff]  ;;  %v9931_v16 = vld [vmem:[%s28652_s0 + $0x1700] sm:$0xff] }
 0xd05   :  { %v19277_v45 = vpop.f32.mrf.mxu0  ;;  %19323 = vmatmul.mubr.f32.gmra.mxu1 %v9714_v22  ;;  %v9929_v20 = vld [vmem:[%s28652_s0 + $0x16f0] sm:$0xff]  ;;  %19442 = vmatprep.subr.mxu0 %v15576_v5  ;;  %v9932_v10 = vld [vmem:[%s28652_s0 + $0x1708] sm:$0xff]  ;;  %v9934_v61 = vld [vmem:[%s28652_s0 + $0x1718] sm:$0xff] }
 0xd06   :  { %v9685_v30 = vmax.f32 %v9653_v58, %v9669_v0  ;;  %v9672_v41 = vmax.f32 %v25796_v39, %v19277_v45  ;;  %v9715_v40 = vmax.f32 %v9699_v19, 0.0  ;;  %v9702_v8 = vadd.f32 %v25804_v35, %v9686_v21  ;;  %19443 = vmatpush3.msra.mxu0 %v15576_v5  ;;  %v15575_v22 = vld [vmem:[%s28653_s3 + $0x5e8] sm:$0xff]  ;;  %v9933_v32 = vld [vmem:[%s28652_s0 + $0x1710] sm:$0xff]  ;;  %v9935_v58 = vld [vmem:[%s28652_s0 + $0x1720] sm:$0xff] }
 0xd07   :  { %v9632_v59 = vpop.f32.mrf.mxu0  ;;  %19444 = vmatprep.subr.mxu0 %v15575_v22  ;;  %v15574_v57 = vld [vmem:[%s28653_s3 + $0x5e0] sm:$0xff]  ;;  %v9936_v21 = vld [vmem:[%s28652_s0 + $0x1728] sm:$0xff]  ;;  %v9937_v0 = vld [vmem:[%s28652_s0 + $0x1730] sm:$0xff] }
 0xd08   :  { %v9688_v29 = vmax.f32 %v29067_v42, %v9672_v41  ;;  %v9671_v15 = vmax.f32 %v25798_v48, %v9632_v59  ;;  %19325 = vmatprep.mubr.f32.mxu1 %v9715_v40  ;;  %v9701_v27 = vadd.f32 %v25804_v35, %v9685_v30  ;;  %v9718_v36 = vmax.f32 %v9702_v8, 0.0  ;;  %v9900_v48 = vld [vmem:[%s28652_s0 + $0x1608] sm:$0xff]  ;;  %19445 = vmatpush3.msra.mxu0 %v15575_v22  ;;  %v9938_v19 = vld [vmem:[%s28652_s0 + $0x1738] sm:$0xff]  ;;  %v9939_v45 = vld [vmem:[%s28652_s0 + $0x1740] sm:$0xff] }
 0xd09   :  { %19326 = vmatmul.mubr.f32.gmra.mxu1 %v9716_v3  ;;  %19446 = vmatprep.subr.mxu0 %v15574_v57  ;;  %v15573_v30 = vld [vmem:[%s28653_s3 + $0x5d8] sm:$0xff]  ;;  %v9940_v41 = vld [vmem:[%s28652_s0 + $0x1748] sm:$0xff]  ;;  %v9941_v40 = vld [vmem:[%s28652_s0 + $0x1750] sm:$0xff] }
 0xd0a   :  { %v9687_v25 = vmax.f32 %v9655_v62, %v9671_v15  ;;  %v9717_v39 = vmax.f32 %v9701_v27, 0.0  ;;  %v9704_v56 = vadd.f32 %v25804_v35, %v9688_v29  ;;  %19447 = vmatpush3.msra.mxu0 %v15574_v57  ;;  %v9942_v3 = vld [vmem:[%s28652_s0 + $0x1758] sm:$0xff]  ;;  %v9943_v8 = vld [vmem:[%s28652_s0 + $0x1760] sm:$0xff]  ;;  %v15572_v59 = vld [vmem:[%s28653_s3 + $0x5d0] sm:$0xff] }
 0xd0b   :  { %19448 = vmatprep.subr.mxu0 %v15573_v30  ;;  %v9944_v62 = vld [vmem:[%s28652_s0 + $0x1768] sm:$0xff]  ;;  %v9945_v42 = vld [vmem:[%s28652_s0 + $0x1770] sm:$0xff]  ;;  %v9946_v29 = vld [vmem:[%s28652_s0 + $0x1778] sm:$0xff] }
 0xd0c   :  { %19328 = vmatprep.mubr.f32.mxu1 %v9717_v39  ;;  %v9703_v34 = vadd.f32 %v25804_v35, %v9687_v25  ;;  %v9720_v53 = vmax.f32 %v9704_v56, 0.0  ;;  %19449 = vmatpush3.msra.mxu0 %v15573_v30  ;;  %v9947_v15 = vld [vmem:[%s28652_s0 + $0x1780] sm:$0xff]  ;;  %v15571_v27 = vld [vmem:[%s28653_s3 + $0x5c8] sm:$0xff]  ;;  %v9949_v39 = vld [vmem:[%s28652_s0 + $0x1790] sm:$0xff] }
 0xd0d   :  { %19329 = vmatmul.mubr.f32.gmra.mxu1 %v9718_v36  ;;  %19450 = vmatprep.subr.mxu0 %v15572_v59  ;;  %v9948_v25 = vld [vmem:[%s28652_s0 + $0x1788] sm:$0xff]  ;;  %v9950_v36 = vld [vmem:[%s28652_s0 + $0x1798] sm:$0xff]  ;;  %v9951_v56 = vld [vmem:[%s28652_s0 + $0x17a0] sm:$0xff] }
 0xd0e   :  { %v9719_v51 = vmax.f32 %v9703_v34, 0.0  ;;  %19451 = vmatpush3.msra.mxu0 %v15572_v59  ;;  %v9952_v34 = vld [vmem:[%s28652_s0 + $0x17a8] sm:$0xff]  ;;  %v29077_v5 = vld [vmem:[#allocation36_spill] sm:$0xff] }
 0xd0f   :  { %19452 = vmatprep.subr.mxu0 %v15571_v27 }
 0xd10   :  { %19331 = vmatprep.mubr.f32.mxu1 %v9719_v51  ;;  %19453 = vmatpush3.msra.mxu0 %v15571_v27  ;;  %v15570_v51 = vld [vmem:[%s28653_s3 + $0x5c0] sm:$0xff] }
 0xd11   :  { %19332 = vmatmul.mubr.f32.gmra.mxu1 %v9720_v53  ;;  %v9953_v53 = vld [vmem:[%s28652_s0 + $0x17b0] sm:$0xff]  ;;  %19454 = vmatprep.subr.mxu0 %v15570_v51 }
 0xd12   :  { %19344 = vmatprep.mubr.msk.f32.mxu1 %vm96_vm1, %v9899_v23  ;;  %19455 = vmatpush3.msra.mxu0 %v15570_v51  ;;  %v9954_v23 = vld [vmem:[%s28652_s0 + $0x17b8] sm:$0xff] }
 0xd15   :  { %19345 = vmatmul.mubr.msk.f32.vlgmr.msra.gmra.mxu1 %vm96_vm1, %v9900_v48  ;;  %v9955_v48 = vld [vmem:[%s28652_s0 + $0x17c0] sm:$0xff] }
 0xd16   :  { %19347 = vmatprep.mubr.msk.f32.mxu1 %vm96_vm1, %v9901_v11  ;;  %v9956_v11 = vld [vmem:[%s28652_s0 + $0x17c8] sm:$0xff] }
 0xd19   :  { %19348 = vmatmul.mubr.msk.f32.gmra.mxu1 %vm96_vm1, %v9902_v38  ;;  %v15569_v38 = vld [vmem:[%s28653_s3 + $0x5b8] sm:$0xff] }
 0xd1a   :  { %19350 = vmatprep.mubr.msk.f32.mxu1 %vm96_vm1, %v9903_v50  ;;  %v9957_v50 = vld [vmem:[%s28652_s0 + $0x17d0] sm:$0xff]  ;;  %19456 = vmatprep.subr.mxu0 %v15569_v38 }
 0xd1b   :  { %19457 = vmatpush3.msra.mxu0 %v15569_v38 }
 0xd1d   :  { %19351 = vmatmul.mubr.msk.f32.gmra.mxu1 %vm96_vm1, %v9904_v55  ;;  %v9958_v55 = vld [vmem:[%s28652_s0 + $0x17d8] sm:$0xff] }
 0xd1e   :  { %19353 = vmatprep.mubr.msk.f32.mxu1 %vm96_vm1, %v9905_v13  ;;  %v9959_v13 = vld [vmem:[%s28652_s0 + $0x17e0] sm:$0xff] }
 0xd21   :  { %19354 = vmatmul.mubr.msk.f32.gmra.mxu1 %vm96_vm1, %v9906_v46  ;;  %v9960_v46 = vld [vmem:[%s28652_s0 + $0x17e8] sm:$0xff] }
 0xd22   :  { %19356 = vmatprep.mubr.msk.f32.mxu1 %vm96_vm1, %v9907_v28  ;;  %v15568_v28 = vld [vmem:[%s28653_s3 + $0x5b0] sm:$0xff] }
 0xd23   :  { %19458 = vmatprep.subr.mxu0 %v15568_v28 }
 0xd24   :  { %19459 = vmatpush3.msra.mxu0 %v15568_v28 }
 0xd25   :  { %19357 = vmatmul.mubr.msk.f32.gmra.mxu1 %vm96_vm1, %v9908_v52  ;;  %v9961_v52 = vld [vmem:[%s28652_s0 + $0x17f0] sm:$0xff] }
 0xd26   :  { %19359 = vmatprep.mubr.msk.f32.mxu1 %vm96_vm1, %v9909_v49  ;;  %v9962_v49 = vld [vmem:[%s28652_s0 + $0x17f8] sm:$0xff] }
 0xd29   :  { %19360 = vmatmul.mubr.msk.f32.gmra.mxu1 %vm96_vm1, %v9910_v54  ;;  %v15567_v54 = vld [vmem:[%s28653_s3 + $0x5a8] sm:$0xff] }
 0xd2a   :  { %19362 = vmatprep.mubr.msk.f32.mxu1 %vm96_vm1, %v9911_v6  ;;  %19460 = vmatprep.subr.mxu0 %v15567_v54  ;;  %v15566_v6 = vld [vmem:[%s28653_s3 + $0x5a0] sm:$0xff] }
 0xd2b   :  { %19461 = vmatpush3.msra.mxu0 %v15567_v54 }
 0xd2c   :  { %19462 = vmatprep.subr.mxu0 %v15566_v6 }
 0xd2d   :  { %19363 = vmatmul.mubr.msk.f32.gmra.mxu1 %vm96_vm1, %v9912_v43  ;;  %19463 = vmatpush3.msra.mxu0 %v15566_v6  ;;  %v15565_v43 = vld [vmem:[%s28653_s3 + $0x598] sm:$0xff] }
 0xd2e   :  { %19365 = vmatprep.mubr.msk.f32.mxu1 %vm96_vm1, %v9913_v24  ;;  %19464 = vmatprep.subr.mxu0 %v15565_v43  ;;  %v15564_v24 = vld [vmem:[%s28653_s3 + $0x590] sm:$0xff] }
 0xd2f   :  { %19465 = vmatpush3.msra.mxu0 %v15565_v43 }
 0xd30   :  { %19466 = vmatprep.subr.mxu0 %v15564_v24 }
 0xd31   :  { %19366 = vmatmul.mubr.msk.f32.gmra.mxu1 %vm96_vm1, %v9914_v2  ;;  %19467 = vmatpush3.msra.mxu0 %v15564_v24  ;;  %v15563_v2 = vld [vmem:[%s28653_s3 + $0x588] sm:$0xff] }
 0xd32   :  { %19368 = vmatprep.mubr.msk.f32.mxu1 %vm96_vm1, %v9915_v14  ;;  %19468 = vmatprep.subr.mxu0 %v15563_v2 }
 0xd33   :  { %19469 = vmatpush3.msra.mxu0 %v15563_v2 }
 0xd35   :  { %19369 = vmatmul.mubr.msk.f32.gmra.mxu1 %vm96_vm1, %v9916_v17  ;;  %v29068_v17 = vld [vmem:[#allocation82_spill] sm:$0xff] }
 0xd36   :  { %19371 = vmatprep.mubr.msk.f32.mxu1 %vm96_vm1, %v9917_v47 }
 0xd39   :  { %19372 = vmatmul.mubr.msk.f32.gmra.mxu1 %vm96_vm1, %v9918_v1 }
 0xd3a   :  { %19374 = vmatprep.mubr.msk.f32.mxu1 %vm96_vm1, %v9919_v63 }
 0xd3d   :  { %19375 = vmatmul.mubr.msk.f32.gmra.mxu1 %vm96_vm1, %v9920_v26  ;;  %v29071_v26 = vld [vmem:[#allocation32_spill] sm:$0xff] }
 0xd3e   :  { %19377 = vmatprep.mubr.msk.f32.mxu1 %vm96_vm1, %v9921_v31 }
 0xd41   :  { %19378 = vmatmul.mubr.msk.f32.gmra.mxu1 %vm96_vm1, %v9922_v12 }
 0xd42   :  { %19380 = vmatprep.mubr.msk.f32.mxu1 %vm96_vm1, %v9923_v37 }
 0xd45   :  { %19381 = vmatmul.mubr.msk.f32.gmra.mxu1 %vm96_vm1, %v9924_v9  ;;  %v29074_v9 = vld [vmem:[#allocation34_spill] sm:$0xff] }
 0xd46   :  { %19383 = vmatprep.mubr.msk.f32.mxu1 %vm96_vm1, %v9925_v7  ;;  %v15562_v7 = vld [vmem:[%s28653_s3 + $0x580] sm:$0xff] }
 0xd47   :  { %19470 = vmatprep.subr.mxu0 %v15562_v7 }
 0xd48   :  { %19471 = vmatpush3.msra.mxu0 %v15562_v7 }
 0xd49   :  { %19384 = vmatmul.mubr.msk.f32.gmra.mxu1 %vm96_vm1, %v9926_v4 }
 0xd4a   :  { %19386 = vmatprep.mubr.msk.f32.mxu1 %vm96_vm1, %v9927_v18 }
 0xd4d   :  { %19387 = vmatmul.mubr.msk.f32.gmra.mxu1 %vm96_vm1, %v9928_v33  ;;  %v26190_v33 = vld [vmem:[%s28651_s1 + $0x20] sm:$0xf] }
 0xd4e   :  { %19389 = vmatprep.mubr.msk.f32.mxu1 %vm96_vm1, %v9929_v20  ;;  %19496 = vmatprep.subr.msk.mxu0 %vm289_vm0, %v26190_v33 }
 0xd51   :  { %19390 = vmatmul.mubr.msk.f32.gmra.mxu1 %vm96_vm1, %v9930_v60 }
 0xd52   :  { %19392 = vmatprep.mubr.msk.f32.mxu1 %vm96_vm1, %v9931_v16 }
 0xd55   :  { %19393 = vmatmul.mubr.msk.f32.gmra.mxu1 %vm96_vm1, %v9932_v10  ;;  %v29080_v10 = vld [vmem:[#allocation25_spill] sm:$0xff] }
 0xd56   :  { %19395 = vmatprep.mubr.msk.f32.mxu1 %vm96_vm1, %v9933_v32 }
 0xd59   :  { %19396 = vmatmul.mubr.msk.f32.gmra.mxu1 %vm96_vm1, %v9934_v61 }
 0xd5a   :  { %19398 = vmatprep.mubr.msk.f32.mxu1 %vm96_vm1, %v9935_v58  ;;  %v29083_v58 = vld [vmem:[#allocation37_spill] sm:$0xff] }
 0xd5d   :  { %19399 = vmatmul.mubr.msk.f32.gmra.mxu1 %vm96_vm1, %v9936_v21 }
 0xd5e   :  { %19401 = vmatprep.mubr.msk.f32.mxu1 %vm96_vm1, %v9937_v0 }
 0xd61   :  { %19402 = vmatmul.mubr.msk.f32.gmra.mxu1 %vm96_vm1, %v9938_v19  ;;  %v29086_v19 = vld [vmem:[#allocation3_spill] sm:$0xff] }
 0xd62   :  { %19404 = vmatprep.mubr.msk.f32.mxu1 %vm96_vm1, %v9939_v45 }
 0xd65   :  { %19405 = vmatmul.mubr.msk.f32.gmra.mxu1 %vm96_vm1, %v9940_v41 }
 0xd66   :  { %19407 = vmatprep.mubr.msk.f32.mxu1 %vm96_vm1, %v9941_v40  ;;  %v29089_v40 = vld [vmem:[#allocation19_spill] sm:$0xff] }
 0xd69   :  { %19408 = vmatmul.mubr.msk.f32.gmra.mxu1 %vm96_vm1, %v9942_v3 }
 0xd6a   :  { %19410 = vmatprep.mubr.msk.f32.mxu1 %vm96_vm1, %v9943_v8 }
 0xd6d   :  { %19411 = vmatmul.mubr.msk.f32.gmra.mxu1 %vm96_vm1, %v9944_v62 }
 0xd6e   :  { %19413 = vmatprep.mubr.msk.f32.mxu1 %vm96_vm1, %v9945_v42 }
 0xd71   :  { %19414 = vmatmul.mubr.msk.f32.gmra.mxu1 %vm96_vm1, %v9946_v29 }
 0xd72   :  { %19416 = vmatprep.mubr.msk.f32.mxu1 %vm96_vm1, %v9947_v15 }
 0xd75   :  { %19417 = vmatmul.mubr.msk.f32.gmra.mxu1 %vm96_vm1, %v9948_v25 }
 0xd76   :  { %19419 = vmatprep.mubr.msk.f32.mxu1 %vm96_vm1, %v9949_v39 }
 0xd79   :  { %19420 = vmatmul.mubr.msk.f32.gmra.mxu1 %vm96_vm1, %v9950_v36 }
 0xd7a   :  { %19422 = vmatprep.mubr.msk.f32.mxu1 %vm96_vm1, %v9951_v56 }
 0xd7d   :  { %19423 = vmatmul.mubr.msk.f32.gmra.mxu1 %vm96_vm1, %v9952_v34 }
 0xd7e   :  { %19425 = vmatprep.mubr.msk.f32.mxu1 %vm96_vm1, %v9953_v53 }
 0xd81   :  { %19426 = vmatmul.mubr.msk.f32.gmra.mxu1 %vm96_vm1, %v9954_v23 }
 0xd82   :  { %19428 = vmatprep.mubr.msk.f32.mxu1 %vm96_vm1, %v9955_v48 }
 0xd85   :  { %19429 = vmatmul.mubr.msk.f32.gmra.mxu1 %vm96_vm1, %v9956_v11 }
 0xd86   :  { %19431 = vmatprep.mubr.msk.f32.mxu1 %vm96_vm1, %v9957_v50 }
 0xd89   :  { %19432 = vmatmul.mubr.msk.f32.gmra.mxu1 %vm96_vm1, %v9958_v55 }
 0xd8a   :  { %19434 = vmatprep.mubr.msk.f32.mxu1 %vm96_vm1, %v9959_v13 }
 0xd8d   :  { %19435 = vmatmul.mubr.msk.f32.gmra.mxu1 %vm96_vm1, %v9960_v46 }
 0xd8e   :  { %19437 = vmatprep.mubr.msk.f32.mxu1 %vm96_vm1, %v9961_v52 }
 0xd91   :  { %19438 = vmatmul.mubr.msk.f32.gmra.mxu1 %vm96_vm1, %v9962_v49 }
 0xdb5   :  { %v19312_v14 = vpop.f32.mrf.mxu1 }
 0xdb6   :  { %v26170_v47 = vadd.f32 %v19312_v14, %v29068_v17 }
 0xdb7   :  { %v26172_v1 = vpop.f32.mrf.mxu1 }
 0xdb8   :  { %29069 = vst [vmem:[#allocation82_spill] sm:$0xff] %v26170_v47  ;;  %29070 = vst [vmem:[#allocation90_spill] sm:$0xff] %v26172_v1 }
 0xdb9   :  { %v19315_v63 = vpop.f32.mrf.mxu1 }
 0xdba   :  { %v26175_v31 = vadd.f32 %v19315_v63, %v29071_v26 }
 0xdbb   :  { %v26177_v12 = vpop.f32.mrf.mxu1 }
 0xdbc   :  { %29072 = vst [vmem:[#allocation32_spill] sm:$0xff] %v26175_v31  ;;  %29073 = vst [vmem:[#allocation91_spill] sm:$0xff] %v26177_v12 }
 0xdbd   :  { %v19318_v37 = vpop.f32.mrf.mxu1 }
 0xdbe   :  { %v26180_v44 = vadd.f32 %v19318_v37, %v29074_v9 }
 0xdbf   :  { %v26185_v4 = vpop.f32.mrf.mxu1 }
 0xdc0   :  { %29075 = vst [vmem:[#allocation34_spill] sm:$0xff] %v26180_v44  ;;  %29076 = vst [vmem:[#allocation92_spill] sm:$0xff] %v26185_v4 }
 0xdc1   :  { %v19321_v18 = vpop.f32.mrf.mxu1 }
 0xdc2   :  { %v26195_v20 = vadd.f32 %v19321_v18, %v29077_v5 }
 0xdc3   :  { %v26197_v60 = vpop.f32.mrf.mxu1 }
 0xdc4   :  { %29078 = vst [vmem:[#allocation36_spill] sm:$0xff] %v26195_v20  ;;  %29079 = vst [vmem:[#allocation93_spill] sm:$0xff] %v26197_v60 }
 0xdc5   :  { %v19324_v16 = vpop.f32.mrf.mxu1 }
 0xdc6   :  { %v26200_v22 = vadd.f32 %v19324_v16, %v29080_v10 }
 0xdc7   :  { %v26202_v32 = vpop.f32.mrf.mxu1 }
 0xdc8   :  { %29081 = vst [vmem:[#allocation25_spill] sm:$0xff] %v26200_v22  ;;  %29082 = vst [vmem:[#allocation94_spill] sm:$0xff] %v26202_v32 }
 0xdc9   :  { %v19327_v61 = vpop.f32.mrf.mxu1 }
 0xdca   :  { %v26205_v57 = vadd.f32 %v19327_v61, %v29083_v58 }
 0xdcb   :  { %v26207_v21 = vpop.f32.mrf.mxu1 }
 0xdcc   :  { %29084 = vst [vmem:[#allocation37_spill] sm:$0xff] %v26205_v57  ;;  %29085 = vst [vmem:[#allocation95_spill] sm:$0xff] %v26207_v21 }
 0xdcd   :  { %v19330_v0 = vpop.f32.mrf.mxu1 }
 0xdce   :  { %v26210_v45 = vadd.f32 %v19330_v0, %v29086_v19 }
 0xdcf   :  { %v26212_v30 = vpop.f32.mrf.mxu1 }
 0xdd0   :  { %29087 = vst [vmem:[#allocation3_spill] sm:$0xff] %v26210_v45  ;;  %29088 = vst [vmem:[#allocation96_spill] sm:$0xff] %v26212_v30 }
 0xdd1   :  { %v19333_v41 = vpop.f32.mrf.mxu1 }
 0xdd2   :  { %v26215_v3 = vadd.f32 %v19333_v41, %v29089_v40 }
 0xdd3   :  { %v26217_v8 = vpop.f32.mrf.mxu1 }
 0xdd4   :  { %29090 = vst [vmem:[#allocation19_spill] sm:$0xff] %v26215_v3  ;;  %29091 = vst [vmem:[#allocation97_spill] sm:$0xff] %v26217_v8 }
 0xdd5   :  { %v19346_v59 = vpop.f32.mrf.mxu1 }
 0xdd7   :  { %v26219_v62 = vpop.f32.mrf.mxu1 }
 0xdd9   :  { %v26221_v42 = vpop.f32.mrf.mxu1 }
 0xddb   :  { %v26223_v29 = vpop.f32.mrf.mxu1 }
 0xddd   :  { %v26225_v15 = vpop.f32.mrf.mxu1 }
 0xddf   :  { %v26227_v27 = vpop.f32.mrf.mxu1 }
 0xde1   :  { %v26229_v25 = vpop.f32.mrf.mxu1 }
 0xde3   :  { %v26231_v39 = vpop.f32.mrf.mxu1 }
 0xde5   :  { %v26233_v36 = vpop.f32.mrf.mxu1 }
 0xde7   :  { %v26235_v56 = vpop.f32.mrf.mxu1 }
 0xde9   :  { %v26237_v34 = vpop.f32.mrf.mxu1 }
 0xdeb   :  { %v26239_v51 = vpop.f32.mrf.mxu1 }
 0xded   :  { %v26241_v53 = vpop.f32.mrf.mxu1 }
 0xdef   :  { %v26243_v23 = vpop.f32.mrf.mxu1 }
 0xdf1   :  { %v26245_v48 = vpop.f32.mrf.mxu1 }
 0xdf3   :  { %v26247_v11 = vpop.f32.mrf.mxu1 }
 0xdf5   :  { %v19370_v38 = vpop.f32.mrf.mxu1 }
 0xdf6   :  { %v10541_v50 = vmax.f32 %v19346_v59, %v19370_v38 }
 0xdf7   :  { %v10301_v55 = vpop.f32.mrf.mxu1 }
 0xdf8   :  { %v10540_v21 = vmax.f32 %v26219_v62, %v10301_v55 }
 0xdf9   :  { %v19373_v13 = vpop.f32.mrf.mxu1 }
 0xdfa   :  { %v10543_v46 = vmax.f32 %v26221_v42, %v19373_v13 }
 0xdfb   :  { %v10311_v28 = vpop.f32.mrf.mxu1 }
 0xdfc   :  { %v10542_v57 = vmax.f32 %v26223_v29, %v10311_v28 }
 0xdfd   :  { %v19376_v52 = vpop.f32.mrf.mxu1 }
 0xdfe   :  { %v10545_v49 = vmax.f32 %v26225_v15, %v19376_v52 }
 0xdff   :  { %v10321_v54 = vpop.f32.mrf.mxu1 }
 0xe01   :  { %v26251_v6 = vpop.f32.mrf.mxu1 }
 0xe03   :  { %v26255_v24 = vpop.f32.mrf.mxu1 }
 0xe05   :  { %v26257_v2 = vpop.f32.mrf.mxu1 }
 0xe07   :  { %v26261_v17 = vpop.f32.mrf.mxu1 }
 0xe08   :  { %v10548_v28 = vmax.f32 %v26235_v56, %v26261_v17 }
 0xe09   :  { %v26263_v63 = vpop.f32.mrf.mxu1 }
 0xe0b   :  { %v26267_v37 = vpop.f32.mrf.mxu1 }
 0xe0d   :  { %v26269_v9 = vpop.f32.mrf.mxu1 }
 0xe0f   :  { %v26273_v18 = vpop.f32.mrf.mxu1 }
 0xe11   :  { %v26275_v5 = vpop.f32.mrf.mxu1 }
 0xe13   :  { %v26279_v10 = vpop.f32.mrf.mxu1 }
 0xe15   :  { %v19394_v61 = vpop.f32.mrf.mxu1 }
 0xe17   :  { %v10381_v58 = vpop.f32.mrf.mxu1 }
 0xe19   :  { %v19397_v0 = vpop.f32.mrf.mxu1 }
 0xe1b   :  { %v10391_v19 = vpop.f32.mrf.mxu1 }
 0xe1d   :  { %v19400_v41 = vpop.f32.mrf.mxu1 }
 0xe1f   :  { %v10401_v40 = vpop.f32.mrf.mxu1 }
 0xe21   :  { %v19403_v59 = vpop.f32.mrf.mxu1 }
 0xe23   :  { %v10411_v42 = vpop.f32.mrf.mxu1 }
 0xe25   :  { %v26281_v15 = vpop.f32.mrf.mxu1 }
 0xe27   :  { %v26283_v38 = vpop.f32.mrf.mxu1 }
 0xe29   :  { %v26285_v13 = vpop.f32.mrf.mxu1 }
 0xe2b   :  { %v26287_v52 = vpop.f32.mrf.mxu1 }
 0xe2d   :  { %v26289_v7 = vpop.f32.mrf.mxu1 }
 0xe2f   :  { %v26291_v16 = vpop.f32.mrf.mxu1 }
 0xe31   :  { %v26293_v26 = vpop.f32.mrf.mxu1 }
 0xe33   :  { %v26295_v14 = vpop.f32.mrf.mxu1 }
 0xe34   :  { %29092 = vst [vmem:[#allocation98_spill] sm:$0xff] %v26295_v14 }
 0xe35   :  { %v19418_v43 = vpop.f32.mrf.mxu1 }
 0xe36   :  { %v10557_v8 = vmax.f32 %v19394_v61, %v19418_v43 }
 0xe37   :  { %v10461_v30 = vpop.f32.mrf.mxu1 }
 0xe38   :  { %v10573_v32 = vmax.f32 %v10541_v50, %v10557_v8  ;;  %v10556_v60 = vmax.f32 %v10381_v58, %v10461_v30  ;;  %v26323_v50 = vld [vmem:[%s28651_s1 + $0x10] sm:$0xff] }
 0xe39   :  { %v19421_v4 = vpop.f32.mrf.mxu1 }
 0xe3a   :  { %v10572_v12 = vmax.f32 %v10540_v21, %v10556_v60  ;;  %v10559_v1 = vmax.f32 %v19397_v0, %v19421_v4  ;;  %v10589_v3 = vadd.f32 %v25804_v35, %v10573_v32  ;;  %v10544_v60 = vmax.f32 %v26227_v27, %v10321_v54 }
 0xe3b   :  { %v10471_v45 = vpop.f32.mrf.mxu1 }
 0xe3c   :  { %v10575_v22 = vmax.f32 %v10543_v46, %v10559_v1  ;;  %v10558_v20 = vmax.f32 %v10391_v19, %v10471_v45  ;;  %v10588_v44 = vadd.f32 %v25804_v35, %v10572_v12  ;;  %v10605_v14 = vmax.f32 %v10589_v3, 0.0  ;;  %v26346_v19 = vld [vmem:[%s28651_s1] sm:$0xff] }
 0xe3d   :  { %v19424_v31 = vpop.f32.mrf.mxu1  ;;  %v10546_v12 = vmax.f32 %v26231_v39, %v26255_v24  ;;  %v26334_v24 = vld [vmem:[%s28651_s1 + $0x8] sm:$0xff] }
 0xe3e   :  { %v10574_v47 = vmax.f32 %v10542_v57, %v10558_v20  ;;  %v10561_v43 = vmax.f32 %v19400_v41, %v19424_v31  ;;  %v10604_v61 = vmax.f32 %v10588_v44, 0.0  ;;  %v10591_v8 = vadd.f32 %v25804_v35, %v10575_v22  ;;  %v26312_v57 = vld [vmem:[%s28651_s1 + $0x18] sm:$0xff] }
 0xe3f   :  { %v10481_v30 = vpop.f32.mrf.mxu1 }
 0xe40   :  { %v10577_v4 = vmax.f32 %v10545_v49, %v10561_v43  ;;  %v10560_v21 = vmax.f32 %v10401_v40, %v10481_v30  ;;  %19472 = vmatprep.mubr.f32.mxu0 %v10604_v61  ;;  %v10590_v32 = vadd.f32 %v25804_v35, %v10574_v47  ;;  %v10607_v44 = vmax.f32 %v10591_v8, 0.0 }
 0xe41   :  { %v19427_v62 = vpop.f32.mrf.mxu1  ;;  %19473 = vmatmul.mubr.f32.vlgmr.msra.gmra.mxu0 %v10605_v14  ;;  %v29093_v47 = vmax.f32 %v26229_v25, %v26251_v6  ;;  %v29094_v14 = vmax.f32 %v26233_v36, %v26257_v2 }
 0xe42   :  { %v10576_v1 = vmax.f32 %v10544_v60, %v10560_v21  ;;  %v10563_v45 = vmax.f32 %v19403_v59, %v19427_v62  ;;  %19497 = vmatpush3.msk.msra.mxu0 %vm289_vm0, %v26190_v33  ;;  %v10606_v31 = vmax.f32 %v10590_v32, 0.0  ;;  %v10593_v20 = vadd.f32 %v25804_v35, %v10577_v4 }
 0xe43   :  { %v10491_v22 = vpop.f32.mrf.mxu1  ;;  %19498 = vmatprep.subr.mxu0 %v26312_v57 }
 0xe44   :  { %v10579_v3 = vmax.f32 %v29093_v47, %v10563_v45  ;;  %v10562_v29 = vmax.f32 %v10411_v42, %v10491_v22  ;;  %19475 = vmatprep.mubr.f32.mxu0 %v10606_v31  ;;  %v10592_v27 = vadd.f32 %v25804_v35, %v10576_v1  ;;  %19499 = vmatpush3.msra.mxu0 %v26312_v57  ;;  %v10609_v49 = vmax.f32 %v10593_v20, 0.0 }
 0xe45   :  { %v19430_v39 = vpop.f32.mrf.mxu1  ;;  %19476 = vmatmul.mubr.f32.gmra.mxu0 %v10607_v44  ;;  %19500 = vmatprep.subr.mxu0 %v26323_v50 }
 0xe46   :  { %v10578_v55 = vmax.f32 %v10546_v12, %v10562_v29  ;;  %v10565_v46 = vmax.f32 %v26281_v15, %v19430_v39  ;;  %v10608_v25 = vmax.f32 %v10592_v27, 0.0  ;;  %19501 = vmatpush3.msra.mxu0 %v26323_v50  ;;  %v10595_v54 = vadd.f32 %v25804_v35, %v10579_v3  ;;  %v10800_v39 = vld [vmem:[%s28652_s0 + $0x1810] sm:$0xff] }
 0xe47   :  { %v10501_v6 = vpop.f32.mrf.mxu1  ;;  %19502 = vmatprep.subr.mxu0 %v26334_v24  ;;  %v10550_v15 = vmax.f32 %v26239_v51, %v26267_v37  ;;  %v10552_v51 = vmax.f32 %v26243_v23, %v26273_v18  ;;  %v10554_v23 = vmax.f32 %v26247_v11, %v26279_v10  ;;  %v29098_v18 = vld [vmem:[#allocation98_spill] sm:$0xff] }
 0xe48   :  { %v10581_v58 = vmax.f32 %v29094_v14, %v10565_v46  ;;  %v10564_v0 = vmax.f32 %v26283_v38, %v10501_v6  ;;  %19478 = vmatprep.mubr.f32.mxu0 %v10608_v25  ;;  %v10594_v56 = vadd.f32 %v25804_v35, %v10578_v55  ;;  %19503 = vmatpush3.msra.mxu0 %v26334_v24  ;;  %v10611_v40 = vmax.f32 %v10595_v54, 0.0  ;;  %v10802_v55 = vld [vmem:[%s28652_s0 + $0x1820] sm:$0xff]  ;;  %v10803_v46 = vld [vmem:[%s28652_s0 + $0x1828] sm:$0xff]  ;;  %v10804_v25 = vld [vmem:[%s28652_s0 + $0x1830] sm:$0xff] }
 0xe49   :  { %v19433_v17 = vpop.f32.mrf.mxu1  ;;  %19479 = vmatmul.mubr.f32.gmra.mxu0 %v10609_v49  ;;  %19504 = vmatprep.subr.mxu0 %v26346_v19  ;;  %v29095_v38 = vmax.f32 %v26237_v34, %v26263_v63  ;;  %v29096_v34 = vmax.f32 %v26241_v53, %v26269_v9  ;;  %v29097_v53 = vmax.f32 %v26245_v48, %v26275_v5  ;;  %v10798_v48 = vld [vmem:[%s28652_s0 + $0x1800] sm:$0xff]  ;;  %v10799_v5 = vld [vmem:[%s28652_s0 + $0x1808] sm:$0xff]  ;;  %v10808_v6 = vld [vmem:[%s28652_s0 + $0x1850] sm:$0xff] }
 0xe4a   :  { %v10580_v41 = vmax.f32 %v10548_v28, %v10564_v0  ;;  %v10567_v36 = vmax.f32 %v26285_v13, %v19433_v17  ;;  %v10610_v2 = vmax.f32 %v10594_v56, 0.0  ;;  %19505 = vmatpush3.msra.mxu0 %v26346_v19  ;;  %v10597_v59 = vadd.f32 %v25804_v35, %v10581_v58  ;;  %v10805_v28 = vld [vmem:[%s28652_s0 + $0x1838] sm:$0xff]  ;;  %v10806_v49 = vld [vmem:[%s28652_s0 + $0x1840] sm:$0xff]  ;;  %v10807_v54 = vld [vmem:[%s28652_s0 + $0x1848] sm:$0xff] }
 0xe4b   :  { %v10511_v42 = vpop.f32.mrf.mxu1  ;;  %v10809_v14 = vld [vmem:[%s28652_s0 + $0x1858] sm:$0xff]  ;;  %v10810_v58 = vld [vmem:[%s28652_s0 + $0x1860] sm:$0xff]  ;;  %v10811_v0 = vld [vmem:[%s28652_s0 + $0x1868] sm:$0xff] }
 0xe4c   :  { %v10583_v43 = vmax.f32 %v29095_v38, %v10567_v36  ;;  %v10566_v61 = vmax.f32 %v26287_v52, %v10511_v42  ;;  %19481 = vmatprep.mubr.f32.mxu0 %v10610_v2  ;;  %v10596_v8 = vadd.f32 %v25804_v35, %v10580_v41  ;;  %v10613_v21 = vmax.f32 %v10597_v59, 0.0  ;;  %v10812_v56 = vld [vmem:[%s28652_s0 + $0x1870] sm:$0xff]  ;;  %v10813_v17 = vld [vmem:[%s28652_s0 + $0x1878] sm:$0xff]  ;;  %v10814_v41 = vld [vmem:[%s28652_s0 + $0x1880] sm:$0xff] }
 0xe4d   :  { %v19436_v13 = vpop.f32.mrf.mxu1  ;;  %19482 = vmatmul.mubr.f32.gmra.mxu0 %v10611_v40  ;;  %v10815_v36 = vld [vmem:[%s28652_s0 + $0x1888] sm:$0xff]  ;;  %v10816_v2 = vld [vmem:[%s28652_s0 + $0x1890] sm:$0xff]  ;;  %v10817_v40 = vld [vmem:[%s28652_s0 + $0x1898] sm:$0xff] }
 0xe4e   :  { %v10582_v30 = vmax.f32 %v10550_v15, %v10566_v61  ;;  %v10569_v60 = vmax.f32 %v26289_v7, %v19436_v13  ;;  %v10612_v4 = vmax.f32 %v10596_v8, 0.0  ;;  %v10599_v32 = vadd.f32 %v25804_v35, %v10583_v43  ;;  %v10818_v59 = vld [vmem:[%s28652_s0 + $0x18a0] sm:$0xff]  ;;  %v10819_v42 = vld [vmem:[%s28652_s0 + $0x18a8] sm:$0xff]  ;;  %v10820_v15 = vld [vmem:[%s28652_s0 + $0x18b0] sm:$0xff] }
 0xe4f   :  { %v10521_v62 = vpop.f32.mrf.mxu1  ;;  %v10821_v38 = vld [vmem:[%s28652_s0 + $0x18b8] sm:$0xff]  ;;  %v10822_v43 = vld [vmem:[%s28652_s0 + $0x18c0] sm:$0xff]  ;;  %v10823_v61 = vld [vmem:[%s28652_s0 + $0x18c8] sm:$0xff] }
 0xe50   :  { %v10585_v63 = vmax.f32 %v29096_v34, %v10569_v60  ;;  %v10568_v37 = vmax.f32 %v26291_v16, %v10521_v62  ;;  %19484 = vmatprep.mubr.f32.mxu0 %v10612_v4  ;;  %v10598_v52 = vadd.f32 %v25804_v35, %v10582_v30  ;;  %v10615_v12 = vmax.f32 %v10599_v32, 0.0  ;;  %v15658_v8 = vld [vmem:[%s28653_s3 + $0x678] sm:$0xff]  ;;  %v10824_v13 = vld [vmem:[%s28652_s0 + $0x18d0] sm:$0xff]  ;;  %v10826_v60 = vld [vmem:[%s28652_s0 + $0x18e0] sm:$0xff] }
 0xe51   :  { %v19439_v1 = vpop.f32.mrf.mxu1  ;;  %19485 = vmatmul.mubr.f32.gmra.mxu0 %v10613_v21  ;;  %19602 = vmatprep.subr.mxu1 %v15658_v8  ;;  %v10825_v30 = vld [vmem:[%s28652_s0 + $0x18d8] sm:$0xff]  ;;  %v10827_v4 = vld [vmem:[%s28652_s0 + $0x18e8] sm:$0xff]  ;;  %v15657_v21 = vld [vmem:[%s28653_s3 + $0x670] sm:$0xff] }
 0xe52   :  { %v10584_v7 = vmax.f32 %v10552_v51, %v10568_v37  ;;  %v10571_v45 = vmax.f32 %v26293_v26, %v19439_v1  ;;  %v10614_v31 = vmax.f32 %v10598_v52, 0.0  ;;  %v10601_v44 = vadd.f32 %v25804_v35, %v10585_v63  ;;  %19603 = vmatpush3.msra.mxu1 %v15658_v8  ;;  %v10828_v32 = vld [vmem:[%s28652_s0 + $0x18f0] sm:$0xff]  ;;  %v10829_v62 = vld [vmem:[%s28652_s0 + $0x18f8] sm:$0xff]  ;;  %v10830_v51 = vld [vmem:[%s28652_s0 + $0x1900] sm:$0xff] }
 0xe53   :  { %v10531_v20 = vpop.f32.mrf.mxu1  ;;  %19604 = vmatprep.subr.mxu1 %v15657_v21  ;;  %v10831_v34 = vld [vmem:[%s28652_s0 + $0x1908] sm:$0xff]  ;;  %v10832_v37 = vld [vmem:[%s28652_s0 + $0x1910] sm:$0xff]  ;;  %v10833_v52 = vld [vmem:[%s28652_s0 + $0x1918] sm:$0xff] }
 0xe54   :  { %v10587_v9 = vmax.f32 %v29097_v53, %v10571_v45  ;;  %v10570_v16 = vmax.f32 %v29098_v18, %v10531_v20  ;;  %19487 = vmatprep.mubr.f32.mxu0 %v10614_v31  ;;  %v10600_v22 = vadd.f32 %v25804_v35, %v10584_v7  ;;  %v10617_v3 = vmax.f32 %v10601_v44, 0.0  ;;  %19605 = vmatpush3.msra.mxu1 %v15657_v21  ;;  %v15656_v63 = vld [vmem:[%s28653_s3 + $0x668] sm:$0xff]  ;;  %v10834_v1 = vld [vmem:[%s28652_s0 + $0x1920] sm:$0xff]  ;;  %v10836_v31 = vld [vmem:[%s28652_s0 + $0x1930] sm:$0xff] }
 0xe55   :  { %19488 = vmatmul.mubr.f32.gmra.mxu0 %v10615_v12  ;;  %19606 = vmatprep.subr.mxu1 %v15656_v63  ;;  %v15655_v7 = vld [vmem:[%s28653_s3 + $0x660] sm:$0xff]  ;;  %v10835_v45 = vld [vmem:[%s28652_s0 + $0x1928] sm:$0xff]  ;;  %v10837_v12 = vld [vmem:[%s28652_s0 + $0x1938] sm:$0xff] }
 0xe56   :  { %v10586_v47 = vmax.f32 %v10554_v23, %v10570_v16  ;;  %v10616_v26 = vmax.f32 %v10600_v22, 0.0  ;;  %v10603_v29 = vadd.f32 %v25804_v35, %v10587_v9  ;;  %19607 = vmatpush3.msra.mxu1 %v15656_v63  ;;  %v10838_v44 = vld [vmem:[%s28652_s0 + $0x1940] sm:$0xff]  ;;  %v15654_v20 = vld [vmem:[%s28653_s3 + $0x658] sm:$0xff]  ;;  %v10839_v23 = vld [vmem:[%s28652_s0 + $0x1948] sm:$0xff] }
 0xe57   :  { %19608 = vmatprep.subr.mxu1 %v15655_v7  ;;  %v10840_v53 = vld [vmem:[%s28652_s0 + $0x1950] sm:$0xff]  ;;  %v10841_v9 = vld [vmem:[%s28652_s0 + $0x1958] sm:$0xff]  ;;  %v10842_v18 = vld [vmem:[%s28652_s0 + $0x1960] sm:$0xff] }
 0xe58   :  { %19490 = vmatprep.mubr.f32.mxu0 %v10616_v26  ;;  %v10602_v27 = vadd.f32 %v25804_v35, %v10586_v47  ;;  %v10619_v10 = vmax.f32 %v10603_v29, 0.0  ;;  %v10801_v35 = vld [vmem:[%s28652_s0 + $0x1818] sm:$0xff]  ;;  %19609 = vmatpush3.msra.mxu1 %v15655_v7  ;;  %v15653_v16 = vld [vmem:[%s28653_s3 + $0x650] sm:$0xff]  ;;  %v10843_v22 = vld [vmem:[%s28652_s0 + $0x1968] sm:$0xff] }
 0xe59   :  { %19491 = vmatmul.mubr.f32.gmra.mxu0 %v10617_v3  ;;  %19610 = vmatprep.subr.mxu1 %v15654_v20  ;;  %v10844_v47 = vld [vmem:[%s28652_s0 + $0x1970] sm:$0xff]  ;;  %v10845_v26 = vld [vmem:[%s28652_s0 + $0x1978] sm:$0xff]  ;;  %v10846_v3 = vld [vmem:[%s28652_s0 + $0x1980] sm:$0xff] }
 0xe5a   :  { %v10618_v11 = vmax.f32 %v10602_v27, 0.0  ;;  %19611 = vmatpush3.msra.mxu1 %v15654_v20  ;;  %v15652_v29 = vld [vmem:[%s28653_s3 + $0x648] sm:$0xff]  ;;  %v15643_v21 = vld [vmem:[%s28653_s3 + $0x600] sm:$0xff] }
 0xe5b   :  { %19612 = vmatprep.subr.mxu1 %v15653_v16  ;;  %v10847_v27 = vld [vmem:[%s28652_s0 + $0x1988] sm:$0xff] }
 0xe5c   :  { %19493 = vmatprep.mubr.f32.mxu0 %v10618_v11  ;;  %19613 = vmatpush3.msra.mxu1 %v15653_v16  ;;  %v10848_v11 = vld [vmem:[%s28652_s0 + $0x1990] sm:$0xff]  ;;  %v29120_v16 = vld [vmem:[#allocation19_spill] sm:$0xff] }
 0xe5d   :  { %19494 = vmatmul.mubr.f32.gmra.mxu0 %v10619_v10  ;;  %19614 = vmatprep.subr.mxu1 %v15652_v29  ;;  %v10849_v10 = vld [vmem:[%s28652_s0 + $0x1998] sm:$0xff] }
 0xe5e   :  { %19506 = vmatprep.mubr.msk.f32.mxu0 %vm96_vm1, %v10798_v48  ;;  %19615 = vmatpush3.msra.mxu1 %v15652_v29  ;;  %v10850_v48 = vld [vmem:[%s28652_s0 + $0x19a0] sm:$0xff] }
 0xe61   :  { %19507 = vmatmul.mubr.msk.f32.vlgmr.msra.gmra.mxu0 %vm96_vm1, %v10799_v5  ;;  %v10851_v5 = vld [vmem:[%s28652_s0 + $0x19a8] sm:$0xff] }
 0xe62   :  { %19509 = vmatprep.mubr.msk.f32.mxu0 %vm96_vm1, %v10800_v39  ;;  %v15651_v39 = vld [vmem:[%s28653_s3 + $0x640] sm:$0xff] }
 0xe63   :  { %19616 = vmatprep.subr.mxu1 %v15651_v39 }
 0xe64   :  { %19617 = vmatpush3.msra.mxu1 %v15651_v39 }
 0xe65   :  { %19510 = vmatmul.mubr.msk.f32.gmra.mxu0 %vm96_vm1, %v10801_v35  ;;  %v10852_v35 = vld [vmem:[%s28652_s0 + $0x19b0] sm:$0xff] }
 0xe66   :  { %19512 = vmatprep.mubr.msk.f32.mxu0 %vm96_vm1, %v10802_v55  ;;  %v10853_v55 = vld [vmem:[%s28652_s0 + $0x19b8] sm:$0xff] }
 0xe69   :  { %19513 = vmatmul.mubr.msk.f32.gmra.mxu0 %vm96_vm1, %v10803_v46  ;;  %v10854_v46 = vld [vmem:[%s28652_s0 + $0x19c0] sm:$0xff] }
 0xe6a   :  { %19515 = vmatprep.mubr.msk.f32.mxu0 %vm96_vm1, %v10804_v25  ;;  %v10855_v25 = vld [vmem:[%s28652_s0 + $0x19c8] sm:$0xff] }
 0xe6d   :  { %19516 = vmatmul.mubr.msk.f32.gmra.mxu0 %vm96_vm1, %v10805_v28  ;;  %v15650_v28 = vld [vmem:[%s28653_s3 + $0x638] sm:$0xff] }
 0xe6e   :  { %19518 = vmatprep.mubr.msk.f32.mxu0 %vm96_vm1, %v10806_v49  ;;  %v10856_v49 = vld [vmem:[%s28652_s0 + $0x19d0] sm:$0xff]  ;;  %19618 = vmatprep.subr.mxu1 %v15650_v28 }
 0xe6f   :  { %19619 = vmatpush3.msra.mxu1 %v15650_v28 }
 0xe71   :  { %19519 = vmatmul.mubr.msk.f32.gmra.mxu0 %vm96_vm1, %v10807_v54  ;;  %v10857_v54 = vld [vmem:[%s28652_s0 + $0x19d8] sm:$0xff] }
 0xe72   :  { %19521 = vmatprep.mubr.msk.f32.mxu0 %vm96_vm1, %v10808_v6  ;;  %v10858_v6 = vld [vmem:[%s28652_s0 + $0x19e0] sm:$0xff] }
 0xe75   :  { %19522 = vmatmul.mubr.msk.f32.gmra.mxu0 %vm96_vm1, %v10809_v14  ;;  %v10859_v14 = vld [vmem:[%s28652_s0 + $0x19e8] sm:$0xff] }
 0xe76   :  { %19524 = vmatprep.mubr.msk.f32.mxu0 %vm96_vm1, %v10810_v58  ;;  %v15649_v58 = vld [vmem:[%s28653_s3 + $0x630] sm:$0xff] }
 0xe77   :  { %19620 = vmatprep.subr.mxu1 %v15649_v58 }
 0xe78   :  { %19621 = vmatpush3.msra.mxu1 %v15649_v58 }
 0xe79   :  { %19525 = vmatmul.mubr.msk.f32.gmra.mxu0 %vm96_vm1, %v10811_v0  ;;  %v10860_v0 = vld [vmem:[%s28652_s0 + $0x19f0] sm:$0xff] }
 0xe7a   :  { %19527 = vmatprep.mubr.msk.f32.mxu0 %vm96_vm1, %v10812_v56  ;;  %v10861_v56 = vld [vmem:[%s28652_s0 + $0x19f8] sm:$0xff] }
 0xe7d   :  { %19528 = vmatmul.mubr.msk.f32.gmra.mxu0 %vm96_vm1, %v10813_v17  ;;  %v15648_v17 = vld [vmem:[%s28653_s3 + $0x628] sm:$0xff] }
 0xe7e   :  { %19530 = vmatprep.mubr.msk.f32.mxu0 %vm96_vm1, %v10814_v41  ;;  %19622 = vmatprep.subr.mxu1 %v15648_v17  ;;  %v15647_v41 = vld [vmem:[%s28653_s3 + $0x620] sm:$0xff] }
 0xe7f   :  { %19623 = vmatpush3.msra.mxu1 %v15648_v17 }
 0xe80   :  { %19624 = vmatprep.subr.mxu1 %v15647_v41 }
 0xe81   :  { %19531 = vmatmul.mubr.msk.f32.gmra.mxu0 %vm96_vm1, %v10815_v36  ;;  %19625 = vmatpush3.msra.mxu1 %v15647_v41  ;;  %v15646_v36 = vld [vmem:[%s28653_s3 + $0x618] sm:$0xff] }
 0xe82   :  { %19533 = vmatprep.mubr.msk.f32.mxu0 %vm96_vm1, %v10816_v2  ;;  %19626 = vmatprep.subr.mxu1 %v15646_v36  ;;  %v15645_v2 = vld [vmem:[%s28653_s3 + $0x610] sm:$0xff] }
 0xe83   :  { %19627 = vmatpush3.msra.mxu1 %v15646_v36 }
 0xe84   :  { %19628 = vmatprep.subr.mxu1 %v15645_v2 }
 0xe85   :  { %19534 = vmatmul.mubr.msk.f32.gmra.mxu0 %vm96_vm1, %v10817_v40  ;;  %19629 = vmatpush3.msra.mxu1 %v15645_v2  ;;  %v15644_v40 = vld [vmem:[%s28653_s3 + $0x608] sm:$0xff] }
 0xe86   :  { %19536 = vmatprep.mubr.msk.f32.mxu0 %vm96_vm1, %v10818_v59  ;;  %19630 = vmatprep.subr.mxu1 %v15644_v40 }
 0xe87   :  { %19631 = vmatpush3.msra.mxu1 %v15644_v40 }
 0xe88   :  { %19632 = vmatprep.subr.mxu1 %v15643_v21 }
 0xe89   :  { %19537 = vmatmul.mubr.msk.f32.gmra.mxu0 %vm96_vm1, %v10819_v42  ;;  %v29099_v42 = vld [vmem:[#allocation82_spill] sm:$0xff]  ;;  %19633 = vmatpush3.msra.mxu1 %v15643_v21 }
 0xe8a   :  { %19539 = vmatprep.mubr.msk.f32.mxu0 %vm96_vm1, %v10820_v15  ;;  %19658 = vmatprep.subr.msk.mxu1 %vm289_vm0, %v26190_v33 }
 0xe8d   :  { %19540 = vmatmul.mubr.msk.f32.gmra.mxu0 %vm96_vm1, %v10821_v38 }
 0xe8e   :  { %19542 = vmatprep.mubr.msk.f32.mxu0 %vm96_vm1, %v10822_v43 }
 0xe91   :  { %19543 = vmatmul.mubr.msk.f32.gmra.mxu0 %vm96_vm1, %v10823_v61  ;;  %v29102_v61 = vld [vmem:[#allocation32_spill] sm:$0xff] }
 0xe92   :  { %19545 = vmatprep.mubr.msk.f32.mxu0 %vm96_vm1, %v10824_v13 }
 0xe95   :  { %19546 = vmatmul.mubr.msk.f32.gmra.mxu0 %vm96_vm1, %v10825_v30 }
 0xe96   :  { %19548 = vmatprep.mubr.msk.f32.mxu0 %vm96_vm1, %v10826_v60  ;;  %v29105_v60 = vld [vmem:[#allocation34_spill] sm:$0xff] }
 0xe99   :  { %19549 = vmatmul.mubr.msk.f32.gmra.mxu0 %vm96_vm1, %v10827_v4 }
 0xe9a   :  { %19551 = vmatprep.mubr.msk.f32.mxu0 %vm96_vm1, %v10828_v32 }
 0xe9d   :  { %19552 = vmatmul.mubr.msk.f32.gmra.mxu0 %vm96_vm1, %v10829_v62 }
 0xe9e   :  { %19554 = vmatprep.mubr.msk.f32.mxu0 %vm96_vm1, %v10830_v51  ;;  %v29108_v51 = vld [vmem:[#allocation36_spill] sm:$0xff] }
 0xea1   :  { %19555 = vmatmul.mubr.msk.f32.gmra.mxu0 %vm96_vm1, %v10831_v34 }
 0xea2   :  { %19557 = vmatprep.mubr.msk.f32.mxu0 %vm96_vm1, %v10832_v37 }
 0xea5   :  { %19558 = vmatmul.mubr.msk.f32.gmra.mxu0 %vm96_vm1, %v10833_v52  ;;  %v29111_v52 = vld [vmem:[#allocation25_spill] sm:$0xff] }
 0xea6   :  { %19560 = vmatprep.mubr.msk.f32.mxu0 %vm96_vm1, %v10834_v1 }
 0xea9   :  { %19561 = vmatmul.mubr.msk.f32.gmra.mxu0 %vm96_vm1, %v10835_v45 }
 0xeaa   :  { %19563 = vmatprep.mubr.msk.f32.mxu0 %vm96_vm1, %v10836_v31  ;;  %v29114_v31 = vld [vmem:[#allocation37_spill] sm:$0xff] }
 0xead   :  { %19564 = vmatmul.mubr.msk.f32.gmra.mxu0 %vm96_vm1, %v10837_v12 }
 0xeae   :  { %19566 = vmatprep.mubr.msk.f32.mxu0 %vm96_vm1, %v10838_v44 }
 0xeb1   :  { %19567 = vmatmul.mubr.msk.f32.gmra.mxu0 %vm96_vm1, %v10839_v23  ;;  %v29117_v23 = vld [vmem:[#allocation3_spill] sm:$0xff] }
 0xeb2   :  { %19569 = vmatprep.mubr.msk.f32.mxu0 %vm96_vm1, %v10840_v53 }
 0xeb5   :  { %19570 = vmatmul.mubr.msk.f32.gmra.mxu0 %vm96_vm1, %v10841_v9 }
 0xeb6   :  { %19572 = vmatprep.mubr.msk.f32.mxu0 %vm96_vm1, %v10842_v18 }
 0xeb9   :  { %19573 = vmatmul.mubr.msk.f32.gmra.mxu0 %vm96_vm1, %v10843_v22 }
 0xeba   :  { %19575 = vmatprep.mubr.msk.f32.mxu0 %vm96_vm1, %v10844_v47 }
 0xebd   :  { %19576 = vmatmul.mubr.msk.f32.gmra.mxu0 %vm96_vm1, %v10845_v26 }
 0xebe   :  { %19578 = vmatprep.mubr.msk.f32.mxu0 %vm96_vm1, %v10846_v3 }
 0xec1   :  { %19579 = vmatmul.mubr.msk.f32.gmra.mxu0 %vm96_vm1, %v10847_v27 }
 0xec2   :  { %19581 = vmatprep.mubr.msk.f32.mxu0 %vm96_vm1, %v10848_v11 }
 0xec5   :  { %19582 = vmatmul.mubr.msk.f32.gmra.mxu0 %vm96_vm1, %v10849_v10 }
 0xec6   :  { %19584 = vmatprep.mubr.msk.f32.mxu0 %vm96_vm1, %v10850_v48 }
 0xec9   :  { %19585 = vmatmul.mubr.msk.f32.gmra.mxu0 %vm96_vm1, %v10851_v5 }
 0xeca   :  { %19587 = vmatprep.mubr.msk.f32.mxu0 %vm96_vm1, %v10852_v35 }
 0xecd   :  { %19588 = vmatmul.mubr.msk.f32.gmra.mxu0 %vm96_vm1, %v10853_v55 }
 0xece   :  { %19590 = vmatprep.mubr.msk.f32.mxu0 %vm96_vm1, %v10854_v46 }
 0xed1   :  { %19591 = vmatmul.mubr.msk.f32.gmra.mxu0 %vm96_vm1, %v10855_v25 }
 0xed2   :  { %19593 = vmatprep.mubr.msk.f32.mxu0 %vm96_vm1, %v10856_v49 }
 0xed5   :  { %19594 = vmatmul.mubr.msk.f32.gmra.mxu0 %vm96_vm1, %v10857_v54 }
 0xed6   :  { %19596 = vmatprep.mubr.msk.f32.mxu0 %vm96_vm1, %v10858_v6 }
 0xed9   :  { %19597 = vmatmul.mubr.msk.f32.gmra.mxu0 %vm96_vm1, %v10859_v14 }
 0xeda   :  { %19599 = vmatprep.mubr.msk.f32.mxu0 %vm96_vm1, %v10860_v0 }
 0xedd   :  { %19600 = vmatmul.mubr.msk.f32.gmra.mxu0 %vm96_vm1, %v10861_v56 }
 0xf01   :  { %v19474_v59 = vpop.f32.mrf.mxu0 }
 0xf02   :  { %v26681_v15 = vadd.f32 %v19474_v59, %v29099_v42 }
 0xf03   :  { %v26683_v38 = vpop.f32.mrf.mxu0 }
 0xf04   :  { %29100 = vst [vmem:[#allocation98_spill] sm:$0xff] %v26681_v15  ;;  %29101 = vst [vmem:[#allocation82_spill] sm:$0xff] %v26683_v38 }
 0xf05   :  { %v19477_v43 = vpop.f32.mrf.mxu0 }
 0xf06   :  { %v26686_v8 = vadd.f32 %v19477_v43, %v29102_v61 }
 0xf07   :  { %v26688_v13 = vpop.f32.mrf.mxu0 }
 0xf08   :  { %29103 = vst [vmem:[#allocation32_spill] sm:$0xff] %v26686_v8  ;;  %29104 = vst [vmem:[#allocation99_spill] sm:$0xff] %v26688_v13 }
 0xf09   :  { %v19480_v30 = vpop.f32.mrf.mxu0 }
 0xf0a   :  { %v26691_v4 = vadd.f32 %v19480_v30, %v29105_v60 }
 0xf0b   :  { %v26696_v32 = vpop.f32.mrf.mxu0 }
 0xf0c   :  { %29106 = vst [vmem:[#allocation34_spill] sm:$0xff] %v26691_v4  ;;  %29107 = vst [vmem:[#allocation100_spill] sm:$0xff] %v26696_v32 }
 0xf0d   :  { %v19483_v62 = vpop.f32.mrf.mxu0 }
 0xf0e   :  { %v26701_v34 = vadd.f32 %v19483_v62, %v29108_v51 }
 0xf0f   :  { %v26703_v63 = vpop.f32.mrf.mxu0 }
 0xf10   :  { %29109 = vst [vmem:[#allocation36_spill] sm:$0xff] %v26701_v34  ;;  %29110 = vst [vmem:[#allocation101_spill] sm:$0xff] %v26703_v63 }
 0xf11   :  { %v19486_v37 = vpop.f32.mrf.mxu0 }
 0xf12   :  { %v26706_v1 = vadd.f32 %v19486_v37, %v29111_v52 }
 0xf13   :  { %v26708_v7 = vpop.f32.mrf.mxu0 }
 0xf14   :  { %29112 = vst [vmem:[#allocation25_spill] sm:$0xff] %v26706_v1  ;;  %29113 = vst [vmem:[#allocation102_spill] sm:$0xff] %v26708_v7  ;;  %v26809_v1 = vld [vmem:[%s28654_s2] ss:$0 sm:$0xff] }
 0xf15   :  { %v19489_v45 = vpop.f32.mrf.mxu0 }
 0xf16   :  { %v26711_v12 = vadd.f32 %v19489_v45, %v29114_v31 }
 0xf17   :  { %v26713_v44 = vpop.f32.mrf.mxu0 }
 0xf18   :  { %29115 = vst [vmem:[#allocation37_spill] sm:$0xff] %v26711_v12  ;;  %29116 = vst [vmem:[#allocation103_spill] sm:$0xff] %v26713_v44 }
 0xf19   :  { %v19492_v20 = vpop.f32.mrf.mxu0 }
 0xf1a   :  { %v26716_v53 = vadd.f32 %v19492_v20, %v29117_v23 }
 0xf1b   :  { %v26718_v9 = vpop.f32.mrf.mxu0 }
 0xf1c   :  { %29118 = vst [vmem:[#allocation3_spill] sm:$0xff] %v26716_v53  ;;  %29119 = vst [vmem:[#allocation104_spill] sm:$0xff] %v26718_v9 }
 0xf1d   :  { %v19495_v18 = vpop.f32.mrf.mxu0 }
 0xf1e   :  { %v26721_v22 = vadd.f32 %v19495_v18, %v29120_v16 }
 0xf1f   :  { %v26723_v47 = vpop.f32.mrf.mxu0 }
 0xf20   :  { %29121 = vst [vmem:[#allocation19_spill] sm:$0xff] %v26721_v22  ;;  %29122 = vst [vmem:[#allocation105_spill] sm:$0xff] %v26723_v47 }
 0xf21   :  { %v19508_v26 = vpop.f32.mrf.mxu0 }
 0xf23   :  { %v26725_v3 = vpop.f32.mrf.mxu0 }
 0xf25   :  { %v26727_v29 = vpop.f32.mrf.mxu0 }
 0xf27   :  { %v26729_v27 = vpop.f32.mrf.mxu0 }
 0xf29   :  { %v26731_v11 = vpop.f32.mrf.mxu0 }
 0xf2b   :  { %v26733_v10 = vpop.f32.mrf.mxu0 }
 0xf2d   :  { %v26735_v48 = vpop.f32.mrf.mxu0 }
 0xf2f   :  { %v26737_v5 = vpop.f32.mrf.mxu0 }
 0xf31   :  { %v26739_v39 = vpop.f32.mrf.mxu0 }
 0xf33   :  { %v26741_v35 = vpop.f32.mrf.mxu0 }
 0xf35   :  { %v26743_v55 = vpop.f32.mrf.mxu0 }
 0xf37   :  { %v26745_v46 = vpop.f32.mrf.mxu0 }
 0xf39   :  { %v26747_v25 = vpop.f32.mrf.mxu0 }
 0xf3b   :  { %v26749_v28 = vpop.f32.mrf.mxu0 }
 0xf3d   :  { %v26751_v49 = vpop.f32.mrf.mxu0 }
 0xf3f   :  { %v26753_v54 = vpop.f32.mrf.mxu0 }
 0xf41   :  { %v19532_v6 = vpop.f32.mrf.mxu0 }
 0xf42   :  { %v11440_v14 = vmax.f32 %v19508_v26, %v19532_v6 }
 0xf43   :  { %v11200_v58 = vpop.f32.mrf.mxu0 }
 0xf44   :  { %v11439_v32 = vmax.f32 %v26725_v3, %v11200_v58 }
 0xf45   :  { %v19535_v0 = vpop.f32.mrf.mxu0 }
 0xf46   :  { %v11442_v56 = vmax.f32 %v26727_v29, %v19535_v0 }
 0xf47   :  { %v11210_v17 = vpop.f32.mrf.mxu0 }
 0xf48   :  { %v11441_v8 = vmax.f32 %v26729_v27, %v11210_v17 }
 0xf49   :  { %v19538_v41 = vpop.f32.mrf.mxu0 }
 0xf4a   :  { %v11444_v36 = vmax.f32 %v26731_v11, %v19538_v41 }
 0xf4b   :  { %v26757_v2 = vpop.f32.mrf.mxu0 }
 0xf4c   :  { %v11443_v58 = vmax.f32 %v26733_v10, %v26757_v2 }
 0xf4d   :  { %v26759_v40 = vpop.f32.mrf.mxu0 }
 0xf4e   :  { %v29123_v17 = vmax.f32 %v26735_v48, %v26759_v40 }
 0xf4f   :  { %v26763_v42 = vpop.f32.mrf.mxu0 }
 0xf51   :  { %v26765_v43 = vpop.f32.mrf.mxu0 }
 0xf53   :  { %v26769_v30 = vpop.f32.mrf.mxu0 }
 0xf54   :  { %v11447_v48 = vmax.f32 %v26741_v35, %v26769_v30 }
 0xf55   :  { %v26771_v60 = vpop.f32.mrf.mxu0 }
 0xf57   :  { %v26775_v62 = vpop.f32.mrf.mxu0 }
 0xf59   :  { %v26777_v51 = vpop.f32.mrf.mxu0 }
 0xf5b   :  { %v26781_v52 = vpop.f32.mrf.mxu0 }
 0xf5d   :  { %v26783_v45 = vpop.f32.mrf.mxu0 }
 0xf5f   :  { %v26787_v20 = vpop.f32.mrf.mxu0 }
 0xf61   :  { %v19556_v23 = vpop.f32.mrf.mxu0 }
 0xf63   :  { %v11280_v18 = vpop.f32.mrf.mxu0 }
 0xf65   :  { %v19559_v16 = vpop.f32.mrf.mxu0 }
 0xf67   :  { %v11290_v26 = vpop.f32.mrf.mxu0 }
 0xf69   :  { %v19562_v29 = vpop.f32.mrf.mxu0 }
 0xf6b   :  { %v11300_v11 = vpop.f32.mrf.mxu0 }
 0xf6d   :  { %v19565_v6 = vpop.f32.mrf.mxu0 }
 0xf6f   :  { %v11310_v0 = vpop.f32.mrf.mxu0 }
 0xf71   :  { %v26789_v41 = vpop.f32.mrf.mxu0 }
 0xf73   :  { %v26791_v37 = vpop.f32.mrf.mxu0 }
 0xf75   :  { %v26793_v21 = vpop.f32.mrf.mxu0 }
 0xf77   :  { %v26795_v61 = vpop.f32.mrf.mxu0 }
 0xf79   :  { %v26797_v59 = vpop.f32.mrf.mxu0 }
 0xf7b   :  { %v26799_v31 = vpop.f32.mrf.mxu0 }
 0xf7d   :  { %v26801_v47 = vpop.f32.mrf.mxu0 }
 0xf7f   :  { %v26803_v9 = vpop.f32.mrf.mxu0 }
 0xf81   :  { %v19580_v44 = vpop.f32.mrf.mxu0 }
 0xf82   :  { %v11456_v7 = vmax.f32 %v19556_v23, %v19580_v44 }
 0xf83   :  { %v11360_v63 = vpop.f32.mrf.mxu0 }
 0xf84   :  { %v11472_v13 = vmax.f32 %v11440_v14, %v11456_v7  ;;  %v11455_v38 = vmax.f32 %v11280_v18, %v11360_v63 }
 0xf85   :  { %v19583_v22 = vpop.f32.mrf.mxu0 }
 0xf86   :  { %v11471_v53 = vmax.f32 %v11439_v32, %v11455_v38  ;;  %v11458_v12 = vmax.f32 %v19559_v16, %v19583_v22  ;;  %v11488_v34 = vadd.f32 %v26809_v1, %v11472_v13 }
 0xf87   :  { %v11370_v4 = vpop.f32.mrf.mxu0 }
 0xf88   :  { %v11474_v15 = vmax.f32 %v11442_v56, %v11458_v12  ;;  %v11457_v44 = vmax.f32 %v11290_v26, %v11370_v4  ;;  %v11487_v23 = vadd.f32 %v26809_v1, %v11471_v53  ;;  %v11504_v38 = vmax.f32 %v11488_v34, 0.0 }
 0xf89   :  { %v19586_v3 = vpop.f32.mrf.mxu0 }
 0xf8a   :  { %v11473_v7 = vmax.f32 %v11441_v8, %v11457_v44  ;;  %v11460_v63 = vmax.f32 %v19562_v29, %v19586_v3  ;;  %v11503_v14 = vmax.f32 %v11487_v23, 0.0  ;;  %v11490_v32 = vadd.f32 %v26809_v1, %v11474_v15 }
 0xf8b   :  { %v11380_v22 = vpop.f32.mrf.mxu0  ;;  %v11445_v15 = vmax.f32 %v26737_v5, %v26763_v42 }
 0xf8c   :  { %v11476_v18 = vmax.f32 %v11444_v36, %v11460_v63  ;;  %v11459_v13 = vmax.f32 %v11300_v11, %v11380_v22  ;;  %19634 = vmatprep.mubr.f32.mxu1 %v11503_v14  ;;  %v11489_v27 = vadd.f32 %v26809_v1, %v11473_v7  ;;  %v11506_v34 = vmax.f32 %v11490_v32, 0.0 }
 0xf8d   :  { %v19589_v12 = vpop.f32.mrf.mxu0  ;;  %19635 = vmatmul.mubr.f32.vlgmr.msra.gmra.mxu1 %v11504_v38 }
 0xf8e   :  { %v11475_v4 = vmax.f32 %v11443_v58, %v11459_v13  ;;  %v11462_v53 = vmax.f32 %v19565_v6, %v19589_v12  ;;  %19659 = vmatpush3.msk.msra.mxu1 %vm289_vm0, %v26190_v33  ;;  %v11505_v8 = vmax.f32 %v11489_v27, 0.0  ;;  %v11492_v56 = vadd.f32 %v26809_v1, %v11476_v18 }
 0xf8f   :  { %v11390_v10 = vpop.f32.mrf.mxu0  ;;  %19660 = vmatprep.subr.mxu1 %v26312_v57 }
 0xf90   :  { %v11478_v36 = vmax.f32 %v29123_v17, %v11462_v53  ;;  %v11461_v2 = vmax.f32 %v11310_v0, %v11390_v10  ;;  %19637 = vmatprep.mubr.f32.mxu1 %v11505_v8  ;;  %v11491_v16 = vadd.f32 %v26809_v1, %v11475_v4  ;;  %19661 = vmatpush3.msra.mxu1 %v26312_v57  ;;  %v11508_v40 = vmax.f32 %v11492_v56, 0.0  ;;  %v11700_v10 = vld [vmem:[%s28652_s0 + $0x1a18] sm:$0xff]  ;;  %v11701_v17 = vld [vmem:[%s28652_s0 + $0x1a20] sm:$0xff] }
 0xf91   :  { %v19592_v33 = vpop.f32.mrf.mxu0  ;;  %19638 = vmatmul.mubr.f32.gmra.mxu1 %v11506_v34  ;;  %19662 = vmatprep.subr.mxu1 %v26323_v50  ;;  %v29124_v57 = vmax.f32 %v26739_v39, %v26765_v43 }
 0xf92   :  { %v11477_v5 = vmax.f32 %v11445_v15, %v11461_v2  ;;  %v11464_v42 = vmax.f32 %v26789_v41, %v19592_v33  ;;  %v11507_v26 = vmax.f32 %v11491_v16, 0.0  ;;  %19663 = vmatpush3.msra.mxu1 %v26323_v50  ;;  %v11494_v29 = vadd.f32 %v26809_v1, %v11478_v36  ;;  %v11702_v36 = vld [vmem:[%s28652_s0 + $0x1a28] sm:$0xff]  ;;  %v11703_v2 = vld [vmem:[%s28652_s0 + $0x1a30] sm:$0xff]  ;;  %v11704_v16 = vld [vmem:[%s28652_s0 + $0x1a38] sm:$0xff] }
 0xf93   :  { %v11400_v11 = vpop.f32.mrf.mxu0  ;;  %19664 = vmatprep.subr.mxu1 %v26334_v24  ;;  %v11705_v33 = vld [vmem:[%s28652_s0 + $0x1a40] sm:$0xff] }
 0xf94   :  { %v11480_v6 = vmax.f32 %v29124_v57, %v11464_v42  ;;  %v11463_v0 = vmax.f32 %v26791_v37, %v11400_v11  ;;  %19640 = vmatprep.mubr.f32.mxu1 %v11507_v26  ;;  %v11493_v41 = vadd.f32 %v26809_v1, %v11477_v5  ;;  %19665 = vmatpush3.msra.mxu1 %v26334_v24  ;;  %v11510_v23 = vmax.f32 %v11494_v29, 0.0  ;;  %v11706_v5 = vld [vmem:[%s28652_s0 + $0x1a48] sm:$0xff]  ;;  %v11707_v42 = vld [vmem:[%s28652_s0 + $0x1a50] sm:$0xff]  ;;  %v11708_v26 = vld [vmem:[%s28652_s0 + $0x1a58] sm:$0xff] }
 0xf95   :  { %v19595_v50 = vpop.f32.mrf.mxu0  ;;  %19641 = vmatmul.mubr.f32.gmra.mxu1 %v11508_v40  ;;  %19666 = vmatprep.subr.mxu1 %v26346_v19  ;;  %v11449_v37 = vmax.f32 %v26745_v46, %v26775_v62  ;;  %v29125_v24 = vmax.f32 %v26743_v55, %v26771_v60  ;;  %v11451_v46 = vmax.f32 %v26749_v28, %v26781_v52  ;;  %v11710_v40 = vld [vmem:[%s28652_s0 + $0x1a68] sm:$0xff]  ;;  %v11711_v29 = vld [vmem:[%s28652_s0 + $0x1a70] sm:$0xff]  ;;  %v11712_v11 = vld [vmem:[%s28652_s0 + $0x1a78] sm:$0xff] }
 0xf96   :  { %v11479_v35 = vmax.f32 %v11447_v48, %v11463_v0  ;;  %v11466_v30 = vmax.f32 %v26793_v21, %v19595_v50  ;;  %v11509_v44 = vmax.f32 %v11493_v41, 0.0  ;;  %19667 = vmatpush3.msra.mxu1 %v26346_v19  ;;  %v11496_v39 = vadd.f32 %v26809_v1, %v11480_v6  ;;  %v11709_v48 = vld [vmem:[%s28652_s0 + $0x1a60] sm:$0xff]  ;;  %v11714_v6 = vld [vmem:[%s28652_s0 + $0x1a88] sm:$0xff]  ;;  %v11715_v0 = vld [vmem:[%s28652_s0 + $0x1a90] sm:$0xff] }
 0xf97   :  { %v11410_v43 = vpop.f32.mrf.mxu0  ;;  %v29126_v55 = vmax.f32 %v26747_v25, %v26777_v51  ;;  %v11453_v28 = vmax.f32 %v26753_v54, %v26787_v20  ;;  %v29127_v25 = vmax.f32 %v26751_v49, %v26783_v45  ;;  %v11697_v49 = vld [vmem:[%s28652_s0 + $0x1a00] sm:$0xff]  ;;  %v11699_v45 = vld [vmem:[%s28652_s0 + $0x1a10] sm:$0xff]  ;;  %v11716_v41 = vld [vmem:[%s28652_s0 + $0x1a98] sm:$0xff] }
 0xf98   :  { %v11482_v3 = vmax.f32 %v29125_v24, %v11466_v30  ;;  %v11465_v7 = vmax.f32 %v26795_v61, %v11410_v43  ;;  %19643 = vmatprep.mubr.f32.mxu1 %v11509_v44  ;;  %v11495_v63 = vadd.f32 %v26809_v1, %v11479_v35  ;;  %v11512_v32 = vmax.f32 %v11496_v39, 0.0  ;;  %v11713_v57 = vld [vmem:[%s28652_s0 + $0x1a80] sm:$0xff]  ;;  %v11718_v35 = vld [vmem:[%s28652_s0 + $0x1aa8] sm:$0xff]  ;;  %v11719_v30 = vld [vmem:[%s28652_s0 + $0x1ab0] sm:$0xff] }
 0xf99   :  { %v19598_v21 = vpop.f32.mrf.mxu0  ;;  %19644 = vmatmul.mubr.f32.gmra.mxu1 %v11510_v23  ;;  %v11717_v50 = vld [vmem:[%s28652_s0 + $0x1aa0] sm:$0xff]  ;;  %v11720_v44 = vld [vmem:[%s28652_s0 + $0x1ab8] sm:$0xff]  ;;  %v11722_v39 = vld [vmem:[%s28652_s0 + $0x1ac8] sm:$0xff] }
 0xf9a   :  { %v11481_v14 = vmax.f32 %v11449_v37, %v11465_v7  ;;  %v11468_v19 = vmax.f32 %v26797_v59, %v19598_v21  ;;  %v11511_v38 = vmax.f32 %v11495_v63, 0.0  ;;  %v11498_v22 = vadd.f32 %v26809_v1, %v11482_v3  ;;  %v11721_v23 = vld [vmem:[%s28652_s0 + $0x1ac0] sm:$0xff]  ;;  %v15739_v43 = vld [vmem:[%s28653_s3 + $0x6f8] sm:$0xff]  ;;  %v11723_v37 = vld [vmem:[%s28652_s0 + $0x1ad0] sm:$0xff] }
 0xf9b   :  { %v11420_v58 = vpop.f32.mrf.mxu0  ;;  %19764 = vmatprep.subr.mxu0 %v15739_v43  ;;  %v11724_v24 = vld [vmem:[%s28652_s0 + $0x1ad8] sm:$0xff]  ;;  %v11725_v3 = vld [vmem:[%s28652_s0 + $0x1ae0] sm:$0xff]  ;;  %v11726_v7 = vld [vmem:[%s28652_s0 + $0x1ae8] sm:$0xff] }
 0xf9c   :  { %v11484_v61 = vmax.f32 %v29126_v55, %v11468_v19  ;;  %v11467_v60 = vmax.f32 %v26799_v31, %v11420_v58  ;;  %19646 = vmatprep.mubr.f32.mxu1 %v11511_v38  ;;  %v11497_v62 = vadd.f32 %v26809_v1, %v11481_v14  ;;  %v11514_v12 = vmax.f32 %v11498_v22, 0.0  ;;  %19765 = vmatpush3.msra.mxu0 %v15739_v43  ;;  %v15738_v63 = vld [vmem:[%s28653_s3 + $0x6f0] sm:$0xff]  ;;  %v11728_v14 = vld [vmem:[%s28652_s0 + $0x1af8] sm:$0xff]  ;;  %v11729_v19 = vld [vmem:[%s28652_s0 + $0x1b00] sm:$0xff] }
 0xf9d   :  { %v19601_v18 = vpop.f32.mrf.mxu0  ;;  %19647 = vmatmul.mubr.f32.gmra.mxu1 %v11512_v32  ;;  %v11727_v21 = vld [vmem:[%s28652_s0 + $0x1af0] sm:$0xff]  ;;  %19766 = vmatprep.subr.mxu0 %v15738_v63  ;;  %v11730_v38 = vld [vmem:[%s28652_s0 + $0x1b08] sm:$0xff]  ;;  %v11732_v58 = vld [vmem:[%s28652_s0 + $0x1b18] sm:$0xff] }
 0xf9e   :  { %v11483_v59 = vmax.f32 %v11451_v46, %v11467_v60  ;;  %v11470_v13 = vmax.f32 %v26801_v47, %v19601_v18  ;;  %v11513_v27 = vmax.f32 %v11497_v62, 0.0  ;;  %v11500_v4 = vadd.f32 %v26809_v1, %v11484_v61  ;;  %19767 = vmatpush3.msra.mxu0 %v15738_v63  ;;  %v15737_v32 = vld [vmem:[%s28653_s3 + $0x6e8] sm:$0xff]  ;;  %v11731_v22 = vld [vmem:[%s28652_s0 + $0x1b10] sm:$0xff]  ;;  %v11733_v46 = vld [vmem:[%s28652_s0 + $0x1b20] sm:$0xff] }
 0xf9f   :  { %v11430_v53 = vpop.f32.mrf.mxu0  ;;  %19768 = vmatprep.subr.mxu0 %v15737_v32  ;;  %v15736_v55 = vld [vmem:[%s28653_s3 + $0x6e0] sm:$0xff]  ;;  %v11734_v61 = vld [vmem:[%s28652_s0 + $0x1b28] sm:$0xff]  ;;  %v11735_v60 = vld [vmem:[%s28652_s0 + $0x1b30] sm:$0xff] }
 0xfa0   :  { %v11486_v51 = vmax.f32 %v29127_v25, %v11470_v13  ;;  %v11469_v52 = vmax.f32 %v26803_v9, %v11430_v53  ;;  %19649 = vmatprep.mubr.f32.mxu1 %v11513_v27  ;;  %v11499_v31 = vadd.f32 %v26809_v1, %v11483_v59  ;;  %v11516_v15 = vmax.f32 %v11500_v4, 0.0  ;;  %v11698_v9 = vld [vmem:[%s28652_s0 + $0x1a08] sm:$0xff]  ;;  %19769 = vmatpush3.msra.mxu0 %v15737_v32  ;;  %v11736_v62 = vld [vmem:[%s28652_s0 + $0x1b38] sm:$0xff]  ;;  %v11737_v18 = vld [vmem:[%s28652_s0 + $0x1b40] sm:$0xff] }
 0xfa1   :  { %19650 = vmatmul.mubr.f32.gmra.mxu1 %v11514_v12  ;;  %19770 = vmatprep.subr.mxu0 %v15736_v55  ;;  %v15735_v59 = vld [vmem:[%s28653_s3 + $0x6d8] sm:$0xff]  ;;  %v11738_v13 = vld [vmem:[%s28652_s0 + $0x1b48] sm:$0xff]  ;;  %v11739_v27 = vld [vmem:[%s28652_s0 + $0x1b50] sm:$0xff] }
 0xfa2   :  { %v11485_v8 = vmax.f32 %v11453_v28, %v11469_v52  ;;  %v11515_v47 = vmax.f32 %v11499_v31, 0.0  ;;  %v11502_v34 = vadd.f32 %v26809_v1, %v11486_v51  ;;  %19771 = vmatpush3.msra.mxu0 %v15736_v55  ;;  %v11740_v12 = vld [vmem:[%s28652_s0 + $0x1b58] sm:$0xff]  ;;  %v11741_v4 = vld [vmem:[%s28652_s0 + $0x1b60] sm:$0xff]  ;;  %v15734_v53 = vld [vmem:[%s28653_s3 + $0x6d0] sm:$0xff] }
 0xfa3   :  { %19772 = vmatprep.subr.mxu0 %v15735_v59  ;;  %v11742_v28 = vld [vmem:[%s28652_s0 + $0x1b68] sm:$0xff]  ;;  %v11743_v25 = vld [vmem:[%s28652_s0 + $0x1b70] sm:$0xff]  ;;  %v11744_v51 = vld [vmem:[%s28652_s0 + $0x1b78] sm:$0xff] }
 0xfa4   :  { %19652 = vmatprep.mubr.f32.mxu1 %v11515_v47  ;;  %v11501_v56 = vadd.f32 %v26809_v1, %v11485_v8  ;;  %v11518_v20 = vmax.f32 %v11502_v34, 0.0  ;;  %19773 = vmatpush3.msra.mxu0 %v15735_v59  ;;  %v11745_v52 = vld [vmem:[%s28652_s0 + $0x1b80] sm:$0xff]  ;;  %v15733_v31 = vld [vmem:[%s28653_s3 + $0x6c8] sm:$0xff]  ;;  %v11747_v47 = vld [vmem:[%s28652_s0 + $0x1b90] sm:$0xff] }
 0xfa5   :  { %19653 = vmatmul.mubr.f32.gmra.mxu1 %v11516_v15  ;;  %19774 = vmatprep.subr.mxu0 %v15734_v53  ;;  %v11746_v8 = vld [vmem:[%s28652_s0 + $0x1b88] sm:$0xff]  ;;  %v11748_v15 = vld [vmem:[%s28652_s0 + $0x1b98] sm:$0xff]  ;;  %v11749_v34 = vld [vmem:[%s28652_s0 + $0x1ba0] sm:$0xff] }
 0xfa6   :  { %v11517_v54 = vmax.f32 %v11501_v56, 0.0  ;;  %19775 = vmatpush3.msra.mxu0 %v15734_v53  ;;  %v11750_v56 = vld [vmem:[%s28652_s0 + $0x1ba8] sm:$0xff]  ;;  %v29137_v63 = vld [vmem:[#allocation36_spill] sm:$0xff] }
 0xfa7   :  { %19776 = vmatprep.subr.mxu0 %v15733_v31 }
 0xfa8   :  { %19655 = vmatprep.mubr.f32.mxu1 %v11517_v54  ;;  %19777 = vmatpush3.msra.mxu0 %v15733_v31  ;;  %v15732_v54 = vld [vmem:[%s28653_s3 + $0x6c0] sm:$0xff] }
 0xfa9   :  { %19656 = vmatmul.mubr.f32.gmra.mxu1 %v11518_v20  ;;  %v11751_v20 = vld [vmem:[%s28652_s0 + $0x1bb0] sm:$0xff]  ;;  %19778 = vmatprep.subr.mxu0 %v15732_v54 }
 0xfaa   :  { %19668 = vmatprep.mubr.msk.f32.mxu1 %vm96_vm1, %v11697_v49  ;;  %19779 = vmatpush3.msra.mxu0 %v15732_v54  ;;  %v11752_v49 = vld [vmem:[%s28652_s0 + $0x1bb8] sm:$0xff] }
 0xfad   :  { %19669 = vmatmul.mubr.msk.f32.vlgmr.msra.gmra.mxu1 %vm96_vm1, %v11698_v9  ;;  %v11753_v9 = vld [vmem:[%s28652_s0 + $0x1bc0] sm:$0xff] }
 0xfae   :  { %19671 = vmatprep.mubr.msk.f32.mxu1 %vm96_vm1, %v11699_v45  ;;  %v11754_v45 = vld [vmem:[%s28652_s0 + $0x1bc8] sm:$0xff] }
 0xfb1   :  { %19672 = vmatmul.mubr.msk.f32.gmra.mxu1 %vm96_vm1, %v11700_v10  ;;  %v15731_v10 = vld [vmem:[%s28653_s3 + $0x6b8] sm:$0xff] }
 0xfb2   :  { %19674 = vmatprep.mubr.msk.f32.mxu1 %vm96_vm1, %v11701_v17  ;;  %v11755_v17 = vld [vmem:[%s28652_s0 + $0x1bd0] sm:$0xff]  ;;  %19780 = vmatprep.subr.mxu0 %v15731_v10 }
 0xfb3   :  { %19781 = vmatpush3.msra.mxu0 %v15731_v10 }
 0xfb5   :  { %19675 = vmatmul.mubr.msk.f32.gmra.mxu1 %vm96_vm1, %v11702_v36  ;;  %v11756_v36 = vld [vmem:[%s28652_s0 + $0x1bd8] sm:$0xff] }
 0xfb6   :  { %19677 = vmatprep.mubr.msk.f32.mxu1 %vm96_vm1, %v11703_v2  ;;  %v11757_v2 = vld [vmem:[%s28652_s0 + $0x1be0] sm:$0xff] }
 0xfb9   :  { %19678 = vmatmul.mubr.msk.f32.gmra.mxu1 %vm96_vm1, %v11704_v16  ;;  %v11758_v16 = vld [vmem:[%s28652_s0 + $0x1be8] sm:$0xff] }
 0xfba   :  { %19680 = vmatprep.mubr.msk.f32.mxu1 %vm96_vm1, %v11705_v33  ;;  %v15730_v33 = vld [vmem:[%s28653_s3 + $0x6b0] sm:$0xff] }
 0xfbb   :  { %19782 = vmatprep.subr.mxu0 %v15730_v33 }
 0xfbc   :  { %19783 = vmatpush3.msra.mxu0 %v15730_v33 }
 0xfbd   :  { %19681 = vmatmul.mubr.msk.f32.gmra.mxu1 %vm96_vm1, %v11706_v5  ;;  %v11759_v5 = vld [vmem:[%s28652_s0 + $0x1bf0] sm:$0xff] }
 0xfbe   :  { %19683 = vmatprep.mubr.msk.f32.mxu1 %vm96_vm1, %v11707_v42  ;;  %v11760_v42 = vld [vmem:[%s28652_s0 + $0x1bf8] sm:$0xff] }
 0xfc1   :  { %19684 = vmatmul.mubr.msk.f32.gmra.mxu1 %vm96_vm1, %v11708_v26  ;;  %v15729_v26 = vld [vmem:[%s28653_s3 + $0x6a8] sm:$0xff] }
 0xfc2   :  { %19686 = vmatprep.mubr.msk.f32.mxu1 %vm96_vm1, %v11709_v48  ;;  %19784 = vmatprep.subr.mxu0 %v15729_v26  ;;  %v15728_v48 = vld [vmem:[%s28653_s3 + $0x6a0] sm:$0xff] }
 0xfc3   :  { %19785 = vmatpush3.msra.mxu0 %v15729_v26 }
 0xfc4   :  { %19786 = vmatprep.subr.mxu0 %v15728_v48 }
 0xfc5   :  { %19687 = vmatmul.mubr.msk.f32.gmra.mxu1 %vm96_vm1, %v11710_v40  ;;  %19787 = vmatpush3.msra.mxu0 %v15728_v48  ;;  %v15727_v40 = vld [vmem:[%s28653_s3 + $0x698] sm:$0xff] }
 0xfc6   :  { %19689 = vmatprep.mubr.msk.f32.mxu1 %vm96_vm1, %v11711_v29  ;;  %19788 = vmatprep.subr.mxu0 %v15727_v40  ;;  %v15726_v29 = vld [vmem:[%s28653_s3 + $0x690] sm:$0xff] }
 0xfc7   :  { %19789 = vmatpush3.msra.mxu0 %v15727_v40 }
 0xfc8   :  { %19790 = vmatprep.subr.mxu0 %v15726_v29 }
 0xfc9   :  { %19690 = vmatmul.mubr.msk.f32.gmra.mxu1 %vm96_vm1, %v11712_v11  ;;  %19791 = vmatpush3.msra.mxu0 %v15726_v29  ;;  %v15725_v11 = vld [vmem:[%s28653_s3 + $0x688] sm:$0xff] }
 0xfca   :  { %19692 = vmatprep.mubr.msk.f32.mxu1 %vm96_vm1, %v11713_v57  ;;  %19792 = vmatprep.subr.mxu0 %v15725_v11 }
 0xfcb   :  { %19793 = vmatpush3.msra.mxu0 %v15725_v11 }
 0xfcd   :  { %19693 = vmatmul.mubr.msk.f32.gmra.mxu1 %vm96_vm1, %v11714_v6  ;;  %v29128_v6 = vld [vmem:[#allocation98_spill] sm:$0xff] }
 0xfce   :  { %19695 = vmatprep.mubr.msk.f32.mxu1 %vm96_vm1, %v11715_v0 }
 0xfd1   :  { %19696 = vmatmul.mubr.msk.f32.gmra.mxu1 %vm96_vm1, %v11716_v41 }
 0xfd2   :  { %19698 = vmatprep.mubr.msk.f32.mxu1 %vm96_vm1, %v11717_v50 }
 0xfd5   :  { %19699 = vmatmul.mubr.msk.f32.gmra.mxu1 %vm96_vm1, %v11718_v35  ;;  %v29131_v35 = vld [vmem:[#allocation32_spill] sm:$0xff] }
 0xfd6   :  { %19701 = vmatprep.mubr.msk.f32.mxu1 %vm96_vm1, %v11719_v30 }
 0xfd9   :  { %19702 = vmatmul.mubr.msk.f32.gmra.mxu1 %vm96_vm1, %v11720_v44 }
 0xfda   :  { %19704 = vmatprep.mubr.msk.f32.mxu1 %vm96_vm1, %v11721_v23 }
 0xfdd   :  { %19705 = vmatmul.mubr.msk.f32.gmra.mxu1 %vm96_vm1, %v11722_v39  ;;  %v29134_v39 = vld [vmem:[#allocation34_spill] sm:$0xff] }
 0xfde   :  { %19707 = vmatprep.mubr.msk.f32.mxu1 %vm96_vm1, %v11723_v37  ;;  %v15724_v37 = vld [vmem:[%s28653_s3 + $0x680] sm:$0xff] }
 0xfdf   :  { %19794 = vmatprep.subr.mxu0 %v15724_v37 }
 0xfe0   :  { %19795 = vmatpush3.msra.mxu0 %v15724_v37 }
 0xfe1   :  { %19708 = vmatmul.mubr.msk.f32.gmra.mxu1 %vm96_vm1, %v11724_v24 }
 0xfe2   :  { %19710 = vmatprep.mubr.msk.f32.mxu1 %vm96_vm1, %v11725_v3 }
 0xfe5   :  { %19711 = vmatmul.mubr.msk.f32.gmra.mxu1 %vm96_vm1, %v11726_v7  ;;  %v27195_v7 = vld [vmem:[%s28651_s1 + $0x20] sm:$0xf] }
 0xfe6   :  { %19713 = vmatprep.mubr.msk.f32.mxu1 %vm96_vm1, %v11727_v21  ;;  %19820 = vmatprep.subr.msk.mxu0 %vm289_vm0, %v27195_v7 }
 0xfe9   :  { %19714 = vmatmul.mubr.msk.f32.gmra.mxu1 %vm96_vm1, %v11728_v14 }
 0xfea   :  { %19716 = vmatprep.mubr.msk.f32.mxu1 %vm96_vm1, %v11729_v19 }
 0xfed   :  { %19717 = vmatmul.mubr.msk.f32.gmra.mxu1 %vm96_vm1, %v11730_v38  ;;  %v29140_v38 = vld [vmem:[#allocation25_spill] sm:$0xff] }
 0xfee   :  { %19719 = vmatprep.mubr.msk.f32.mxu1 %vm96_vm1, %v11731_v22 }
 0xff1   :  { %19720 = vmatmul.mubr.msk.f32.gmra.mxu1 %vm96_vm1, %v11732_v58 }
 0xff2   :  { %19722 = vmatprep.mubr.msk.f32.mxu1 %vm96_vm1, %v11733_v46  ;;  %v29143_v46 = vld [vmem:[#allocation37_spill] sm:$0xff] }
 0xff5   :  { %19723 = vmatmul.mubr.msk.f32.gmra.mxu1 %vm96_vm1, %v11734_v61 }
 0xff6   :  { %19725 = vmatprep.mubr.msk.f32.mxu1 %vm96_vm1, %v11735_v60 }
 0xff9   :  { %19726 = vmatmul.mubr.msk.f32.gmra.mxu1 %vm96_vm1, %v11736_v62  ;;  %v29146_v62 = vld [vmem:[#allocation3_spill] sm:$0xff] }
 0xffa   :  { %19728 = vmatprep.mubr.msk.f32.mxu1 %vm96_vm1, %v11737_v18 }
 0xffd   :  { %19729 = vmatmul.mubr.msk.f32.gmra.mxu1 %vm96_vm1, %v11738_v13 }
 0xffe   :  { %19731 = vmatprep.mubr.msk.f32.mxu1 %vm96_vm1, %v11739_v27  ;;  %v29149_v27 = vld [vmem:[#allocation19_spill] sm:$0xff] }
0x1001   :  { %19732 = vmatmul.mubr.msk.f32.gmra.mxu1 %vm96_vm1, %v11740_v12 }
0x1002   :  { %19734 = vmatprep.mubr.msk.f32.mxu1 %vm96_vm1, %v11741_v4 }
0x1005   :  { %19735 = vmatmul.mubr.msk.f32.gmra.mxu1 %vm96_vm1, %v11742_v28 }
0x1006   :  { %19737 = vmatprep.mubr.msk.f32.mxu1 %vm96_vm1, %v11743_v25 }
0x1009   :  { %19738 = vmatmul.mubr.msk.f32.gmra.mxu1 %vm96_vm1, %v11744_v51 }
0x100a   :  { %19740 = vmatprep.mubr.msk.f32.mxu1 %vm96_vm1, %v11745_v52 }
0x100d   :  { %19741 = vmatmul.mubr.msk.f32.gmra.mxu1 %vm96_vm1, %v11746_v8 }
0x100e   :  { %19743 = vmatprep.mubr.msk.f32.mxu1 %vm96_vm1, %v11747_v47 }
0x1011   :  { %19744 = vmatmul.mubr.msk.f32.gmra.mxu1 %vm96_vm1, %v11748_v15 }
0x1012   :  { %19746 = vmatprep.mubr.msk.f32.mxu1 %vm96_vm1, %v11749_v34 }
0x1015   :  { %19747 = vmatmul.mubr.msk.f32.gmra.mxu1 %vm96_vm1, %v11750_v56 }
0x1016   :  { %19749 = vmatprep.mubr.msk.f32.mxu1 %vm96_vm1, %v11751_v20 }
0x1019   :  { %19750 = vmatmul.mubr.msk.f32.gmra.mxu1 %vm96_vm1, %v11752_v49 }
0x101a   :  { %19752 = vmatprep.mubr.msk.f32.mxu1 %vm96_vm1, %v11753_v9 }
0x101d   :  { %19753 = vmatmul.mubr.msk.f32.gmra.mxu1 %vm96_vm1, %v11754_v45 }
0x101e   :  { %19755 = vmatprep.mubr.msk.f32.mxu1 %vm96_vm1, %v11755_v17 }
0x1021   :  { %19756 = vmatmul.mubr.msk.f32.gmra.mxu1 %vm96_vm1, %v11756_v36 }
0x1022   :  { %19758 = vmatprep.mubr.msk.f32.mxu1 %vm96_vm1, %v11757_v2 }
0x1025   :  { %19759 = vmatmul.mubr.msk.f32.gmra.mxu1 %vm96_vm1, %v11758_v16 }
0x1026   :  { %19761 = vmatprep.mubr.msk.f32.mxu1 %vm96_vm1, %v11759_v5 }
0x1029   :  { %19762 = vmatmul.mubr.msk.f32.gmra.mxu1 %vm96_vm1, %v11760_v42 }
0x104d   :  { %v19636_v57 = vpop.f32.mrf.mxu1 }
0x104e   :  { %v27175_v0 = vadd.f32 %v19636_v57, %v29128_v6 }
0x104f   :  { %v27177_v41 = vpop.f32.mrf.mxu1 }
0x1050   :  { %29129 = vst [vmem:[#allocation98_spill] sm:$0xff] %v27175_v0  ;;  %29130 = vst [vmem:[#allocation106_spill] sm:$0xff] %v27177_v41 }
0x1051   :  { %v19639_v50 = vpop.f32.mrf.mxu1 }
0x1052   :  { %v27180_v30 = vadd.f32 %v19639_v50, %v29131_v35 }
0x1053   :  { %v27182_v44 = vpop.f32.mrf.mxu1 }
0x1054   :  { %29132 = vst [vmem:[#allocation32_spill] sm:$0xff] %v27180_v30  ;;  %29133 = vst [vmem:[#allocation107_spill] sm:$0xff] %v27182_v44 }
0x1055   :  { %v19642_v23 = vpop.f32.mrf.mxu1 }
0x1056   :  { %v27185_v43 = vadd.f32 %v19642_v23, %v29134_v39 }
0x1057   :  { %v27190_v24 = vpop.f32.mrf.mxu1 }
0x1058   :  { %29135 = vst [vmem:[#allocation34_spill] sm:$0xff] %v27185_v43  ;;  %29136 = vst [vmem:[#allocation108_spill] sm:$0xff] %v27190_v24 }
0x1059   :  { %v19645_v3 = vpop.f32.mrf.mxu1 }
0x105a   :  { %v27200_v21 = vadd.f32 %v19645_v3, %v29137_v63 }
0x105b   :  { %v27202_v14 = vpop.f32.mrf.mxu1 }
0x105c   :  { %29138 = vst [vmem:[#allocation36_spill] sm:$0xff] %v27200_v21  ;;  %29139 = vst [vmem:[#allocation109_spill] sm:$0xff] %v27202_v14 }
0x105d   :  { %v19648_v19 = vpop.f32.mrf.mxu1 }
0x105e   :  { %v27205_v32 = vadd.f32 %v19648_v19, %v29140_v38 }
0x105f   :  { %v27207_v22 = vpop.f32.mrf.mxu1 }
0x1060   :  { %29141 = vst [vmem:[#allocation25_spill] sm:$0xff] %v27205_v32  ;;  %29142 = vst [vmem:[#allocation110_spill] sm:$0xff] %v27207_v22 }
0x1061   :  { %v19651_v58 = vpop.f32.mrf.mxu1 }
0x1062   :  { %v27210_v55 = vadd.f32 %v19651_v58, %v29143_v46 }
0x1063   :  { %v27212_v61 = vpop.f32.mrf.mxu1 }
0x1064   :  { %29144 = vst [vmem:[#allocation37_spill] sm:$0xff] %v27210_v55  ;;  %29145 = vst [vmem:[#allocation111_spill] sm:$0xff] %v27212_v61 }
0x1065   :  { %v19654_v60 = vpop.f32.mrf.mxu1 }
0x1066   :  { %v27215_v18 = vadd.f32 %v19654_v60, %v29146_v62 }
0x1067   :  { %v27217_v59 = vpop.f32.mrf.mxu1 }
0x1068   :  { %29147 = vst [vmem:[#allocation3_spill] sm:$0xff] %v27215_v18  ;;  %29148 = vst [vmem:[#allocation112_spill] sm:$0xff] %v27217_v59 }
0x1069   :  { %v19657_v13 = vpop.f32.mrf.mxu1 }
0x106a   :  { %v27220_v12 = vadd.f32 %v19657_v13, %v29149_v27 }
0x106b   :  { %v27222_v4 = vpop.f32.mrf.mxu1 }
0x106c   :  { %29150 = vst [vmem:[#allocation19_spill] sm:$0xff] %v27220_v12  ;;  %29151 = vst [vmem:[#allocation113_spill] sm:$0xff] %v27222_v4 }
0x106d   :  { %v19670_v53 = vpop.f32.mrf.mxu1 }
0x106f   :  { %v27224_v28 = vpop.f32.mrf.mxu1 }
0x1071   :  { %v27226_v25 = vpop.f32.mrf.mxu1 }
0x1073   :  { %v27228_v51 = vpop.f32.mrf.mxu1 }
0x1075   :  { %v27230_v52 = vpop.f32.mrf.mxu1 }
0x1077   :  { %v27232_v31 = vpop.f32.mrf.mxu1 }
0x1079   :  { %v27234_v8 = vpop.f32.mrf.mxu1 }
0x107b   :  { %v27236_v47 = vpop.f32.mrf.mxu1 }
0x107d   :  { %v27238_v15 = vpop.f32.mrf.mxu1 }
0x107f   :  { %v27240_v34 = vpop.f32.mrf.mxu1 }
0x1081   :  { %v27242_v56 = vpop.f32.mrf.mxu1 }
0x1083   :  { %v27244_v54 = vpop.f32.mrf.mxu1 }
0x1085   :  { %v27246_v20 = vpop.f32.mrf.mxu1 }
0x1087   :  { %v27248_v49 = vpop.f32.mrf.mxu1 }
0x1089   :  { %v27250_v9 = vpop.f32.mrf.mxu1 }
0x108b   :  { %v27252_v45 = vpop.f32.mrf.mxu1 }
0x108d   :  { %v19694_v10 = vpop.f32.mrf.mxu1 }
0x108e   :  { %v12339_v17 = vmax.f32 %v19670_v53, %v19694_v10 }
0x108f   :  { %v12099_v36 = vpop.f32.mrf.mxu1 }
0x1090   :  { %v12338_v61 = vmax.f32 %v27224_v28, %v12099_v36 }
0x1091   :  { %v19697_v2 = vpop.f32.mrf.mxu1 }
0x1092   :  { %v12341_v16 = vmax.f32 %v27226_v25, %v19697_v2 }
0x1093   :  { %v12109_v33 = vpop.f32.mrf.mxu1 }
0x1094   :  { %v12340_v55 = vmax.f32 %v27228_v51, %v12109_v33 }
0x1095   :  { %v19700_v5 = vpop.f32.mrf.mxu1 }
0x1096   :  { %v12343_v42 = vmax.f32 %v27230_v52, %v19700_v5 }
0x1097   :  { %v12119_v26 = vpop.f32.mrf.mxu1 }
0x1099   :  { %v27256_v48 = vpop.f32.mrf.mxu1 }
0x109b   :  { %v27260_v29 = vpop.f32.mrf.mxu1 }
0x109d   :  { %v27262_v11 = vpop.f32.mrf.mxu1 }
0x109f   :  { %v27266_v6 = vpop.f32.mrf.mxu1 }
0x10a0   :  { %v12346_v33 = vmax.f32 %v27240_v34, %v27266_v6 }
0x10a1   :  { %v27268_v50 = vpop.f32.mrf.mxu1 }
0x10a3   :  { %v27272_v23 = vpop.f32.mrf.mxu1 }
0x10a5   :  { %v27274_v39 = vpop.f32.mrf.mxu1 }
0x10a7   :  { %v27278_v3 = vpop.f32.mrf.mxu1 }
0x10a9   :  { %v27280_v63 = vpop.f32.mrf.mxu1 }
0x10ab   :  { %v27284_v38 = vpop.f32.mrf.mxu1 }
0x10ad   :  { %v19718_v58 = vpop.f32.mrf.mxu1 }
0x10af   :  { %v12179_v46 = vpop.f32.mrf.mxu1 }
0x10b1   :  { %v19721_v60 = vpop.f32.mrf.mxu1 }
0x10b3   :  { %v12189_v62 = vpop.f32.mrf.mxu1 }
0x10b5   :  { %v19724_v13 = vpop.f32.mrf.mxu1 }
0x10b7   :  { %v12199_v27 = vpop.f32.mrf.mxu1 }
0x10b9   :  { %v19727_v53 = vpop.f32.mrf.mxu1 }
0x10bb   :  { %v12209_v25 = vpop.f32.mrf.mxu1 }
0x10bd   :  { %v27286_v52 = vpop.f32.mrf.mxu1 }
0x10bf   :  { %v27288_v10 = vpop.f32.mrf.mxu1 }
0x10c1   :  { %v27290_v2 = vpop.f32.mrf.mxu1 }
0x10c3   :  { %v27292_v5 = vpop.f32.mrf.mxu1 }
0x10c5   :  { %v27294_v37 = vpop.f32.mrf.mxu1 }
0x10c7   :  { %v27296_v19 = vpop.f32.mrf.mxu1 }
0x10c9   :  { %v27298_v35 = vpop.f32.mrf.mxu1 }
0x10cb   :  { %v27300_v57 = vpop.f32.mrf.mxu1 }
0x10cc   :  { %29152 = vst [vmem:[#allocation114_spill] sm:$0xff] %v27300_v57 }
0x10cd   :  { %v19742_v40 = vpop.f32.mrf.mxu1 }
0x10ce   :  { %v12355_v4 = vmax.f32 %v19718_v58, %v19742_v40 }
0x10cf   :  { %v12259_v59 = vpop.f32.mrf.mxu1 }
0x10d0   :  { %v12371_v22 = vmax.f32 %v12339_v17, %v12355_v4  ;;  %v12354_v14 = vmax.f32 %v12179_v46, %v12259_v59  ;;  %v27328_v17 = vld [vmem:[%s28651_s1 + $0x10] sm:$0xff] }
0x10d1   :  { %v19745_v24 = vpop.f32.mrf.mxu1 }
0x10d2   :  { %v12370_v44 = vmax.f32 %v12338_v61, %v12354_v14  ;;  %v12357_v41 = vmax.f32 %v19721_v60, %v19745_v24  ;;  %v12387_v12 = vadd.f32 %v26809_v1, %v12371_v22  ;;  %v12342_v14 = vmax.f32 %v27232_v31, %v12119_v26 }
0x10d3   :  { %v12269_v18 = vpop.f32.mrf.mxu1 }
0x10d4   :  { %v12373_v32 = vmax.f32 %v12341_v16, %v12357_v41  ;;  %v12356_v21 = vmax.f32 %v12189_v62, %v12269_v18  ;;  %v12386_v43 = vadd.f32 %v26809_v1, %v12370_v44  ;;  %v12403_v57 = vmax.f32 %v12387_v12, 0.0  ;;  %v27351_v62 = vld [vmem:[%s28651_s1] sm:$0xff] }
0x10d5   :  { %v19748_v30 = vpop.f32.mrf.mxu1  ;;  %v12344_v44 = vmax.f32 %v27236_v47, %v27260_v29  ;;  %v27339_v29 = vld [vmem:[%s28651_s1 + $0x8] sm:$0xff] }
0x10d6   :  { %v12372_v0 = vmax.f32 %v12340_v55, %v12356_v21  ;;  %v12359_v40 = vmax.f32 %v19724_v13, %v19748_v30  ;;  %v12402_v58 = vmax.f32 %v12386_v43, 0.0  ;;  %v12389_v4 = vadd.f32 %v26809_v1, %v12373_v32  ;;  %v27317_v55 = vld [vmem:[%s28651_s1 + $0x18] sm:$0xff] }
0x10d7   :  { %v12279_v59 = vpop.f32.mrf.mxu1 }
0x10d8   :  { %v12375_v24 = vmax.f32 %v12343_v42, %v12359_v40  ;;  %v12358_v61 = vmax.f32 %v12199_v27, %v12279_v59  ;;  %19796 = vmatprep.mubr.f32.mxu0 %v12402_v58  ;;  %v12388_v22 = vadd.f32 %v26809_v1, %v12372_v0  ;;  %v12405_v43 = vmax.f32 %v12389_v4, 0.0 }
0x10d9   :  { %v19751_v28 = vpop.f32.mrf.mxu1  ;;  %19797 = vmatmul.mubr.f32.vlgmr.msra.gmra.mxu0 %v12403_v57  ;;  %v29153_v0 = vmax.f32 %v27234_v8, %v27256_v48  ;;  %v29154_v57 = vmax.f32 %v27238_v15, %v27262_v11 }
0x10da   :  { %v12374_v41 = vmax.f32 %v12342_v14, %v12358_v61  ;;  %v12361_v18 = vmax.f32 %v19727_v53, %v19751_v28  ;;  %19821 = vmatpush3.msk.msra.mxu0 %vm289_vm0, %v27195_v7  ;;  %v12404_v30 = vmax.f32 %v12388_v22, 0.0  ;;  %v12391_v21 = vadd.f32 %v26809_v1, %v12375_v24 }
0x10db   :  { %v12289_v32 = vpop.f32.mrf.mxu1  ;;  %19822 = vmatprep.subr.mxu0 %v27317_v55 }
0x10dc   :  { %v12377_v12 = vmax.f32 %v29153_v0, %v12361_v18  ;;  %v12360_v51 = vmax.f32 %v12209_v25, %v12289_v32  ;;  %19799 = vmatprep.mubr.f32.mxu0 %v12404_v30  ;;  %v12390_v31 = vadd.f32 %v26809_v1, %v12374_v41  ;;  %19823 = vmatpush3.msra.mxu0 %v27317_v55  ;;  %v12407_v42 = vmax.f32 %v12391_v21, 0.0 }
0x10dd   :  { %v19754_v47 = vpop.f32.mrf.mxu1  ;;  %19800 = vmatmul.mubr.f32.gmra.mxu0 %v12405_v43  ;;  %19824 = vmatprep.subr.mxu0 %v27328_v17 }
0x10de   :  { %v12376_v36 = vmax.f32 %v12344_v44, %v12360_v51  ;;  %v12363_v16 = vmax.f32 %v27286_v52, %v19754_v47  ;;  %v12406_v8 = vmax.f32 %v12390_v31, 0.0  ;;  %19825 = vmatpush3.msra.mxu0 %v27328_v17  ;;  %v12393_v26 = vadd.f32 %v26809_v1, %v12377_v12  ;;  %v12598_v47 = vld [vmem:[%s28652_s0 + $0x1c10] sm:$0xff] }
0x10df   :  { %v12299_v48 = vpop.f32.mrf.mxu1  ;;  %19826 = vmatprep.subr.mxu0 %v27339_v29  ;;  %v12348_v52 = vmax.f32 %v27244_v54, %v27272_v23  ;;  %v12350_v54 = vmax.f32 %v27248_v49, %v27278_v3  ;;  %v12352_v49 = vmax.f32 %v27252_v45, %v27284_v38  ;;  %v29158_v3 = vld [vmem:[#allocation114_spill] sm:$0xff] }
0x10e0   :  { %v12379_v46 = vmax.f32 %v29154_v57, %v12363_v16  ;;  %v12362_v60 = vmax.f32 %v27288_v10, %v12299_v48  ;;  %19802 = vmatprep.mubr.f32.mxu0 %v12406_v8  ;;  %v12392_v34 = vadd.f32 %v26809_v1, %v12376_v36  ;;  %19827 = vmatpush3.msra.mxu0 %v27339_v29  ;;  %v12409_v27 = vmax.f32 %v12393_v26, 0.0  ;;  %v12600_v36 = vld [vmem:[%s28652_s0 + $0x1c20] sm:$0xff]  ;;  %v12601_v16 = vld [vmem:[%s28652_s0 + $0x1c28] sm:$0xff]  ;;  %v12602_v8 = vld [vmem:[%s28652_s0 + $0x1c30] sm:$0xff] }
0x10e1   :  { %v19757_v6 = vpop.f32.mrf.mxu1  ;;  %19803 = vmatmul.mubr.f32.gmra.mxu0 %v12407_v42  ;;  %19828 = vmatprep.subr.mxu0 %v27351_v62  ;;  %v29155_v10 = vmax.f32 %v27242_v56, %v27268_v50  ;;  %v29156_v56 = vmax.f32 %v27246_v20, %v27274_v39  ;;  %v29157_v20 = vmax.f32 %v27250_v9, %v27280_v63  ;;  %v12596_v9 = vld [vmem:[%s28652_s0 + $0x1c00] sm:$0xff]  ;;  %v12597_v63 = vld [vmem:[%s28652_s0 + $0x1c08] sm:$0xff]  ;;  %v12606_v48 = vld [vmem:[%s28652_s0 + $0x1c50] sm:$0xff] }
0x10e2   :  { %v12378_v13 = vmax.f32 %v12346_v33, %v12362_v60  ;;  %v12365_v15 = vmax.f32 %v27290_v2, %v19757_v6  ;;  %v12408_v11 = vmax.f32 %v12392_v34, 0.0  ;;  %19829 = vmatpush3.msra.mxu0 %v27351_v62  ;;  %v12395_v53 = vadd.f32 %v26809_v1, %v12379_v46  ;;  %v12603_v33 = vld [vmem:[%s28652_s0 + $0x1c38] sm:$0xff]  ;;  %v12604_v42 = vld [vmem:[%s28652_s0 + $0x1c40] sm:$0xff]  ;;  %v12605_v26 = vld [vmem:[%s28652_s0 + $0x1c48] sm:$0xff] }
0x10e3   :  { %v12309_v25 = vpop.f32.mrf.mxu1  ;;  %v12607_v57 = vld [vmem:[%s28652_s0 + $0x1c58] sm:$0xff]  ;;  %v12608_v46 = vld [vmem:[%s28652_s0 + $0x1c60] sm:$0xff]  ;;  %v12609_v60 = vld [vmem:[%s28652_s0 + $0x1c68] sm:$0xff] }
0x10e4   :  { %v12381_v40 = vmax.f32 %v29155_v10, %v12365_v15  ;;  %v12364_v58 = vmax.f32 %v27292_v5, %v12309_v25  ;;  %19805 = vmatprep.mubr.f32.mxu0 %v12408_v11  ;;  %v12394_v4 = vadd.f32 %v26809_v1, %v12378_v13  ;;  %v12411_v61 = vmax.f32 %v12395_v53, 0.0  ;;  %v12610_v34 = vld [vmem:[%s28652_s0 + $0x1c70] sm:$0xff]  ;;  %v12611_v6 = vld [vmem:[%s28652_s0 + $0x1c78] sm:$0xff]  ;;  %v12612_v13 = vld [vmem:[%s28652_s0 + $0x1c80] sm:$0xff] }
0x10e5   :  { %v19760_v2 = vpop.f32.mrf.mxu1  ;;  %19806 = vmatmul.mubr.f32.gmra.mxu0 %v12409_v27  ;;  %v12613_v15 = vld [vmem:[%s28652_s0 + $0x1c88] sm:$0xff]  ;;  %v12614_v11 = vld [vmem:[%s28652_s0 + $0x1c90] sm:$0xff]  ;;  %v12615_v27 = vld [vmem:[%s28652_s0 + $0x1c98] sm:$0xff] }
0x10e6   :  { %v12380_v59 = vmax.f32 %v12348_v52, %v12364_v58  ;;  %v12367_v14 = vmax.f32 %v27294_v37, %v19760_v2  ;;  %v12410_v24 = vmax.f32 %v12394_v4, 0.0  ;;  %v12397_v22 = vadd.f32 %v26809_v1, %v12381_v40  ;;  %v12616_v53 = vld [vmem:[%s28652_s0 + $0x1ca0] sm:$0xff]  ;;  %v12617_v25 = vld [vmem:[%s28652_s0 + $0x1ca8] sm:$0xff]  ;;  %v12618_v52 = vld [vmem:[%s28652_s0 + $0x1cb0] sm:$0xff] }
0x10e7   :  { %v12319_v28 = vpop.f32.mrf.mxu1  ;;  %v12619_v10 = vld [vmem:[%s28652_s0 + $0x1cb8] sm:$0xff]  ;;  %v12620_v40 = vld [vmem:[%s28652_s0 + $0x1cc0] sm:$0xff]  ;;  %v12621_v58 = vld [vmem:[%s28652_s0 + $0x1cc8] sm:$0xff] }
0x10e8   :  { %v12383_v50 = vmax.f32 %v29156_v56, %v12367_v14  ;;  %v12366_v23 = vmax.f32 %v27296_v19, %v12319_v28  ;;  %19808 = vmatprep.mubr.f32.mxu0 %v12410_v24  ;;  %v12396_v5 = vadd.f32 %v26809_v1, %v12380_v59  ;;  %v12413_v44 = vmax.f32 %v12397_v22, 0.0  ;;  %v15820_v4 = vld [vmem:[%s28653_s3 + $0x778] sm:$0xff]  ;;  %v12622_v2 = vld [vmem:[%s28652_s0 + $0x1cd0] sm:$0xff]  ;;  %v12624_v14 = vld [vmem:[%s28652_s0 + $0x1ce0] sm:$0xff] }
0x10e9   :  { %v19763_v41 = vpop.f32.mrf.mxu1  ;;  %19809 = vmatmul.mubr.f32.gmra.mxu0 %v12411_v61  ;;  %19926 = vmatprep.subr.mxu1 %v15820_v4  ;;  %v12623_v59 = vld [vmem:[%s28652_s0 + $0x1cd8] sm:$0xff]  ;;  %v12625_v24 = vld [vmem:[%s28652_s0 + $0x1ce8] sm:$0xff]  ;;  %v15819_v61 = vld [vmem:[%s28653_s3 + $0x770] sm:$0xff] }
0x10ea   :  { %v12382_v37 = vmax.f32 %v12350_v54, %v12366_v23  ;;  %v12369_v18 = vmax.f32 %v27298_v35, %v19763_v41  ;;  %v12412_v30 = vmax.f32 %v12396_v5, 0.0  ;;  %v12399_v43 = vadd.f32 %v26809_v1, %v12383_v50  ;;  %19927 = vmatpush3.msra.mxu1 %v15820_v4  ;;  %v12626_v22 = vld [vmem:[%s28652_s0 + $0x1cf0] sm:$0xff]  ;;  %v12627_v28 = vld [vmem:[%s28652_s0 + $0x1cf8] sm:$0xff]  ;;  %v12628_v54 = vld [vmem:[%s28652_s0 + $0x1d00] sm:$0xff] }
0x10eb   :  { %v12329_v21 = vpop.f32.mrf.mxu1  ;;  %19928 = vmatprep.subr.mxu1 %v15819_v61  ;;  %v12629_v56 = vld [vmem:[%s28652_s0 + $0x1d08] sm:$0xff]  ;;  %v12630_v23 = vld [vmem:[%s28652_s0 + $0x1d10] sm:$0xff]  ;;  %v12631_v5 = vld [vmem:[%s28652_s0 + $0x1d18] sm:$0xff] }
0x10ec   :  { %v12385_v39 = vmax.f32 %v29157_v20, %v12369_v18  ;;  %v12368_v19 = vmax.f32 %v29158_v3, %v12329_v21  ;;  %19811 = vmatprep.mubr.f32.mxu0 %v12412_v30  ;;  %v12398_v32 = vadd.f32 %v26809_v1, %v12382_v37  ;;  %v12415_v12 = vmax.f32 %v12399_v43, 0.0  ;;  %19929 = vmatpush3.msra.mxu1 %v15819_v61  ;;  %v15818_v50 = vld [vmem:[%s28653_s3 + $0x768] sm:$0xff]  ;;  %v12632_v41 = vld [vmem:[%s28652_s0 + $0x1d20] sm:$0xff]  ;;  %v12634_v30 = vld [vmem:[%s28652_s0 + $0x1d30] sm:$0xff] }
0x10ed   :  { %19812 = vmatmul.mubr.f32.gmra.mxu0 %v12413_v44  ;;  %19930 = vmatprep.subr.mxu1 %v15818_v50  ;;  %v15817_v37 = vld [vmem:[%s28653_s3 + $0x760] sm:$0xff]  ;;  %v12633_v18 = vld [vmem:[%s28652_s0 + $0x1d28] sm:$0xff]  ;;  %v12635_v44 = vld [vmem:[%s28652_s0 + $0x1d38] sm:$0xff] }
0x10ee   :  { %v12384_v0 = vmax.f32 %v12352_v49, %v12368_v19  ;;  %v12414_v35 = vmax.f32 %v12398_v32, 0.0  ;;  %v12401_v51 = vadd.f32 %v26809_v1, %v12385_v39  ;;  %19931 = vmatpush3.msra.mxu1 %v15818_v50  ;;  %v12636_v43 = vld [vmem:[%s28652_s0 + $0x1d40] sm:$0xff]  ;;  %v15816_v21 = vld [vmem:[%s28653_s3 + $0x758] sm:$0xff]  ;;  %v12637_v49 = vld [vmem:[%s28652_s0 + $0x1d48] sm:$0xff] }
0x10ef   :  { %19932 = vmatprep.subr.mxu1 %v15817_v37  ;;  %v12638_v20 = vld [vmem:[%s28652_s0 + $0x1d50] sm:$0xff]  ;;  %v12639_v39 = vld [vmem:[%s28652_s0 + $0x1d58] sm:$0xff]  ;;  %v12640_v3 = vld [vmem:[%s28652_s0 + $0x1d60] sm:$0xff] }
0x10f0   :  { %19814 = vmatprep.mubr.f32.mxu0 %v12414_v35  ;;  %v12400_v31 = vadd.f32 %v26809_v1, %v12384_v0  ;;  %v12417_v38 = vmax.f32 %v12401_v51, 0.0  ;;  %v12599_v1 = vld [vmem:[%s28652_s0 + $0x1c18] sm:$0xff]  ;;  %19933 = vmatpush3.msra.mxu1 %v15817_v37  ;;  %v15815_v19 = vld [vmem:[%s28653_s3 + $0x750] sm:$0xff]  ;;  %v12641_v32 = vld [vmem:[%s28652_s0 + $0x1d68] sm:$0xff] }
0x10f1   :  { %19815 = vmatmul.mubr.f32.gmra.mxu0 %v12415_v12  ;;  %19934 = vmatprep.subr.mxu1 %v15816_v21  ;;  %v12642_v0 = vld [vmem:[%s28652_s0 + $0x1d70] sm:$0xff]  ;;  %v12643_v35 = vld [vmem:[%s28652_s0 + $0x1d78] sm:$0xff]  ;;  %v12644_v12 = vld [vmem:[%s28652_s0 + $0x1d80] sm:$0xff] }
0x10f2   :  { %v12416_v45 = vmax.f32 %v12400_v31, 0.0  ;;  %19935 = vmatpush3.msra.mxu1 %v15816_v21  ;;  %v15814_v51 = vld [vmem:[%s28653_s3 + $0x748] sm:$0xff]  ;;  %v15805_v61 = vld [vmem:[%s28653_s3 + $0x700] sm:$0xff] }
0x10f3   :  { %19936 = vmatprep.subr.mxu1 %v15815_v19  ;;  %v12645_v31 = vld [vmem:[%s28652_s0 + $0x1d88] sm:$0xff] }
0x10f4   :  { %19817 = vmatprep.mubr.f32.mxu0 %v12416_v45  ;;  %19937 = vmatpush3.msra.mxu1 %v15815_v19  ;;  %v12646_v45 = vld [vmem:[%s28652_s0 + $0x1d90] sm:$0xff]  ;;  %v29179_v19 = vld [vmem:[#allocation19_spill] sm:$0xff] }
0x10f5   :  { %19818 = vmatmul.mubr.f32.gmra.mxu0 %v12417_v38  ;;  %19938 = vmatprep.subr.mxu1 %v15814_v51  ;;  %v12647_v38 = vld [vmem:[%s28652_s0 + $0x1d98] sm:$0xff] }
0x10f6   :  { %19830 = vmatprep.mubr.msk.f32.mxu0 %vm96_vm1, %v12596_v9  ;;  %19939 = vmatpush3.msra.mxu1 %v15814_v51  ;;  %v12648_v9 = vld [vmem:[%s28652_s0 + $0x1da0] sm:$0xff] }
0x10f9   :  { %19831 = vmatmul.mubr.msk.f32.vlgmr.msra.gmra.mxu0 %vm96_vm1, %v12597_v63  ;;  %v12649_v63 = vld [vmem:[%s28652_s0 + $0x1da8] sm:$0xff] }
0x10fa   :  { %19833 = vmatprep.mubr.msk.f32.mxu0 %vm96_vm1, %v12598_v47  ;;  %v15813_v47 = vld [vmem:[%s28653_s3 + $0x740] sm:$0xff] }
0x10fb   :  { %19940 = vmatprep.subr.mxu1 %v15813_v47 }
0x10fc   :  { %19941 = vmatpush3.msra.mxu1 %v15813_v47 }
0x10fd   :  { %19834 = vmatmul.mubr.msk.f32.gmra.mxu0 %vm96_vm1, %v12599_v1  ;;  %v12650_v1 = vld [vmem:[%s28652_s0 + $0x1db0] sm:$0xff] }
0x10fe   :  { %19836 = vmatprep.mubr.msk.f32.mxu0 %vm96_vm1, %v12600_v36  ;;  %v12651_v36 = vld [vmem:[%s28652_s0 + $0x1db8] sm:$0xff] }
0x1101   :  { %19837 = vmatmul.mubr.msk.f32.gmra.mxu0 %vm96_vm1, %v12601_v16  ;;  %v12652_v16 = vld [vmem:[%s28652_s0 + $0x1dc0] sm:$0xff] }
0x1102   :  { %19839 = vmatprep.mubr.msk.f32.mxu0 %vm96_vm1, %v12602_v8  ;;  %v12653_v8 = vld [vmem:[%s28652_s0 + $0x1dc8] sm:$0xff] }
0x1105   :  { %19840 = vmatmul.mubr.msk.f32.gmra.mxu0 %vm96_vm1, %v12603_v33  ;;  %v15812_v33 = vld [vmem:[%s28653_s3 + $0x738] sm:$0xff] }
0x1106   :  { %19842 = vmatprep.mubr.msk.f32.mxu0 %vm96_vm1, %v12604_v42  ;;  %v12654_v42 = vld [vmem:[%s28652_s0 + $0x1dd0] sm:$0xff]  ;;  %19942 = vmatprep.subr.mxu1 %v15812_v33 }
0x1107   :  { %19943 = vmatpush3.msra.mxu1 %v15812_v33 }
0x1109   :  { %19843 = vmatmul.mubr.msk.f32.gmra.mxu0 %vm96_vm1, %v12605_v26  ;;  %v12655_v26 = vld [vmem:[%s28652_s0 + $0x1dd8] sm:$0xff] }
0x110a   :  { %19845 = vmatprep.mubr.msk.f32.mxu0 %vm96_vm1, %v12606_v48  ;;  %v12656_v48 = vld [vmem:[%s28652_s0 + $0x1de0] sm:$0xff] }
0x110d   :  { %19846 = vmatmul.mubr.msk.f32.gmra.mxu0 %vm96_vm1, %v12607_v57  ;;  %v12657_v57 = vld [vmem:[%s28652_s0 + $0x1de8] sm:$0xff] }
0x110e   :  { %19848 = vmatprep.mubr.msk.f32.mxu0 %vm96_vm1, %v12608_v46  ;;  %v15811_v46 = vld [vmem:[%s28653_s3 + $0x730] sm:$0xff] }
0x110f   :  { %19944 = vmatprep.subr.mxu1 %v15811_v46 }
0x1110   :  { %19945 = vmatpush3.msra.mxu1 %v15811_v46 }
0x1111   :  { %19849 = vmatmul.mubr.msk.f32.gmra.mxu0 %vm96_vm1, %v12609_v60  ;;  %v12658_v60 = vld [vmem:[%s28652_s0 + $0x1df0] sm:$0xff] }
0x1112   :  { %19851 = vmatprep.mubr.msk.f32.mxu0 %vm96_vm1, %v12610_v34  ;;  %v12659_v34 = vld [vmem:[%s28652_s0 + $0x1df8] sm:$0xff] }
0x1115   :  { %19852 = vmatmul.mubr.msk.f32.gmra.mxu0 %vm96_vm1, %v12611_v6  ;;  %v15810_v6 = vld [vmem:[%s28653_s3 + $0x728] sm:$0xff] }
0x1116   :  { %19854 = vmatprep.mubr.msk.f32.mxu0 %vm96_vm1, %v12612_v13  ;;  %19946 = vmatprep.subr.mxu1 %v15810_v6  ;;  %v15809_v13 = vld [vmem:[%s28653_s3 + $0x720] sm:$0xff] }
0x1117   :  { %19947 = vmatpush3.msra.mxu1 %v15810_v6 }
0x1118   :  { %19948 = vmatprep.subr.mxu1 %v15809_v13 }
0x1119   :  { %19855 = vmatmul.mubr.msk.f32.gmra.mxu0 %vm96_vm1, %v12613_v15  ;;  %19949 = vmatpush3.msra.mxu1 %v15809_v13  ;;  %v15808_v15 = vld [vmem:[%s28653_s3 + $0x718] sm:$0xff] }
0x111a   :  { %19857 = vmatprep.mubr.msk.f32.mxu0 %vm96_vm1, %v12614_v11  ;;  %19950 = vmatprep.subr.mxu1 %v15808_v15  ;;  %v15807_v11 = vld [vmem:[%s28653_s3 + $0x710] sm:$0xff] }
0x111b   :  { %19951 = vmatpush3.msra.mxu1 %v15808_v15 }
0x111c   :  { %19952 = vmatprep.subr.mxu1 %v15807_v11 }
0x111d   :  { %19858 = vmatmul.mubr.msk.f32.gmra.mxu0 %vm96_vm1, %v12615_v27  ;;  %19953 = vmatpush3.msra.mxu1 %v15807_v11  ;;  %v15806_v27 = vld [vmem:[%s28653_s3 + $0x708] sm:$0xff] }
0x111e   :  { %19860 = vmatprep.mubr.msk.f32.mxu0 %vm96_vm1, %v12616_v53  ;;  %19954 = vmatprep.subr.mxu1 %v15806_v27 }
0x111f   :  { %19955 = vmatpush3.msra.mxu1 %v15806_v27 }
0x1120   :  { %19956 = vmatprep.subr.mxu1 %v15805_v61 }
0x1121   :  { %19861 = vmatmul.mubr.msk.f32.gmra.mxu0 %vm96_vm1, %v12617_v25  ;;  %v29159_v25 = vld [vmem:[#allocation98_spill] sm:$0xff]  ;;  %19957 = vmatpush3.msra.mxu1 %v15805_v61 }
0x1122   :  { %19863 = vmatprep.mubr.msk.f32.mxu0 %vm96_vm1, %v12618_v52  ;;  %19982 = vmatprep.subr.msk.mxu1 %vm289_vm0, %v27195_v7 }
0x1125   :  { %19864 = vmatmul.mubr.msk.f32.gmra.mxu0 %vm96_vm1, %v12619_v10 }
0x1126   :  { %19866 = vmatprep.mubr.msk.f32.mxu0 %vm96_vm1, %v12620_v40 }
0x1129   :  { %19867 = vmatmul.mubr.msk.f32.gmra.mxu0 %vm96_vm1, %v12621_v58  ;;  %v29161_v58 = vld [vmem:[#allocation32_spill] sm:$0xff] }
0x112a   :  { %19869 = vmatprep.mubr.msk.f32.mxu0 %vm96_vm1, %v12622_v2 }
0x112d   :  { %19870 = vmatmul.mubr.msk.f32.gmra.mxu0 %vm96_vm1, %v12623_v59 }
0x112e   :  { %19872 = vmatprep.mubr.msk.f32.mxu0 %vm96_vm1, %v12624_v14  ;;  %v29164_v14 = vld [vmem:[#allocation34_spill] sm:$0xff] }
0x1131   :  { %19873 = vmatmul.mubr.msk.f32.gmra.mxu0 %vm96_vm1, %v12625_v24 }
0x1132   :  { %19875 = vmatprep.mubr.msk.f32.mxu0 %vm96_vm1, %v12626_v22 }
0x1135   :  { %19876 = vmatmul.mubr.msk.f32.gmra.mxu0 %vm96_vm1, %v12627_v28 }
0x1136   :  { %19878 = vmatprep.mubr.msk.f32.mxu0 %vm96_vm1, %v12628_v54  ;;  %v29167_v54 = vld [vmem:[#allocation36_spill] sm:$0xff] }
0x1139   :  { %19879 = vmatmul.mubr.msk.f32.gmra.mxu0 %vm96_vm1, %v12629_v56 }
0x113a   :  { %19881 = vmatprep.mubr.msk.f32.mxu0 %vm96_vm1, %v12630_v23 }
0x113d   :  { %19882 = vmatmul.mubr.msk.f32.gmra.mxu0 %vm96_vm1, %v12631_v5  ;;  %v29170_v5 = vld [vmem:[#allocation25_spill] sm:$0xff] }
0x113e   :  { %19884 = vmatprep.mubr.msk.f32.mxu0 %vm96_vm1, %v12632_v41 }
0x1141   :  { %19885 = vmatmul.mubr.msk.f32.gmra.mxu0 %vm96_vm1, %v12633_v18 }
0x1142   :  { %19887 = vmatprep.mubr.msk.f32.mxu0 %vm96_vm1, %v12634_v30  ;;  %v29173_v30 = vld [vmem:[#allocation37_spill] sm:$0xff] }
0x1145   :  { %19888 = vmatmul.mubr.msk.f32.gmra.mxu0 %vm96_vm1, %v12635_v44 }
0x1146   :  { %19890 = vmatprep.mubr.msk.f32.mxu0 %vm96_vm1, %v12636_v43 }
0x1149   :  { %19891 = vmatmul.mubr.msk.f32.gmra.mxu0 %vm96_vm1, %v12637_v49  ;;  %v29176_v49 = vld [vmem:[#allocation3_spill] sm:$0xff] }
0x114a   :  { %19893 = vmatprep.mubr.msk.f32.mxu0 %vm96_vm1, %v12638_v20 }
0x114d   :  { %19894 = vmatmul.mubr.msk.f32.gmra.mxu0 %vm96_vm1, %v12639_v39 }
0x114e   :  { %19896 = vmatprep.mubr.msk.f32.mxu0 %vm96_vm1, %v12640_v3 }
0x1151   :  { %19897 = vmatmul.mubr.msk.f32.gmra.mxu0 %vm96_vm1, %v12641_v32 }
0x1152   :  { %19899 = vmatprep.mubr.msk.f32.mxu0 %vm96_vm1, %v12642_v0 }
0x1155   :  { %19900 = vmatmul.mubr.msk.f32.gmra.mxu0 %vm96_vm1, %v12643_v35 }
0x1156   :  { %19902 = vmatprep.mubr.msk.f32.mxu0 %vm96_vm1, %v12644_v12 }
0x1159   :  { %19903 = vmatmul.mubr.msk.f32.gmra.mxu0 %vm96_vm1, %v12645_v31 }
0x115a   :  { %19905 = vmatprep.mubr.msk.f32.mxu0 %vm96_vm1, %v12646_v45 }
0x115d   :  { %19906 = vmatmul.mubr.msk.f32.gmra.mxu0 %vm96_vm1, %v12647_v38 }
0x115e   :  { %19908 = vmatprep.mubr.msk.f32.mxu0 %vm96_vm1, %v12648_v9 }
0x1161   :  { %19909 = vmatmul.mubr.msk.f32.gmra.mxu0 %vm96_vm1, %v12649_v63 }
0x1162   :  { %19911 = vmatprep.mubr.msk.f32.mxu0 %vm96_vm1, %v12650_v1 }
0x1165   :  { %19912 = vmatmul.mubr.msk.f32.gmra.mxu0 %vm96_vm1, %v12651_v36 }
0x1166   :  { %19914 = vmatprep.mubr.msk.f32.mxu0 %vm96_vm1, %v12652_v16 }
0x1169   :  { %19915 = vmatmul.mubr.msk.f32.gmra.mxu0 %vm96_vm1, %v12653_v8 }
0x116a   :  { %19917 = vmatprep.mubr.msk.f32.mxu0 %vm96_vm1, %v12654_v42 }
0x116d   :  { %19918 = vmatmul.mubr.msk.f32.gmra.mxu0 %vm96_vm1, %v12655_v26 }
0x116e   :  { %19920 = vmatprep.mubr.msk.f32.mxu0 %vm96_vm1, %v12656_v48 }
0x1171   :  { %19921 = vmatmul.mubr.msk.f32.gmra.mxu0 %vm96_vm1, %v12657_v57 }
0x1172   :  { %19923 = vmatprep.mubr.msk.f32.mxu0 %vm96_vm1, %v12658_v60 }
0x1175   :  { %19924 = vmatmul.mubr.msk.f32.gmra.mxu0 %vm96_vm1, %v12659_v34 }
0x1199   :  { %v19798_v53 = vpop.f32.mrf.mxu0 }
0x119a   :  { %v27686_v52 = vadd.f32 %v19798_v53, %v29159_v25 }
0x119b   :  { %v27688_v10 = vpop.f32.mrf.mxu0 }
0x119c   :  { %29160 = vst [vmem:[#allocation114_spill] sm:$0xff] %v27686_v52 }
0x119d   :  { %v19801_v40 = vpop.f32.mrf.mxu0 }
0x119e   :  { %v27691_v4 = vadd.f32 %v19801_v40, %v29161_v58 }
0x119f   :  { %v27693_v2 = vpop.f32.mrf.mxu0 }
0x11a0   :  { %29162 = vst [vmem:[#allocation98_spill] sm:$0xff] %v27691_v4  ;;  %29163 = vst [vmem:[#allocation32_spill] sm:$0xff] %v27693_v2 }
0x11a1   :  { %v19804_v59 = vpop.f32.mrf.mxu0 }
0x11a2   :  { %v27696_v24 = vadd.f32 %v19804_v59, %v29164_v14 }
0x11a3   :  { %v27701_v22 = vpop.f32.mrf.mxu0 }
0x11a4   :  { %29165 = vst [vmem:[#allocation34_spill] sm:$0xff] %v27696_v24  ;;  %29166 = vst [vmem:[#allocation115_spill] sm:$0xff] %v27701_v22 }
0x11a5   :  { %v19807_v28 = vpop.f32.mrf.mxu0 }
0x11a6   :  { %v27706_v56 = vadd.f32 %v19807_v28, %v29167_v54 }
0x11a7   :  { %v27708_v50 = vpop.f32.mrf.mxu0 }
0x11a8   :  { %29168 = vst [vmem:[#allocation36_spill] sm:$0xff] %v27706_v56  ;;  %29169 = vst [vmem:[#allocation116_spill] sm:$0xff] %v27708_v50  ;;  %v27828_v56 = vld [vmem:[%s28654_s2] ss:$0 sm:$0xff] }
0x11a9   :  { %v19810_v23 = vpop.f32.mrf.mxu0 }
0x11aa   :  { %v27711_v41 = vadd.f32 %v19810_v23, %v29170_v5 }
0x11ab   :  { %v27713_v37 = vpop.f32.mrf.mxu0 }
0x11ac   :  { %29171 = vst [vmem:[#allocation25_spill] sm:$0xff] %v27711_v41  ;;  %29172 = vst [vmem:[#allocation117_spill] sm:$0xff] %v27713_v37 }
0x11ad   :  { %v19813_v18 = vpop.f32.mrf.mxu0 }
0x11ae   :  { %v27716_v44 = vadd.f32 %v19813_v18, %v29173_v30 }
0x11af   :  { %v27718_v43 = vpop.f32.mrf.mxu0 }
0x11b0   :  { %29174 = vst [vmem:[#allocation37_spill] sm:$0xff] %v27716_v44  ;;  %29175 = vst [vmem:[#allocation118_spill] sm:$0xff] %v27718_v43 }
0x11b1   :  { %v19816_v21 = vpop.f32.mrf.mxu0 }
0x11b2   :  { %v27721_v20 = vadd.f32 %v19816_v21, %v29176_v49 }
0x11b3   :  { %v27723_v39 = vpop.f32.mrf.mxu0 }
0x11b4   :  { %29177 = vst [vmem:[#allocation3_spill] sm:$0xff] %v27721_v20  ;;  %29178 = vst [vmem:[#allocation119_spill] sm:$0xff] %v27723_v39 }
0x11b5   :  { %v19819_v3 = vpop.f32.mrf.mxu0 }
0x11b6   :  { %v27726_v32 = vadd.f32 %v19819_v3, %v29179_v19 }
0x11b7   :  { %v27728_v0 = vpop.f32.mrf.mxu0 }
0x11b8   :  { %29180 = vst [vmem:[#allocation19_spill] sm:$0xff] %v27726_v32  ;;  %29181 = vst [vmem:[#allocation120_spill] sm:$0xff] %v27728_v0 }
0x11b9   :  { %v27730_v35 = vpop.f32.mrf.mxu0 }
0x11bb   :  { %v27732_v12 = vpop.f32.mrf.mxu0 }
0x11bd   :  { %v27734_v51 = vpop.f32.mrf.mxu0 }
0x11bf   :  { %v27736_v31 = vpop.f32.mrf.mxu0 }
0x11c1   :  { %v27738_v45 = vpop.f32.mrf.mxu0 }
0x11c3   :  { %v27740_v38 = vpop.f32.mrf.mxu0 }
0x11c5   :  { %v27742_v9 = vpop.f32.mrf.mxu0 }
0x11c7   :  { %v27744_v63 = vpop.f32.mrf.mxu0 }
0x11c9   :  { %v27746_v47 = vpop.f32.mrf.mxu0 }
0x11cb   :  { %v27748_v1 = vpop.f32.mrf.mxu0 }
0x11cd   :  { %v27750_v36 = vpop.f32.mrf.mxu0 }
0x11cf   :  { %v27752_v16 = vpop.f32.mrf.mxu0 }
0x11d1   :  { %v27754_v8 = vpop.f32.mrf.mxu0 }
0x11d3   :  { %v27756_v33 = vpop.f32.mrf.mxu0 }
0x11d5   :  { %v27758_v42 = vpop.f32.mrf.mxu0 }
0x11d7   :  { %v27760_v26 = vpop.f32.mrf.mxu0 }
0x11d9   :  { %v19856_v48 = vpop.f32.mrf.mxu0 }
0x11da   :  { %v13238_v57 = vmax.f32 %v27730_v35, %v19856_v48 }
0x11db   :  { %v12998_v46 = vpop.f32.mrf.mxu0 }
0x11dc   :  { %v13237_v60 = vmax.f32 %v27732_v12, %v12998_v46 }
0x11dd   :  { %v19859_v34 = vpop.f32.mrf.mxu0 }
0x11de   :  { %v13240_v6 = vmax.f32 %v27734_v51, %v19859_v34 }
0x11df   :  { %v13008_v13 = vpop.f32.mrf.mxu0 }
0x11e0   :  { %v13239_v15 = vmax.f32 %v27736_v31, %v13008_v13 }
0x11e1   :  { %v19862_v11 = vpop.f32.mrf.mxu0 }
0x11e2   :  { %v13242_v27 = vmax.f32 %v27738_v45, %v19862_v11 }
0x11e3   :  { %v27767_v53 = vpop.f32.mrf.mxu0 }
0x11e5   :  { %v27771_v40 = vpop.f32.mrf.mxu0 }
0x11e7   :  { %v27775_v59 = vpop.f32.mrf.mxu0 }
0x11e9   :  { %v27779_v61 = vpop.f32.mrf.mxu0 }
0x11eb   :  { %v27783_v54 = vpop.f32.mrf.mxu0 }
0x11ed   :  { %v27787_v5 = vpop.f32.mrf.mxu0 }
0x11ef   :  { %v27791_v30 = vpop.f32.mrf.mxu0 }
0x11f1   :  { %v27795_v49 = vpop.f32.mrf.mxu0 }
0x11f3   :  { %v27799_v19 = vpop.f32.mrf.mxu0 }
0x11f5   :  { %v27803_v12 = vpop.f32.mrf.mxu0 }
0x11f7   :  { %v27807_v31 = vpop.f32.mrf.mxu0 }
0x11f9   :  { %v19880_v48 = vpop.f32.mrf.mxu0 }
0x11fb   :  { %v13078_v46 = vpop.f32.mrf.mxu0 }
0x11fd   :  { %v19883_v34 = vpop.f32.mrf.mxu0 }
0x11ff   :  { %v13088_v13 = vpop.f32.mrf.mxu0 }
0x1201   :  { %v19886_v11 = vpop.f32.mrf.mxu0 }
0x1203   :  { %v13098_v3 = vpop.f32.mrf.mxu0 }
0x1205   :  { %v19889_v21 = vpop.f32.mrf.mxu0 }
0x1207   :  { %v13108_v18 = vpop.f32.mrf.mxu0 }
0x1209   :  { %v19892_v23 = vpop.f32.mrf.mxu0 }
0x120b   :  { %v27811_v35 = vpop.f32.mrf.mxu0 }
0x120d   :  { %v27813_v28 = vpop.f32.mrf.mxu0 }
0x120f   :  { %v27815_v14 = vpop.f32.mrf.mxu0 }
0x1211   :  { %v27817_v51 = vpop.f32.mrf.mxu0 }
0x1213   :  { %v27819_v58 = vpop.f32.mrf.mxu0 }
0x1215   :  { %v27821_v45 = vpop.f32.mrf.mxu0 }
0x1217   :  { %v27823_v25 = vpop.f32.mrf.mxu0 }
0x1219   :  { %v19904_v32 = vpop.f32.mrf.mxu0 }
0x121a   :  { %v13254_v0 = vmax.f32 %v19880_v48, %v19904_v32 }
0x121b   :  { %v13158_v20 = vpop.f32.mrf.mxu0 }
0x121c   :  { %v13270_v39 = vmax.f32 %v13238_v57, %v13254_v0  ;;  %v13253_v44 = vmax.f32 %v13078_v46, %v13158_v20 }
0x121d   :  { %v19907_v43 = vpop.f32.mrf.mxu0 }
0x121e   :  { %v13269_v41 = vmax.f32 %v13237_v60, %v13253_v44  ;;  %v13256_v37 = vmax.f32 %v19883_v34, %v19907_v43  ;;  %v13286_v50 = vadd.f32 %v27828_v56, %v13270_v39 }
0x121f   :  { %v13168_v24 = vpop.f32.mrf.mxu0 }
0x1220   :  { %v13272_v22 = vmax.f32 %v13240_v6, %v13256_v37  ;;  %v13255_v4 = vmax.f32 %v13088_v13, %v13168_v24  ;;  %v13285_v2 = vadd.f32 %v27828_v56, %v13269_v41  ;;  %v13302_v20 = vmax.f32 %v13286_v50, 0.0 }
0x1221   :  { %v19910_v52 = vpop.f32.mrf.mxu0  ;;  %v29182_v24 = vmax.f32 %v27740_v38, %v27767_v53  ;;  %v29183_v50 = vmax.f32 %v27742_v9, %v27771_v40 }
0x1222   :  { %v13271_v32 = vmax.f32 %v13239_v15, %v13255_v4  ;;  %v13258_v48 = vmax.f32 %v19886_v11, %v19910_v52  ;;  %v13301_v0 = vmax.f32 %v13285_v2, 0.0  ;;  %v13288_v44 = vadd.f32 %v27828_v56, %v13272_v22 }
0x1223   :  { %v13178_v43 = vpop.f32.mrf.mxu0 }
0x1224   :  { %v13274_v57 = vmax.f32 %v13242_v27, %v13258_v48  ;;  %v13257_v60 = vmax.f32 %v13098_v3, %v13178_v43  ;;  %19958 = vmatprep.mubr.f32.mxu1 %v13301_v0  ;;  %v13287_v46 = vadd.f32 %v27828_v56, %v13271_v32  ;;  %v13304_v4 = vmax.f32 %v13288_v44, 0.0 }
0x1225   :  { %v19913_v34 = vpop.f32.mrf.mxu0  ;;  %19959 = vmatmul.mubr.f32.vlgmr.msra.gmra.mxu1 %v13302_v20 }
0x1226   :  { %v13273_v37 = vmax.f32 %v29182_v24, %v13257_v60  ;;  %v13260_v41 = vmax.f32 %v19889_v21, %v19913_v34  ;;  %19983 = vmatpush3.msk.msra.mxu1 %vm289_vm0, %v27195_v7  ;;  %v13303_v52 = vmax.f32 %v13287_v46, 0.0  ;;  %v13290_v2 = vadd.f32 %v27828_v56, %v13274_v57 }
0x1227   :  { %v13188_v22 = vpop.f32.mrf.mxu0  ;;  %19984 = vmatprep.subr.mxu1 %v27317_v55  ;;  %v29184_v7 = vmax.f32 %v27744_v63, %v27775_v59 }
0x1228   :  { %v13276_v39 = vmax.f32 %v29183_v50, %v13260_v41  ;;  %v13259_v6 = vmax.f32 %v13108_v18, %v13188_v22  ;;  %19961 = vmatprep.mubr.f32.mxu1 %v13303_v52  ;;  %v13289_v38 = vadd.f32 %v27828_v56, %v13273_v37  ;;  %19985 = vmatpush3.msra.mxu1 %v27317_v55  ;;  %v13306_v9 = vmax.f32 %v13290_v2, 0.0 }
0x1229   :  { %v19916_v15 = vpop.f32.mrf.mxu0  ;;  %19962 = vmatmul.mubr.f32.gmra.mxu1 %v13304_v4  ;;  %19986 = vmatprep.subr.mxu1 %v27328_v17  ;;  %v29185_v55 = vmax.f32 %v27746_v47, %v27779_v61 }
0x122a   :  { %v13275_v27 = vmax.f32 %v29184_v7, %v13259_v6  ;;  %v13262_v53 = vmax.f32 %v19892_v23, %v19916_v15  ;;  %v13305_v21 = vmax.f32 %v13289_v38, 0.0  ;;  %19987 = vmatpush3.msra.mxu1 %v27328_v17  ;;  %v13292_v40 = vadd.f32 %v27828_v56, %v13276_v39  ;;  %v13498_v39 = vld [vmem:[%s28652_s0 + $0x1e18] sm:$0xff]  ;;  %v13499_v6 = vld [vmem:[%s28652_s0 + $0x1e20] sm:$0xff]  ;;  %v13500_v38 = vld [vmem:[%s28652_s0 + $0x1e28] sm:$0xff] }
0x122b   :  { %v13198_v18 = vpop.f32.mrf.mxu0  ;;  %19988 = vmatprep.subr.mxu1 %v27339_v29  ;;  %v29186_v17 = vmax.f32 %v27748_v1, %v27783_v54  ;;  %v13501_v15 = vld [vmem:[%s28652_s0 + $0x1e30] sm:$0xff]  ;;  %v13502_v7 = vld [vmem:[%s28652_s0 + $0x1e38] sm:$0xff] }
0x122c   :  { %v13278_v3 = vmax.f32 %v29185_v55, %v13262_v53  ;;  %v13261_v13 = vmax.f32 %v27811_v35, %v13198_v18  ;;  %19964 = vmatprep.mubr.f32.mxu1 %v13305_v21  ;;  %v13291_v63 = vadd.f32 %v27828_v56, %v13275_v27  ;;  %19989 = vmatpush3.msra.mxu1 %v27339_v29  ;;  %v13308_v47 = vmax.f32 %v13292_v40, 0.0  ;;  %v13503_v27 = vld [vmem:[%s28652_s0 + $0x1e40] sm:$0xff]  ;;  %v13504_v53 = vld [vmem:[%s28652_s0 + $0x1e48] sm:$0xff]  ;;  %v13505_v21 = vld [vmem:[%s28652_s0 + $0x1e50] sm:$0xff] }
0x122d   :  { %v19919_v59 = vpop.f32.mrf.mxu0  ;;  %19965 = vmatmul.mubr.f32.gmra.mxu1 %v13306_v9  ;;  %19990 = vmatprep.subr.mxu1 %v27351_v62  ;;  %v29187_v29 = vmax.f32 %v27750_v36, %v27787_v5  ;;  %v29189_v36 = vmax.f32 %v27754_v8, %v27795_v49  ;;  %v29191_v8 = vmax.f32 %v27758_v42, %v27803_v12  ;;  %v13506_v9 = vld [vmem:[%s28652_s0 + $0x1e58] sm:$0xff]  ;;  %v13507_v40 = vld [vmem:[%s28652_s0 + $0x1e60] sm:$0xff]  ;;  %v13508_v18 = vld [vmem:[%s28652_s0 + $0x1e68] sm:$0xff] }
0x122e   :  { %v13277_v23 = vmax.f32 %v29186_v17, %v13261_v13  ;;  %v13264_v11 = vmax.f32 %v27813_v28, %v19919_v59  ;;  %v13307_v32 = vmax.f32 %v13291_v63, 0.0  ;;  %19991 = vmatpush3.msra.mxu1 %v27351_v62  ;;  %v13294_v61 = vadd.f32 %v27828_v56, %v13278_v3  ;;  %v13509_v55 = vld [vmem:[%s28652_s0 + $0x1e70] sm:$0xff]  ;;  %v13510_v3 = vld [vmem:[%s28652_s0 + $0x1e78] sm:$0xff]  ;;  %v13511_v13 = vld [vmem:[%s28652_s0 + $0x1e80] sm:$0xff] }
0x122f   :  { %v13208_v35 = vpop.f32.mrf.mxu0  ;;  %v29188_v28 = vmax.f32 %v27752_v16, %v27791_v30  ;;  %v29190_v16 = vmax.f32 %v27756_v33, %v27799_v19  ;;  %v29192_v33 = vmax.f32 %v27760_v26, %v27807_v31  ;;  %v13496_v26 = vld [vmem:[%s28652_s0 + $0x1e08] sm:$0xff]  ;;  %v13497_v31 = vld [vmem:[%s28652_s0 + $0x1e10] sm:$0xff]  ;;  %v13514_v17 = vld [vmem:[%s28652_s0 + $0x1e98] sm:$0xff] }
0x1230   :  { %v13280_v48 = vmax.f32 %v29187_v29, %v13264_v11  ;;  %v13263_v0 = vmax.f32 %v27815_v14, %v13208_v35  ;;  %19967 = vmatprep.mubr.f32.mxu1 %v13307_v32  ;;  %v13293_v20 = vadd.f32 %v27828_v56, %v13277_v23  ;;  %v13310_v43 = vmax.f32 %v13294_v61, 0.0  ;;  %v13512_v63 = vld [vmem:[%s28652_s0 + $0x1e88] sm:$0xff]  ;;  %v13513_v59 = vld [vmem:[%s28652_s0 + $0x1e90] sm:$0xff]  ;;  %v13515_v23 = vld [vmem:[%s28652_s0 + $0x1ea0] sm:$0xff] }
0x1231   :  { %v19922_v1 = vpop.f32.mrf.mxu0  ;;  %19968 = vmatmul.mubr.f32.gmra.mxu1 %v13308_v47  ;;  %v13516_v11 = vld [vmem:[%s28652_s0 + $0x1ea8] sm:$0xff]  ;;  %v13517_v32 = vld [vmem:[%s28652_s0 + $0x1eb0] sm:$0xff]  ;;  %v13518_v47 = vld [vmem:[%s28652_s0 + $0x1eb8] sm:$0xff] }
0x1232   :  { %v13279_v54 = vmax.f32 %v29188_v28, %v13263_v0  ;;  %v13266_v62 = vmax.f32 %v27817_v51, %v19922_v1  ;;  %v13309_v44 = vmax.f32 %v13293_v20, 0.0  ;;  %v13296_v57 = vadd.f32 %v27828_v56, %v13280_v48  ;;  %v13519_v61 = vld [vmem:[%s28652_s0 + $0x1ec0] sm:$0xff]  ;;  %v13520_v35 = vld [vmem:[%s28652_s0 + $0x1ec8] sm:$0xff]  ;;  %v15901_v29 = vld [vmem:[%s28653_s3 + $0x7f8] sm:$0xff] }
0x1233   :  { %v13218_v60 = vpop.f32.mrf.mxu0  ;;  %v13521_v48 = vld [vmem:[%s28652_s0 + $0x1ed0] sm:$0xff]  ;;  %20088 = vmatprep.subr.mxu0 %v15901_v29  ;;  %v13522_v0 = vld [vmem:[%s28652_s0 + $0x1ed8] sm:$0xff]  ;;  %v13523_v20 = vld [vmem:[%s28652_s0 + $0x1ee0] sm:$0xff] }
0x1234   :  { %v13282_v14 = vmax.f32 %v29189_v36, %v13266_v62  ;;  %v13265_v5 = vmax.f32 %v27819_v58, %v13218_v60  ;;  %19970 = vmatprep.mubr.f32.mxu1 %v13309_v44  ;;  %v13295_v46 = vadd.f32 %v27828_v56, %v13279_v54  ;;  %v13312_v37 = vmax.f32 %v13296_v57, 0.0  ;;  %20089 = vmatpush3.msra.mxu0 %v15901_v29  ;;  %v13524_v1 = vld [vmem:[%s28652_s0 + $0x1ee8] sm:$0xff]  ;;  %v15900_v28 = vld [vmem:[%s28653_s3 + $0x7f0] sm:$0xff]  ;;  %v13526_v62 = vld [vmem:[%s28652_s0 + $0x1ef8] sm:$0xff] }
0x1235   :  { %v19925_v34 = vpop.f32.mrf.mxu0  ;;  %19971 = vmatmul.mubr.f32.gmra.mxu1 %v13310_v43  ;;  %v13525_v54 = vld [vmem:[%s28652_s0 + $0x1ef0] sm:$0xff]  ;;  %20090 = vmatprep.subr.mxu0 %v15900_v28  ;;  %v13527_v44 = vld [vmem:[%s28652_s0 + $0x1f00] sm:$0xff]  ;;  %v13528_v43 = vld [vmem:[%s28652_s0 + $0x1f08] sm:$0xff] }
0x1236   :  { %v13281_v30 = vmax.f32 %v29190_v16, %v13265_v5  ;;  %v13268_v51 = vmax.f32 %v27821_v45, %v19925_v34  ;;  %v13311_v24 = vmax.f32 %v13295_v46, 0.0  ;;  %v13298_v41 = vadd.f32 %v27828_v56, %v13282_v14  ;;  %20091 = vmatpush3.msra.mxu0 %v15900_v28  ;;  %v15899_v57 = vld [vmem:[%s28653_s3 + $0x7e8] sm:$0xff]  ;;  %v13529_v60 = vld [vmem:[%s28652_s0 + $0x1f10] sm:$0xff]  ;;  %v13530_v36 = vld [vmem:[%s28652_s0 + $0x1f18] sm:$0xff] }
0x1237   :  { %v13228_v52 = vpop.f32.mrf.mxu0  ;;  %20092 = vmatprep.subr.mxu0 %v15899_v57  ;;  %v13531_v14 = vld [vmem:[%s28652_s0 + $0x1f20] sm:$0xff]  ;;  %v13532_v46 = vld [vmem:[%s28652_s0 + $0x1f28] sm:$0xff]  ;;  %v13533_v34 = vld [vmem:[%s28652_s0 + $0x1f30] sm:$0xff] }
0x1238   :  { %v13284_v58 = vmax.f32 %v29191_v8, %v13268_v51  ;;  %v13267_v49 = vmax.f32 %v27823_v25, %v13228_v52  ;;  %19973 = vmatprep.mubr.f32.mxu1 %v13311_v24  ;;  %v13297_v4 = vadd.f32 %v27828_v56, %v13281_v30  ;;  %v13314_v2 = vmax.f32 %v13298_v41, 0.0  ;;  %v13495_v25 = vld [vmem:[%s28652_s0 + $0x1e00] sm:$0xff]  ;;  %20093 = vmatpush3.msra.mxu0 %v15899_v57  ;;  %v13534_v16 = vld [vmem:[%s28652_s0 + $0x1f38] sm:$0xff]  ;;  %v13536_v24 = vld [vmem:[%s28652_s0 + $0x1f48] sm:$0xff] }
0x1239   :  { %19974 = vmatmul.mubr.f32.gmra.mxu1 %v13312_v37  ;;  %v15898_v5 = vld [vmem:[%s28653_s3 + $0x7e0] sm:$0xff]  ;;  %v15897_v51 = vld [vmem:[%s28653_s3 + $0x7d8] sm:$0xff]  ;;  %v13537_v37 = vld [vmem:[%s28652_s0 + $0x1f50] sm:$0xff] }
0x123a   :  { %v13283_v19 = vmax.f32 %v29192_v33, %v13267_v49  ;;  %v13313_v45 = vmax.f32 %v13297_v4, 0.0  ;;  %v13300_v22 = vadd.f32 %v27828_v56, %v13284_v58  ;;  %20094 = vmatprep.subr.mxu0 %v15898_v5  ;;  %v13535_v30 = vld [vmem:[%s28652_s0 + $0x1f40] sm:$0xff]  ;;  %v13538_v41 = vld [vmem:[%s28652_s0 + $0x1f58] sm:$0xff]  ;;  %v15896_v8 = vld [vmem:[%s28653_s3 + $0x7d0] sm:$0xff] }
0x123b   :  { %20095 = vmatpush3.msra.mxu0 %v15898_v5  ;;  %v13539_v52 = vld [vmem:[%s28652_s0 + $0x1f60] sm:$0xff]  ;;  %v13540_v58 = vld [vmem:[%s28652_s0 + $0x1f68] sm:$0xff]  ;;  %v13541_v49 = vld [vmem:[%s28652_s0 + $0x1f70] sm:$0xff] }
0x123c   :  { %19976 = vmatprep.mubr.f32.mxu1 %v13313_v45  ;;  %v13299_v50 = vadd.f32 %v27828_v56, %v13283_v19  ;;  %v13316_v12 = vmax.f32 %v13300_v22, 0.0  ;;  %20096 = vmatprep.subr.mxu0 %v15897_v51  ;;  %v13542_v4 = vld [vmem:[%s28652_s0 + $0x1f78] sm:$0xff]  ;;  %v13543_v33 = vld [vmem:[%s28652_s0 + $0x1f80] sm:$0xff]  ;;  %v15895_v19 = vld [vmem:[%s28653_s3 + $0x7c8] sm:$0xff] }
0x123d   :  { %19977 = vmatmul.mubr.f32.gmra.mxu1 %v13314_v2  ;;  %20097 = vmatpush3.msra.mxu0 %v15897_v51  ;;  %v13544_v45 = vld [vmem:[%s28652_s0 + $0x1f88] sm:$0xff]  ;;  %v13545_v2 = vld [vmem:[%s28652_s0 + $0x1f90] sm:$0xff]  ;;  %v13546_v22 = vld [vmem:[%s28652_s0 + $0x1f98] sm:$0xff] }
0x123e   :  { %v13315_v42 = vmax.f32 %v13299_v50, 0.0  ;;  %20098 = vmatprep.subr.mxu0 %v15896_v8  ;;  %v13547_v50 = vld [vmem:[%s28652_s0 + $0x1fa0] sm:$0xff]  ;;  %v29205_v57 = vld [vmem:[#allocation48_spill] sm:$0xff] }
0x123f   :  { %20099 = vmatpush3.msra.mxu0 %v15896_v8  ;;  %v29207_v5 = vld [vmem:[#allocation58_spill] sm:$0xff]  ;;  %v15888_v51 = vld [vmem:[%s28653_s3 + $0x790] sm:$0xff] }
0x1240   :  { %19979 = vmatprep.mubr.f32.mxu1 %v13315_v42  ;;  %20100 = vmatprep.subr.mxu0 %v15895_v19  ;;  %v13548_v42 = vld [vmem:[%s28652_s0 + $0x1fa8] sm:$0xff]  ;;  %v29212_v8 = vld [vmem:[#allocation50_spill] sm:$0xff] }
0x1241   :  { %19980 = vmatmul.mubr.f32.gmra.mxu1 %v13316_v12  ;;  %20101 = vmatpush3.msra.mxu0 %v15895_v19  ;;  %v15894_v12 = vld [vmem:[%s28653_s3 + $0x7c0] sm:$0xff] }
0x1242   :  { %19992 = vmatprep.mubr.msk.f32.mxu1 %vm96_vm1, %v13495_v25  ;;  %v13549_v25 = vld [vmem:[%s28652_s0 + $0x1fb0] sm:$0xff]  ;;  %20102 = vmatprep.subr.mxu0 %v15894_v12 }
0x1243   :  { %20103 = vmatpush3.msra.mxu0 %v15894_v12  ;;  %v29218_v12 = vld [vmem:[#allocation21_spill] sm:$0xff] }
0x1245   :  { %19993 = vmatmul.mubr.msk.f32.vlgmr.msra.gmra.mxu1 %vm96_vm1, %v13496_v26  ;;  %v13550_v26 = vld [vmem:[%s28652_s0 + $0x1fb8] sm:$0xff] }
0x1246   :  { %19995 = vmatprep.mubr.msk.f32.mxu1 %vm96_vm1, %v13497_v31  ;;  %v13551_v31 = vld [vmem:[%s28652_s0 + $0x1fc0] sm:$0xff] }
0x1249   :  { %19996 = vmatmul.mubr.msk.f32.gmra.mxu1 %vm96_vm1, %v13498_v39  ;;  %v13552_v39 = vld [vmem:[%s28652_s0 + $0x1fc8] sm:$0xff] }
0x124a   :  { %19998 = vmatprep.mubr.msk.f32.mxu1 %vm96_vm1, %v13499_v6  ;;  %v15893_v6 = vld [vmem:[%s28653_s3 + $0x7b8] sm:$0xff] }
0x124b   :  { %20104 = vmatprep.subr.mxu0 %v15893_v6 }
0x124c   :  { %20105 = vmatpush3.msra.mxu0 %v15893_v6 }
0x124d   :  { %19999 = vmatmul.mubr.msk.f32.gmra.mxu1 %vm96_vm1, %v13500_v38  ;;  %v13553_v38 = vld [vmem:[%s28652_s0 + $0x1fd0] sm:$0xff] }
0x124e   :  { %20001 = vmatprep.mubr.msk.f32.mxu1 %vm96_vm1, %v13501_v15  ;;  %v13554_v15 = vld [vmem:[%s28652_s0 + $0x1fd8] sm:$0xff] }
0x1251   :  { %20002 = vmatmul.mubr.msk.f32.gmra.mxu1 %vm96_vm1, %v13502_v7  ;;  %v13555_v7 = vld [vmem:[%s28652_s0 + $0x1fe0] sm:$0xff] }
0x1252   :  { %20004 = vmatprep.mubr.msk.f32.mxu1 %vm96_vm1, %v13503_v27  ;;  %v13556_v27 = vld [vmem:[%s28652_s0 + $0x1fe8] sm:$0xff] }
0x1255   :  { %20005 = vmatmul.mubr.msk.f32.gmra.mxu1 %vm96_vm1, %v13504_v53  ;;  %v15892_v53 = vld [vmem:[%s28653_s3 + $0x7b0] sm:$0xff] }
0x1256   :  { %20007 = vmatprep.mubr.msk.f32.mxu1 %vm96_vm1, %v13505_v21  ;;  %v13557_v21 = vld [vmem:[%s28652_s0 + $0x1ff0] sm:$0xff]  ;;  %20106 = vmatprep.subr.mxu0 %v15892_v53 }
0x1257   :  { %20107 = vmatpush3.msra.mxu0 %v15892_v53  ;;  %v29223_v53 = vld [vmem:[#allocation31_spill] sm:$0xff] }
0x1259   :  { %20008 = vmatmul.mubr.msk.f32.gmra.mxu1 %vm96_vm1, %v13506_v9  ;;  %v13558_v9 = vld [vmem:[%s28652_s0 + $0x1ff8] sm:$0xff] }
0x125a   :  { %20010 = vmatprep.mubr.msk.f32.mxu1 %vm96_vm1, %v13507_v40  ;;  %v15891_v40 = vld [vmem:[%s28653_s3 + $0x7a8] sm:$0xff] }
0x125b   :  { %20108 = vmatprep.subr.mxu0 %v15891_v40 }
0x125c   :  { %20109 = vmatpush3.msra.mxu0 %v15891_v40 }
0x125d   :  { %20011 = vmatmul.mubr.msk.f32.gmra.mxu1 %vm96_vm1, %v13508_v18  ;;  %v15890_v18 = vld [vmem:[%s28653_s3 + $0x7a0] sm:$0xff] }
0x125e   :  { %20013 = vmatprep.mubr.msk.f32.mxu1 %vm96_vm1, %v13509_v55  ;;  %20110 = vmatprep.subr.mxu0 %v15890_v18  ;;  %v29193_v55 = vld [vmem:[#allocation4_spill] sm:$0xff] }
0x125f   :  { %20111 = vmatpush3.msra.mxu0 %v15890_v18  ;;  %v29225_v18 = vld [vmem:[#allocation60_spill] sm:$0xff] }
0x1261   :  { %20014 = vmatmul.mubr.msk.f32.gmra.mxu1 %vm96_vm1, %v13510_v3  ;;  %v29194_v3 = vld [vmem:[#allocation2_spill] sm:$0xff] }
0x1262   :  { %20016 = vmatprep.mubr.msk.f32.mxu1 %vm96_vm1, %v13511_v13  ;;  %v1730_v13 = vadd.f32 %v29194_v3, %v29193_v55  ;;  %v29226_v3 = vld [vmem:[#allocation75_spill] sm:$0xff] }
0x1265   :  { %20017 = vmatmul.mubr.msk.f32.gmra.mxu1 %vm96_vm1, %v13512_v63  ;;  %v29195_v63 = vld [vmem:[#allocation46_spill] sm:$0xff] }
0x1266   :  { %20019 = vmatprep.mubr.msk.f32.mxu1 %vm96_vm1, %v13513_v59  ;;  %v2691_v59 = vadd.f32 %v29195_v63, %v1730_v13  ;;  %v29227_v63 = vld [vmem:[#allocation90_spill] sm:$0xff] }
0x1269   :  { %20020 = vmatmul.mubr.msk.f32.gmra.mxu1 %vm96_vm1, %v13514_v17  ;;  %v15889_v17 = vld [vmem:[%s28653_s3 + $0x798] sm:$0xff] }
0x126a   :  { %20022 = vmatprep.mubr.msk.f32.mxu1 %vm96_vm1, %v13515_v23  ;;  %v29196_v23 = vld [vmem:[#allocation5_spill] sm:$0xff]  ;;  %20112 = vmatprep.subr.mxu0 %v15889_v17 }
0x126b   :  { %20113 = vmatpush3.msra.mxu0 %v15889_v17  ;;  %v29228_v17 = vld [vmem:[#allocation7_spill] sm:$0xff] }
0x126c   :  { %20114 = vmatprep.subr.mxu0 %v15888_v51 }
0x126d   :  { %20023 = vmatmul.mubr.msk.f32.gmra.mxu1 %vm96_vm1, %v13516_v11  ;;  %v29197_v11 = vld [vmem:[#allocation39_spill] sm:$0xff]  ;;  %20115 = vmatpush3.msra.mxu0 %v15888_v51  ;;  %v29241_v51 = vld [vmem:[#allocation28_spill] sm:$0xff] }
0x126e   :  { %20025 = vmatprep.mubr.msk.f32.mxu1 %vm96_vm1, %v13517_v32  ;;  %v1740_v32 = vadd.f32 %v29197_v11, %v29196_v23  ;;  %v29229_v23 = vld [vmem:[#allocation22_spill] sm:$0xff] }
0x126f   :  { %v1780_v11 = vadd.f32 %v29229_v23, %v29228_v17  ;;  %v29260_v23 = vld [vmem:[#allocation70_spill] sm:$0xff] }
0x1271   :  { %20026 = vmatmul.mubr.msk.f32.gmra.mxu1 %vm96_vm1, %v13518_v47  ;;  %v29198_v47 = vld [vmem:[#allocation26_spill] sm:$0xff] }
0x1272   :  { %20028 = vmatprep.mubr.msk.f32.mxu1 %vm96_vm1, %v13519_v61  ;;  %v3590_v61 = vadd.f32 %v29198_v47, %v2691_v59 }
0x1275   :  { %20029 = vmatmul.mubr.msk.f32.gmra.mxu1 %vm96_vm1, %v13520_v35  ;;  %v29199_v35 = vld [vmem:[#allocation29_spill] sm:$0xff] }
0x1276   :  { %20031 = vmatprep.mubr.msk.f32.mxu1 %vm96_vm1, %v13521_v48  ;;  %v2693_v29 = vadd.f32 %v29199_v35, %v1740_v32  ;;  %v29200_v48 = vld [vmem:[#allocation47_spill] sm:$0xff]  ;;  %v29230_v32 = vld [vmem:[#allocation8_spill] sm:$0xff] }
0x1279   :  { %20032 = vmatmul.mubr.msk.f32.gmra.mxu1 %vm96_vm1, %v13522_v0  ;;  %v4489_v0 = vadd.f32 %v29200_v48, %v3590_v61  ;;  %v29231_v61 = vld [vmem:[#allocation53_spill] sm:$0xff]  ;;  %v29232_v48 = vld [vmem:[#allocation68_spill] sm:$0xff] }
0x127a   :  { %20034 = vmatprep.mubr.msk.f32.mxu1 %vm96_vm1, %v13523_v20  ;;  %v29201_v20 = vld [vmem:[#allocation24_spill] sm:$0xff] }
0x127d   :  { %20035 = vmatmul.mubr.msk.f32.gmra.mxu1 %vm96_vm1, %v13524_v1  ;;  %v29202_v1 = vld [vmem:[#allocation27_spill] sm:$0xff] }
0x127e   :  { %20037 = vmatprep.mubr.msk.f32.mxu1 %vm96_vm1, %v13525_v54  ;;  %v1750_v28 = vadd.f32 %v29202_v1, %v29201_v20  ;;  %v29203_v54 = vld [vmem:[#allocation9_spill] sm:$0xff]  ;;  %v29233_v20 = vld [vmem:[#allocation83_spill] sm:$0xff] }
0x1281   :  { %20038 = vmatmul.mubr.msk.f32.gmra.mxu1 %vm96_vm1, %v13526_v62  ;;  %v3592_v62 = vadd.f32 %v29203_v54, %v2693_v29  ;;  %v15887_v29 = vld [vmem:[%s28653_s3 + $0x788] sm:$0xff] }
0x1282   :  { %20040 = vmatprep.mubr.msk.f32.mxu1 %vm96_vm1, %v13527_v44  ;;  %v29204_v44 = vld [vmem:[#allocation13_spill] sm:$0xff]  ;;  %20116 = vmatprep.subr.mxu0 %v15887_v29 }
0x1283   :  { %20117 = vmatpush3.msra.mxu0 %v15887_v29 }
0x1285   :  { %20041 = vmatmul.mubr.msk.f32.gmra.mxu1 %vm96_vm1, %v13528_v43  ;;  %v5388_v43 = vadd.f32 %v29204_v44, %v4489_v0 }
0x1286   :  { %20043 = vmatprep.mubr.msk.f32.mxu1 %vm96_vm1, %v13529_v60  ;;  %v2695_v60 = vadd.f32 %v29205_v57, %v1750_v28  ;;  %v29234_v28 = vld [vmem:[#allocation82_spill] sm:$0xff] }
0x1289   :  { %20044 = vmatmul.mubr.msk.f32.gmra.mxu1 %vm96_vm1, %v13530_v36  ;;  %v29206_v36 = vld [vmem:[#allocation15_spill] sm:$0xff] }
0x128a   :  { %20046 = vmatprep.mubr.msk.f32.mxu1 %vm96_vm1, %v13531_v14  ;;  %v4491_v14 = vadd.f32 %v29206_v36, %v3592_v62  ;;  %v29235_v62 = vld [vmem:[#allocation18_spill] sm:$0xff] }
0x128b   :  { %v2701_v44 = vadd.f32 %v29235_v62, %v1780_v11  ;;  %v29267_v62 = vld [vmem:[#allocation41_spill] sm:$0xff] }
0x128d   :  { %20047 = vmatmul.mubr.msk.f32.gmra.mxu1 %vm96_vm1, %v13532_v46  ;;  %v6287_v46 = vadd.f32 %v29207_v5, %v5388_v43  ;;  %v29236_v43 = vld [vmem:[#allocation10_spill] sm:$0xff] }
0x128e   :  { %20049 = vmatprep.mubr.msk.f32.mxu1 %vm96_vm1, %v13533_v34  ;;  %v29208_v34 = vld [vmem:[#allocation6_spill] sm:$0xff] }
0x1291   :  { %20050 = vmatmul.mubr.msk.f32.gmra.mxu1 %vm96_vm1, %v13534_v16  ;;  %v29209_v16 = vld [vmem:[#allocation11_spill] sm:$0xff] }
0x1292   :  { %20052 = vmatprep.mubr.msk.f32.mxu1 %vm96_vm1, %v13535_v30  ;;  %v1760_v30 = vadd.f32 %v29209_v16, %v29208_v34  ;;  %v29240_v16 = vld [vmem:[#allocation106_spill] sm:$0xff] }
0x1295   :  { %20053 = vmatmul.mubr.msk.f32.gmra.mxu1 %vm96_vm1, %v13536_v24  ;;  %v29210_v24 = vld [vmem:[#allocation45_spill] sm:$0xff] }
0x1296   :  { %20055 = vmatprep.mubr.msk.f32.mxu1 %vm96_vm1, %v13537_v37  ;;  %v3594_v37 = vadd.f32 %v29210_v24, %v2695_v60  ;;  %v29237_v60 = vld [vmem:[#allocation61_spill] sm:$0xff]  ;;  %v29242_v24 = vld [vmem:[#allocation23_spill] sm:$0xff] }
0x1299   :  { %20056 = vmatmul.mubr.msk.f32.gmra.mxu1 %vm96_vm1, %v13538_v41  ;;  %v29211_v41 = vld [vmem:[#allocation51_spill] sm:$0xff] }
0x129a   :  { %20058 = vmatprep.mubr.msk.f32.mxu1 %vm96_vm1, %v13539_v52  ;;  %v5390_v52 = vadd.f32 %v29211_v41, %v4491_v14  ;;  %v29238_v14 = vld [vmem:[#allocation76_spill] sm:$0xff] }
0x129b   :  { %v29243_v41 = vld [vmem:[#allocation40_spill] sm:$0xff] }
0x129d   :  { %20059 = vmatmul.mubr.msk.f32.gmra.mxu1 %vm96_vm1, %v13540_v58  ;;  %v7186_v58 = vadd.f32 %v29212_v8, %v6287_v46  ;;  %v29239_v46 = vld [vmem:[#allocation91_spill] sm:$0xff]  ;;  %v29244_v8 = vld [vmem:[#allocation54_spill] sm:$0xff] }
0x129e   :  { %20061 = vmatprep.mubr.msk.f32.mxu1 %vm96_vm1, %v13541_v49  ;;  %v29213_v49 = vld [vmem:[#allocation16_spill] sm:$0xff] }
0x12a1   :  { %20062 = vmatmul.mubr.msk.f32.gmra.mxu1 %vm96_vm1, %v13542_v4  ;;  %v2697_v4 = vadd.f32 %v29213_v49, %v1760_v30  ;;  %v29245_v49 = vld [vmem:[#allocation69_spill] sm:$0xff] }
0x12a2   :  { %20064 = vmatprep.mubr.msk.f32.mxu1 %vm96_vm1, %v13543_v33  ;;  %v29214_v33 = vld [vmem:[#allocation17_spill] sm:$0xff] }
0x12a3   :  { %v4493_v19 = vadd.f32 %v29214_v33, %v3594_v37  ;;  %v1790_v37 = vadd.f32 %v29242_v24, %v29241_v51  ;;  %v29273_v51 = vld [vmem:[#allocation14_spill] sm:$0xff] }
0x12a5   :  { %20065 = vmatmul.mubr.msk.f32.gmra.mxu1 %vm96_vm1, %v13544_v45  ;;  %v29215_v45 = vld [vmem:[#allocation59_spill] sm:$0xff] }
0x12a6   :  { %20067 = vmatprep.mubr.msk.f32.mxu1 %vm96_vm1, %v13545_v2  ;;  %v6289_v2 = vadd.f32 %v29215_v45, %v5390_v52  ;;  %v3600_v52 = vadd.f32 %v29243_v41, %v2701_v44 }
0x12a9   :  { %20068 = vmatmul.mubr.msk.f32.gmra.mxu1 %vm96_vm1, %v13546_v22  ;;  %v29216_v22 = vld [vmem:[#allocation74_spill] sm:$0xff] }
0x12aa   :  { %20070 = vmatprep.mubr.msk.f32.mxu1 %vm96_vm1, %v13547_v50  ;;  %v8085_v50 = vadd.f32 %v29216_v22, %v7186_v58 }
0x12ad   :  { %20071 = vmatmul.mubr.msk.f32.gmra.mxu1 %vm96_vm1, %v13548_v42  ;;  %v29217_v42 = vld [vmem:[#allocation42_spill] sm:$0xff] }
0x12ae   :  { %20073 = vmatprep.mubr.msk.f32.mxu1 %vm96_vm1, %v13549_v25  ;;  %v1770_v25 = vadd.f32 %v29218_v12, %v29217_v42  ;;  %v29248_v42 = vld [vmem:[#allocation114_spill] sm:$0xff] }
0x12b1   :  { %20074 = vmatmul.mubr.msk.f32.gmra.mxu1 %vm96_vm1, %v13550_v26  ;;  %v29219_v26 = vld [vmem:[#allocation44_spill] sm:$0xff] }
0x12b2   :  { %20076 = vmatprep.mubr.msk.f32.mxu1 %vm96_vm1, %v13551_v31  ;;  %v3596_v31 = vadd.f32 %v29219_v26, %v2697_v4 }
0x12b5   :  { %20077 = vmatmul.mubr.msk.f32.gmra.mxu1 %vm96_vm1, %v13552_v39  ;;  %v29220_v39 = vld [vmem:[#allocation52_spill] sm:$0xff] }
0x12b6   :  { %20079 = vmatprep.mubr.msk.f32.mxu1 %vm96_vm1, %v13553_v38  ;;  %v5392_v6 = vadd.f32 %v29220_v39, %v4493_v19  ;;  %v29221_v38 = vld [vmem:[#allocation67_spill] sm:$0xff]  ;;  %v29246_v19 = vld [vmem:[#allocation84_spill] sm:$0xff] }
0x12b8   :  { %v6291_v55 = vadd.f32 %v29225_v18, %v5392_v6  ;;  %v29251_v6 = vld [vmem:[#allocation62_spill] sm:$0xff] }
0x12b9   :  { %20080 = vmatmul.mubr.msk.f32.gmra.mxu1 %vm96_vm1, %v13554_v15  ;;  %v7188_v15 = vadd.f32 %v29221_v38, %v6289_v2  ;;  %v29247_v2 = vld [vmem:[#allocation99_spill] sm:$0xff] }
0x12ba   :  { %20082 = vmatprep.mubr.msk.f32.mxu1 %vm96_vm1, %v13555_v7  ;;  %v29222_v7 = vld [vmem:[#allocation66_spill] sm:$0xff]  ;;  %v7190_v0 = vadd.f32 %v29232_v48, %v6291_v55  ;;  %v29256_v55 = vld [vmem:[#allocation43_spill] sm:$0xff]  ;;  %v29263_v48 = vld [vmem:[#allocation32_spill] sm:$0xff] }
0x12bb   :  { %v8087_v13 = vadd.f32 %v29226_v3, %v7188_v15 }
0x12bc   :  { %v8089_v5 = vadd.f32 %v29238_v14, %v7190_v0 }
0x12bd   :  { %20083 = vmatmul.mubr.msk.f32.gmra.mxu1 %vm96_vm1, %v13556_v27  ;;  %v8984_v27 = vadd.f32 %v29222_v7, %v8085_v50  ;;  %v8986_v1 = vadd.f32 %v29233_v20, %v8087_v13  ;;  %v29252_v7 = vld [vmem:[#allocation77_spill] sm:$0xff]  ;;  %v29258_v13 = vld [vmem:[#allocation12_spill] sm:$0xff]  ;;  %v29264_v20 = vld [vmem:[#allocation98_spill] sm:$0xff] }
0x12be   :  { %20085 = vmatprep.mubr.msk.f32.mxu1 %vm96_vm1, %v13557_v21  ;;  %v2699_v21 = vadd.f32 %v29223_v53, %v1770_v25  ;;  %v8988_v45 = vadd.f32 %v29246_v19, %v8089_v5  ;;  %v29249_v25 = vld [vmem:[#allocation33_spill] sm:$0xff]  ;;  %v29253_v53 = vld [vmem:[#allocation92_spill] sm:$0xff] }
0x12bf   :  { %v9883_v59 = vadd.f32 %v29227_v63, %v8984_v27  ;;  %v9885_v34 = vadd.f32 %v29239_v46, %v8986_v1  ;;  %v2703_v26 = vadd.f32 %v29249_v25, %v1790_v37  ;;  %v29270_v5 = vld [vmem:[#allocation93_spill] sm:$0xff]  ;;  %v29274_v37 = vld [vmem:[#allocation56_spill] sm:$0xff] }
0x12c0   :  { %v3598_v47 = vadd.f32 %v29230_v32, %v2699_v21  ;;  %v9887_v21 = vadd.f32 %v29253_v53, %v8988_v45  ;;  %v29278_v45 = vld [vmem:[#allocation115_spill] sm:$0xff]  ;;  %v29281_v25 = vld [vmem:[#allocation49_spill] sm:$0xff] }
0x12c1   :  { %20086 = vmatmul.mubr.msk.f32.gmra.mxu1 %vm96_vm1, %v13558_v9  ;;  %v29224_v9 = vld [vmem:[#allocation35_spill] sm:$0xff]  ;;  %v10782_v54 = vadd.f32 %v29234_v28, %v9883_v59  ;;  %v10784_v22 = vadd.f32 %v29247_v2, %v9885_v34  ;;  %v3602_v63 = vadd.f32 %v29258_v13, %v2703_v26  ;;  %v29266_v28 = vld [vmem:[#allocation20_spill] sm:$0xff]  ;;  %v29285_v53 = vld [vmem:[#allocation109_spill] sm:$0xff] }
0x12c2   :  { %v4495_v40 = vadd.f32 %v29224_v9, %v3596_v31  ;;  %v4497_v57 = vadd.f32 %v29236_v43, %v3598_v47  ;;  %v29250_v31 = vld [vmem:[#allocation38_spill] sm:$0xff]  ;;  %v29254_v9 = vld [vmem:[#allocation107_spill] sm:$0xff]  ;;  %v29261_v47 = vld [vmem:[#allocation85_spill] sm:$0xff] }
0x12c3   :  { %v11681_v30 = vadd.f32 %v29240_v16, %v10782_v54  ;;  %v4499_v39 = vadd.f32 %v29250_v31, %v3600_v52  ;;  %v29259_v59 = vld [vmem:[#allocation55_spill] sm:$0xff]  ;;  %v4501_v44 = vadd.f32 %v29267_v62, %v3602_v63  ;;  %v29271_v34 = vld [vmem:[#allocation108_spill] sm:$0xff]  ;;  %v29297_v62 = vld [vmem:[#allocation110_spill] sm:$0xff] }
0x12c4   :  { %v5394_v35 = vadd.f32 %v29231_v61, %v4495_v40  ;;  %v5396_v58 = vadd.f32 %v29244_v8, %v4497_v57  ;;  %v11683_v40 = vadd.f32 %v29254_v9, %v10784_v22  ;;  %v29268_v43 = vld [vmem:[#allocation63_spill] sm:$0xff]  ;;  %v29279_v22 = vld [vmem:[#allocation34_spill] sm:$0xff]  ;;  %v29282_v31 = vld [vmem:[#allocation64_spill] sm:$0xff] }
0x12c5   :  { %v12580_v50 = vadd.f32 %v27688_v10, %v11681_v30  ;;  %v29257_v10 = vld [vmem:[#allocation30_spill] sm:$0xff]  ;;  %v5398_v17 = vadd.f32 %v29259_v59, %v4499_v39  ;;  %v5400_v41 = vadd.f32 %v29274_v37, %v4501_v44  ;;  %v29275_v52 = vld [vmem:[#allocation71_spill] sm:$0xff] }
0x12c6   :  { %v6293_v36 = vadd.f32 %v29237_v60, %v5394_v35  ;;  %v6295_v38 = vadd.f32 %v29251_v6, %v5396_v58  ;;  %v1800_v3 = vadd.f32 %v29257_v10, %v29256_v55  ;;  %v29262_v35 = vld [vmem:[#allocation100_spill] sm:$0xff]  ;;  %v12582_v0 = vadd.f32 %v29263_v48, %v11683_v40  ;;  %v29287_v40 = vld [vmem:[#allocation57_spill] sm:$0xff]  ;;  %v29289_v63 = vld [vmem:[#allocation87_spill] sm:$0xff] }
0x12c7   :  { %v10786_v29 = vadd.f32 %v29262_v35, %v9887_v21  ;;  %v6297_v57 = vadd.f32 %v29268_v43, %v5398_v17  ;;  %v6299_v39 = vadd.f32 %v29282_v31, %v5400_v41  ;;  %v29288_v10 = vld [vmem:[#allocation72_spill] sm:$0xff]  ;;  %v29290_v17 = vld [vmem:[#allocation102_spill] sm:$0xff]  ;;  %v29294_v35 = vld [vmem:[#allocation65_spill] sm:$0xff] }
0x12c8   :  { %v7192_v4 = vadd.f32 %v29245_v49, %v6293_v36  ;;  %v7194_v11 = vadd.f32 %v29260_v23, %v6295_v38  ;;  %v2705_v54 = vadd.f32 %v29266_v28, %v1800_v3  ;;  %v29269_v36 = vld [vmem:[#allocation78_spill] sm:$0xff]  ;;  %v29283_v38 = vld [vmem:[#allocation79_spill] sm:$0xff] }
0x12c9   :  { %v11685_v16 = vadd.f32 %v29271_v34, %v10786_v29  ;;  %v7196_v8 = vadd.f32 %v29275_v52, %v6297_v57  ;;  %v29276_v49 = vld [vmem:[#allocation86_spill] sm:$0xff]  ;;  %v7198_v3 = vadd.f32 %v29288_v10, %v6299_v39  ;;  %v29296_v28 = vld [vmem:[#allocation95_spill] sm:$0xff]  ;;  %v29299_v57 = vld [vmem:[#allocation73_spill] sm:$0xff] }
0x12ca   :  { %v8091_v27 = vadd.f32 %v29252_v7, %v7192_v4  ;;  %v8093_v14 = vadd.f32 %v29269_v36, %v7194_v11  ;;  %v3604_v24 = vadd.f32 %v29273_v51, %v2705_v54  ;;  %v29284_v7 = vld [vmem:[#allocation94_spill] sm:$0xff]  ;;  %v29291_v11 = vld [vmem:[#allocation116_spill] sm:$0xff]  ;;  %v29305_v52 = vld [vmem:[#allocation81_spill] sm:$0xff] }
0x12cb   :  { %v12584_v2 = vadd.f32 %v29278_v45, %v11685_v16  ;;  %v29302_v16 = vld [vmem:[#allocation117_spill] sm:$0xff] }
0x12cc   :  { %v8990_v61 = vadd.f32 %v29261_v47, %v8091_v27  ;;  %v8992_v4 = vadd.f32 %v29276_v49, %v8093_v14  ;;  %v4503_v26 = vadd.f32 %v29281_v25, %v3604_v24  ;;  %v29292_v47 = vld [vmem:[#allocation36_spill] sm:$0xff]  ;;  %v29303_v24 = vld [vmem:[#allocation25_spill] sm:$0xff] }
0x12cd   :  { %v29300_v14 = vld [vmem:[#allocation88_spill] sm:$0xff]  ;;  %v29312_v39 = vld [vmem:[#allocation37_spill] sm:$0xff] }
0x12ce   :  { %v9889_v46 = vadd.f32 %v29270_v5, %v8990_v61  ;;  %v9891_v27 = vadd.f32 %v29284_v7, %v8992_v4  ;;  %v5402_v55 = vadd.f32 %v29287_v40, %v4503_v26  ;;  %v29307_v4 = vld [vmem:[#allocation111_spill] sm:$0xff]  ;;  %v29311_v26 = vld [vmem:[#allocation118_spill] sm:$0xff] }
0x12d0   :  { %v10790_v23 = vadd.f32 %v29290_v17, %v9891_v27  ;;  %v6301_v29 = vadd.f32 %v29294_v35, %v5402_v55  ;;  %v29315_v27 = vld [vmem:[#allocation112_spill] sm:$0xff]  ;;  %v29317_v55 = vld [vmem:[#allocation105_spill] sm:$0xff] }
0x12d1   :  { %v29323_v35 = vld [vmem:[#allocation120_spill] sm:$0xff] }
0x12d2   :  { %v11689_v44 = vadd.f32 %v29297_v62, %v10790_v23  ;;  %v29321_v23 = vld [vmem:[#allocation113_spill] sm:$0xff] }
0x12d4   :  { %v12588_v51 = vadd.f32 %v29302_v16, %v11689_v44 }
0x12e5   :  { %v19960_v33 = vpop.f32.mrf.mxu1 }
0x12e6   :  { %v28254_v12 = vadd.f32 %v19960_v33, %v29248_v42  ;;  %v29277_v33 = vld [vmem:[#allocation101_spill] sm:$0xff]  ;;  %v15886_v42 = vld [vmem:[%s28653_s3 + $0x780] sm:$0xff] }
0x12e7   :  { %v13400_v15 = vpop.f32.mrf.mxu1  ;;  %v10788_v19 = vadd.f32 %v29277_v33, %v9889_v46  ;;  %20118 = vmatprep.subr.mxu0 %v15886_v42  ;;  %v29301_v46 = vld [vmem:[#allocation103_spill] sm:$0xff] }
0x12e8   :  { %v28262_v18 = vadd.f32 %v13400_v15, %v12580_v50  ;;  %v8095_v15 = vadd.f32 %v29283_v38, %v7196_v8  ;;  %20119 = vmatpush3.msra.mxu0 %v15886_v42  ;;  %v29310_v42 = vld [vmem:[#allocation104_spill] sm:$0xff] }
0x12e9   :  { %v19963_v32 = vpop.f32.mrf.mxu1  ;;  %v11687_v21 = vadd.f32 %v29285_v53, %v10788_v19 }
0x12ea   :  { %29255 = vst [vmem:[#allocation4_spill] sm:$0xff] %v28262_v18  ;;  %v28273_v1 = vadd.f32 %v19963_v32, %v29264_v20  ;;  %v8994_v59 = vadd.f32 %v29289_v63, %v8095_v15  ;;  %v29314_v15 = vld [vmem:[#allocation97_spill] sm:$0xff]  ;;  %v29319_v63 = vld [vmem:[#allocation3_spill] sm:$0xff] }
0x12eb   :  { %v13410_v60 = vpop.f32.mrf.mxu1  ;;  %v12586_v32 = vadd.f32 %v29291_v11, %v11687_v21 }
0x12ec   :  { %29265 = vst [vmem:[#allocation2_spill] sm:$0xff] %v28273_v1  ;;  %v28281_v30 = vadd.f32 %v13410_v60, %v12582_v0  ;;  %v29295_v0 = vld [vmem:[#allocation80_spill] sm:$0xff]  ;;  %v9893_v54 = vadd.f32 %v29296_v28, %v8994_v59  ;;  %v7200_v60 = vadd.f32 %v29299_v57, %v6301_v29 }
0x12ed   :  { %v19966_v58 = vpop.f32.mrf.mxu1  ;;  %v8097_v20 = vadd.f32 %v29295_v0, %v7198_v3  ;;  %v29318_v3 = vld [vmem:[#allocation119_spill] sm:$0xff] }
0x12ee   :  { %29272 = vst [vmem:[#allocation46_spill] sm:$0xff] %v28281_v30  ;;  %v28290_v50 = vadd.f32 %v19966_v58, %v29279_v22  ;;  %v10792_v34 = vadd.f32 %v29301_v46, %v9893_v54  ;;  %v8099_v8 = vadd.f32 %v29305_v52, %v7200_v60  ;;  %v29306_v58 = vld [vmem:[#allocation96_spill] sm:$0xff] }
0x12ef   :  { %v13420_v6 = vpop.f32.mrf.mxu1  ;;  %v8996_v5 = vadd.f32 %v29300_v14, %v8097_v20 }
0x12f0   :  { %29280 = vst [vmem:[#allocation5_spill] sm:$0xff] %v28290_v50  ;;  %v28300_v9 = vadd.f32 %v13420_v6, %v12584_v2  ;;  %v11691_v33 = vadd.f32 %v29307_v4, %v10792_v34  ;;  %v29309_v2 = vld [vmem:[#allocation89_spill] sm:$0xff] }
0x12f1   :  { %v19969_v13 = vpop.f32.mrf.mxu1  ;;  %v9895_v49 = vadd.f32 %v29306_v58, %v8996_v5  ;;  %v8998_v22 = vadd.f32 %v29309_v2, %v8099_v8 }
0x12f2   :  { %29286 = vst [vmem:[#allocation39_spill] sm:$0xff] %v28300_v9  ;;  %v28308_v61 = vadd.f32 %v19969_v13, %v29292_v47  ;;  %v12590_v31 = vadd.f32 %v29311_v26, %v11691_v33 }
0x12f3   :  { %v13430_v48 = vpop.f32.mrf.mxu1  ;;  %v10794_v25 = vadd.f32 %v29310_v42, %v9895_v49  ;;  %v9897_v7 = vadd.f32 %v29314_v15, %v8998_v22 }
0x12f4   :  { %29293 = vst [vmem:[#allocation26_spill] sm:$0xff] %v28308_v61  ;;  %v28314_v43 = vadd.f32 %v13430_v48, %v12586_v32  ;;  %v29324_v48 = vld [vmem:[#allocation19_spill] sm:$0xff] }
0x12f5   :  { %v19972_v36 = vpop.f32.mrf.mxu1  ;;  %v11693_v53 = vadd.f32 %v29315_v27, %v10794_v25  ;;  %v10796_v10 = vadd.f32 %v29317_v55, %v9897_v7 }
0x12f6   :  { %29298 = vst [vmem:[#allocation29_spill] sm:$0xff] %v28314_v43  ;;  %v28321_v37 = vadd.f32 %v19972_v36, %v29303_v24  ;;  %v28365_v36 = vld [vmem:[%s28655_s5 + $0x78] sm:$0xff] }
0x12f7   :  { %v13440_v41 = vpop.f32.mrf.mxu1  ;;  %v12592_v13 = vadd.f32 %v29318_v3, %v11693_v53  ;;  %v11695_v11 = vadd.f32 %v29321_v23, %v10796_v10  ;;  %20144 = vmatprep.subr.mxu0 %v28365_v36 }
0x12f8   :  { %29304 = vst [vmem:[#allocation47_spill] sm:$0xff] %v28321_v37  ;;  %v28326_v19 = vadd.f32 %v13440_v41, %v12588_v51 }
0x12f9   :  { %v19975_v45 = vpop.f32.mrf.mxu1  ;;  %v12594_v29 = vadd.f32 %v29323_v35, %v11695_v11 }
0x12fa   :  { %29308 = vst [vmem:[#allocation24_spill] sm:$0xff] %v28326_v19  ;;  %v28332_v6 = vadd.f32 %v19975_v45, %v29312_v39 }
0x12fb   :  { %v13450_v38 = vpop.f32.mrf.mxu1 }
0x12fc   :  { %29313 = vst [vmem:[#allocation27_spill] sm:$0xff] %v28332_v6  ;;  %v28336_v21 = vadd.f32 %v13450_v38, %v12590_v31 }
0x12fd   :  { %v19978_v40 = vpop.f32.mrf.mxu1 }
0x12fe   :  { %29316 = vst [vmem:[#allocation9_spill] sm:$0xff] %v28336_v21  ;;  %v28341_v59 = vadd.f32 %v19978_v40, %v29319_v63 }
0x12ff   :  { %v13460_v17 = vpop.f32.mrf.mxu1 }
0x1300   :  { %29320 = vst [vmem:[#allocation13_spill] sm:$0xff] %v28341_v59  ;;  %v28344_v32 = vadd.f32 %v13460_v17, %v12592_v13 }
0x1301   :  { %v19981_v47 = vpop.f32.mrf.mxu1 }
0x1302   :  { %29322 = vst [vmem:[#allocation48_spill] sm:$0xff] %v28344_v32  ;;  %v28348_v0 = vadd.f32 %v19981_v47, %v29324_v48 }
0x1303   :  { %v13470_v20 = vpop.f32.mrf.mxu1 }
0x1304   :  { %29325 = vst [vmem:[#allocation15_spill] sm:$0xff] %v28348_v0  ;;  %v28350_v28 = vadd.f32 %v13470_v20, %v12594_v29 }
0x1305   :  { %v28352_v54 = vpop.f32.mrf.mxu1 }
0x1306   :  { %29326 = vst [vmem:[#allocation58_spill] sm:$0xff] %v28350_v28 }
0x1307   :  { %v28354_v62 = vpop.f32.mrf.mxu1 }
0x1309   :  { %v28356_v44 = vpop.f32.mrf.mxu1 }
0x130b   :  { %v28358_v57 = vpop.f32.mrf.mxu1 }
0x130d   :  { %v28360_v60 = vpop.f32.mrf.mxu1 }
0x130f   :  { %v28367_v14 = vpop.f32.mrf.mxu1 }
0x1311   :  { %v28370_v5 = vpop.f32.mrf.mxu1 }
0x1313   :  { %v28372_v46 = vpop.f32.mrf.mxu1 }
0x1315   :  { %v28374_v34 = vpop.f32.mrf.mxu1 }
0x1317   :  { %v28376_v16 = vpop.f32.mrf.mxu1 }
0x1319   :  { %v28378_v51 = vpop.f32.mrf.mxu1 }
0x131b   :  { %v28380_v24 = vpop.f32.mrf.mxu1 }
0x131d   :  { %v28382_v41 = vpop.f32.mrf.mxu1 }
0x131f   :  { %v28384_v52 = vpop.f32.mrf.mxu1 }
0x1321   :  { %v28386_v8 = vpop.f32.mrf.mxu1 }
0x1323   :  { %v28388_v58 = vpop.f32.mrf.mxu1 }
0x1325   :  { %v20018_v49 = vpop.f32.mrf.mxu1 }
0x1326   :  { %v14137_v4 = vmax.f32 %v28352_v54, %v20018_v49 }
0x1327   :  { %v13897_v33 = vpop.f32.mrf.mxu1 }
0x1328   :  { %v14136_v45 = vmax.f32 %v28354_v62, %v13897_v33 }
0x1329   :  { %v20021_v2 = vpop.f32.mrf.mxu1 }
0x132a   :  { %v14139_v22 = vmax.f32 %v28356_v44, %v20021_v2 }
0x132b   :  { %v13907_v42 = vpop.f32.mrf.mxu1 }
0x132c   :  { %v14138_v25 = vmax.f32 %v28358_v57, %v13907_v42 }
0x132d   :  { %v20024_v26 = vpop.f32.mrf.mxu1 }
0x132e   :  { %v14141_v31 = vmax.f32 %v28360_v60, %v20024_v26 }
0x132f   :  { %v28395_v39 = vpop.f32.mrf.mxu1 }
0x1331   :  { %v28399_v15 = vpop.f32.mrf.mxu1 }
0x1333   :  { %v28403_v27 = vpop.f32.mrf.mxu1 }
0x1335   :  { %v28407_v40 = vpop.f32.mrf.mxu1 }
0x1337   :  { %v28411_v10 = vpop.f32.mrf.mxu1 }
0x1339   :  { %v28415_v13 = vpop.f32.mrf.mxu1 }
0x133b   :  { %v28419_v17 = vpop.f32.mrf.mxu1 }
0x133d   :  { %v28423_v11 = vpop.f32.mrf.mxu1 }
0x133f   :  { %v28427_v35 = vpop.f32.mrf.mxu1 }
0x1341   :  { %v28431_v48 = vpop.f32.mrf.mxu1 }
0x1343   :  { %v28435_v54 = vpop.f32.mrf.mxu1 }
0x1345   :  { %v20042_v44 = vpop.f32.mrf.mxu1 }
0x1347   :  { %v13977_v57 = vpop.f32.mrf.mxu1 }
0x1349   :  { %v20045_v60 = vpop.f32.mrf.mxu1 }
0x134b   :  { %v13987_v49 = vpop.f32.mrf.mxu1 }
0x134d   :  { %v20048_v33 = vpop.f32.mrf.mxu1 }
0x134f   :  { %v13997_v2 = vpop.f32.mrf.mxu1 }
0x1351   :  { %v20051_v42 = vpop.f32.mrf.mxu1 }
0x1353   :  { %v14007_v26 = vpop.f32.mrf.mxu1 }
0x1355   :  { %v28439_v47 = vpop.f32.mrf.mxu1 }
0x1357   :  { %v28441_v29 = vpop.f32.mrf.mxu1 }
0x1359   :  { %v28443_v23 = vpop.f32.mrf.mxu1 }
0x135b   :  { %v28445_v20 = vpop.f32.mrf.mxu1 }
0x135d   :  { %v28447_v63 = vpop.f32.mrf.mxu1 }
0x135f   :  { %v28449_v3 = vpop.f32.mrf.mxu1 }
0x1361   :  { %v28451_v62 = vpop.f32.mrf.mxu1 }
0x1363   :  { %v28453_v55 = vpop.f32.mrf.mxu1 }
0x1365   :  { %v20066_v53 = vpop.f32.mrf.mxu1 }
0x1366   :  { %v14153_v7 = vmax.f32 %v20042_v44, %v20066_v53 }
0x1367   :  { %v14057_v38 = vpop.f32.mrf.mxu1 }
0x1368   :  { %v14169_v28 = vmax.f32 %v14137_v4, %v14153_v7  ;;  %v14152_v0 = vmax.f32 %v13977_v57, %v14057_v38  ;;  %v29330_v57 = vmax.f32 %v28374_v34, %v28407_v40 }
0x1369   :  { %v20069_v32 = vpop.f32.mrf.mxu1 }
0x136a   :  { %v14168_v59 = vmax.f32 %v14136_v45, %v14152_v0  ;;  %v14155_v21 = vmax.f32 %v20045_v60, %v20069_v32  ;;  %v14185_v6 = vadd.f32 %v27828_v56, %v14169_v28  ;;  %v28476_v28 = vld [vmem:[%s28654_s2] ss:$0 sm:$0xff] }
0x136b   :  { %v14067_v19 = vpop.f32.mrf.mxu1 }
0x136c   :  { %v14171_v37 = vmax.f32 %v14139_v22, %v14155_v21  ;;  %v14154_v43 = vmax.f32 %v13987_v49, %v14067_v19  ;;  %v14184_v61 = vadd.f32 %v27828_v56, %v14168_v59  ;;  %v14201_v18 = vmax.f32 %v14185_v6, 0.0  ;;  %v14447_v21 = vld [vmem:[%s28655_s5 + $0x70] sm:$0xff] }
0x136d   :  { %v20072_v9 = vpop.f32.mrf.mxu1 }
0x136e   :  { %v14170_v50 = vmax.f32 %v14138_v25, %v14154_v43  ;;  %v14157_v30 = vmax.f32 %v20048_v33, %v20072_v9  ;;  %v14200_v1 = vmax.f32 %v14184_v61, 0.0  ;;  %v14187_v53 = vadd.f32 %v27828_v56, %v14171_v37 }
0x136f   :  { %v14077_v44 = vpop.f32.mrf.mxu1  ;;  %v29327_v43 = vmax.f32 %v28367_v14, %v28395_v39  ;;  %v29331_v33 = vmax.f32 %v28376_v16, %v28411_v10 }
0x1370   :  { %v14173_v4 = vmax.f32 %v14141_v31, %v14157_v30  ;;  %v14156_v38 = vmax.f32 %v13997_v2, %v14077_v44  ;;  %20120 = vmatprep.mubr.f32.mxu0 %v14200_v1  ;;  %v14186_v32 = vadd.f32 %v27828_v56, %v14170_v50  ;;  %v14446_v1 = vld [vmem:[%s28655_s5 + $0x68] sm:$0xff]  ;;  %v14203_v30 = vmax.f32 %v14187_v53, 0.0  ;;  %v14444_v31 = vld [vmem:[%s28655_s5 + $0x58] sm:$0xff] }
0x1371   :  { %v20075_v19 = vpop.f32.mrf.mxu1  ;;  %20121 = vmatmul.mubr.f32.vlgmr.msra.gmra.mxu0 %v14201_v18  ;;  %v29328_v18 = vmax.f32 %v28370_v5, %v28399_v15  ;;  %v29329_v5 = vmax.f32 %v28372_v46, %v28403_v27  ;;  %v29332_v44 = vmax.f32 %v28378_v51, %v28415_v13 }
0x1372   :  { %v14172_v9 = vmax.f32 %v29327_v43, %v14156_v38  ;;  %v14159_v61 = vmax.f32 %v20051_v42, %v20075_v19  ;;  %v14202_v6 = vmax.f32 %v14186_v32, 0.0  ;;  %20145 = vmatpush3.msra.mxu0 %v28365_v36  ;;  %v14189_v50 = vadd.f32 %v27828_v56, %v14173_v4  ;;  %v14445_v56 = vld [vmem:[%s28655_s5 + $0x60] sm:$0xff] }
0x1373   :  { %v14087_v37 = vpop.f32.mrf.mxu1  ;;  %20146 = vmatprep.subr.mxu0 %v14447_v21  ;;  %v29333_v32 = vmax.f32 %v28380_v24, %v28419_v17  ;;  %v14439_v17 = vld [vmem:[%s28655_s5 + $0x30] sm:$0xff] }
0x1374   :  { %v14175_v59 = vmax.f32 %v29328_v18, %v14159_v61  ;;  %v14158_v0 = vmax.f32 %v14007_v26, %v14087_v37  ;;  %20123 = vmatprep.mubr.f32.mxu0 %v14202_v6  ;;  %v14188_v36 = vadd.f32 %v28476_v28, %v14172_v9  ;;  %20147 = vmatpush3.msra.mxu0 %v14447_v21  ;;  %v14205_v39 = vmax.f32 %v14189_v50, 0.0 }
0x1375   :  { %v20078_v14 = vpop.f32.mrf.mxu1  ;;  %20124 = vmatmul.mubr.f32.gmra.mxu0 %v14203_v30  ;;  %20148 = vmatprep.subr.mxu0 %v14446_v1  ;;  %v29334_v61 = vmax.f32 %v28382_v41, %v28423_v11  ;;  %v29335_v30 = vmax.f32 %v28384_v52, %v28427_v35 }
0x1376   :  { %v14174_v45 = vmax.f32 %v29329_v5, %v14158_v0  ;;  %v14161_v22 = vmax.f32 %v28439_v47, %v20078_v14  ;;  %v14204_v25 = vmax.f32 %v14188_v36, 0.0  ;;  %20149 = vmatpush3.msra.mxu0 %v14446_v1  ;;  %v14191_v15 = vadd.f32 %v28476_v28, %v14175_v59  ;;  %v14443_v47 = vld [vmem:[%s28655_s5 + $0x50] sm:$0xff] }
0x1377   :  { %v14097_v7 = vpop.f32.mrf.mxu1  ;;  %20150 = vmatprep.subr.mxu0 %v14445_v56  ;;  %v29336_v0 = vmax.f32 %v28386_v8, %v28431_v48 }
0x1378   :  { %v14177_v60 = vmax.f32 %v29330_v57, %v14161_v22  ;;  %v14160_v46 = vmax.f32 %v28441_v29, %v14097_v7  ;;  %20126 = vmatprep.mubr.f32.mxu0 %v14204_v25  ;;  %v14190_v27 = vadd.f32 %v28476_v28, %v14174_v45  ;;  %20151 = vmatpush3.msra.mxu0 %v14445_v56  ;;  %v14442_v29 = vld [vmem:[%s28655_s5 + $0x48] sm:$0xff]  ;;  %v14207_v42 = vmax.f32 %v14191_v15, 0.0  ;;  %v14437_v22 = vld [vmem:[%s28655_s5 + $0x20] sm:$0xff]  ;;  %v29338_v57 = vld [vmem:[#allocation4_spill] sm:$0xff] }
0x1379   :  { %v20081_v49 = vpop.f32.mrf.mxu1  ;;  %20127 = vmatmul.mubr.f32.gmra.mxu0 %v14205_v39  ;;  %20152 = vmatprep.subr.mxu0 %v14444_v31  ;;  %v14433_v25 = vld [vmem:[%s28655_s5] sm:$0xff] }
0x137a   :  { %v14176_v2 = vmax.f32 %v29331_v33, %v14160_v46  ;;  %v14163_v34 = vmax.f32 %v28443_v23, %v20081_v49  ;;  %v14206_v40 = vmax.f32 %v14190_v27, 0.0  ;;  %20153 = vmatpush3.msra.mxu0 %v14444_v31  ;;  %v14193_v26 = vadd.f32 %v28476_v28, %v14177_v60  ;;  %v14441_v23 = vld [vmem:[%s28655_s5 + $0x40] sm:$0xff] }
0x137b   :  { %v14107_v53 = vpop.f32.mrf.mxu1  ;;  %20154 = vmatprep.subr.mxu0 %v14443_v47  ;;  %v28567_v15 = vld [vmem:[%s28656_s4] ss:$0 sm:$0xff] }
0x137c   :  { %v14179_v4 = vmax.f32 %v29332_v44, %v14163_v34  ;;  %v14162_v16 = vmax.f32 %v28445_v20, %v14107_v53  ;;  %20129 = vmatprep.mubr.f32.mxu0 %v14206_v40  ;;  %v14192_v10 = vadd.f32 %v28476_v28, %v14176_v2  ;;  %20155 = vmatpush3.msra.mxu0 %v14443_v47  ;;  %v14440_v20 = vld [vmem:[%s28655_s5 + $0x38] sm:$0xff]  ;;  %v14209_v19 = vmax.f32 %v14193_v26, 0.0  ;;  %v29339_v49 = vld [vmem:[#allocation2_spill] sm:$0xff] }
0x137d   :  { %v20084_v38 = vpop.f32.mrf.mxu1  ;;  %20130 = vmatmul.mubr.f32.gmra.mxu0 %v14207_v42  ;;  %20156 = vmatprep.subr.mxu0 %v14442_v29  ;;  %v29340_v40 = vld [vmem:[#allocation46_spill] sm:$0xff]  ;;  %v29341_v44 = vld [vmem:[#allocation5_spill] sm:$0xff] }
0x137e   :  { %v14178_v21 = vmax.f32 %v29333_v32, %v14162_v16  ;;  %v14165_v51 = vmax.f32 %v28447_v63, %v20084_v38  ;;  %v14208_v13 = vmax.f32 %v14192_v10, 0.0  ;;  %20157 = vmatpush3.msra.mxu0 %v14442_v29  ;;  %v14195_v43 = vadd.f32 %v28476_v28, %v14179_v4 }
0x137f   :  { %v14117_v9 = vpop.f32.mrf.mxu1  ;;  %20158 = vmatprep.subr.mxu0 %v14441_v23 }
0x1380   :  { %v14181_v6 = vmax.f32 %v29334_v61, %v14165_v51  ;;  %v14164_v24 = vmax.f32 %v28449_v3, %v14117_v9  ;;  %20132 = vmatprep.mubr.f32.mxu0 %v14208_v13  ;;  %v14194_v63 = vadd.f32 %v28476_v28, %v14178_v21  ;;  %20159 = vmatpush3.msra.mxu0 %v14441_v23  ;;  %v14438_v3 = vld [vmem:[%s28655_s5 + $0x28] sm:$0xff]  ;;  %v14211_v37 = vmax.f32 %v14195_v43, 0.0  ;;  %v29344_v61 = vld [vmem:[#allocation29_spill] sm:$0xff] }
0x1381   :  { %v20087_v1 = vpop.f32.mrf.mxu1  ;;  %20133 = vmatmul.mubr.f32.gmra.mxu0 %v14209_v19  ;;  %20160 = vmatprep.subr.mxu0 %v14440_v20  ;;  %v29342_v23 = vld [vmem:[#allocation39_spill] sm:$0xff] }
0x1382   :  { %v14180_v50 = vmax.f32 %v29335_v30, %v14164_v24  ;;  %v14167_v41 = vmax.f32 %v28451_v62, %v20087_v1  ;;  %v14210_v11 = vmax.f32 %v14194_v63, 0.0  ;;  %20161 = vmatpush3.msra.mxu0 %v14440_v20  ;;  %v14197_v18 = vadd.f32 %v28476_v28, %v14181_v6  ;;  %v29343_v20 = vld [vmem:[#allocation26_spill] sm:$0xff]  ;;  %v29345_v30 = vld [vmem:[#allocation47_spill] sm:$0xff] }
0x1383   :  { %v14127_v59 = vpop.f32.mrf.mxu1  ;;  %20162 = vmatprep.subr.mxu0 %v14439_v17  ;;  %v29337_v62 = vmax.f32 %v28388_v58, %v28435_v54  ;;  %v14436_v58 = vld [vmem:[%s28655_s5 + $0x18] sm:$0xff]  ;;  %v14435_v54 = vld [vmem:[%s28655_s5 + $0x10] sm:$0xff] }
0x1384   :  { %v14183_v36 = vmax.f32 %v29336_v0, %v14167_v41  ;;  %v14166_v52 = vmax.f32 %v28453_v55, %v14127_v59  ;;  %20135 = vmatprep.mubr.f32.mxu0 %v14210_v11  ;;  %v14196_v35 = vadd.f32 %v28476_v28, %v14180_v50  ;;  %20163 = vmatpush3.msra.mxu0 %v14439_v17  ;;  %v14213_v5 = vmax.f32 %v14197_v18, 0.0 }
0x1385   :  { %20136 = vmatmul.mubr.f32.gmra.mxu0 %v14211_v37  ;;  %20164 = vmatprep.subr.mxu0 %v14438_v3 }
0x1386   :  { %v14182_v56 = vmax.f32 %v29337_v62, %v14166_v52  ;;  %v14212_v14 = vmax.f32 %v14196_v35, 0.0  ;;  %20165 = vmatpush3.msra.mxu0 %v14438_v3  ;;  %v14199_v45 = vadd.f32 %v28476_v28, %v14183_v36  ;;  %v29346_v3 = vld [vmem:[#allocation24_spill] sm:$0xff]  ;;  %v29347_v52 = vld [vmem:[#allocation27_spill] sm:$0xff] }
0x1387   :  { %20166 = vmatprep.subr.mxu0 %v14437_v22 }
0x1388   :  { %20138 = vmatprep.mubr.f32.mxu0 %v14212_v14  ;;  %v14198_v8 = vadd.f32 %v28476_v28, %v14182_v56  ;;  %v14215_v48 = vmax.f32 %v14199_v45, 0.0  ;;  %20167 = vmatpush3.msra.mxu0 %v14437_v22  ;;  %v14434_v28 = vld [vmem:[%s28655_s5 + $0x8] sm:$0xff]  ;;  %v29348_v14 = vld [vmem:[#allocation9_spill] sm:$0xff] }
0x1389   :  { %20139 = vmatmul.mubr.f32.gmra.mxu0 %v14213_v5  ;;  %20168 = vmatprep.subr.mxu0 %v14436_v58  ;;  %v29349_v22 = vld [vmem:[#allocation13_spill] sm:$0xff] }
0x138a   :  { %v14214_v55 = vmax.f32 %v14198_v8, 0.0  ;;  %20169 = vmatpush3.msra.mxu0 %v14436_v58 }
0x138b   :  { %20170 = vmatprep.subr.mxu0 %v14435_v54 }
0x138c   :  { %20141 = vmatprep.mubr.f32.mxu0 %v14214_v55  ;;  %20171 = vmatpush3.msra.mxu0 %v14435_v54 }
0x138d   :  { %20142 = vmatmul.mubr.f32.gmra.mxu0 %v14215_v48  ;;  %20172 = vmatprep.subr.mxu0 %v14434_v28 }
0x138e   :  { %20173 = vmatpush3.msra.mxu0 %v14434_v28 }
0x138f   :  { %20174 = vmatprep.subr.mxu0 %v14433_v25 }
0x1390   :  { %20175 = vmatpush3.msra.mxu0 %v14433_v25  ;;  %v29350_v25 = vld [vmem:[#allocation48_spill] sm:$0xff] }
0x1431   :  { %v20122_v31 = vpop.f32.mrf.mxu0 }
0x1432   :  { %v14379_v39 = vadd.f32 %v20122_v31, %v28254_v12 }
0x1433   :  { %v14299_v7 = vpop.f32.mrf.mxu0 }
0x1434   :  { %v14378_v60 = vadd.f32 %v14299_v7, %v29338_v57  ;;  %v14402_v46 = vadd.f32 %v28567_v15, %v14379_v39 }
0x1435   :  { %v20125_v27 = vpop.f32.mrf.mxu0 }
0x1436   :  { %v14401_v47 = vadd.f32 %v28567_v15, %v14378_v60  ;;  %v14381_v33 = vadd.f32 %v20125_v27, %v29339_v49  ;;  %v14418_v12 = vmax.f32 %v14402_v46, 0.0  ;;  %v29351_v46 = vld [vmem:[#allocation15_spill] sm:$0xff] }
0x1437   :  { %v14309_v2 = vpop.f32.mrf.mxu0 }
0x1438   :  { %v14417_v34 = vmax.f32 %v14401_v47, 0.0  ;;  %v14380_v29 = vadd.f32 %v14309_v2, %v29340_v40  ;;  %v14404_v42 = vadd.f32 %v28567_v15, %v14381_v33  ;;  %v29352_v33 = vld [vmem:[#allocation58_spill] sm:$0xff] }
0x1439   :  { %v20128_v26 = vpop.f32.mrf.mxu0 }
0x143a   :  { %v14403_v53 = vadd.f32 %v28567_v15, %v14380_v29  ;;  %v14383_v4 = vadd.f32 %v20128_v26, %v29341_v44  ;;  %20176 = vmatprep.mubr.f32.mxu0 %v14417_v34  ;;  %v14420_v32 = vmax.f32 %v14404_v42, 0.0  ;;  %v15903_v26 = vld [vmem:[%s28657_s6] ss:$0 sm:$0xff] }
0x143b   :  { %v14319_v16 = vpop.f32.mrf.mxu0  ;;  %20177 = vmatmul.mubr.f32.vlgmr.msra.gmra.mxu0 %v14418_v12 }
0x143c   :  { %v14419_v10 = vmax.f32 %v14403_v53, 0.0  ;;  %v14382_v38 = vadd.f32 %v14319_v16, %v29342_v23  ;;  %v14406_v21 = vadd.f32 %v28567_v15, %v14383_v4 }
0x143d   :  { %v20131_v51 = vpop.f32.mrf.mxu0 }
0x143e   :  { %v14405_v13 = vadd.f32 %v28567_v15, %v14382_v38  ;;  %v14385_v19 = vadd.f32 %v20131_v51, %v29343_v20  ;;  %20179 = vmatprep.mubr.f32.mxu0 %v14419_v10  ;;  %v14422_v24 = vmax.f32 %v14406_v21, 0.0 }
0x143f   :  { %v14329_v43 = vpop.f32.mrf.mxu0  ;;  %20180 = vmatmul.mubr.f32.gmra.mxu0 %v14420_v32 }
0x1440   :  { %v14421_v9 = vmax.f32 %v14405_v13, 0.0  ;;  %v14384_v6 = vadd.f32 %v14329_v43, %v29344_v61  ;;  %v14408_v63 = vadd.f32 %v28567_v15, %v14385_v19 }
0x1441   :  { %v20134_v17 = vpop.f32.mrf.mxu0 }
0x1442   :  { %v14407_v1 = vadd.f32 %v28567_v15, %v14384_v6  ;;  %v14387_v50 = vadd.f32 %v20134_v17, %v29345_v30  ;;  %20182 = vmatprep.mubr.f32.mxu0 %v14421_v9  ;;  %v14424_v18 = vmax.f32 %v14408_v63, 0.0 }
0x1443   :  { %v14339_v41 = vpop.f32.mrf.mxu0  ;;  %20183 = vmatmul.mubr.f32.gmra.mxu0 %v14422_v24 }
0x1444   :  { %v14423_v11 = vmax.f32 %v14407_v1, 0.0  ;;  %v14386_v37 = vadd.f32 %v14339_v41, %v29346_v3  ;;  %v14410_v59 = vadd.f32 %v28567_v15, %v14387_v50 }
0x1445   :  { %v20137_v0 = vpop.f32.mrf.mxu0 }
0x1446   :  { %v14409_v36 = vadd.f32 %v28567_v15, %v14386_v37  ;;  %v14389_v35 = vadd.f32 %v20137_v0, %v29347_v52  ;;  %20185 = vmatprep.mubr.f32.mxu0 %v14423_v11  ;;  %v14426_v45 = vmax.f32 %v14410_v59, 0.0 }
0x1447   :  { %v14349_v62 = vpop.f32.mrf.mxu0  ;;  %20186 = vmatmul.mubr.f32.gmra.mxu0 %v14424_v18 }
0x1448   :  { %v14425_v56 = vmax.f32 %v14409_v36, 0.0  ;;  %v14388_v5 = vadd.f32 %v14349_v62, %v29348_v14  ;;  %v14412_v8 = vadd.f32 %v28567_v15, %v14389_v35 }
0x1449   :  { %v20140_v55 = vpop.f32.mrf.mxu0 }
0x144a   :  { %v14411_v48 = vadd.f32 %v28567_v15, %v14388_v5  ;;  %v14391_v58 = vadd.f32 %v20140_v55, %v29349_v22  ;;  %20188 = vmatprep.mubr.f32.mxu0 %v14425_v56  ;;  %v14428_v39 = vmax.f32 %v14412_v8, 0.0 }
0x144b   :  { %v14359_v54 = vpop.f32.mrf.mxu0  ;;  %20189 = vmatmul.mubr.f32.gmra.mxu0 %v14426_v45 }
0x144c   :  { %v14427_v28 = vmax.f32 %v14411_v48, 0.0  ;;  %v14390_v31 = vadd.f32 %v14359_v54, %v29350_v25  ;;  %v14414_v7 = vadd.f32 %v28567_v15, %v14391_v58 }
0x144d   :  { %v20143_v57 = vpop.f32.mrf.mxu0 }
0x144e   :  { %v14413_v60 = vadd.f32 %v28567_v15, %v14390_v31  ;;  %v14393_v27 = vadd.f32 %v20143_v57, %v29351_v46  ;;  %20191 = vmatprep.mubr.f32.mxu0 %v14427_v28  ;;  %v14430_v34 = vmax.f32 %v14414_v7, 0.0 }
0x144f   :  { %v14369_v47 = vpop.f32.mrf.mxu0  ;;  %20192 = vmatmul.mubr.f32.gmra.mxu0 %v14428_v39 }
0x1450   :  { %v14429_v49 = vmax.f32 %v14413_v60, 0.0  ;;  %v14392_v2 = vadd.f32 %v14369_v47, %v29352_v33  ;;  %v14416_v40 = vadd.f32 %v28567_v15, %v14393_v27 }
0x1452   :  { %v14415_v29 = vadd.f32 %v28567_v15, %v14392_v2  ;;  %20194 = vmatprep.mubr.f32.mxu0 %v14429_v49  ;;  %v14432_v42 = vmax.f32 %v14416_v40, 0.0 }
0x1453   :  { %20195 = vmatmul.mubr.f32.gmra.mxu0 %v14430_v34 }
0x1454   :  { %v14431_v12 = vmax.f32 %v14415_v29, 0.0 }
0x1456   :  { %20197 = vmatprep.mubr.f32.mxu0 %v14431_v12 }
0x1457   :  { %20198 = vmatmul.mubr.f32.gmra.mxu0 %v14432_v42 }
0x14fb   :  { %v20178_v53 = vpop.f32.mrf.mxu0 }
0x14fc   :  { %v14528_v44 = vadd.f32 %v20178_v53, %v15903_v26 }
0x14fd   :  { %v14522_v4 = vpop.f32.mrf.mxu0 }
0x14fe   :  { %14602 = vst [vmem:[%s28658_s7 + $0x8] sm:$0xff] %v14528_v44  ;;  %v14523_v16 = vadd.f32 %v15903_v26, %v14522_v4 }
0x14ff   :  { %v20181_v10 = vpop.f32.mrf.mxu0 }
0x1500   :  { %14601 = vst [vmem:[%s28658_s7] sm:$0xff] %v14523_v16  ;;  %v14538_v15 = vadd.f32 %v20181_v10, %v15903_v26 }
0x1501   :  { %v14532_v23 = vpop.f32.mrf.mxu0 }
0x1502   :  { %14604 = vst [vmem:[%s28658_s7 + $0x18] sm:$0xff] %v14538_v15  ;;  %v14533_v38 = vadd.f32 %v15903_v26, %v14532_v23 }
0x1503   :  { %v20184_v32 = vpop.f32.mrf.mxu0 }
0x1504   :  { %14603 = vst [vmem:[%s28658_s7 + $0x10] sm:$0xff] %v14533_v38  ;;  %v14548_v21 = vadd.f32 %v20184_v32, %v15903_v26 }
0x1505   :  { %v14542_v51 = vpop.f32.mrf.mxu0 }
0x1506   :  { %14606 = vst [vmem:[%s28658_s7 + $0x28] sm:$0xff] %v14548_v21  ;;  %v14543_v13 = vadd.f32 %v15903_v26, %v14542_v51 }
0x1507   :  { %v20187_v20 = vpop.f32.mrf.mxu0 }
0x1508   :  { %14605 = vst [vmem:[%s28658_s7 + $0x20] sm:$0xff] %v14543_v13  ;;  %v14558_v19 = vadd.f32 %v20187_v20, %v15903_v26 }
0x1509   :  { %v14552_v43 = vpop.f32.mrf.mxu0 }
0x150a   :  { %14608 = vst [vmem:[%s28658_s7 + $0x38] sm:$0xff] %v14558_v19  ;;  %v14553_v9 = vadd.f32 %v15903_v26, %v14552_v43 }
0x150b   :  { %v20190_v61 = vpop.f32.mrf.mxu0 }
0x150c   :  { %14607 = vst [vmem:[%s28658_s7 + $0x30] sm:$0xff] %v14553_v9  ;;  %v14568_v6 = vadd.f32 %v20190_v61, %v15903_v26 }
0x150d   :  { %v14562_v24 = vpop.f32.mrf.mxu0 }
0x150e   :  { %14610 = vst [vmem:[%s28658_s7 + $0x48] sm:$0xff] %v14568_v6  ;;  %v14563_v63 = vadd.f32 %v15903_v26, %v14562_v24 }
0x150f   :  { %v20193_v17 = vpop.f32.mrf.mxu0 }
0x1510   :  { %14609 = vst [vmem:[%s28658_s7 + $0x40] sm:$0xff] %v14563_v63  ;;  %v14578_v1 = vadd.f32 %v20193_v17, %v15903_v26 }
0x1511   :  { %v14572_v30 = vpop.f32.mrf.mxu0 }
0x1512   :  { %14612 = vst [vmem:[%s28658_s7 + $0x58] sm:$0xff] %v14578_v1  ;;  %v14573_v50 = vadd.f32 %v15903_v26, %v14572_v30 }
0x1513   :  { %v20196_v41 = vpop.f32.mrf.mxu0 }
0x1514   :  { %14611 = vst [vmem:[%s28658_s7 + $0x50] sm:$0xff] %v14573_v50  ;;  %v14588_v11 = vadd.f32 %v20196_v41, %v15903_v26 }
0x1515   :  { %v14582_v3 = vpop.f32.mrf.mxu0 }
0x1516   :  { %14614 = vst [vmem:[%s28658_s7 + $0x68] sm:$0xff] %v14588_v11  ;;  %v14583_v37 = vadd.f32 %v15903_v26, %v14582_v3 }
0x1517   :  { %v20199_v18 = vpop.f32.mrf.mxu0 }
0x1518   :  { %14613 = vst [vmem:[%s28658_s7 + $0x60] sm:$0xff] %v14583_v37  ;;  %v14598_v59 = vadd.f32 %v20199_v18, %v15903_v26 }
0x1519   :  { %v14592_v0 = vpop.f32.mrf.mxu0 }
0x151a   :  { %14616 = vst [vmem:[%s28658_s7 + $0x78] sm:$0xff] %v14598_v59  ;;  %v14593_v36 = vadd.f32 %v15903_v26, %v14592_v0 }
0x151c   :  { %14615 = vst [vmem:[%s28658_s7 + $0x70] sm:$0xff] %v14593_v36 }

</bundles_post_ra>
